<compile_context>
chip_gen: v7x
topology: tpu7x:2x2x1
jax: 0.10.0
libtpu: 0.0.40
codegen_flags: <defaults>
</compile_context>

<pallas_src>
import jax
import jax.numpy as jnp
from jax.experimental import pallas as pl
from jax.experimental.pallas import tpu as pltpu

# ----------------------------- configuration -------------------------------
B          = 2     # batch
N_OBS      = 16    # observed points
N_QUERY    = 16    # query points
POINT_DIM  = 4     # xyz + label
LATENT     = 64    # config.dimensions.latent_dim
NUM_QIN    = 8     # config.dimensions.num_query_in   (z_phi rows)
NUM_PARTS  = 4     # config.dimensions.num_parts      (z_pi rows)
NUM_GENUS  = 2     # config.dimensions.num_genus  -> topo_g out = NUM_GENUS+1
HEADS      = 4
HEAD_DIM   = LATENT // HEADS
FFN_HIDDEN = 4 * LATENT
LN_EPS     = 1e-5
HIGH_LEVEL_TOKEN = "mean"   # config.model.high_level_token ('mean' | 'max')
EMB_PART_TYPE    = "fc"     # config.model.emb_part.type   (only 'fc' fused)

# Fixed weight orderings used to pass flat lists of arrays into the kernels.
ENC_KEYS  = ["w1", "b1", "w2", "b2"]
XBLK_KEYS = ["ln_q_g", "ln_q_b", "ln_kv_g", "ln_kv_b",
             "wq", "bq", "wkv", "bkv", "wo", "bo",
             "ln2_g", "ln2_b", "ffn_w1", "ffn_b1", "ffn_w2", "ffn_b2"]
SBLK_KEYS = ["ln_q_g", "ln_q_b",
             "wq", "bq", "wkv", "bkv", "wo", "bo",
             "ln2_g", "ln2_b", "ffn_w1", "ffn_b1", "ffn_w2", "ffn_b2"]
HEAD_KEYS = ["fc_w", "fc_b", "t1_w", "t1_b", "t2_w", "t2_b", "t3_w", "t3_b"]


# ------------------------------ kernel helpers ------------------------------
def _ln(x, g, b):
    """LayerNorm over the last dim.  g/b are (1, C) values."""
    mu = jnp.mean(x, axis=-1, keepdims=True)
    xc = x - mu
    var = jnp.mean(xc * xc, axis=-1, keepdims=True)
    return xc * jax.lax.rsqrt(var + LN_EPS) * g + b


def _encode_points(pts, p):
    """Pointwise Conv1d(k=1) -> ReLU -> Conv1d(k=1), channels-last."""
    h = jnp.maximum(
        jnp.dot(pts, p["w1"], preferred_element_type=jnp.float32) + p["b1"], 0.0)
    return jnp.dot(h, p["w2"], preferred_element_type=jnp.float32) + p["b2"]


def _attn_ffn_block(x, ctx, p, self_attn=False):
    """Pre-LN multi-head attention + FFN block for one batch element.

    x   : (Lq, C) residual stream (queries)
    ctx : (Lk, C) context (keys / values); ignored when self_attn=True.

    Q projection has the 1/sqrt(dh) scale folded into its weights at init.
    K/V come from a single fused (C, 2C) matmul; heads are split with static
    lane slices; output projection is one (Lq, C) @ (C, C) matmul.
    """
    C = LATENT
    q_ln = _ln(x, p["ln_q_g"], p["ln_q_b"])
    if self_attn:
        kv_ln = q_ln
    else:
        kv_ln = _ln(ctx, p["ln_kv_g"], p["ln_kv_b"])

    q = jnp.dot(q_ln, p["wq"], preferred_element_type=jnp.float32) + p["bq"]      # (Lq, C)
    kv = jnp.dot(kv_ln, p["wkv"], preferred_element_type=jnp.float32) + p["bkv"]  # (Lk, 2C)
    k = kv[:, :C]
    v = kv[:, C:]

    # per-head scores via static lane slices (no broadcast/materialized K^T)
    scores = []
    for h in range(HEADS):
        sl = slice(h * HEAD_DIM, (h + 1) * HEAD_DIM)
        scores.append(jax.lax.dot_general(
            q[:, sl], k[:, sl], (((1,), (1,)), ((), ())),
            preferred_element_type=jnp.float32))                                  # (Lq, Lk)
    s = jnp.stack(scores, axis=0)                                                  # (H, Lq, Lk)
    s = s - jnp.max(s, axis=-1, keepdims=True)
    e = jnp.exp(s)
    prob = e / jnp.sum(e, axis=-1, keepdims=True)   # exact divide for parity

    outs = []
    for h in range(HEADS):
        sl = slice(h * HEAD_DIM, (h + 1) * HEAD_DIM)
        outs.append(jnp.dot(prob[h], v[:, sl],
                            preferred_element_type=jnp.float32))                  # (Lq, dh)
    attn = jnp.concatenate(outs, axis=-1)                                          # (Lq, C)
    attn = jnp.dot(attn, p["wo"], preferred_element_type=jnp.float32) + p["bo"]

    x = x + attn

    h_ = _ln(x, p["ln2_g"], p["ln2_b"])
    h_ = jnp.maximum(
        jnp.dot(h_, p["ffn_w1"], preferred_element_type=jnp.float32) + p["ffn_b1"],
        0.0)
    x = x + jnp.dot(h_, p["ffn_w2"], preferred_element_type=jnp.float32) + p["ffn_b2"]
    return x


# ------------------------------ fused kernels -------------------------------
def _encode_kernel(*refs):
    """point_encoder(observed) -> aggregate -> high-level token -> completer."""
    obs_ref, zphi_ref = refs[0], refs[1]
    i = 2
    enc = {k: refs[i + j][...] for j, k in enumerate(ENC_KEYS)}
    i += len(ENC_KEYS)
    agg = {k: refs[i + j][...] for j, k in enumerate(XBLK_KEYS)}
    i += len(XBLK_KEYS)
    comp = {k: refs[i + j][...] for j, k in enumerate(SBLK_KEYS)}
    i += len(SBLK_KEYS)
    z_ref = refs[i]

    obs = obs_ref[0].astype(jnp.float32)                   # (N_OBS, POINT_DIM)
    z_obs = _encode_points(obs, enc)                        # (N_OBS, C)

    z_phi = zphi_ref[...].astype(jnp.float32)               # (NUM_QIN, C)
    z_agg = _attn_ffn_block(z_phi, z_obs, agg)               # (NUM_QIN, C)

    if HIGH_LEVEL_TOKEN == "mean":
        tok = jnp.mean(z_agg, axis=0, keepdims=True)
    else:  # 'max'
        tok = jnp.max(z_agg, axis=0, keepdims=True)
    z0 = jnp.concatenate([z_agg, tok], axis=0)               # (NUM_QIN+1, C)

    z = _attn_ffn_block(z0, z0, comp, self_attn=True)         # completer
    z_ref[0] = z.astype(z_ref.dtype)                          # single full-tile store


def _decode_kernel(*refs):
    """segmenter -> process_part(fc) -> topo_g -> encoder(query) -> interpolate
    -> part_logit einsum ('bcp,bqc->bqp')."""
    query_ref, zin_ref, zpi_ref = refs[0], refs[1], refs[2]
    i = 3
    enc = {k: refs[i + j][...] for j, k in enumerate(ENC_KEYS)}
    i += len(ENC_KEYS)
    seg = {k: refs[i + j][...] for j, k in enumerate(XBLK_KEYS)}
    i += len(XBLK_KEYS)
    itp = {k: refs[i + j][...] for j, k in enumerate(XBLK_KEYS)}
    i += len(XBLK_KEYS)
    head = {k: refs[i + j][...] for j, k in enumerate(HEAD_KEYS)}
    i += len(HEAD_KEYS)
    part_ref, g_ref = refs[i], refs[i + 1]

    z = zin_ref[0].astype(jnp.float32)                       # (G, C)
    z_pi = zpi_ref[...].astype(jnp.float32)                   # (P, C)

    # segmenter + process_part (fc)
    z_p = _attn_ffn_block(z_pi, z, seg)                        # (P, C)
    z_p = jnp.dot(z_p, head["fc_w"],
                  preferred_element_type=jnp.float32) + head["fc_b"]

    # topo_g MLP
    h1 = jnp.maximum(jnp.dot(z_p, head["t1_w"],
                             preferred_element_type=jnp.float32) + head["t1_b"], 0.0)
    h2 = jnp.maximum(jnp.dot(h1, head["t2_w"],
                             preferred_element_type=jnp.float32) + head["t2_b"], 0.0)
    g = jnp.dot(h2, head["t3_w"],
                preferred_element_type=jnp.float32) + head["t3_b"]                 # (P, G+1)

    # interpolate path
    q_pts = query_ref[0].astype(jnp.float32)                  # (Q, POINT_DIM)
    z_q = _encode_points(q_pts, enc)                            # (Q, C)
    z_q_int = _attn_ffn_block(z_q, z, itp)                       # (Q, C)

    # part_logit = einsum('bcp,bqc->bqp', z_p^T, z_q_int) = z_q_int @ z_p^T
    part = jax.lax.dot_general(z_q_int, z_p, (((1,), (1,)), ((), ())),
                               preferred_element_type=jnp.float32)                 # (Q, P)

    part_ref[0] = part.astype(part_ref.dtype)
    g_ref[0] = g.astype(g_ref.dtype)


# ------------------------------ op wrappers ---------------------------------
def _w_spec(arr):
    nd = arr.ndim
    return pl.BlockSpec(arr.shape, lambda b, _nd=nd: (0,) * _nd)


def encode(observed, params):
    """Fused encode: (B, N_OBS, POINT_DIM) -> z (B, NUM_QIN+1, LATENT)."""
    Bb = observed.shape[0]
    G = NUM_QIN + 1
    weights = ([params["encoder"][k] for k in ENC_KEYS]
               + [params["aggregate"][k] for k in XBLK_KEYS]
               + [params["completer"][k] for k in SBLK_KEYS])
    return pl.pallas_call(
        _encode_kernel,
        out_shape=jax.ShapeDtypeStruct((Bb, G, LATENT), jnp.float32),
        grid=(Bb,),
        in_specs=[pl.BlockSpec((1, N_OBS, POINT_DIM), lambda b: (b, 0, 0)),
                  pl.BlockSpec((NUM_QIN, LATENT), lambda b: (0, 0))]
                 + [_w_spec(w) for w in weights],
        out_specs=pl.BlockSpec((1, G, LATENT), lambda b: (b, 0, 0)),
        compiler_params=pltpu.CompilerParams(dimension_semantics=("parallel",)),
    )(observed, params["z_phi"], *weights)


def decode(query, z, params):
    """Fused decode: -> part_logit (B, Q, P), g_logit (B, P, NUM_GENUS+1)."""
    Bb = query.shape[0]
    G = z.shape[1]
    G1 = NUM_GENUS + 1
    weights = ([params["encoder"][k] for k in ENC_KEYS]
               + [params["segmenter"][k] for k in XBLK_KEYS]
               + [params["interpolate"][k] for k in XBLK_KEYS]
               + [params["head"][k] for k in HEAD_KEYS])
    part, g = pl.pallas_call(
        _decode_kernel,
        out_shape=(jax.ShapeDtypeStruct((Bb, N_QUERY, NUM_PARTS), jnp.float32),
                   jax.ShapeDtypeStruct((Bb, NUM_PARTS, G1), jnp.float32)),
        grid=(Bb,),
        in_specs=[pl.BlockSpec((1, N_QUERY, POINT_DIM), lambda b: (b, 0, 0)),
                  pl.BlockSpec((1, G, LATENT), lambda b: (b, 0, 0)),
                  pl.BlockSpec((NUM_PARTS, LATENT), lambda b: (0, 0))]
                 + [_w_spec(w) for w in weights],
        out_specs=(pl.BlockSpec((1, N_QUERY, NUM_PARTS), lambda b: (b, 0, 0)),
                   pl.BlockSpec((1, NUM_PARTS, G1), lambda b: (b, 0, 0))),
        compiler_params=pltpu.CompilerParams(dimension_semantics=("parallel",)),
    )(query, z, params["z_pi"], *weights)
    return part, g


# ------------------------------ Reconstructor -------------------------------
def reconstructor_forward(observed, query, params, z=None, do_decode=True):
    if z is None:
        z = encode(observed, params)      # encoder + aggregate + token + completer
    if do_decode:
        rec, g = decode(query, z, params)
    else:
        rec, g = None, None
    return rec, g, z


# ------------------------------ parameter init -------------------------------
def trunc_normal(key, shape, std=0.02):
    return std * jax.random.truncated_normal(key, -2.0, 2.0, shape, jnp.float32)


def init_block_p(key, C, self_attn=False):
    """Pre-LN MHA + FFN block params.  Q-scale folded into wq/bq; K,V fused."""
    ks = jax.random.split(key, 6)
    dh = C // HEADS
    scale = 1.0 / (dh ** 0.5)
    wq = trunc_normal(ks[0], (C, C)) * scale
    bq = jnp.zeros((1, C), jnp.float32)            # zero bias: scaling is a no-op
    wk = trunc_normal(ks[1], (C, C))
    wv = trunc_normal(ks[2], (C, C))
    p = dict(
        ln_q_g=jnp.ones((1, C), jnp.float32), ln_q_b=jnp.zeros((1, C), jnp.float32),
        wq=wq, bq=bq,
        wkv=jnp.concatenate([wk, wv], axis=1),      # (C, 2C)
        bkv=jnp.zeros((1, 2 * C), jnp.float32),
        wo=trunc_normal(ks[3], (C, C)), bo=jnp.zeros((1, C), jnp.float32),
        ln2_g=jnp.ones((1, C), jnp.float32), ln2_b=jnp.zeros((1, C), jnp.float32),
        ffn_w1=trunc_normal(ks[4], (C, FFN_HIDDEN)),
        ffn_b1=jnp.zeros((1, FFN_HIDDEN), jnp.float32),
        ffn_w2=trunc_normal(ks[5], (FFN_HIDDEN, C)),
        ffn_b2=jnp.zeros((1, C), jnp.float32),
    )
    if not self_attn:
        p["ln_kv_g"] = jnp.ones((1, C), jnp.float32)
        p["ln_kv_b"] = jnp.zeros((1, C), jnp.float32)
    return p


def init_params(key):
    ks = jax.random.split(key, 12)
    C = LATENT
    encoder = dict(
        w1=trunc_normal(ks[0], (POINT_DIM, C)), b1=jnp.zeros((1, C), jnp.float32),
        w2=trunc_normal(ks[1], (C, C)),         b2=jnp.zeros((1, C), jnp.float32),
    )
    head = dict(
        fc_w=trunc_normal(ks[2], (C, C)), fc_b=jnp.zeros((1, C), jnp.float32),
        t1_w=trunc_normal(ks[3], (C, C // 4)),
        t1_b=jnp.zeros((1, C // 4), jnp.float32),
        t2_w=trunc_normal(ks[4], (C // 4, C // 16)),
        t2_b=jnp.zeros((1, C // 16), jnp.float32),
        t3_w=trunc_normal(ks[5], (C // 16, NUM_GENUS + 1)),
        t3_b=jnp.zeros((1, NUM_GENUS + 1), jnp.float32),
    )
    return {
        "encoder": encoder,
        "z_phi": jax.random.normal(ks[6], (NUM_QIN, C), jnp.float32),
        "z_pi": jax.random.normal(ks[7], (NUM_PARTS, C), jnp.float32),
        "aggregate": init_block_p(ks[8], C),
        "completer": init_block_p(ks[9], C, self_attn=True),
        "interpolate": init_block_p(ks[10], C),
        "segmenter": init_block_p(ks[11], C),
        "head": head,
    }


# ----------------------------------- main ------------------------------------
if __name__ == "__main__":
    key = jax.random.PRNGKey(0)
    k_obs, k_query, k_params = jax.random.split(key, 3)

    observed = jax.random.normal(k_obs, (B, N_OBS, POINT_DIM), jnp.float32)
    query = jax.random.normal(k_query, (B, N_QUERY, POINT_DIM), jnp.float32)
    params = init_params(k_params)

    fwd = jax.jit(lambda o, q, p: reconstructor_forward(o, q, p))
    rec, g, z = fwd(observed, query, params)
    jax.block_until_ready((rec, g, z))

    assert rec.shape == (B, N_QUERY, NUM_PARTS)
    assert g.shape == (B, NUM_PARTS, NUM_GENUS + 1)
    assert z.shape == (B, NUM_QIN + 1, LATENT)
    print("KERNEL_OK")
</pallas_src>

<mosaic_0001>
module attributes {stable_mosaic.version = 11 : i64} {
  func.func @_encode_kernel(%arg0: i32, %arg1: memref<1x16x4xf32, #tpu.memory_space<vmem>>, %arg2: memref<8x64xf32, #tpu.memory_space<vmem>>, %arg3: memref<4x64xf32, #tpu.memory_space<vmem>>, %arg4: memref<1x64xf32, #tpu.memory_space<vmem>>, %arg5: memref<64x64xf32, #tpu.memory_space<vmem>>, %arg6: memref<1x64xf32, #tpu.memory_space<vmem>>, %arg7: memref<1x64xf32, #tpu.memory_space<vmem>>, %arg8: memref<1x64xf32, #tpu.memory_space<vmem>>, %arg9: memref<1x64xf32, #tpu.memory_space<vmem>>, %arg10: memref<1x64xf32, #tpu.memory_space<vmem>>, %arg11: memref<64x64xf32, #tpu.memory_space<vmem>>, %arg12: memref<1x64xf32, #tpu.memory_space<vmem>>, %arg13: memref<64x128xf32, #tpu.memory_space<vmem>>, %arg14: memref<1x128xf32, #tpu.memory_space<vmem>>, %arg15: memref<64x64xf32, #tpu.memory_space<vmem>>, %arg16: memref<1x64xf32, #tpu.memory_space<vmem>>, %arg17: memref<1x64xf32, #tpu.memory_space<vmem>>, %arg18: memref<1x64xf32, #tpu.memory_space<vmem>>, %arg19: memref<64x256xf32, #tpu.memory_space<vmem>>, %arg20: memref<1x256xf32, #tpu.memory_space<vmem>>, %arg21: memref<256x64xf32, #tpu.memory_space<vmem>>, %arg22: memref<1x64xf32, #tpu.memory_space<vmem>>, %arg23: memref<1x64xf32, #tpu.memory_space<vmem>>, %arg24: memref<1x64xf32, #tpu.memory_space<vmem>>, %arg25: memref<64x64xf32, #tpu.memory_space<vmem>>, %arg26: memref<1x64xf32, #tpu.memory_space<vmem>>, %arg27: memref<64x128xf32, #tpu.memory_space<vmem>>, %arg28: memref<1x128xf32, #tpu.memory_space<vmem>>, %arg29: memref<64x64xf32, #tpu.memory_space<vmem>>, %arg30: memref<1x64xf32, #tpu.memory_space<vmem>>, %arg31: memref<1x64xf32, #tpu.memory_space<vmem>>, %arg32: memref<1x64xf32, #tpu.memory_space<vmem>>, %arg33: memref<64x256xf32, #tpu.memory_space<vmem>>, %arg34: memref<1x256xf32, #tpu.memory_space<vmem>>, %arg35: memref<256x64xf32, #tpu.memory_space<vmem>>, %arg36: memref<1x64xf32, #tpu.memory_space<vmem>>, %arg37: memref<1x9x64xf32, #tpu.memory_space<vmem>>) attributes {dimension_semantics = [#tpu.dimension_semantics<parallel>], iteration_bounds = array<i64: 2>, scalar_prefetch = 0 : i64, scratch_operands = 0 : i64, tpu.core_type = #tpu.core_type<tc>, window_params = [{transform_indices = @transform_0, window_bounds = array<i64: 1, 16, 4>}, {pipeline_mode = #tpu.pipeline_mode<synchronous>, transform_indices = @transform_1, window_bounds = array<i64: 8, 64>}, {pipeline_mode = #tpu.pipeline_mode<synchronous>, transform_indices = @transform_2, window_bounds = array<i64: 4, 64>}, {pipeline_mode = #tpu.pipeline_mode<synchronous>, transform_indices = @transform_3, window_bounds = array<i64: 1, 64>}, {pipeline_mode = #tpu.pipeline_mode<synchronous>, transform_indices = @transform_4, window_bounds = array<i64: 64, 64>}, {pipeline_mode = #tpu.pipeline_mode<synchronous>, transform_indices = @transform_5, window_bounds = array<i64: 1, 64>}, {pipeline_mode = #tpu.pipeline_mode<synchronous>, transform_indices = @transform_6, window_bounds = array<i64: 1, 64>}, {pipeline_mode = #tpu.pipeline_mode<synchronous>, transform_indices = @transform_7, window_bounds = array<i64: 1, 64>}, {pipeline_mode = #tpu.pipeline_mode<synchronous>, transform_indices = @transform_8, window_bounds = array<i64: 1, 64>}, {pipeline_mode = #tpu.pipeline_mode<synchronous>, transform_indices = @transform_9, window_bounds = array<i64: 1, 64>}, {pipeline_mode = #tpu.pipeline_mode<synchronous>, transform_indices = @transform_10, window_bounds = array<i64: 64, 64>}, {pipeline_mode = #tpu.pipeline_mode<synchronous>, transform_indices = @transform_11, window_bounds = array<i64: 1, 64>}, {pipeline_mode = #tpu.pipeline_mode<synchronous>, transform_indices = @transform_12, window_bounds = array<i64: 64, 128>}, {pipeline_mode = #tpu.pipeline_mode<synchronous>, transform_indices = @transform_13, window_bounds = array<i64: 1, 128>}, {pipeline_mode = #tpu.pipeline_mode<synchronous>, transform_indices = @transform_14, window_bounds = array<i64: 64, 64>}, {pipeline_mode = #tpu.pipeline_mode<synchronous>, transform_indices = @transform_15, window_bounds = array<i64: 1, 64>}, {pipeline_mode = #tpu.pipeline_mode<synchronous>, transform_indices = @transform_16, window_bounds = array<i64: 1, 64>}, {pipeline_mode = #tpu.pipeline_mode<synchronous>, transform_indices = @transform_17, window_bounds = array<i64: 1, 64>}, {pipeline_mode = #tpu.pipeline_mode<synchronous>, transform_indices = @transform_18, window_bounds = array<i64: 64, 256>}, {pipeline_mode = #tpu.pipeline_mode<synchronous>, transform_indices = @transform_19, window_bounds = array<i64: 1, 256>}, {pipeline_mode = #tpu.pipeline_mode<synchronous>, transform_indices = @transform_20, window_bounds = array<i64: 256, 64>}, {pipeline_mode = #tpu.pipeline_mode<synchronous>, transform_indices = @transform_21, window_bounds = array<i64: 1, 64>}, {pipeline_mode = #tpu.pipeline_mode<synchronous>, transform_indices = @transform_22, window_bounds = array<i64: 1, 64>}, {pipeline_mode = #tpu.pipeline_mode<synchronous>, transform_indices = @transform_23, window_bounds = array<i64: 1, 64>}, {pipeline_mode = #tpu.pipeline_mode<synchronous>, transform_indices = @transform_24, window_bounds = array<i64: 64, 64>}, {pipeline_mode = #tpu.pipeline_mode<synchronous>, transform_indices = @transform_25, window_bounds = array<i64: 1, 64>}, {pipeline_mode = #tpu.pipeline_mode<synchronous>, transform_indices = @transform_26, window_bounds = array<i64: 64, 128>}, {pipeline_mode = #tpu.pipeline_mode<synchronous>, transform_indices = @transform_27, window_bounds = array<i64: 1, 128>}, {pipeline_mode = #tpu.pipeline_mode<synchronous>, transform_indices = @transform_28, window_bounds = array<i64: 64, 64>}, {pipeline_mode = #tpu.pipeline_mode<synchronous>, transform_indices = @transform_29, window_bounds = array<i64: 1, 64>}, {pipeline_mode = #tpu.pipeline_mode<synchronous>, transform_indices = @transform_30, window_bounds = array<i64: 1, 64>}, {pipeline_mode = #tpu.pipeline_mode<synchronous>, transform_indices = @transform_31, window_bounds = array<i64: 1, 64>}, {pipeline_mode = #tpu.pipeline_mode<synchronous>, transform_indices = @transform_32, window_bounds = array<i64: 64, 256>}, {pipeline_mode = #tpu.pipeline_mode<synchronous>, transform_indices = @transform_33, window_bounds = array<i64: 1, 256>}, {pipeline_mode = #tpu.pipeline_mode<synchronous>, transform_indices = @transform_34, window_bounds = array<i64: 256, 64>}, {pipeline_mode = #tpu.pipeline_mode<synchronous>, transform_indices = @transform_35, window_bounds = array<i64: 1, 64>}, {transform_indices = @transform_36, window_bounds = array<i64: 1, 9, 64>}]} {
    %c0 = arith.constant 0 : index
    %c0_0 = arith.constant 0 : index
    %0 = vector.load %arg3[%c0, %c0_0] : memref<4x64xf32, #tpu.memory_space<vmem>>, vector<4x64xf32>
    %c0_1 = arith.constant 0 : index
    %c0_2 = arith.constant 0 : index
    %1 = vector.load %arg4[%c0_1, %c0_2] : memref<1x64xf32, #tpu.memory_space<vmem>>, vector<1x64xf32>
    %c0_3 = arith.constant 0 : index
    %c0_4 = arith.constant 0 : index
    %2 = vector.load %arg5[%c0_3, %c0_4] : memref<64x64xf32, #tpu.memory_space<vmem>>, vector<64x64xf32>
    %c0_5 = arith.constant 0 : index
    %c0_6 = arith.constant 0 : index
    %3 = vector.load %arg6[%c0_5, %c0_6] : memref<1x64xf32, #tpu.memory_space<vmem>>, vector<1x64xf32>
    %c0_7 = arith.constant 0 : index
    %c0_8 = arith.constant 0 : index
    %4 = vector.load %arg7[%c0_7, %c0_8] : memref<1x64xf32, #tpu.memory_space<vmem>>, vector<1x64xf32>
    %c0_9 = arith.constant 0 : index
    %c0_10 = arith.constant 0 : index
    %5 = vector.load %arg8[%c0_9, %c0_10] : memref<1x64xf32, #tpu.memory_space<vmem>>, vector<1x64xf32>
    %c0_11 = arith.constant 0 : index
    %c0_12 = arith.constant 0 : index
    %6 = vector.load %arg9[%c0_11, %c0_12] : memref<1x64xf32, #tpu.memory_space<vmem>>, vector<1x64xf32>
    %c0_13 = arith.constant 0 : index
    %c0_14 = arith.constant 0 : index
    %7 = vector.load %arg10[%c0_13, %c0_14] : memref<1x64xf32, #tpu.memory_space<vmem>>, vector<1x64xf32>
    %c0_15 = arith.constant 0 : index
    %c0_16 = arith.constant 0 : index
    %8 = vector.load %arg11[%c0_15, %c0_16] : memref<64x64xf32, #tpu.memory_space<vmem>>, vector<64x64xf32>
    %c0_17 = arith.constant 0 : index
    %c0_18 = arith.constant 0 : index
    %9 = vector.load %arg12[%c0_17, %c0_18] : memref<1x64xf32, #tpu.memory_space<vmem>>, vector<1x64xf32>
    %c0_19 = arith.constant 0 : index
    %c0_20 = arith.constant 0 : index
    %10 = vector.load %arg13[%c0_19, %c0_20] : memref<64x128xf32, #tpu.memory_space<vmem>>, vector<64x128xf32>
    %c0_21 = arith.constant 0 : index
    %c0_22 = arith.constant 0 : index
    %11 = vector.load %arg14[%c0_21, %c0_22] : memref<1x128xf32, #tpu.memory_space<vmem>>, vector<1x128xf32>
    %c0_23 = arith.constant 0 : index
    %c0_24 = arith.constant 0 : index
    %12 = vector.load %arg15[%c0_23, %c0_24] : memref<64x64xf32, #tpu.memory_space<vmem>>, vector<64x64xf32>
    %c0_25 = arith.constant 0 : index
    %c0_26 = arith.constant 0 : index
    %13 = vector.load %arg16[%c0_25, %c0_26] : memref<1x64xf32, #tpu.memory_space<vmem>>, vector<1x64xf32>
    %c0_27 = arith.constant 0 : index
    %c0_28 = arith.constant 0 : index
    %14 = vector.load %arg17[%c0_27, %c0_28] : memref<1x64xf32, #tpu.memory_space<vmem>>, vector<1x64xf32>
    %c0_29 = arith.constant 0 : index
    %c0_30 = arith.constant 0 : index
    %15 = vector.load %arg18[%c0_29, %c0_30] : memref<1x64xf32, #tpu.memory_space<vmem>>, vector<1x64xf32>
    %c0_31 = arith.constant 0 : index
    %c0_32 = arith.constant 0 : index
    %16 = vector.load %arg19[%c0_31, %c0_32] : memref<64x256xf32, #tpu.memory_space<vmem>>, vector<64x256xf32>
    %c0_33 = arith.constant 0 : index
    %c0_34 = arith.constant 0 : index
    %17 = vector.load %arg20[%c0_33, %c0_34] : memref<1x256xf32, #tpu.memory_space<vmem>>, vector<1x256xf32>
    %c0_35 = arith.constant 0 : index
    %c0_36 = arith.constant 0 : index
    %18 = vector.load %arg21[%c0_35, %c0_36] : memref<256x64xf32, #tpu.memory_space<vmem>>, vector<256x64xf32>
    %c0_37 = arith.constant 0 : index
    %c0_38 = arith.constant 0 : index
    %19 = vector.load %arg22[%c0_37, %c0_38] : memref<1x64xf32, #tpu.memory_space<vmem>>, vector<1x64xf32>
    %c0_39 = arith.constant 0 : index
    %c0_40 = arith.constant 0 : index
    %20 = vector.load %arg23[%c0_39, %c0_40] : memref<1x64xf32, #tpu.memory_space<vmem>>, vector<1x64xf32>
    %c0_41 = arith.constant 0 : index
    %c0_42 = arith.constant 0 : index
    %21 = vector.load %arg24[%c0_41, %c0_42] : memref<1x64xf32, #tpu.memory_space<vmem>>, vector<1x64xf32>
    %c0_43 = arith.constant 0 : index
    %c0_44 = arith.constant 0 : index
    %22 = vector.load %arg25[%c0_43, %c0_44] : memref<64x64xf32, #tpu.memory_space<vmem>>, vector<64x64xf32>
    %c0_45 = arith.constant 0 : index
    %c0_46 = arith.constant 0 : index
    %23 = vector.load %arg26[%c0_45, %c0_46] : memref<1x64xf32, #tpu.memory_space<vmem>>, vector<1x64xf32>
    %c0_47 = arith.constant 0 : index
    %c0_48 = arith.constant 0 : index
    %24 = vector.load %arg27[%c0_47, %c0_48] : memref<64x128xf32, #tpu.memory_space<vmem>>, vector<64x128xf32>
    %c0_49 = arith.constant 0 : index
    %c0_50 = arith.constant 0 : index
    %25 = vector.load %arg28[%c0_49, %c0_50] : memref<1x128xf32, #tpu.memory_space<vmem>>, vector<1x128xf32>
    %c0_51 = arith.constant 0 : index
    %c0_52 = arith.constant 0 : index
    %26 = vector.load %arg29[%c0_51, %c0_52] : memref<64x64xf32, #tpu.memory_space<vmem>>, vector<64x64xf32>
    %c0_53 = arith.constant 0 : index
    %c0_54 = arith.constant 0 : index
    %27 = vector.load %arg30[%c0_53, %c0_54] : memref<1x64xf32, #tpu.memory_space<vmem>>, vector<1x64xf32>
    %c0_55 = arith.constant 0 : index
    %c0_56 = arith.constant 0 : index
    %28 = vector.load %arg31[%c0_55, %c0_56] : memref<1x64xf32, #tpu.memory_space<vmem>>, vector<1x64xf32>
    %c0_57 = arith.constant 0 : index
    %c0_58 = arith.constant 0 : index
    %29 = vector.load %arg32[%c0_57, %c0_58] : memref<1x64xf32, #tpu.memory_space<vmem>>, vector<1x64xf32>
    %c0_59 = arith.constant 0 : index
    %c0_60 = arith.constant 0 : index
    %30 = vector.load %arg33[%c0_59, %c0_60] : memref<64x256xf32, #tpu.memory_space<vmem>>, vector<64x256xf32>
    %c0_61 = arith.constant 0 : index
    %c0_62 = arith.constant 0 : index
    %31 = vector.load %arg34[%c0_61, %c0_62] : memref<1x256xf32, #tpu.memory_space<vmem>>, vector<1x256xf32>
    %c0_63 = arith.constant 0 : index
    %c0_64 = arith.constant 0 : index
    %32 = vector.load %arg35[%c0_63, %c0_64] : memref<256x64xf32, #tpu.memory_space<vmem>>, vector<256x64xf32>
    %c0_65 = arith.constant 0 : index
    %c0_66 = arith.constant 0 : index
    %33 = vector.load %arg36[%c0_65, %c0_66] : memref<1x64xf32, #tpu.memory_space<vmem>>, vector<1x64xf32>
    %c0_67 = arith.constant 0 : index
    %c0_68 = arith.constant 0 : index
    %c0_69 = arith.constant 0 : index
    %34 = vector.load %arg1[%c0_67, %c0_68, %c0_69] : memref<1x16x4xf32, #tpu.memory_space<vmem>>, vector<1x16x4xf32>
    %35 = vector.shape_cast %34 : vector<1x16x4xf32> to vector<16x4xf32>
    %cst = arith.constant dense<0.000000e+00> : vector<16x64xf32>
    %36 = tpu.matmul %35, %0, %cst {dimension_numbers = #tpu.dot_dimension_numbers<[1], [0], [0], [1], [0, 0, 1, 1], [], []>} : vector<16x4xf32>, vector<4x64xf32>, vector<16x64xf32> -> vector<16x64xf32>
    %37 = vector.broadcast %1 : vector<1x64xf32> to vector<16x64xf32>
    %38 = arith.addf %36, %37 : vector<16x64xf32>
    %cst_70 = arith.constant 0.000000e+00 : f32
    %39 = vector.broadcast %cst_70 : f32 to vector<16x64xf32>
    %40 = arith.maximumf %38, %39 : vector<16x64xf32>
    %cst_71 = arith.constant dense<0.000000e+00> : vector<16x64xf32>
    %41 = tpu.matmul %40, %2, %cst_71 {dimension_numbers = #tpu.dot_dimension_numbers<[1], [0], [0], [1], [0, 0, 1, 1], [], []>} : vector<16x64xf32>, vector<64x64xf32>, vector<16x64xf32> -> vector<16x64xf32>
    %42 = vector.broadcast %3 : vector<1x64xf32> to vector<16x64xf32>
    %43 = arith.addf %41, %42 : vector<16x64xf32>
    %c0_72 = arith.constant 0 : index
    %c0_73 = arith.constant 0 : index
    %44 = vector.load %arg2[%c0_72, %c0_73] : memref<8x64xf32, #tpu.memory_space<vmem>>, vector<8x64xf32>
    %cst_74 = arith.constant dense<0.000000e+00> : vector<8xf32>
    %45 = vector.multi_reduction <add>, %44, %cst_74 [1] : vector<8x64xf32> to vector<8xf32>
    %46 = vector.shape_cast %45 : vector<8xf32> to vector<8x1xf32>
    %cst_75 = arith.constant 6.400000e+01 : f32
    %47 = vector.broadcast %cst_75 : f32 to vector<8x1xf32>
    %48 = arith.divf %46, %47 : vector<8x1xf32>
    %49 = vector.broadcast %48 : vector<8x1xf32> to vector<8x64xf32>
    %50 = arith.subf %44, %49 : vector<8x64xf32>
    %51 = arith.mulf %50, %50 : vector<8x64xf32>
    %cst_76 = arith.constant dense<0.000000e+00> : vector<8xf32>
    %52 = vector.multi_reduction <add>, %51, %cst_76 [1] : vector<8x64xf32> to vector<8xf32>
    %53 = vector.shape_cast %52 : vector<8xf32> to vector<8x1xf32>
    %cst_77 = arith.constant 6.400000e+01 : f32
    %54 = vector.broadcast %cst_77 : f32 to vector<8x1xf32>
    %55 = arith.divf %53, %54 : vector<8x1xf32>
    %cst_78 = arith.constant 9.99999974E-6 : f32
    %56 = vector.broadcast %cst_78 : f32 to vector<8x1xf32>
    %57 = arith.addf %55, %56 : vector<8x1xf32>
    %58 = math.rsqrt %57 : vector<8x1xf32>
    %59 = vector.broadcast %58 : vector<8x1xf32> to vector<8x64xf32>
    %60 = arith.mulf %50, %59 : vector<8x64xf32>
    %61 = vector.broadcast %4 : vector<1x64xf32> to vector<8x64xf32>
    %62 = arith.mulf %60, %61 : vector<8x64xf32>
    %63 = vector.broadcast %5 : vector<1x64xf32> to vector<8x64xf32>
    %64 = arith.addf %62, %63 : vector<8x64xf32>
    %cst_79 = arith.constant dense<0.000000e+00> : vector<16xf32>
    %65 = vector.multi_reduction <add>, %43, %cst_79 [1] : vector<16x64xf32> to vector<16xf32>
    %66 = vector.shape_cast %65 : vector<16xf32> to vector<16x1xf32>
    %cst_80 = arith.constant 6.400000e+01 : f32
    %67 = vector.broadcast %cst_80 : f32 to vector<16x1xf32>
    %68 = arith.divf %66, %67 : vector<16x1xf32>
    %69 = vector.broadcast %68 : vector<16x1xf32> to vector<16x64xf32>
    %70 = arith.subf %43, %69 : vector<16x64xf32>
    %71 = arith.mulf %70, %70 : vector<16x64xf32>
    %cst_81 = arith.constant dense<0.000000e+00> : vector<16xf32>
    %72 = vector.multi_reduction <add>, %71, %cst_81 [1] : vector<16x64xf32> to vector<16xf32>
    %73 = vector.shape_cast %72 : vector<16xf32> to vector<16x1xf32>
    %cst_82 = arith.constant 6.400000e+01 : f32
    %74 = vector.broadcast %cst_82 : f32 to vector<16x1xf32>
    %75 = arith.divf %73, %74 : vector<16x1xf32>
    %cst_83 = arith.constant 9.99999974E-6 : f32
    %76 = vector.broadcast %cst_83 : f32 to vector<16x1xf32>
    %77 = arith.addf %75, %76 : vector<16x1xf32>
    %78 = math.rsqrt %77 : vector<16x1xf32>
    %79 = vector.broadcast %78 : vector<16x1xf32> to vector<16x64xf32>
    %80 = arith.mulf %70, %79 : vector<16x64xf32>
    %81 = vector.broadcast %6 : vector<1x64xf32> to vector<16x64xf32>
    %82 = arith.mulf %80, %81 : vector<16x64xf32>
    %83 = vector.broadcast %7 : vector<1x64xf32> to vector<16x64xf32>
    %84 = arith.addf %82, %83 : vector<16x64xf32>
    %cst_84 = arith.constant dense<0.000000e+00> : vector<8x64xf32>
    %85 = tpu.matmul %64, %8, %cst_84 {dimension_numbers = #tpu.dot_dimension_numbers<[1], [0], [0], [1], [0, 0, 1, 1], [], []>} : vector<8x64xf32>, vector<64x64xf32>, vector<8x64xf32> -> vector<8x64xf32>
    %86 = vector.broadcast %9 : vector<1x64xf32> to vector<8x64xf32>
    %87 = arith.addf %85, %86 : vector<8x64xf32>
    %cst_85 = arith.constant dense<0.000000e+00> : vector<16x128xf32>
    %88 = tpu.matmul %84, %10, %cst_85 {dimension_numbers = #tpu.dot_dimension_numbers<[1], [0], [0], [1], [0, 0, 1, 1], [], []>} : vector<16x64xf32>, vector<64x128xf32>, vector<16x128xf32> -> vector<16x128xf32>
    %89 = vector.broadcast %11 : vector<1x128xf32> to vector<16x128xf32>
    %90 = arith.addf %88, %89 : vector<16x128xf32>
    %91 = vector.extract_strided_slice %90 {offsets = [0, 0], sizes = [16, 64], strides = [1, 1]} : vector<16x128xf32> to vector<16x64xf32>
    %92 = vector.extract_strided_slice %90 {offsets = [0, 64], sizes = [16, 64], strides = [1, 1]} : vector<16x128xf32> to vector<16x64xf32>
    %93 = vector.extract_strided_slice %87 {offsets = [0, 0], sizes = [8, 16], strides = [1, 1]} : vector<8x64xf32> to vector<8x16xf32>
    %94 = vector.extract_strided_slice %91 {offsets = [0, 0], sizes = [16, 16], strides = [1, 1]} : vector<16x64xf32> to vector<16x16xf32>
    %cst_86 = arith.constant dense<0.000000e+00> : vector<8x16xf32>
    %95 = tpu.matmul %93, %94, %cst_86 {dimension_numbers = #tpu.dot_dimension_numbers<[1], [1], [0], [0], [0, 0, 1, 0], [], []>} : vector<8x16xf32>, vector<16x16xf32>, vector<8x16xf32> -> vector<8x16xf32>
    %96 = vector.extract_strided_slice %87 {offsets = [0, 16], sizes = [8, 16], strides = [1, 1]} : vector<8x64xf32> to vector<8x16xf32>
    %97 = vector.extract_strided_slice %91 {offsets = [0, 16], sizes = [16, 16], strides = [1, 1]} : vector<16x64xf32> to vector<16x16xf32>
    %cst_87 = arith.constant dense<0.000000e+00> : vector<8x16xf32>
    %98 = tpu.matmul %96, %97, %cst_87 {dimension_numbers = #tpu.dot_dimension_numbers<[1], [1], [0], [0], [0, 0, 1, 0], [], []>} : vector<8x16xf32>, vector<16x16xf32>, vector<8x16xf32> -> vector<8x16xf32>
    %99 = vector.extract_strided_slice %87 {offsets = [0, 32], sizes = [8, 16], strides = [1, 1]} : vector<8x64xf32> to vector<8x16xf32>
    %100 = vector.extract_strided_slice %91 {offsets = [0, 32], sizes = [16, 16], strides = [1, 1]} : vector<16x64xf32> to vector<16x16xf32>
    %cst_88 = arith.constant dense<0.000000e+00> : vector<8x16xf32>
    %101 = tpu.matmul %99, %100, %cst_88 {dimension_numbers = #tpu.dot_dimension_numbers<[1], [1], [0], [0], [0, 0, 1, 0], [], []>} : vector<8x16xf32>, vector<16x16xf32>, vector<8x16xf32> -> vector<8x16xf32>
    %102 = vector.extract_strided_slice %87 {offsets = [0, 48], sizes = [8, 16], strides = [1, 1]} : vector<8x64xf32> to vector<8x16xf32>
    %103 = vector.extract_strided_slice %91 {offsets = [0, 48], sizes = [16, 16], strides = [1, 1]} : vector<16x64xf32> to vector<16x16xf32>
    %cst_89 = arith.constant dense<0.000000e+00> : vector<8x16xf32>
    %104 = tpu.matmul %102, %103, %cst_89 {dimension_numbers = #tpu.dot_dimension_numbers<[1], [1], [0], [0], [0, 0, 1, 0], [], []>} : vector<8x16xf32>, vector<16x16xf32>, vector<8x16xf32> -> vector<8x16xf32>
    %105 = vector.shape_cast %95 : vector<8x16xf32> to vector<1x8x16xf32>
    %106 = vector.shape_cast %98 : vector<8x16xf32> to vector<1x8x16xf32>
    %107 = vector.shape_cast %101 : vector<8x16xf32> to vector<1x8x16xf32>
    %108 = vector.shape_cast %104 : vector<8x16xf32> to vector<1x8x16xf32>
    %109 = tpu.concatenate %105, %106, %107, %108 in 0 : vector<1x8x16xf32>, vector<1x8x16xf32>, vector<1x8x16xf32>, vector<1x8x16xf32> -> vector<4x8x16xf32>
    %cst_90 = arith.constant dense<0xFF800000> : vector<4x8xf32>
    %110 = vector.multi_reduction <maximumf>, %109, %cst_90 [2] : vector<4x8x16xf32> to vector<4x8xf32>
    %111 = vector.shape_cast %110 : vector<4x8xf32> to vector<4x8x1xf32>
    %112 = vector.broadcast %111 : vector<4x8x1xf32> to vector<4x8x16xf32>
    %113 = arith.subf %109, %112 : vector<4x8x16xf32>
    %114 = math.exp %113 : vector<4x8x16xf32>
    %cst_91 = arith.constant dense<0.000000e+00> : vector<4x8xf32>
    %115 = vector.multi_reduction <add>, %114, %cst_91 [2] : vector<4x8x16xf32> to vector<4x8xf32>
    %116 = vector.shape_cast %115 : vector<4x8xf32> to vector<4x8x1xf32>
    %117 = vector.broadcast %116 : vector<4x8x1xf32> to vector<4x8x16xf32>
    %118 = arith.divf %114, %117 : vector<4x8x16xf32>
    %119 = vector.extract_strided_slice %118 {offsets = [0, 0, 0], sizes = [1, 8, 16], strides = [1, 1, 1]} : vector<4x8x16xf32> to vector<1x8x16xf32>
    %120 = vector.shape_cast %119 : vector<1x8x16xf32> to vector<8x16xf32>
    %121 = vector.extract_strided_slice %92 {offsets = [0, 0], sizes = [16, 16], strides = [1, 1]} : vector<16x64xf32> to vector<16x16xf32>
    %cst_92 = arith.constant dense<0.000000e+00> : vector<8x16xf32>
    %122 = tpu.matmul %120, %121, %cst_92 {dimension_numbers = #tpu.dot_dimension_numbers<[1], [0], [0], [1], [0, 0, 1, 1], [], []>} : vector<8x16xf32>, vector<16x16xf32>, vector<8x16xf32> -> vector<8x16xf32>
    %123 = vector.extract_strided_slice %118 {offsets = [1, 0, 0], sizes = [1, 8, 16], strides = [1, 1, 1]} : vector<4x8x16xf32> to vector<1x8x16xf32>
    %124 = vector.shape_cast %123 : vector<1x8x16xf32> to vector<8x16xf32>
    %125 = vector.extract_strided_slice %92 {offsets = [0, 16], sizes = [16, 16], strides = [1, 1]} : vector<16x64xf32> to vector<16x16xf32>
    %cst_93 = arith.constant dense<0.000000e+00> : vector<8x16xf32>
    %126 = tpu.matmul %124, %125, %cst_93 {dimension_numbers = #tpu.dot_dimension_numbers<[1], [0], [0], [1], [0, 0, 1, 1], [], []>} : vector<8x16xf32>, vector<16x16xf32>, vector<8x16xf32> -> vector<8x16xf32>
    %127 = vector.extract_strided_slice %118 {offsets = [2, 0, 0], sizes = [1, 8, 16], strides = [1, 1, 1]} : vector<4x8x16xf32> to vector<1x8x16xf32>
    %128 = vector.shape_cast %127 : vector<1x8x16xf32> to vector<8x16xf32>
    %129 = vector.extract_strided_slice %92 {offsets = [0, 32], sizes = [16, 16], strides = [1, 1]} : vector<16x64xf32> to vector<16x16xf32>
    %cst_94 = arith.constant dense<0.000000e+00> : vector<8x16xf32>
    %130 = tpu.matmul %128, %129, %cst_94 {dimension_numbers = #tpu.dot_dimension_numbers<[1], [0], [0], [1], [0, 0, 1, 1], [], []>} : vector<8x16xf32>, vector<16x16xf32>, vector<8x16xf32> -> vector<8x16xf32>
    %131 = vector.extract_strided_slice %118 {offsets = [3, 0, 0], sizes = [1, 8, 16], strides = [1, 1, 1]} : vector<4x8x16xf32> to vector<1x8x16xf32>
    %132 = vector.shape_cast %131 : vector<1x8x16xf32> to vector<8x16xf32>
    %133 = vector.extract_strided_slice %92 {offsets = [0, 48], sizes = [16, 16], strides = [1, 1]} : vector<16x64xf32> to vector<16x16xf32>
    %cst_95 = arith.constant dense<0.000000e+00> : vector<8x16xf32>
    %134 = tpu.matmul %132, %133, %cst_95 {dimension_numbers = #tpu.dot_dimension_numbers<[1], [0], [0], [1], [0, 0, 1, 1], [], []>} : vector<8x16xf32>, vector<16x16xf32>, vector<8x16xf32> -> vector<8x16xf32>
    %135 = tpu.concatenate %122, %126, %130, %134 in 1 : vector<8x16xf32>, vector<8x16xf32>, vector<8x16xf32>, vector<8x16xf32> -> vector<8x64xf32>
    %cst_96 = arith.constant dense<0.000000e+00> : vector<8x64xf32>
    %136 = tpu.matmul %135, %12, %cst_96 {dimension_numbers = #tpu.dot_dimension_numbers<[1], [0], [0], [1], [0, 0, 1, 1], [], []>} : vector<8x64xf32>, vector<64x64xf32>, vector<8x64xf32> -> vector<8x64xf32>
    %137 = vector.broadcast %13 : vector<1x64xf32> to vector<8x64xf32>
    %138 = arith.addf %136, %137 : vector<8x64xf32>
    %139 = arith.addf %44, %138 : vector<8x64xf32>
    %cst_97 = arith.constant dense<0.000000e+00> : vector<8xf32>
    %140 = vector.multi_reduction <add>, %139, %cst_97 [1] : vector<8x64xf32> to vector<8xf32>
    %141 = vector.shape_cast %140 : vector<8xf32> to vector<8x1xf32>
    %cst_98 = arith.constant 6.400000e+01 : f32
    %142 = vector.broadcast %cst_98 : f32 to vector<8x1xf32>
    %143 = arith.divf %141, %142 : vector<8x1xf32>
    %144 = vector.broadcast %143 : vector<8x1xf32> to vector<8x64xf32>
    %145 = arith.subf %139, %144 : vector<8x64xf32>
    %146 = arith.mulf %145, %145 : vector<8x64xf32>
    %cst_99 = arith.constant dense<0.000000e+00> : vector<8xf32>
    %147 = vector.multi_reduction <add>, %146, %cst_99 [1] : vector<8x64xf32> to vector<8xf32>
    %148 = vector.shape_cast %147 : vector<8xf32> to vector<8x1xf32>
    %cst_100 = arith.constant 6.400000e+01 : f32
    %149 = vector.broadcast %cst_100 : f32 to vector<8x1xf32>
    %150 = arith.divf %148, %149 : vector<8x1xf32>
    %cst_101 = arith.constant 9.99999974E-6 : f32
    %151 = vector.broadcast %cst_101 : f32 to vector<8x1xf32>
    %152 = arith.addf %150, %151 : vector<8x1xf32>
    %153 = math.rsqrt %152 : vector<8x1xf32>
    %154 = vector.broadcast %153 : vector<8x1xf32> to vector<8x64xf32>
    %155 = arith.mulf %145, %154 : vector<8x64xf32>
    %156 = vector.broadcast %14 : vector<1x64xf32> to vector<8x64xf32>
    %157 = arith.mulf %155, %156 : vector<8x64xf32>
    %158 = vector.broadcast %15 : vector<1x64xf32> to vector<8x64xf32>
    %159 = arith.addf %157, %158 : vector<8x64xf32>
    %cst_102 = arith.constant dense<0.000000e+00> : vector<8x256xf32>
    %160 = tpu.matmul %159, %16, %cst_102 {dimension_numbers = #tpu.dot_dimension_numbers<[1], [0], [0], [1], [0, 0, 1, 1], [], []>} : vector<8x64xf32>, vector<64x256xf32>, vector<8x256xf32> -> vector<8x256xf32>
    %161 = vector.broadcast %17 : vector<1x256xf32> to vector<8x256xf32>
    %162 = arith.addf %160, %161 : vector<8x256xf32>
    %cst_103 = arith.constant 0.000000e+00 : f32
    %163 = vector.broadcast %cst_103 : f32 to vector<8x256xf32>
    %164 = arith.maximumf %162, %163 : vector<8x256xf32>
    %cst_104 = arith.constant dense<0.000000e+00> : vector<8x64xf32>
    %165 = tpu.matmul %164, %18, %cst_104 {dimension_numbers = #tpu.dot_dimension_numbers<[1], [0], [0], [1], [0, 0, 1, 1], [], []>} : vector<8x256xf32>, vector<256x64xf32>, vector<8x64xf32> -> vector<8x64xf32>
    %166 = arith.addf %139, %165 : vector<8x64xf32>
    %167 = vector.broadcast %19 : vector<1x64xf32> to vector<8x64xf32>
    %168 = arith.addf %166, %167 : vector<8x64xf32>
    %cst_105 = arith.constant dense<0.000000e+00> : vector<64xf32>
    %169 = vector.multi_reduction <add>, %168, %cst_105 [0] : vector<8x64xf32> to vector<64xf32>
    %170 = vector.shape_cast %169 : vector<64xf32> to vector<1x64xf32>
    %cst_106 = arith.constant 8.000000e+00 : f32
    %171 = vector.broadcast %cst_106 : f32 to vector<1x64xf32>
    %172 = arith.divf %170, %171 : vector<1x64xf32>
    %173 = tpu.concatenate %168, %172 in 0 : vector<8x64xf32>, vector<1x64xf32> -> vector<9x64xf32>
    %cst_107 = arith.constant dense<0.000000e+00> : vector<9xf32>
    %174 = vector.multi_reduction <add>, %173, %cst_107 [1] : vector<9x64xf32> to vector<9xf32>
    %175 = vector.shape_cast %174 : vector<9xf32> to vector<9x1xf32>
    %cst_108 = arith.constant 6.400000e+01 : f32
    %176 = vector.broadcast %cst_108 : f32 to vector<9x1xf32>
    %177 = arith.divf %175, %176 : vector<9x1xf32>
    %178 = vector.broadcast %177 : vector<9x1xf32> to vector<9x64xf32>
    %179 = arith.subf %173, %178 : vector<9x64xf32>
    %180 = arith.mulf %179, %179 : vector<9x64xf32>
    %cst_109 = arith.constant dense<0.000000e+00> : vector<9xf32>
    %181 = vector.multi_reduction <add>, %180, %cst_109 [1] : vector<9x64xf32> to vector<9xf32>
    %182 = vector.shape_cast %181 : vector<9xf32> to vector<9x1xf32>
    %cst_110 = arith.constant 6.400000e+01 : f32
    %183 = vector.broadcast %cst_110 : f32 to vector<9x1xf32>
    %184 = arith.divf %182, %183 : vector<9x1xf32>
    %cst_111 = arith.constant 9.99999974E-6 : f32
    %185 = vector.broadcast %cst_111 : f32 to vector<9x1xf32>
    %186 = arith.addf %184, %185 : vector<9x1xf32>
    %187 = math.rsqrt %186 : vector<9x1xf32>
    %188 = vector.broadcast %187 : vector<9x1xf32> to vector<9x64xf32>
    %189 = arith.mulf %179, %188 : vector<9x64xf32>
    %190 = vector.broadcast %20 : vector<1x64xf32> to vector<9x64xf32>
    %191 = arith.mulf %189, %190 : vector<9x64xf32>
    %192 = vector.broadcast %21 : vector<1x64xf32> to vector<9x64xf32>
    %193 = arith.addf %191, %192 : vector<9x64xf32>
    %cst_112 = arith.constant dense<0.000000e+00> : vector<9x64xf32>
    %194 = tpu.matmul %193, %22, %cst_112 {dimension_numbers = #tpu.dot_dimension_numbers<[1], [0], [0], [1], [0, 0, 1, 1], [], []>} : vector<9x64xf32>, vector<64x64xf32>, vector<9x64xf32> -> vector<9x64xf32>
    %195 = vector.broadcast %23 : vector<1x64xf32> to vector<9x64xf32>
    %196 = arith.addf %194, %195 : vector<9x64xf32>
    %cst_113 = arith.constant dense<0.000000e+00> : vector<9x128xf32>
    %197 = tpu.matmul %193, %24, %cst_113 {dimension_numbers = #tpu.dot_dimension_numbers<[1], [0], [0], [1], [0, 0, 1, 1], [], []>} : vector<9x64xf32>, vector<64x128xf32>, vector<9x128xf32> -> vector<9x128xf32>
    %198 = vector.broadcast %25 : vector<1x128xf32> to vector<9x128xf32>
    %199 = arith.addf %197, %198 : vector<9x128xf32>
    %200 = vector.extract_strided_slice %199 {offsets = [0, 0], sizes = [9, 64], strides = [1, 1]} : vector<9x128xf32> to vector<9x64xf32>
    %201 = vector.extract_strided_slice %199 {offsets = [0, 64], sizes = [9, 64], strides = [1, 1]} : vector<9x128xf32> to vector<9x64xf32>
    %202 = vector.extract_strided_slice %196 {offsets = [0, 0], sizes = [9, 16], strides = [1, 1]} : vector<9x64xf32> to vector<9x16xf32>
    %203 = vector.extract_strided_slice %200 {offsets = [0, 0], sizes = [9, 16], strides = [1, 1]} : vector<9x64xf32> to vector<9x16xf32>
    %cst_114 = arith.constant dense<0.000000e+00> : vector<9x9xf32>
    %204 = tpu.matmul %202, %203, %cst_114 {dimension_numbers = #tpu.dot_dimension_numbers<[1], [1], [0], [0], [0, 0, 1, 0], [], []>} : vector<9x16xf32>, vector<9x16xf32>, vector<9x9xf32> -> vector<9x9xf32>
    %205 = vector.extract_strided_slice %196 {offsets = [0, 16], sizes = [9, 16], strides = [1, 1]} : vector<9x64xf32> to vector<9x16xf32>
    %206 = vector.extract_strided_slice %200 {offsets = [0, 16], sizes = [9, 16], strides = [1, 1]} : vector<9x64xf32> to vector<9x16xf32>
    %cst_115 = arith.constant dense<0.000000e+00> : vector<9x9xf32>
    %207 = tpu.matmul %205, %206, %cst_115 {dimension_numbers = #tpu.dot_dimension_numbers<[1], [1], [0], [0], [0, 0, 1, 0], [], []>} : vector<9x16xf32>, vector<9x16xf32>, vector<9x9xf32> -> vector<9x9xf32>
    %208 = vector.extract_strided_slice %196 {offsets = [0, 32], sizes = [9, 16], strides = [1, 1]} : vector<9x64xf32> to vector<9x16xf32>
    %209 = vector.extract_strided_slice %200 {offsets = [0, 32], sizes = [9, 16], strides = [1, 1]} : vector<9x64xf32> to vector<9x16xf32>
    %cst_116 = arith.constant dense<0.000000e+00> : vector<9x9xf32>
    %210 = tpu.matmul %208, %209, %cst_116 {dimension_numbers = #tpu.dot_dimension_numbers<[1], [1], [0], [0], [0, 0, 1, 0], [], []>} : vector<9x16xf32>, vector<9x16xf32>, vector<9x9xf32> -> vector<9x9xf32>
    %211 = vector.extract_strided_slice %196 {offsets = [0, 48], sizes = [9, 16], strides = [1, 1]} : vector<9x64xf32> to vector<9x16xf32>
    %212 = vector.extract_strided_slice %200 {offsets = [0, 48], sizes = [9, 16], strides = [1, 1]} : vector<9x64xf32> to vector<9x16xf32>
    %cst_117 = arith.constant dense<0.000000e+00> : vector<9x9xf32>
    %213 = tpu.matmul %211, %212, %cst_117 {dimension_numbers = #tpu.dot_dimension_numbers<[1], [1], [0], [0], [0, 0, 1, 0], [], []>} : vector<9x16xf32>, vector<9x16xf32>, vector<9x9xf32> -> vector<9x9xf32>
    %214 = vector.shape_cast %204 : vector<9x9xf32> to vector<1x9x9xf32>
    %215 = vector.shape_cast %207 : vector<9x9xf32> to vector<1x9x9xf32>
    %216 = vector.shape_cast %210 : vector<9x9xf32> to vector<1x9x9xf32>
    %217 = vector.shape_cast %213 : vector<9x9xf32> to vector<1x9x9xf32>
    %218 = tpu.concatenate %214, %215, %216, %217 in 0 : vector<1x9x9xf32>, vector<1x9x9xf32>, vector<1x9x9xf32>, vector<1x9x9xf32> -> vector<4x9x9xf32>
    %cst_118 = arith.constant dense<0xFF800000> : vector<4x9xf32>
    %219 = vector.multi_reduction <maximumf>, %218, %cst_118 [2] : vector<4x9x9xf32> to vector<4x9xf32>
    %220 = vector.shape_cast %219 : vector<4x9xf32> to vector<4x9x1xf32>
    %221 = vector.broadcast %220 : vector<4x9x1xf32> to vector<4x9x9xf32>
    %222 = arith.subf %218, %221 : vector<4x9x9xf32>
    %223 = math.exp %222 : vector<4x9x9xf32>
    %cst_119 = arith.constant dense<0.000000e+00> : vector<4x9xf32>
    %224 = vector.multi_reduction <add>, %223, %cst_119 [2] : vector<4x9x9xf32> to vector<4x9xf32>
    %225 = vector.shape_cast %224 : vector<4x9xf32> to vector<4x9x1xf32>
    %226 = vector.broadcast %225 : vector<4x9x1xf32> to vector<4x9x9xf32>
    %227 = arith.divf %223, %226 : vector<4x9x9xf32>
    %228 = vector.extract_strided_slice %227 {offsets = [0, 0, 0], sizes = [1, 9, 9], strides = [1, 1, 1]} : vector<4x9x9xf32> to vector<1x9x9xf32>
    %229 = vector.shape_cast %228 : vector<1x9x9xf32> to vector<9x9xf32>
    %230 = vector.extract_strided_slice %201 {offsets = [0, 0], sizes = [9, 16], strides = [1, 1]} : vector<9x64xf32> to vector<9x16xf32>
    %cst_120 = arith.constant dense<0.000000e+00> : vector<9x16xf32>
    %231 = tpu.matmul %229, %230, %cst_120 {dimension_numbers = #tpu.dot_dimension_numbers<[1], [0], [0], [1], [0, 0, 1, 1], [], []>} : vector<9x9xf32>, vector<9x16xf32>, vector<9x16xf32> -> vector<9x16xf32>
    %232 = vector.extract_strided_slice %227 {offsets = [1, 0, 0], sizes = [1, 9, 9], strides = [1, 1, 1]} : vector<4x9x9xf32> to vector<1x9x9xf32>
    %233 = vector.shape_cast %232 : vector<1x9x9xf32> to vector<9x9xf32>
    %234 = vector.extract_strided_slice %201 {offsets = [0, 16], sizes = [9, 16], strides = [1, 1]} : vector<9x64xf32> to vector<9x16xf32>
    %cst_121 = arith.constant dense<0.000000e+00> : vector<9x16xf32>
    %235 = tpu.matmul %233, %234, %cst_121 {dimension_numbers = #tpu.dot_dimension_numbers<[1], [0], [0], [1], [0, 0, 1, 1], [], []>} : vector<9x9xf32>, vector<9x16xf32>, vector<9x16xf32> -> vector<9x16xf32>
    %236 = vector.extract_strided_slice %227 {offsets = [2, 0, 0], sizes = [1, 9, 9], strides = [1, 1, 1]} : vector<4x9x9xf32> to vector<1x9x9xf32>
    %237 = vector.shape_cast %236 : vector<1x9x9xf32> to vector<9x9xf32>
    %238 = vector.extract_strided_slice %201 {offsets = [0, 32], sizes = [9, 16], strides = [1, 1]} : vector<9x64xf32> to vector<9x16xf32>
    %cst_122 = arith.constant dense<0.000000e+00> : vector<9x16xf32>
    %239 = tpu.matmul %237, %238, %cst_122 {dimension_numbers = #tpu.dot_dimension_numbers<[1], [0], [0], [1], [0, 0, 1, 1], [], []>} : vector<9x9xf32>, vector<9x16xf32>, vector<9x16xf32> -> vector<9x16xf32>
    %240 = vector.extract_strided_slice %227 {offsets = [3, 0, 0], sizes = [1, 9, 9], strides = [1, 1, 1]} : vector<4x9x9xf32> to vector<1x9x9xf32>
    %241 = vector.shape_cast %240 : vector<1x9x9xf32> to vector<9x9xf32>
    %242 = vector.extract_strided_slice %201 {offsets = [0, 48], sizes = [9, 16], strides = [1, 1]} : vector<9x64xf32> to vector<9x16xf32>
    %cst_123 = arith.constant dense<0.000000e+00> : vector<9x16xf32>
    %243 = tpu.matmul %241, %242, %cst_123 {dimension_numbers = #tpu.dot_dimension_numbers<[1], [0], [0], [1], [0, 0, 1, 1], [], []>} : vector<9x9xf32>, vector<9x16xf32>, vector<9x16xf32> -> vector<9x16xf32>
    %244 = tpu.concatenate %231, %235, %239, %243 in 1 : vector<9x16xf32>, vector<9x16xf32>, vector<9x16xf32>, vector<9x16xf32> -> vector<9x64xf32>
    %cst_124 = arith.constant dense<0.000000e+00> : vector<9x64xf32>
    %245 = tpu.matmul %244, %26, %cst_124 {dimension_numbers = #tpu.dot_dimension_numbers<[1], [0], [0], [1], [0, 0, 1, 1], [], []>} : vector<9x64xf32>, vector<64x64xf32>, vector<9x64xf32> -> vector<9x64xf32>
    %246 = vector.broadcast %27 : vector<1x64xf32> to vector<9x64xf32>
    %247 = arith.addf %245, %246 : vector<9x64xf32>
    %248 = arith.addf %173, %247 : vector<9x64xf32>
    %cst_125 = arith.constant dense<0.000000e+00> : vector<9xf32>
    %249 = vector.multi_reduction <add>, %248, %cst_125 [1] : vector<9x64xf32> to vector<9xf32>
    %250 = vector.shape_cast %249 : vector<9xf32> to vector<9x1xf32>
    %cst_126 = arith.constant 6.400000e+01 : f32
    %251 = vector.broadcast %cst_126 : f32 to vector<9x1xf32>
    %252 = arith.divf %250, %251 : vector<9x1xf32>
    %253 = vector.broadcast %252 : vector<9x1xf32> to vector<9x64xf32>
    %254 = arith.subf %248, %253 : vector<9x64xf32>
    %255 = arith.mulf %254, %254 : vector<9x64xf32>
    %cst_127 = arith.constant dense<0.000000e+00> : vector<9xf32>
    %256 = vector.multi_reduction <add>, %255, %cst_127 [1] : vector<9x64xf32> to vector<9xf32>
    %257 = vector.shape_cast %256 : vector<9xf32> to vector<9x1xf32>
    %cst_128 = arith.constant 6.400000e+01 : f32
    %258 = vector.broadcast %cst_128 : f32 to vector<9x1xf32>
    %259 = arith.divf %257, %258 : vector<9x1xf32>
    %cst_129 = arith.constant 9.99999974E-6 : f32
    %260 = vector.broadcast %cst_129 : f32 to vector<9x1xf32>
    %261 = arith.addf %259, %260 : vector<9x1xf32>
    %262 = math.rsqrt %261 : vector<9x1xf32>
    %263 = vector.broadcast %262 : vector<9x1xf32> to vector<9x64xf32>
    %264 = arith.mulf %254, %263 : vector<9x64xf32>
    %265 = vector.broadcast %28 : vector<1x64xf32> to vector<9x64xf32>
    %266 = arith.mulf %264, %265 : vector<9x64xf32>
    %267 = vector.broadcast %29 : vector<1x64xf32> to vector<9x64xf32>
    %268 = arith.addf %266, %267 : vector<9x64xf32>
    %cst_130 = arith.constant dense<0.000000e+00> : vector<9x256xf32>
    %269 = tpu.matmul %268, %30, %cst_130 {dimension_numbers = #tpu.dot_dimension_numbers<[1], [0], [0], [1], [0, 0, 1, 1], [], []>} : vector<9x64xf32>, vector<64x256xf32>, vector<9x256xf32> -> vector<9x256xf32>
    %270 = vector.broadcast %31 : vector<1x256xf32> to vector<9x256xf32>
    %271 = arith.addf %269, %270 : vector<9x256xf32>
    %cst_131 = arith.constant 0.000000e+00 : f32
    %272 = vector.broadcast %cst_131 : f32 to vector<9x256xf32>
    %273 = arith.maximumf %271, %272 : vector<9x256xf32>
    %cst_132 = arith.constant dense<0.000000e+00> : vector<9x64xf32>
    %274 = tpu.matmul %273, %32, %cst_132 {dimension_numbers = #tpu.dot_dimension_numbers<[1], [0], [0], [1], [0, 0, 1, 1], [], []>} : vector<9x256xf32>, vector<256x64xf32>, vector<9x64xf32> -> vector<9x64xf32>
    %275 = arith.addf %248, %274 : vector<9x64xf32>
    %276 = vector.broadcast %33 : vector<1x64xf32> to vector<9x64xf32>
    %277 = arith.addf %275, %276 : vector<9x64xf32>
    %c0_133 = arith.constant 0 : index
    %c0_134 = arith.constant 0 : index
    %c0_135 = arith.constant 0 : index
    %278 = vector.load %arg37[%c0_133, %c0_134, %c0_135] : memref<1x9x64xf32, #tpu.memory_space<vmem>>, vector<1x9x64xf32>
    %279 = vector.shape_cast %278 : vector<1x9x64xf32> to vector<9x64xf32>
    %280 = vector.shape_cast %277 : vector<9x64xf32> to vector<1x9x64xf32>
    tpu.vector_store %arg37[%c0_133, %c0_134, %c0_135], %280 {strides = array<i32>} : memref<1x9x64xf32, #tpu.memory_space<vmem>>, vector<1x9x64xf32>,
    return
  }
  func.func @transform_0(%arg0: i32) -> (i32, i32, i32) {
    %c0_i32 = arith.constant 0 : i32
    %c0_i32_0 = arith.constant 0 : i32
    %c0_i32_1 = arith.constant 0 : i32
    return %arg0, %c0_i32, %c0_i32_0 : i32, i32, i32
  }
  func.func @transform_1(%arg0: i32) -> (i32, i32) {
    %c0_i32 = arith.constant 0 : i32
    %c0_i32_0 = arith.constant 0 : i32
    %c0_i32_1 = arith.constant 0 : i32
    return %c0_i32, %c0_i32_0 : i32, i32
  }
  func.func @transform_2(%arg0: i32) -> (i32, i32) {
    %c0_i32 = arith.constant 0 : i32
    %c0_i32_0 = arith.constant 0 : i32
    %c0_i32_1 = arith.constant 0 : i32
    return %c0_i32, %c0_i32_0 : i32, i32
  }
  func.func @transform_3(%arg0: i32) -> (i32, i32) {
    %c0_i32 = arith.constant 0 : i32
    %c0_i32_0 = arith.constant 0 : i32
    %c0_i32_1 = arith.constant 0 : i32
    return %c0_i32, %c0_i32_0 : i32, i32
  }
  func.func @transform_4(%arg0: i32) -> (i32, i32) {
    %c0_i32 = arith.constant 0 : i32
    %c0_i32_0 = arith.constant 0 : i32
    %c0_i32_1 = arith.constant 0 : i32
    return %c0_i32, %c0_i32_0 : i32, i32
  }
  func.func @transform_5(%arg0: i32) -> (i32, i32) {
    %c0_i32 = arith.constant 0 : i32
    %c0_i32_0 = arith.constant 0 : i32
    %c0_i32_1 = arith.constant 0 : i32
    return %c0_i32, %c0_i32_0 : i32, i32
  }
  func.func @transform_6(%arg0: i32) -> (i32, i32) {
    %c0_i32 = arith.constant 0 : i32
    %c0_i32_0 = arith.constant 0 : i32
    %c0_i32_1 = arith.constant 0 : i32
    return %c0_i32, %c0_i32_0 : i32, i32
  }
  func.func @transform_7(%arg0: i32) -> (i32, i32) {
    %c0_i32 = arith.constant 0 : i32
    %c0_i32_0 = arith.constant 0 : i32
    %c0_i32_1 = arith.constant 0 : i32
    return %c0_i32, %c0_i32_0 : i32, i32
  }
  func.func @transform_8(%arg0: i32) -> (i32, i32) {
    %c0_i32 = arith.constant 0 : i32
    %c0_i32_0 = arith.constant 0 : i32
    %c0_i32_1 = arith.constant 0 : i32
    return %c0_i32, %c0_i32_0 : i32, i32
  }
  func.func @transform_9(%arg0: i32) -> (i32, i32) {
    %c0_i32 = arith.constant 0 : i32
    %c0_i32_0 = arith.constant 0 : i32
    %c0_i32_1 = arith.constant 0 : i32
    return %c0_i32, %c0_i32_0 : i32, i32
  }
  func.func @transform_10(%arg0: i32) -> (i32, i32) {
    %c0_i32 = arith.constant 0 : i32
    %c0_i32_0 = arith.constant 0 : i32
    %c0_i32_1 = arith.constant 0 : i32
    return %c0_i32, %c0_i32_0 : i32, i32
  }
  func.func @transform_11(%arg0: i32) -> (i32, i32) {
    %c0_i32 = arith.constant 0 : i32
    %c0_i32_0 = arith.constant 0 : i32
    %c0_i32_1 = arith.constant 0 : i32
    return %c0_i32, %c0_i32_0 : i32, i32
  }
  func.func @transform_12(%arg0: i32) -> (i32, i32) {
    %c0_i32 = arith.constant 0 : i32
    %c0_i32_0 = arith.constant 0 : i32
    %c0_i32_1 = arith.constant 0 : i32
    return %c0_i32, %c0_i32_0 : i32, i32
  }
  func.func @transform_13(%arg0: i32) -> (i32, i32) {
    %c0_i32 = arith.constant 0 : i32
    %c0_i32_0 = arith.constant 0 : i32
    %c0_i32_1 = arith.constant 0 : i32
    return %c0_i32, %c0_i32_0 : i32, i32
  }
  func.func @transform_14(%arg0: i32) -> (i32, i32) {
    %c0_i32 = arith.constant 0 : i32
    %c0_i32_0 = arith.constant 0 : i32
    %c0_i32_1 = arith.constant 0 : i32
    return %c0_i32, %c0_i32_0 : i32, i32
  }
  func.func @transform_15(%arg0: i32) -> (i32, i32) {
    %c0_i32 = arith.constant 0 : i32
    %c0_i32_0 = arith.constant 0 : i32
    %c0_i32_1 = arith.constant 0 : i32
    return %c0_i32, %c0_i32_0 : i32, i32
  }
  func.func @transform_16(%arg0: i32) -> (i32, i32) {
    %c0_i32 = arith.constant 0 : i32
    %c0_i32_0 = arith.constant 0 : i32
    %c0_i32_1 = arith.constant 0 : i32
    return %c0_i32, %c0_i32_0 : i32, i32
  }
  func.func @transform_17(%arg0: i32) -> (i32, i32) {
    %c0_i32 = arith.constant 0 : i32
    %c0_i32_0 = arith.constant 0 : i32
    %c0_i32_1 = arith.constant 0 : i32
    return %c0_i32, %c0_i32_0 : i32, i32
  }
  func.func @transform_18(%arg0: i32) -> (i32, i32) {
    %c0_i32 = arith.constant 0 : i32
    %c0_i32_0 = arith.constant 0 : i32
    %c0_i32_1 = arith.constant 0 : i32
    return %c0_i32, %c0_i32_0 : i32, i32
  }
  func.func @transform_19(%arg0: i32) -> (i32, i32) {
    %c0_i32 = arith.constant 0 : i32
    %c0_i32_0 = arith.constant 0 : i32
    %c0_i32_1 = arith.constant 0 : i32
    return %c0_i32, %c0_i32_0 : i32, i32
  }
  func.func @transform_20(%arg0: i32) -> (i32, i32) {
    %c0_i32 = arith.constant 0 : i32
    %c0_i32_0 = arith.constant 0 : i32
    %c0_i32_1 = arith.constant 0 : i32
    return %c0_i32, %c0_i32_0 : i32, i32
  }
  func.func @transform_21(%arg0: i32) -> (i32, i32) {
    %c0_i32 = arith.constant 0 : i32
    %c0_i32_0 = arith.constant 0 : i32
    %c0_i32_1 = arith.constant 0 : i32
    return %c0_i32, %c0_i32_0 : i32, i32
  }
  func.func @transform_22(%arg0: i32) -> (i32, i32) {
    %c0_i32 = arith.constant 0 : i32
    %c0_i32_0 = arith.constant 0 : i32
    %c0_i32_1 = arith.constant 0 : i32
    return %c0_i32, %c0_i32_0 : i32, i32
  }
  func.func @transform_23(%arg0: i32) -> (i32, i32) {
    %c0_i32 = arith.constant 0 : i32
    %c0_i32_0 = arith.constant 0 : i32
    %c0_i32_1 = arith.constant 0 : i32
    return %c0_i32, %c0_i32_0 : i32, i32
  }
  func.func @transform_24(%arg0: i32) -> (i32, i32) {
    %c0_i32 = arith.constant 0 : i32
    %c0_i32_0 = arith.constant 0 : i32
    %c0_i32_1 = arith.constant 0 : i32
    return %c0_i32, %c0_i32_0 : i32, i32
  }
  func.func @transform_25(%arg0: i32) -> (i32, i32) {
    %c0_i32 = arith.constant 0 : i32
    %c0_i32_0 = arith.constant 0 : i32
    %c0_i32_1 = arith.constant 0 : i32
    return %c0_i32, %c0_i32_0 : i32, i32
  }
  func.func @transform_26(%arg0: i32) -> (i32, i32) {
    %c0_i32 = arith.constant 0 : i32
    %c0_i32_0 = arith.constant 0 : i32
    %c0_i32_1 = arith.constant 0 : i32
    return %c0_i32, %c0_i32_0 : i32, i32
  }
  func.func @transform_27(%arg0: i32) -> (i32, i32) {
    %c0_i32 = arith.constant 0 : i32
    %c0_i32_0 = arith.constant 0 : i32
    %c0_i32_1 = arith.constant 0 : i32
    return %c0_i32, %c0_i32_0 : i32, i32
  }
  func.func @transform_28(%arg0: i32) -> (i32, i32) {
    %c0_i32 = arith.constant 0 : i32
    %c0_i32_0 = arith.constant 0 : i32
    %c0_i32_1 = arith.constant 0 : i32
    return %c0_i32, %c0_i32_0 : i32, i32
  }
  func.func @transform_29(%arg0: i32) -> (i32, i32) {
    %c0_i32 = arith.constant 0 : i32
    %c0_i32_0 = arith.constant 0 : i32
    %c0_i32_1 = arith.constant 0 : i32
    return %c0_i32, %c0_i32_0 : i32, i32
  }
  func.func @transform_30(%arg0: i32) -> (i32, i32) {
    %c0_i32 = arith.constant 0 : i32
    %c0_i32_0 = arith.constant 0 : i32
    %c0_i32_1 = arith.constant 0 : i32
    return %c0_i32, %c0_i32_0 : i32, i32
  }
  func.func @transform_31(%arg0: i32) -> (i32, i32) {
    %c0_i32 = arith.constant 0 : i32
    %c0_i32_0 = arith.constant 0 : i32
    %c0_i32_1 = arith.constant 0 : i32
    return %c0_i32, %c0_i32_0 : i32, i32
  }
  func.func @transform_32(%arg0: i32) -> (i32, i32) {
    %c0_i32 = arith.constant 0 : i32
    %c0_i32_0 = arith.constant 0 : i32
    %c0_i32_1 = arith.constant 0 : i32
    return %c0_i32, %c0_i32_0 : i32, i32
  }
  func.func @transform_33(%arg0: i32) -> (i32, i32) {
    %c0_i32 = arith.constant 0 : i32
    %c0_i32_0 = arith.constant 0 : i32
    %c0_i32_1 = arith.constant 0 : i32
    return %c0_i32, %c0_i32_0 : i32, i32
  }
  func.func @transform_34(%arg0: i32) -> (i32, i32) {
    %c0_i32 = arith.constant 0 : i32
    %c0_i32_0 = arith.constant 0 : i32
    %c0_i32_1 = arith.constant 0 : i32
    return %c0_i32, %c0_i32_0 : i32, i32
  }
  func.func @transform_35(%arg0: i32) -> (i32, i32) {
    %c0_i32 = arith.constant 0 : i32
    %c0_i32_0 = arith.constant 0 : i32
    %c0_i32_1 = arith.constant 0 : i32
    return %c0_i32, %c0_i32_0 : i32, i32
  }
  func.func @transform_36(%arg0: i32) -> (i32, i32, i32) {
    %c0_i32 = arith.constant 0 : i32
    %c0_i32_0 = arith.constant 0 : i32
    %c0_i32_1 = arith.constant 0 : i32
    return %arg0, %c0_i32, %c0_i32_0 : i32, i32, i32
  }
}

module attributes {stable_mosaic.version = 11 : i64} {
  func.func @_decode_kernel(%arg0: i32, %arg1: memref<1x16x4xf32, #tpu.memory_space<vmem>>, %arg2: memref<1x9x64xf32, #tpu.memory_space<vmem>>, %arg3: memref<4x64xf32, #tpu.memory_space<vmem>>, %arg4: memref<4x64xf32, #tpu.memory_space<vmem>>, %arg5: memref<1x64xf32, #tpu.memory_space<vmem>>, %arg6: memref<64x64xf32, #tpu.memory_space<vmem>>, %arg7: memref<1x64xf32, #tpu.memory_space<vmem>>, %arg8: memref<1x64xf32, #tpu.memory_space<vmem>>, %arg9: memref<1x64xf32, #tpu.memory_space<vmem>>, %arg10: memref<1x64xf32, #tpu.memory_space<vmem>>, %arg11: memref<1x64xf32, #tpu.memory_space<vmem>>, %arg12: memref<64x64xf32, #tpu.memory_space<vmem>>, %arg13: memref<1x64xf32, #tpu.memory_space<vmem>>, %arg14: memref<64x128xf32, #tpu.memory_space<vmem>>, %arg15: memref<1x128xf32, #tpu.memory_space<vmem>>, %arg16: memref<64x64xf32, #tpu.memory_space<vmem>>, %arg17: memref<1x64xf32, #tpu.memory_space<vmem>>, %arg18: memref<1x64xf32, #tpu.memory_space<vmem>>, %arg19: memref<1x64xf32, #tpu.memory_space<vmem>>, %arg20: memref<64x256xf32, #tpu.memory_space<vmem>>, %arg21: memref<1x256xf32, #tpu.memory_space<vmem>>, %arg22: memref<256x64xf32, #tpu.memory_space<vmem>>, %arg23: memref<1x64xf32, #tpu.memory_space<vmem>>, %arg24: memref<1x64xf32, #tpu.memory_space<vmem>>, %arg25: memref<1x64xf32, #tpu.memory_space<vmem>>, %arg26: memref<1x64xf32, #tpu.memory_space<vmem>>, %arg27: memref<1x64xf32, #tpu.memory_space<vmem>>, %arg28: memref<64x64xf32, #tpu.memory_space<vmem>>, %arg29: memref<1x64xf32, #tpu.memory_space<vmem>>, %arg30: memref<64x128xf32, #tpu.memory_space<vmem>>, %arg31: memref<1x128xf32, #tpu.memory_space<vmem>>, %arg32: memref<64x64xf32, #tpu.memory_space<vmem>>, %arg33: memref<1x64xf32, #tpu.memory_space<vmem>>, %arg34: memref<1x64xf32, #tpu.memory_space<vmem>>, %arg35: memref<1x64xf32, #tpu.memory_space<vmem>>, %arg36: memref<64x256xf32, #tpu.memory_space<vmem>>, %arg37: memref<1x256xf32, #tpu.memory_space<vmem>>, %arg38: memref<256x64xf32, #tpu.memory_space<vmem>>, %arg39: memref<1x64xf32, #tpu.memory_space<vmem>>, %arg40: memref<64x64xf32, #tpu.memory_space<vmem>>, %arg41: memref<1x64xf32, #tpu.memory_space<vmem>>, %arg42: memref<64x16xf32, #tpu.memory_space<vmem>>, %arg43: memref<1x16xf32, #tpu.memory_space<vmem>>, %arg44: memref<16x4xf32, #tpu.memory_space<vmem>>, %arg45: memref<1x4xf32, #tpu.memory_space<vmem>>, %arg46: memref<4x3xf32, #tpu.memory_space<vmem>>, %arg47: memref<1x3xf32, #tpu.memory_space<vmem>>, %arg48: memref<1x16x4xf32, #tpu.memory_space<vmem>>, %arg49: memref<1x4x3xf32, #tpu.memory_space<vmem>>) attributes {dimension_semantics = [#tpu.dimension_semantics<parallel>], iteration_bounds = array<i64: 2>, scalar_prefetch = 0 : i64, scratch_operands = 0 : i64, tpu.core_type = #tpu.core_type<tc>, window_params = [{transform_indices = @transform_0, window_bounds = array<i64: 1, 16, 4>}, {transform_indices = @transform_1, window_bounds = array<i64: 1, 9, 64>}, {pipeline_mode = #tpu.pipeline_mode<synchronous>, transform_indices = @transform_2, window_bounds = array<i64: 4, 64>}, {pipeline_mode = #tpu.pipeline_mode<synchronous>, transform_indices = @transform_3, window_bounds = array<i64: 4, 64>}, {pipeline_mode = #tpu.pipeline_mode<synchronous>, transform_indices = @transform_4, window_bounds = array<i64: 1, 64>}, {pipeline_mode = #tpu.pipeline_mode<synchronous>, transform_indices = @transform_5, window_bounds = array<i64: 64, 64>}, {pipeline_mode = #tpu.pipeline_mode<synchronous>, transform_indices = @transform_6, window_bounds = array<i64: 1, 64>}, {pipeline_mode = #tpu.pipeline_mode<synchronous>, transform_indices = @transform_7, window_bounds = array<i64: 1, 64>}, {pipeline_mode = #tpu.pipeline_mode<synchronous>, transform_indices = @transform_8, window_bounds = array<i64: 1, 64>}, {pipeline_mode = #tpu.pipeline_mode<synchronous>, transform_indices = @transform_9, window_bounds = array<i64: 1, 64>}, {pipeline_mode = #tpu.pipeline_mode<synchronous>, transform_indices = @transform_10, window_bounds = array<i64: 1, 64>}, {pipeline_mode = #tpu.pipeline_mode<synchronous>, transform_indices = @transform_11, window_bounds = array<i64: 64, 64>}, {pipeline_mode = #tpu.pipeline_mode<synchronous>, transform_indices = @transform_12, window_bounds = array<i64: 1, 64>}, {pipeline_mode = #tpu.pipeline_mode<synchronous>, transform_indices = @transform_13, window_bounds = array<i64: 64, 128>}, {pipeline_mode = #tpu.pipeline_mode<synchronous>, transform_indices = @transform_14, window_bounds = array<i64: 1, 128>}, {pipeline_mode = #tpu.pipeline_mode<synchronous>, transform_indices = @transform_15, window_bounds = array<i64: 64, 64>}, {pipeline_mode = #tpu.pipeline_mode<synchronous>, transform_indices = @transform_16, window_bounds = array<i64: 1, 64>}, {pipeline_mode = #tpu.pipeline_mode<synchronous>, transform_indices = @transform_17, window_bounds = array<i64: 1, 64>}, {pipeline_mode = #tpu.pipeline_mode<synchronous>, transform_indices = @transform_18, window_bounds = array<i64: 1, 64>}, {pipeline_mode = #tpu.pipeline_mode<synchronous>, transform_indices = @transform_19, window_bounds = array<i64: 64, 256>}, {pipeline_mode = #tpu.pipeline_mode<synchronous>, transform_indices = @transform_20, window_bounds = array<i64: 1, 256>}, {pipeline_mode = #tpu.pipeline_mode<synchronous>, transform_indices = @transform_21, window_bounds = array<i64: 256, 64>}, {pipeline_mode = #tpu.pipeline_mode<synchronous>, transform_indices = @transform_22, window_bounds = array<i64: 1, 64>}, {pipeline_mode = #tpu.pipeline_mode<synchronous>, transform_indices = @transform_23, window_bounds = array<i64: 1, 64>}, {pipeline_mode = #tpu.pipeline_mode<synchronous>, transform_indices = @transform_24, window_bounds = array<i64: 1, 64>}, {pipeline_mode = #tpu.pipeline_mode<synchronous>, transform_indices = @transform_25, window_bounds = array<i64: 1, 64>}, {pipeline_mode = #tpu.pipeline_mode<synchronous>, transform_indices = @transform_26, window_bounds = array<i64: 1, 64>}, {pipeline_mode = #tpu.pipeline_mode<synchronous>, transform_indices = @transform_27, window_bounds = array<i64: 64, 64>}, {pipeline_mode = #tpu.pipeline_mode<synchronous>, transform_indices = @transform_28, window_bounds = array<i64: 1, 64>}, {pipeline_mode = #tpu.pipeline_mode<synchronous>, transform_indices = @transform_29, window_bounds = array<i64: 64, 128>}, {pipeline_mode = #tpu.pipeline_mode<synchronous>, transform_indices = @transform_30, window_bounds = array<i64: 1, 128>}, {pipeline_mode = #tpu.pipeline_mode<synchronous>, transform_indices = @transform_31, window_bounds = array<i64: 64, 64>}, {pipeline_mode = #tpu.pipeline_mode<synchronous>, transform_indices = @transform_32, window_bounds = array<i64: 1, 64>}, {pipeline_mode = #tpu.pipeline_mode<synchronous>, transform_indices = @transform_33, window_bounds = array<i64: 1, 64>}, {pipeline_mode = #tpu.pipeline_mode<synchronous>, transform_indices = @transform_34, window_bounds = array<i64: 1, 64>}, {pipeline_mode = #tpu.pipeline_mode<synchronous>, transform_indices = @transform_35, window_bounds = array<i64: 64, 256>}, {pipeline_mode = #tpu.pipeline_mode<synchronous>, transform_indices = @transform_36, window_bounds = array<i64: 1, 256>}, {pipeline_mode = #tpu.pipeline_mode<synchronous>, transform_indices = @transform_37, window_bounds = array<i64: 256, 64>}, {pipeline_mode = #tpu.pipeline_mode<synchronous>, transform_indices = @transform_38, window_bounds = array<i64: 1, 64>}, {pipeline_mode = #tpu.pipeline_mode<synchronous>, transform_indices = @transform_39, window_bounds = array<i64: 64, 64>}, {pipeline_mode = #tpu.pipeline_mode<synchronous>, transform_indices = @transform_40, window_bounds = array<i64: 1, 64>}, {pipeline_mode = #tpu.pipeline_mode<synchronous>, transform_indices = @transform_41, window_bounds = array<i64: 64, 16>}, {pipeline_mode = #tpu.pipeline_mode<synchronous>, transform_indices = @transform_42, window_bounds = array<i64: 1, 16>}, {pipeline_mode = #tpu.pipeline_mode<synchronous>, transform_indices = @transform_43, window_bounds = array<i64: 16, 4>}, {pipeline_mode = #tpu.pipeline_mode<synchronous>, transform_indices = @transform_44, window_bounds = array<i64: 1, 4>}, {pipeline_mode = #tpu.pipeline_mode<synchronous>, transform_indices = @transform_45, window_bounds = array<i64: 4, 3>}, {pipeline_mode = #tpu.pipeline_mode<synchronous>, transform_indices = @transform_46, window_bounds = array<i64: 1, 3>}, {transform_indices = @transform_47, window_bounds = array<i64: 1, 16, 4>}, {transform_indices = @transform_48, window_bounds = array<i64: 1, 4, 3>}]} {
    %c0 = arith.constant 0 : index
    %c0_0 = arith.constant 0 : index
    %0 = vector.load %arg4[%c0, %c0_0] : memref<4x64xf32, #tpu.memory_space<vmem>>, vector<4x64xf32>
    %c0_1 = arith.constant 0 : index
    %c0_2 = arith.constant 0 : index
    %1 = vector.load %arg5[%c0_1, %c0_2] : memref<1x64xf32, #tpu.memory_space<vmem>>, vector<1x64xf32>
    %c0_3 = arith.constant 0 : index
    %c0_4 = arith.constant 0 : index
    %2 = vector.load %arg6[%c0_3, %c0_4] : memref<64x64xf32, #tpu.memory_space<vmem>>, vector<64x64xf32>
    %c0_5 = arith.constant 0 : index
    %c0_6 = arith.constant 0 : index
    %3 = vector.load %arg7[%c0_5, %c0_6] : memref<1x64xf32, #tpu.memory_space<vmem>>, vector<1x64xf32>
    %c0_7 = arith.constant 0 : index
    %c0_8 = arith.constant 0 : index
    %4 = vector.load %arg8[%c0_7, %c0_8] : memref<1x64xf32, #tpu.memory_space<vmem>>, vector<1x64xf32>
    %c0_9 = arith.constant 0 : index
    %c0_10 = arith.constant 0 : index
    %5 = vector.load %arg9[%c0_9, %c0_10] : memref<1x64xf32, #tpu.memory_space<vmem>>, vector<1x64xf32>
    %c0_11 = arith.constant 0 : index
    %c0_12 = arith.constant 0 : index
    %6 = vector.load %arg10[%c0_11, %c0_12] : memref<1x64xf32, #tpu.memory_space<vmem>>, vector<1x64xf32>
    %c0_13 = arith.constant 0 : index
    %c0_14 = arith.constant 0 : index
    %7 = vector.load %arg11[%c0_13, %c0_14] : memref<1x64xf32, #tpu.memory_space<vmem>>, vector<1x64xf32>
    %c0_15 = arith.constant 0 : index
    %c0_16 = arith.constant 0 : index
    %8 = vector.load %arg12[%c0_15, %c0_16] : memref<64x64xf32, #tpu.memory_space<vmem>>, vector<64x64xf32>
    %c0_17 = arith.constant 0 : index
    %c0_18 = arith.constant 0 : index
    %9 = vector.load %arg13[%c0_17, %c0_18] : memref<1x64xf32, #tpu.memory_space<vmem>>, vector<1x64xf32>
    %c0_19 = arith.constant 0 : index
    %c0_20 = arith.constant 0 : index
    %10 = vector.load %arg14[%c0_19, %c0_20] : memref<64x128xf32, #tpu.memory_space<vmem>>, vector<64x128xf32>
    %c0_21 = arith.constant 0 : index
    %c0_22 = arith.constant 0 : index
    %11 = vector.load %arg15[%c0_21, %c0_22] : memref<1x128xf32, #tpu.memory_space<vmem>>, vector<1x128xf32>
    %c0_23 = arith.constant 0 : index
    %c0_24 = arith.constant 0 : index
    %12 = vector.load %arg16[%c0_23, %c0_24] : memref<64x64xf32, #tpu.memory_space<vmem>>, vector<64x64xf32>
    %c0_25 = arith.constant 0 : index
    %c0_26 = arith.constant 0 : index
    %13 = vector.load %arg17[%c0_25, %c0_26] : memref<1x64xf32, #tpu.memory_space<vmem>>, vector<1x64xf32>
    %c0_27 = arith.constant 0 : index
    %c0_28 = arith.constant 0 : index
    %14 = vector.load %arg18[%c0_27, %c0_28] : memref<1x64xf32, #tpu.memory_space<vmem>>, vector<1x64xf32>
    %c0_29 = arith.constant 0 : index
    %c0_30 = arith.constant 0 : index
    %15 = vector.load %arg19[%c0_29, %c0_30] : memref<1x64xf32, #tpu.memory_space<vmem>>, vector<1x64xf32>
    %c0_31 = arith.constant 0 : index
    %c0_32 = arith.constant 0 : index
    %16 = vector.load %arg20[%c0_31, %c0_32] : memref<64x256xf32, #tpu.memory_space<vmem>>, vector<64x256xf32>
    %c0_33 = arith.constant 0 : index
    %c0_34 = arith.constant 0 : index
    %17 = vector.load %arg21[%c0_33, %c0_34] : memref<1x256xf32, #tpu.memory_space<vmem>>, vector<1x256xf32>
    %c0_35 = arith.constant 0 : index
    %c0_36 = arith.constant 0 : index
    %18 = vector.load %arg22[%c0_35, %c0_36] : memref<256x64xf32, #tpu.memory_space<vmem>>, vector<256x64xf32>
    %c0_37 = arith.constant 0 : index
    %c0_38 = arith.constant 0 : index
    %19 = vector.load %arg23[%c0_37, %c0_38] : memref<1x64xf32, #tpu.memory_space<vmem>>, vector<1x64xf32>
    %c0_39 = arith.constant 0 : index
    %c0_40 = arith.constant 0 : index
    %20 = vector.load %arg24[%c0_39, %c0_40] : memref<1x64xf32, #tpu.memory_space<vmem>>, vector<1x64xf32>
    %c0_41 = arith.constant 0 : index
    %c0_42 = arith.constant 0 : index
    %21 = vector.load %arg25[%c0_41, %c0_42] : memref<1x64xf32, #tpu.memory_space<vmem>>, vector<1x64xf32>
    %c0_43 = arith.constant 0 : index
    %c0_44 = arith.constant 0 : index
    %22 = vector.load %arg26[%c0_43, %c0_44] : memref<1x64xf32, #tpu.memory_space<vmem>>, vector<1x64xf32>
    %c0_45 = arith.constant 0 : index
    %c0_46 = arith.constant 0 : index
    %23 = vector.load %arg27[%c0_45, %c0_46] : memref<1x64xf32, #tpu.memory_space<vmem>>, vector<1x64xf32>
    %c0_47 = arith.constant 0 : index
    %c0_48 = arith.constant 0 : index
    %24 = vector.load %arg28[%c0_47, %c0_48] : memref<64x64xf32, #tpu.memory_space<vmem>>, vector<64x64xf32>
    %c0_49 = arith.constant 0 : index
    %c0_50 = arith.constant 0 : index
    %25 = vector.load %arg29[%c0_49, %c0_50] : memref<1x64xf32, #tpu.memory_space<vmem>>, vector<1x64xf32>
    %c0_51 = arith.constant 0 : index
    %c0_52 = arith.constant 0 : index
    %26 = vector.load %arg30[%c0_51, %c0_52] : memref<64x128xf32, #tpu.memory_space<vmem>>, vector<64x128xf32>
    %c0_53 = arith.constant 0 : index
    %c0_54 = arith.constant 0 : index
    %27 = vector.load %arg31[%c0_53, %c0_54] : memref<1x128xf32, #tpu.memory_space<vmem>>, vector<1x128xf32>
    %c0_55 = arith.constant 0 : index
    %c0_56 = arith.constant 0 : index
    %28 = vector.load %arg32[%c0_55, %c0_56] : memref<64x64xf32, #tpu.memory_space<vmem>>, vector<64x64xf32>
    %c0_57 = arith.constant 0 : index
    %c0_58 = arith.constant 0 : index
    %29 = vector.load %arg33[%c0_57, %c0_58] : memref<1x64xf32, #tpu.memory_space<vmem>>, vector<1x64xf32>
    %c0_59 = arith.constant 0 : index
    %c0_60 = arith.constant 0 : index
    %30 = vector.load %arg34[%c0_59, %c0_60] : memref<1x64xf32, #tpu.memory_space<vmem>>, vector<1x64xf32>
    %c0_61 = arith.constant 0 : index
    %c0_62 = arith.constant 0 : index
    %31 = vector.load %arg35[%c0_61, %c0_62] : memref<1x64xf32, #tpu.memory_space<vmem>>, vector<1x64xf32>
    %c0_63 = arith.constant 0 : index
    %c0_64 = arith.constant 0 : index
    %32 = vector.load %arg36[%c0_63, %c0_64] : memref<64x256xf32, #tpu.memory_space<vmem>>, vector<64x256xf32>
    %c0_65 = arith.constant 0 : index
    %c0_66 = arith.constant 0 : index
    %33 = vector.load %arg37[%c0_65, %c0_66] : memref<1x256xf32, #tpu.memory_space<vmem>>, vector<1x256xf32>
    %c0_67 = arith.constant 0 : index
    %c0_68 = arith.constant 0 : index
    %34 = vector.load %arg38[%c0_67, %c0_68] : memref<256x64xf32, #tpu.memory_space<vmem>>, vector<256x64xf32>
    %c0_69 = arith.constant 0 : index
    %c0_70 = arith.constant 0 : index
    %35 = vector.load %arg39[%c0_69, %c0_70] : memref<1x64xf32, #tpu.memory_space<vmem>>, vector<1x64xf32>
    %c0_71 = arith.constant 0 : index
    %c0_72 = arith.constant 0 : index
    %36 = vector.load %arg40[%c0_71, %c0_72] : memref<64x64xf32, #tpu.memory_space<vmem>>, vector<64x64xf32>
    %c0_73 = arith.constant 0 : index
    %c0_74 = arith.constant 0 : index
    %37 = vector.load %arg41[%c0_73, %c0_74] : memref<1x64xf32, #tpu.memory_space<vmem>>, vector<1x64xf32>
    %c0_75 = arith.constant 0 : index
    %c0_76 = arith.constant 0 : index
    %38 = vector.load %arg42[%c0_75, %c0_76] : memref<64x16xf32, #tpu.memory_space<vmem>>, vector<64x16xf32>
    %c0_77 = arith.constant 0 : index
    %c0_78 = arith.constant 0 : index
    %39 = vector.load %arg43[%c0_77, %c0_78] : memref<1x16xf32, #tpu.memory_space<vmem>>, vector<1x16xf32>
    %c0_79 = arith.constant 0 : index
    %c0_80 = arith.constant 0 : index
    %40 = vector.load %arg44[%c0_79, %c0_80] : memref<16x4xf32, #tpu.memory_space<vmem>>, vector<16x4xf32>
    %c0_81 = arith.constant 0 : index
    %c0_82 = arith.constant 0 : index
    %41 = vector.load %arg45[%c0_81, %c0_82] : memref<1x4xf32, #tpu.memory_space<vmem>>, vector<1x4xf32>
    %c0_83 = arith.constant 0 : index
    %c0_84 = arith.constant 0 : index
    %42 = vector.load %arg46[%c0_83, %c0_84] : memref<4x3xf32, #tpu.memory_space<vmem>>, vector<4x3xf32>
    %c0_85 = arith.constant 0 : index
    %c0_86 = arith.constant 0 : index
    %43 = vector.load %arg47[%c0_85, %c0_86] : memref<1x3xf32, #tpu.memory_space<vmem>>, vector<1x3xf32>
    %c0_87 = arith.constant 0 : index
    %c0_88 = arith.constant 0 : index
    %c0_89 = arith.constant 0 : index
    %44 = vector.load %arg2[%c0_87, %c0_88, %c0_89] : memref<1x9x64xf32, #tpu.memory_space<vmem>>, vector<1x9x64xf32>
    %45 = vector.shape_cast %44 : vector<1x9x64xf32> to vector<9x64xf32>
    %c0_90 = arith.constant 0 : index
    %c0_91 = arith.constant 0 : index
    %46 = vector.load %arg3[%c0_90, %c0_91] : memref<4x64xf32, #tpu.memory_space<vmem>>, vector<4x64xf32>
    %cst = arith.constant dense<0.000000e+00> : vector<4xf32>
    %47 = vector.multi_reduction <add>, %46, %cst [1] : vector<4x64xf32> to vector<4xf32>
    %48 = vector.shape_cast %47 : vector<4xf32> to vector<4x1xf32>
    %cst_92 = arith.constant 6.400000e+01 : f32
    %49 = vector.broadcast %cst_92 : f32 to vector<4x1xf32>
    %50 = arith.divf %48, %49 : vector<4x1xf32>
    %51 = vector.broadcast %50 : vector<4x1xf32> to vector<4x64xf32>
    %52 = arith.subf %46, %51 : vector<4x64xf32>
    %53 = arith.mulf %52, %52 : vector<4x64xf32>
    %cst_93 = arith.constant dense<0.000000e+00> : vector<4xf32>
    %54 = vector.multi_reduction <add>, %53, %cst_93 [1] : vector<4x64xf32> to vector<4xf32>
    %55 = vector.shape_cast %54 : vector<4xf32> to vector<4x1xf32>
    %cst_94 = arith.constant 6.400000e+01 : f32
    %56 = vector.broadcast %cst_94 : f32 to vector<4x1xf32>
    %57 = arith.divf %55, %56 : vector<4x1xf32>
    %cst_95 = arith.constant 9.99999974E-6 : f32
    %58 = vector.broadcast %cst_95 : f32 to vector<4x1xf32>
    %59 = arith.addf %57, %58 : vector<4x1xf32>
    %60 = math.rsqrt %59 : vector<4x1xf32>
    %61 = vector.broadcast %60 : vector<4x1xf32> to vector<4x64xf32>
    %62 = arith.mulf %52, %61 : vector<4x64xf32>
    %63 = vector.broadcast %4 : vector<1x64xf32> to vector<4x64xf32>
    %64 = arith.mulf %62, %63 : vector<4x64xf32>
    %65 = vector.broadcast %5 : vector<1x64xf32> to vector<4x64xf32>
    %66 = arith.addf %64, %65 : vector<4x64xf32>
    %cst_96 = arith.constant dense<0.000000e+00> : vector<9xf32>
    %67 = vector.multi_reduction <add>, %45, %cst_96 [1] : vector<9x64xf32> to vector<9xf32>
    %68 = vector.shape_cast %67 : vector<9xf32> to vector<9x1xf32>
    %cst_97 = arith.constant 6.400000e+01 : f32
    %69 = vector.broadcast %cst_97 : f32 to vector<9x1xf32>
    %70 = arith.divf %68, %69 : vector<9x1xf32>
    %71 = vector.broadcast %70 : vector<9x1xf32> to vector<9x64xf32>
    %72 = arith.subf %45, %71 : vector<9x64xf32>
    %73 = arith.mulf %72, %72 : vector<9x64xf32>
    %cst_98 = arith.constant dense<0.000000e+00> : vector<9xf32>
    %74 = vector.multi_reduction <add>, %73, %cst_98 [1] : vector<9x64xf32> to vector<9xf32>
    %75 = vector.shape_cast %74 : vector<9xf32> to vector<9x1xf32>
    %cst_99 = arith.constant 6.400000e+01 : f32
    %76 = vector.broadcast %cst_99 : f32 to vector<9x1xf32>
    %77 = arith.divf %75, %76 : vector<9x1xf32>
    %cst_100 = arith.constant 9.99999974E-6 : f32
    %78 = vector.broadcast %cst_100 : f32 to vector<9x1xf32>
    %79 = arith.addf %77, %78 : vector<9x1xf32>
    %80 = math.rsqrt %79 : vector<9x1xf32>
    %81 = vector.broadcast %80 : vector<9x1xf32> to vector<9x64xf32>
    %82 = arith.mulf %72, %81 : vector<9x64xf32>
    %83 = vector.broadcast %6 : vector<1x64xf32> to vector<9x64xf32>
    %84 = arith.mulf %82, %83 : vector<9x64xf32>
    %85 = vector.broadcast %7 : vector<1x64xf32> to vector<9x64xf32>
    %86 = arith.addf %84, %85 : vector<9x64xf32>
    %cst_101 = arith.constant dense<0.000000e+00> : vector<4x64xf32>
    %87 = tpu.matmul %66, %8, %cst_101 {dimension_numbers = #tpu.dot_dimension_numbers<[1], [0], [0], [1], [0, 0, 1, 1], [], []>} : vector<4x64xf32>, vector<64x64xf32>, vector<4x64xf32> -> vector<4x64xf32>
    %88 = vector.broadcast %9 : vector<1x64xf32> to vector<4x64xf32>
    %89 = arith.addf %87, %88 : vector<4x64xf32>
    %cst_102 = arith.constant dense<0.000000e+00> : vector<9x128xf32>
    %90 = tpu.matmul %86, %10, %cst_102 {dimension_numbers = #tpu.dot_dimension_numbers<[1], [0], [0], [1], [0, 0, 1, 1], [], []>} : vector<9x64xf32>, vector<64x128xf32>, vector<9x128xf32> -> vector<9x128xf32>
    %91 = vector.broadcast %11 : vector<1x128xf32> to vector<9x128xf32>
    %92 = arith.addf %90, %91 : vector<9x128xf32>
    %93 = vector.extract_strided_slice %92 {offsets = [0, 0], sizes = [9, 64], strides = [1, 1]} : vector<9x128xf32> to vector<9x64xf32>
    %94 = vector.extract_strided_slice %92 {offsets = [0, 64], sizes = [9, 64], strides = [1, 1]} : vector<9x128xf32> to vector<9x64xf32>
    %95 = vector.extract_strided_slice %89 {offsets = [0, 0], sizes = [4, 16], strides = [1, 1]} : vector<4x64xf32> to vector<4x16xf32>
    %96 = vector.extract_strided_slice %93 {offsets = [0, 0], sizes = [9, 16], strides = [1, 1]} : vector<9x64xf32> to vector<9x16xf32>
    %cst_103 = arith.constant dense<0.000000e+00> : vector<4x9xf32>
    %97 = tpu.matmul %95, %96, %cst_103 {dimension_numbers = #tpu.dot_dimension_numbers<[1], [1], [0], [0], [0, 0, 1, 0], [], []>} : vector<4x16xf32>, vector<9x16xf32>, vector<4x9xf32> -> vector<4x9xf32>
    %98 = vector.extract_strided_slice %89 {offsets = [0, 16], sizes = [4, 16], strides = [1, 1]} : vector<4x64xf32> to vector<4x16xf32>
    %99 = vector.extract_strided_slice %93 {offsets = [0, 16], sizes = [9, 16], strides = [1, 1]} : vector<9x64xf32> to vector<9x16xf32>
    %cst_104 = arith.constant dense<0.000000e+00> : vector<4x9xf32>
    %100 = tpu.matmul %98, %99, %cst_104 {dimension_numbers = #tpu.dot_dimension_numbers<[1], [1], [0], [0], [0, 0, 1, 0], [], []>} : vector<4x16xf32>, vector<9x16xf32>, vector<4x9xf32> -> vector<4x9xf32>
    %101 = vector.extract_strided_slice %89 {offsets = [0, 32], sizes = [4, 16], strides = [1, 1]} : vector<4x64xf32> to vector<4x16xf32>
    %102 = vector.extract_strided_slice %93 {offsets = [0, 32], sizes = [9, 16], strides = [1, 1]} : vector<9x64xf32> to vector<9x16xf32>
    %cst_105 = arith.constant dense<0.000000e+00> : vector<4x9xf32>
    %103 = tpu.matmul %101, %102, %cst_105 {dimension_numbers = #tpu.dot_dimension_numbers<[1], [1], [0], [0], [0, 0, 1, 0], [], []>} : vector<4x16xf32>, vector<9x16xf32>, vector<4x9xf32> -> vector<4x9xf32>
    %104 = vector.extract_strided_slice %89 {offsets = [0, 48], sizes = [4, 16], strides = [1, 1]} : vector<4x64xf32> to vector<4x16xf32>
    %105 = vector.extract_strided_slice %93 {offsets = [0, 48], sizes = [9, 16], strides = [1, 1]} : vector<9x64xf32> to vector<9x16xf32>
    %cst_106 = arith.constant dense<0.000000e+00> : vector<4x9xf32>
    %106 = tpu.matmul %104, %105, %cst_106 {dimension_numbers = #tpu.dot_dimension_numbers<[1], [1], [0], [0], [0, 0, 1, 0], [], []>} : vector<4x16xf32>, vector<9x16xf32>, vector<4x9xf32> -> vector<4x9xf32>
    %107 = vector.shape_cast %97 : vector<4x9xf32> to vector<1x4x9xf32>
    %108 = vector.shape_cast %100 : vector<4x9xf32> to vector<1x4x9xf32>
    %109 = vector.shape_cast %103 : vector<4x9xf32> to vector<1x4x9xf32>
    %110 = vector.shape_cast %106 : vector<4x9xf32> to vector<1x4x9xf32>
    %111 = tpu.concatenate %107, %108, %109, %110 in 0 : vector<1x4x9xf32>, vector<1x4x9xf32>, vector<1x4x9xf32>, vector<1x4x9xf32> -> vector<4x4x9xf32>
    %cst_107 = arith.constant dense<0xFF800000> : vector<4x4xf32>
    %112 = vector.multi_reduction <maximumf>, %111, %cst_107 [2] : vector<4x4x9xf32> to vector<4x4xf32>
    %113 = vector.shape_cast %112 : vector<4x4xf32> to vector<4x4x1xf32>
    %114 = vector.broadcast %113 : vector<4x4x1xf32> to vector<4x4x9xf32>
    %115 = arith.subf %111, %114 : vector<4x4x9xf32>
    %116 = math.exp %115 : vector<4x4x9xf32>
    %cst_108 = arith.constant dense<0.000000e+00> : vector<4x4xf32>
    %117 = vector.multi_reduction <add>, %116, %cst_108 [2] : vector<4x4x9xf32> to vector<4x4xf32>
    %118 = vector.shape_cast %117 : vector<4x4xf32> to vector<4x4x1xf32>
    %119 = vector.broadcast %118 : vector<4x4x1xf32> to vector<4x4x9xf32>
    %120 = arith.divf %116, %119 : vector<4x4x9xf32>
    %121 = vector.extract_strided_slice %120 {offsets = [0, 0, 0], sizes = [1, 4, 9], strides = [1, 1, 1]} : vector<4x4x9xf32> to vector<1x4x9xf32>
    %122 = vector.shape_cast %121 : vector<1x4x9xf32> to vector<4x9xf32>
    %123 = vector.extract_strided_slice %94 {offsets = [0, 0], sizes = [9, 16], strides = [1, 1]} : vector<9x64xf32> to vector<9x16xf32>
    %cst_109 = arith.constant dense<0.000000e+00> : vector<4x16xf32>
    %124 = tpu.matmul %122, %123, %cst_109 {dimension_numbers = #tpu.dot_dimension_numbers<[1], [0], [0], [1], [0, 0, 1, 1], [], []>} : vector<4x9xf32>, vector<9x16xf32>, vector<4x16xf32> -> vector<4x16xf32>
    %125 = vector.extract_strided_slice %120 {offsets = [1, 0, 0], sizes = [1, 4, 9], strides = [1, 1, 1]} : vector<4x4x9xf32> to vector<1x4x9xf32>
    %126 = vector.shape_cast %125 : vector<1x4x9xf32> to vector<4x9xf32>
    %127 = vector.extract_strided_slice %94 {offsets = [0, 16], sizes = [9, 16], strides = [1, 1]} : vector<9x64xf32> to vector<9x16xf32>
    %cst_110 = arith.constant dense<0.000000e+00> : vector<4x16xf32>
    %128 = tpu.matmul %126, %127, %cst_110 {dimension_numbers = #tpu.dot_dimension_numbers<[1], [0], [0], [1], [0, 0, 1, 1], [], []>} : vector<4x9xf32>, vector<9x16xf32>, vector<4x16xf32> -> vector<4x16xf32>
    %129 = vector.extract_strided_slice %120 {offsets = [2, 0, 0], sizes = [1, 4, 9], strides = [1, 1, 1]} : vector<4x4x9xf32> to vector<1x4x9xf32>
    %130 = vector.shape_cast %129 : vector<1x4x9xf32> to vector<4x9xf32>
    %131 = vector.extract_strided_slice %94 {offsets = [0, 32], sizes = [9, 16], strides = [1, 1]} : vector<9x64xf32> to vector<9x16xf32>
    %cst_111 = arith.constant dense<0.000000e+00> : vector<4x16xf32>
    %132 = tpu.matmul %130, %131, %cst_111 {dimension_numbers = #tpu.dot_dimension_numbers<[1], [0], [0], [1], [0, 0, 1, 1], [], []>} : vector<4x9xf32>, vector<9x16xf32>, vector<4x16xf32> -> vector<4x16xf32>
    %133 = vector.extract_strided_slice %120 {offsets = [3, 0, 0], sizes = [1, 4, 9], strides = [1, 1, 1]} : vector<4x4x9xf32> to vector<1x4x9xf32>
    %134 = vector.shape_cast %133 : vector<1x4x9xf32> to vector<4x9xf32>
    %135 = vector.extract_strided_slice %94 {offsets = [0, 48], sizes = [9, 16], strides = [1, 1]} : vector<9x64xf32> to vector<9x16xf32>
    %cst_112 = arith.constant dense<0.000000e+00> : vector<4x16xf32>
    %136 = tpu.matmul %134, %135, %cst_112 {dimension_numbers = #tpu.dot_dimension_numbers<[1], [0], [0], [1], [0, 0, 1, 1], [], []>} : vector<4x9xf32>, vector<9x16xf32>, vector<4x16xf32> -> vector<4x16xf32>
    %137 = tpu.concatenate %124, %128, %132, %136 in 1 : vector<4x16xf32>, vector<4x16xf32>, vector<4x16xf32>, vector<4x16xf32> -> vector<4x64xf32>
    %cst_113 = arith.constant dense<0.000000e+00> : vector<4x64xf32>
    %138 = tpu.matmul %137, %12, %cst_113 {dimension_numbers = #tpu.dot_dimension_numbers<[1], [0], [0], [1], [0, 0, 1, 1], [], []>} : vector<4x64xf32>, vector<64x64xf32>, vector<4x64xf32> -> vector<4x64xf32>
    %139 = vector.broadcast %13 : vector<1x64xf32> to vector<4x64xf32>
    %140 = arith.addf %138, %139 : vector<4x64xf32>
    %141 = arith.addf %46, %140 : vector<4x64xf32>
    %cst_114 = arith.constant dense<0.000000e+00> : vector<4xf32>
    %142 = vector.multi_reduction <add>, %141, %cst_114 [1] : vector<4x64xf32> to vector<4xf32>
    %143 = vector.shape_cast %142 : vector<4xf32> to vector<4x1xf32>
    %cst_115 = arith.constant 6.400000e+01 : f32
    %144 = vector.broadcast %cst_115 : f32 to vector<4x1xf32>
    %145 = arith.divf %143, %144 : vector<4x1xf32>
    %146 = vector.broadcast %145 : vector<4x1xf32> to vector<4x64xf32>
    %147 = arith.subf %141, %146 : vector<4x64xf32>
    %148 = arith.mulf %147, %147 : vector<4x64xf32>
    %cst_116 = arith.constant dense<0.000000e+00> : vector<4xf32>
    %149 = vector.multi_reduction <add>, %148, %cst_116 [1] : vector<4x64xf32> to vector<4xf32>
    %150 = vector.shape_cast %149 : vector<4xf32> to vector<4x1xf32>
    %cst_117 = arith.constant 6.400000e+01 : f32
    %151 = vector.broadcast %cst_117 : f32 to vector<4x1xf32>
    %152 = arith.divf %150, %151 : vector<4x1xf32>
    %cst_118 = arith.constant 9.99999974E-6 : f32
    %153 = vector.broadcast %cst_118 : f32 to vector<4x1xf32>
    %154 = arith.addf %152, %153 : vector<4x1xf32>
    %155 = math.rsqrt %154 : vector<4x1xf32>
    %156 = vector.broadcast %155 : vector<4x1xf32> to vector<4x64xf32>
    %157 = arith.mulf %147, %156 : vector<4x64xf32>
    %158 = vector.broadcast %14 : vector<1x64xf32> to vector<4x64xf32>
    %159 = arith.mulf %157, %158 : vector<4x64xf32>
    %160 = vector.broadcast %15 : vector<1x64xf32> to vector<4x64xf32>
    %161 = arith.addf %159, %160 : vector<4x64xf32>
    %cst_119 = arith.constant dense<0.000000e+00> : vector<4x256xf32>
    %162 = tpu.matmul %161, %16, %cst_119 {dimension_numbers = #tpu.dot_dimension_numbers<[1], [0], [0], [1], [0, 0, 1, 1], [], []>} : vector<4x64xf32>, vector<64x256xf32>, vector<4x256xf32> -> vector<4x256xf32>
    %163 = vector.broadcast %17 : vector<1x256xf32> to vector<4x256xf32>
    %164 = arith.addf %162, %163 : vector<4x256xf32>
    %cst_120 = arith.constant 0.000000e+00 : f32
    %165 = vector.broadcast %cst_120 : f32 to vector<4x256xf32>
    %166 = arith.maximumf %164, %165 : vector<4x256xf32>
    %cst_121 = arith.constant dense<0.000000e+00> : vector<4x64xf32>
    %167 = tpu.matmul %166, %18, %cst_121 {dimension_numbers = #tpu.dot_dimension_numbers<[1], [0], [0], [1], [0, 0, 1, 1], [], []>} : vector<4x256xf32>, vector<256x64xf32>, vector<4x64xf32> -> vector<4x64xf32>
    %168 = arith.addf %141, %167 : vector<4x64xf32>
    %169 = vector.broadcast %19 : vector<1x64xf32> to vector<4x64xf32>
    %170 = arith.addf %168, %169 : vector<4x64xf32>
    %cst_122 = arith.constant dense<0.000000e+00> : vector<4x64xf32>
    %171 = tpu.matmul %170, %36, %cst_122 {dimension_numbers = #tpu.dot_dimension_numbers<[1], [0], [0], [1], [0, 0, 1, 1], [], []>} : vector<4x64xf32>, vector<64x64xf32>, vector<4x64xf32> -> vector<4x64xf32>
    %172 = vector.broadcast %37 : vector<1x64xf32> to vector<4x64xf32>
    %173 = arith.addf %171, %172 : vector<4x64xf32>
    %cst_123 = arith.constant dense<0.000000e+00> : vector<4x16xf32>
    %174 = tpu.matmul %173, %38, %cst_123 {dimension_numbers = #tpu.dot_dimension_numbers<[1], [0], [0], [1], [0, 0, 1, 1], [], []>} : vector<4x64xf32>, vector<64x16xf32>, vector<4x16xf32> -> vector<4x16xf32>
    %175 = vector.broadcast %39 : vector<1x16xf32> to vector<4x16xf32>
    %176 = arith.addf %174, %175 : vector<4x16xf32>
    %cst_124 = arith.constant 0.000000e+00 : f32
    %177 = vector.broadcast %cst_124 : f32 to vector<4x16xf32>
    %178 = arith.maximumf %176, %177 : vector<4x16xf32>
    %cst_125 = arith.constant dense<0.000000e+00> : vector<4x4xf32>
    %179 = tpu.matmul %178, %40, %cst_125 {dimension_numbers = #tpu.dot_dimension_numbers<[1], [0], [0], [1], [0, 0, 1, 1], [], []>} : vector<4x16xf32>, vector<16x4xf32>, vector<4x4xf32> -> vector<4x4xf32>
    %180 = vector.broadcast %41 : vector<1x4xf32> to vector<4x4xf32>
    %181 = arith.addf %179, %180 : vector<4x4xf32>
    %cst_126 = arith.constant 0.000000e+00 : f32
    %182 = vector.broadcast %cst_126 : f32 to vector<4x4xf32>
    %183 = arith.maximumf %181, %182 : vector<4x4xf32>
    %cst_127 = arith.constant dense<0.000000e+00> : vector<4x3xf32>
    %184 = tpu.matmul %183, %42, %cst_127 {dimension_numbers = #tpu.dot_dimension_numbers<[1], [0], [0], [1], [0, 0, 1, 1], [], []>} : vector<4x4xf32>, vector<4x3xf32>, vector<4x3xf32> -> vector<4x3xf32>
    %185 = vector.broadcast %43 : vector<1x3xf32> to vector<4x3xf32>
    %186 = arith.addf %184, %185 : vector<4x3xf32>
    %c0_128 = arith.constant 0 : index
    %c0_129 = arith.constant 0 : index
    %c0_130 = arith.constant 0 : index
    %187 = vector.load %arg1[%c0_128, %c0_129, %c0_130] : memref<1x16x4xf32, #tpu.memory_space<vmem>>, vector<1x16x4xf32>
    %188 = vector.shape_cast %187 : vector<1x16x4xf32> to vector<16x4xf32>
    %cst_131 = arith.constant dense<0.000000e+00> : vector<16x64xf32>
    %189 = tpu.matmul %188, %0, %cst_131 {dimension_numbers = #tpu.dot_dimension_numbers<[1], [0], [0], [1], [0, 0, 1, 1], [], []>} : vector<16x4xf32>, vector<4x64xf32>, vector<16x64xf32> -> vector<16x64xf32>
    %190 = vector.broadcast %1 : vector<1x64xf32> to vector<16x64xf32>
    %191 = arith.addf %189, %190 : vector<16x64xf32>
    %cst_132 = arith.constant 0.000000e+00 : f32
    %192 = vector.broadcast %cst_132 : f32 to vector<16x64xf32>
    %193 = arith.maximumf %191, %192 : vector<16x64xf32>
    %cst_133 = arith.constant dense<0.000000e+00> : vector<16x64xf32>
    %194 = tpu.matmul %193, %2, %cst_133 {dimension_numbers = #tpu.dot_dimension_numbers<[1], [0], [0], [1], [0, 0, 1, 1], [], []>} : vector<16x64xf32>, vector<64x64xf32>, vector<16x64xf32> -> vector<16x64xf32>
    %195 = vector.broadcast %3 : vector<1x64xf32> to vector<16x64xf32>
    %196 = arith.addf %194, %195 : vector<16x64xf32>
    %cst_134 = arith.constant dense<0.000000e+00> : vector<16xf32>
    %197 = vector.multi_reduction <add>, %196, %cst_134 [1] : vector<16x64xf32> to vector<16xf32>
    %198 = vector.shape_cast %197 : vector<16xf32> to vector<16x1xf32>
    %cst_135 = arith.constant 6.400000e+01 : f32
    %199 = vector.broadcast %cst_135 : f32 to vector<16x1xf32>
    %200 = arith.divf %198, %199 : vector<16x1xf32>
    %201 = vector.broadcast %200 : vector<16x1xf32> to vector<16x64xf32>
    %202 = arith.subf %196, %201 : vector<16x64xf32>
    %203 = arith.mulf %202, %202 : vector<16x64xf32>
    %cst_136 = arith.constant dense<0.000000e+00> : vector<16xf32>
    %204 = vector.multi_reduction <add>, %203, %cst_136 [1] : vector<16x64xf32> to vector<16xf32>
    %205 = vector.shape_cast %204 : vector<16xf32> to vector<16x1xf32>
    %cst_137 = arith.constant 6.400000e+01 : f32
    %206 = vector.broadcast %cst_137 : f32 to vector<16x1xf32>
    %207 = arith.divf %205, %206 : vector<16x1xf32>
    %cst_138 = arith.constant 9.99999974E-6 : f32
    %208 = vector.broadcast %cst_138 : f32 to vector<16x1xf32>
    %209 = arith.addf %207, %208 : vector<16x1xf32>
    %210 = math.rsqrt %209 : vector<16x1xf32>
    %211 = vector.broadcast %210 : vector<16x1xf32> to vector<16x64xf32>
    %212 = arith.mulf %202, %211 : vector<16x64xf32>
    %213 = vector.broadcast %20 : vector<1x64xf32> to vector<16x64xf32>
    %214 = arith.mulf %212, %213 : vector<16x64xf32>
    %215 = vector.broadcast %21 : vector<1x64xf32> to vector<16x64xf32>
    %216 = arith.addf %214, %215 : vector<16x64xf32>
    %cst_139 = arith.constant dense<0.000000e+00> : vector<9xf32>
    %217 = vector.multi_reduction <add>, %45, %cst_139 [1] : vector<9x64xf32> to vector<9xf32>
    %218 = vector.shape_cast %217 : vector<9xf32> to vector<9x1xf32>
    %cst_140 = arith.constant 6.400000e+01 : f32
    %219 = vector.broadcast %cst_140 : f32 to vector<9x1xf32>
    %220 = arith.divf %218, %219 : vector<9x1xf32>
    %221 = vector.broadcast %220 : vector<9x1xf32> to vector<9x64xf32>
    %222 = arith.subf %45, %221 : vector<9x64xf32>
    %223 = arith.mulf %222, %222 : vector<9x64xf32>
    %cst_141 = arith.constant dense<0.000000e+00> : vector<9xf32>
    %224 = vector.multi_reduction <add>, %223, %cst_141 [1] : vector<9x64xf32> to vector<9xf32>
    %225 = vector.shape_cast %224 : vector<9xf32> to vector<9x1xf32>
    %cst_142 = arith.constant 6.400000e+01 : f32
    %226 = vector.broadcast %cst_142 : f32 to vector<9x1xf32>
    %227 = arith.divf %225, %226 : vector<9x1xf32>
    %cst_143 = arith.constant 9.99999974E-6 : f32
    %228 = vector.broadcast %cst_143 : f32 to vector<9x1xf32>
    %229 = arith.addf %227, %228 : vector<9x1xf32>
    %230 = math.rsqrt %229 : vector<9x1xf32>
    %231 = vector.broadcast %230 : vector<9x1xf32> to vector<9x64xf32>
    %232 = arith.mulf %222, %231 : vector<9x64xf32>
    %233 = vector.broadcast %22 : vector<1x64xf32> to vector<9x64xf32>
    %234 = arith.mulf %232, %233 : vector<9x64xf32>
    %235 = vector.broadcast %23 : vector<1x64xf32> to vector<9x64xf32>
    %236 = arith.addf %234, %235 : vector<9x64xf32>
    %cst_144 = arith.constant dense<0.000000e+00> : vector<16x64xf32>
    %237 = tpu.matmul %216, %24, %cst_144 {dimension_numbers = #tpu.dot_dimension_numbers<[1], [0], [0], [1], [0, 0, 1, 1], [], []>} : vector<16x64xf32>, vector<64x64xf32>, vector<16x64xf32> -> vector<16x64xf32>
    %238 = vector.broadcast %25 : vector<1x64xf32> to vector<16x64xf32>
    %239 = arith.addf %237, %238 : vector<16x64xf32>
    %cst_145 = arith.constant dense<0.000000e+00> : vector<9x128xf32>
    %240 = tpu.matmul %236, %26, %cst_145 {dimension_numbers = #tpu.dot_dimension_numbers<[1], [0], [0], [1], [0, 0, 1, 1], [], []>} : vector<9x64xf32>, vector<64x128xf32>, vector<9x128xf32> -> vector<9x128xf32>
    %241 = vector.broadcast %27 : vector<1x128xf32> to vector<9x128xf32>
    %242 = arith.addf %240, %241 : vector<9x128xf32>
    %243 = vector.extract_strided_slice %242 {offsets = [0, 0], sizes = [9, 64], strides = [1, 1]} : vector<9x128xf32> to vector<9x64xf32>
    %244 = vector.extract_strided_slice %242 {offsets = [0, 64], sizes = [9, 64], strides = [1, 1]} : vector<9x128xf32> to vector<9x64xf32>
    %245 = vector.extract_strided_slice %239 {offsets = [0, 0], sizes = [16, 16], strides = [1, 1]} : vector<16x64xf32> to vector<16x16xf32>
    %246 = vector.extract_strided_slice %243 {offsets = [0, 0], sizes = [9, 16], strides = [1, 1]} : vector<9x64xf32> to vector<9x16xf32>
    %cst_146 = arith.constant dense<0.000000e+00> : vector<16x9xf32>
    %247 = tpu.matmul %245, %246, %cst_146 {dimension_numbers = #tpu.dot_dimension_numbers<[1], [1], [0], [0], [0, 0, 1, 0], [], []>} : vector<16x16xf32>, vector<9x16xf32>, vector<16x9xf32> -> vector<16x9xf32>
    %248 = vector.extract_strided_slice %239 {offsets = [0, 16], sizes = [16, 16], strides = [1, 1]} : vector<16x64xf32> to vector<16x16xf32>
    %249 = vector.extract_strided_slice %243 {offsets = [0, 16], sizes = [9, 16], strides = [1, 1]} : vector<9x64xf32> to vector<9x16xf32>
    %cst_147 = arith.constant dense<0.000000e+00> : vector<16x9xf32>
    %250 = tpu.matmul %248, %249, %cst_147 {dimension_numbers = #tpu.dot_dimension_numbers<[1], [1], [0], [0], [0, 0, 1, 0], [], []>} : vector<16x16xf32>, vector<9x16xf32>, vector<16x9xf32> -> vector<16x9xf32>
    %251 = vector.extract_strided_slice %239 {offsets = [0, 32], sizes = [16, 16], strides = [1, 1]} : vector<16x64xf32> to vector<16x16xf32>
    %252 = vector.extract_strided_slice %243 {offsets = [0, 32], sizes = [9, 16], strides = [1, 1]} : vector<9x64xf32> to vector<9x16xf32>
    %cst_148 = arith.constant dense<0.000000e+00> : vector<16x9xf32>
    %253 = tpu.matmul %251, %252, %cst_148 {dimension_numbers = #tpu.dot_dimension_numbers<[1], [1], [0], [0], [0, 0, 1, 0], [], []>} : vector<16x16xf32>, vector<9x16xf32>, vector<16x9xf32> -> vector<16x9xf32>
    %254 = vector.extract_strided_slice %239 {offsets = [0, 48], sizes = [16, 16], strides = [1, 1]} : vector<16x64xf32> to vector<16x16xf32>
    %255 = vector.extract_strided_slice %243 {offsets = [0, 48], sizes = [9, 16], strides = [1, 1]} : vector<9x64xf32> to vector<9x16xf32>
    %cst_149 = arith.constant dense<0.000000e+00> : vector<16x9xf32>
    %256 = tpu.matmul %254, %255, %cst_149 {dimension_numbers = #tpu.dot_dimension_numbers<[1], [1], [0], [0], [0, 0, 1, 0], [], []>} : vector<16x16xf32>, vector<9x16xf32>, vector<16x9xf32> -> vector<16x9xf32>
    %257 = vector.shape_cast %247 : vector<16x9xf32> to vector<1x16x9xf32>
    %258 = vector.shape_cast %250 : vector<16x9xf32> to vector<1x16x9xf32>
    %259 = vector.shape_cast %253 : vector<16x9xf32> to vector<1x16x9xf32>
    %260 = vector.shape_cast %256 : vector<16x9xf32> to vector<1x16x9xf32>
    %261 = tpu.concatenate %257, %258, %259, %260 in 0 : vector<1x16x9xf32>, vector<1x16x9xf32>, vector<1x16x9xf32>, vector<1x16x9xf32> -> vector<4x16x9xf32>
    %cst_150 = arith.constant dense<0xFF800000> : vector<4x16xf32>
    %262 = vector.multi_reduction <maximumf>, %261, %cst_150 [2] : vector<4x16x9xf32> to vector<4x16xf32>
    %263 = vector.shape_cast %262 : vector<4x16xf32> to vector<4x16x1xf32>
    %264 = vector.broadcast %263 : vector<4x16x1xf32> to vector<4x16x9xf32>
    %265 = arith.subf %261, %264 : vector<4x16x9xf32>
    %266 = math.exp %265 : vector<4x16x9xf32>
    %cst_151 = arith.constant dense<0.000000e+00> : vector<4x16xf32>
    %267 = vector.multi_reduction <add>, %266, %cst_151 [2] : vector<4x16x9xf32> to vector<4x16xf32>
    %268 = vector.shape_cast %267 : vector<4x16xf32> to vector<4x16x1xf32>
    %269 = vector.broadcast %268 : vector<4x16x1xf32> to vector<4x16x9xf32>
    %270 = arith.divf %266, %269 : vector<4x16x9xf32>
    %271 = vector.extract_strided_slice %270 {offsets = [0, 0, 0], sizes = [1, 16, 9], strides = [1, 1, 1]} : vector<4x16x9xf32> to vector<1x16x9xf32>
    %272 = vector.shape_cast %271 : vector<1x16x9xf32> to vector<16x9xf32>
    %273 = vector.extract_strided_slice %244 {offsets = [0, 0], sizes = [9, 16], strides = [1, 1]} : vector<9x64xf32> to vector<9x16xf32>
    %cst_152 = arith.constant dense<0.000000e+00> : vector<16x16xf32>
    %274 = tpu.matmul %272, %273, %cst_152 {dimension_numbers = #tpu.dot_dimension_numbers<[1], [0], [0], [1], [0, 0, 1, 1], [], []>} : vector<16x9xf32>, vector<9x16xf32>, vector<16x16xf32> -> vector<16x16xf32>
    %275 = vector.extract_strided_slice %270 {offsets = [1, 0, 0], sizes = [1, 16, 9], strides = [1, 1, 1]} : vector<4x16x9xf32> to vector<1x16x9xf32>
    %276 = vector.shape_cast %275 : vector<1x16x9xf32> to vector<16x9xf32>
    %277 = vector.extract_strided_slice %244 {offsets = [0, 16], sizes = [9, 16], strides = [1, 1]} : vector<9x64xf32> to vector<9x16xf32>
    %cst_153 = arith.constant dense<0.000000e+00> : vector<16x16xf32>
    %278 = tpu.matmul %276, %277, %cst_153 {dimension_numbers = #tpu.dot_dimension_numbers<[1], [0], [0], [1], [0, 0, 1, 1], [], []>} : vector<16x9xf32>, vector<9x16xf32>, vector<16x16xf32> -> vector<16x16xf32>
    %279 = vector.extract_strided_slice %270 {offsets = [2, 0, 0], sizes = [1, 16, 9], strides = [1, 1, 1]} : vector<4x16x9xf32> to vector<1x16x9xf32>
    %280 = vector.shape_cast %279 : vector<1x16x9xf32> to vector<16x9xf32>
    %281 = vector.extract_strided_slice %244 {offsets = [0, 32], sizes = [9, 16], strides = [1, 1]} : vector<9x64xf32> to vector<9x16xf32>
    %cst_154 = arith.constant dense<0.000000e+00> : vector<16x16xf32>
    %282 = tpu.matmul %280, %281, %cst_154 {dimension_numbers = #tpu.dot_dimension_numbers<[1], [0], [0], [1], [0, 0, 1, 1], [], []>} : vector<16x9xf32>, vector<9x16xf32>, vector<16x16xf32> -> vector<16x16xf32>
    %283 = vector.extract_strided_slice %270 {offsets = [3, 0, 0], sizes = [1, 16, 9], strides = [1, 1, 1]} : vector<4x16x9xf32> to vector<1x16x9xf32>
    %284 = vector.shape_cast %283 : vector<1x16x9xf32> to vector<16x9xf32>
    %285 = vector.extract_strided_slice %244 {offsets = [0, 48], sizes = [9, 16], strides = [1, 1]} : vector<9x64xf32> to vector<9x16xf32>
    %cst_155 = arith.constant dense<0.000000e+00> : vector<16x16xf32>
    %286 = tpu.matmul %284, %285, %cst_155 {dimension_numbers = #tpu.dot_dimension_numbers<[1], [0], [0], [1], [0, 0, 1, 1], [], []>} : vector<16x9xf32>, vector<9x16xf32>, vector<16x16xf32> -> vector<16x16xf32>
    %287 = tpu.concatenate %274, %278, %282, %286 in 1 : vector<16x16xf32>, vector<16x16xf32>, vector<16x16xf32>, vector<16x16xf32> -> vector<16x64xf32>
    %cst_156 = arith.constant dense<0.000000e+00> : vector<16x64xf32>
    %288 = tpu.matmul %287, %28, %cst_156 {dimension_numbers = #tpu.dot_dimension_numbers<[1], [0], [0], [1], [0, 0, 1, 1], [], []>} : vector<16x64xf32>, vector<64x64xf32>, vector<16x64xf32> -> vector<16x64xf32>
    %289 = vector.broadcast %29 : vector<1x64xf32> to vector<16x64xf32>
    %290 = arith.addf %288, %289 : vector<16x64xf32>
    %291 = arith.addf %196, %290 : vector<16x64xf32>
    %cst_157 = arith.constant dense<0.000000e+00> : vector<16xf32>
    %292 = vector.multi_reduction <add>, %291, %cst_157 [1] : vector<16x64xf32> to vector<16xf32>
    %293 = vector.shape_cast %292 : vector<16xf32> to vector<16x1xf32>
    %cst_158 = arith.constant 6.400000e+01 : f32
    %294 = vector.broadcast %cst_158 : f32 to vector<16x1xf32>
    %295 = arith.divf %293, %294 : vector<16x1xf32>
    %296 = vector.broadcast %295 : vector<16x1xf32> to vector<16x64xf32>
    %297 = arith.subf %291, %296 : vector<16x64xf32>
    %298 = arith.mulf %297, %297 : vector<16x64xf32>
    %cst_159 = arith.constant dense<0.000000e+00> : vector<16xf32>
    %299 = vector.multi_reduction <add>, %298, %cst_159 [1] : vector<16x64xf32> to vector<16xf32>
    %300 = vector.shape_cast %299 : vector<16xf32> to vector<16x1xf32>
    %cst_160 = arith.constant 6.400000e+01 : f32
    %301 = vector.broadcast %cst_160 : f32 to vector<16x1xf32>
    %302 = arith.divf %300, %301 : vector<16x1xf32>
    %cst_161 = arith.constant 9.99999974E-6 : f32
    %303 = vector.broadcast %cst_161 : f32 to vector<16x1xf32>
    %304 = arith.addf %302, %303 : vector<16x1xf32>
    %305 = math.rsqrt %304 : vector<16x1xf32>
    %306 = vector.broadcast %305 : vector<16x1xf32> to vector<16x64xf32>
    %307 = arith.mulf %297, %306 : vector<16x64xf32>
    %308 = vector.broadcast %30 : vector<1x64xf32> to vector<16x64xf32>
    %309 = arith.mulf %307, %308 : vector<16x64xf32>
    %310 = vector.broadcast %31 : vector<1x64xf32> to vector<16x64xf32>
    %311 = arith.addf %309, %310 : vector<16x64xf32>
    %cst_162 = arith.constant dense<0.000000e+00> : vector<16x256xf32>
    %312 = tpu.matmul %311, %32, %cst_162 {dimension_numbers = #tpu.dot_dimension_numbers<[1], [0], [0], [1], [0, 0, 1, 1], [], []>} : vector<16x64xf32>, vector<64x256xf32>, vector<16x256xf32> -> vector<16x256xf32>
    %313 = vector.broadcast %33 : vector<1x256xf32> to vector<16x256xf32>
    %314 = arith.addf %312, %313 : vector<16x256xf32>
    %cst_163 = arith.constant 0.000000e+00 : f32
    %315 = vector.broadcast %cst_163 : f32 to vector<16x256xf32>
    %316 = arith.maximumf %314, %315 : vector<16x256xf32>
    %cst_164 = arith.constant dense<0.000000e+00> : vector<16x64xf32>
    %317 = tpu.matmul %316, %34, %cst_164 {dimension_numbers = #tpu.dot_dimension_numbers<[1], [0], [0], [1], [0, 0, 1, 1], [], []>} : vector<16x256xf32>, vector<256x64xf32>, vector<16x64xf32> -> vector<16x64xf32>
    %318 = arith.addf %291, %317 : vector<16x64xf32>
    %319 = vector.broadcast %35 : vector<1x64xf32> to vector<16x64xf32>
    %320 = arith.addf %318, %319 : vector<16x64xf32>
    %cst_165 = arith.constant dense<0.000000e+00> : vector<16x4xf32>
    %321 = tpu.matmul %320, %173, %cst_165 {dimension_numbers = #tpu.dot_dimension_numbers<[1], [1], [0], [0], [0, 0, 1, 0], [], []>} : vector<16x64xf32>, vector<4x64xf32>, vector<16x4xf32> -> vector<16x4xf32>
    %c0_166 = arith.constant 0 : index
    %c0_167 = arith.constant 0 : index
    %c0_168 = arith.constant 0 : index
    %322 = vector.load %arg48[%c0_166, %c0_167, %c0_168] : memref<1x16x4xf32, #tpu.memory_space<vmem>>, vector<1x16x4xf32>
    %323 = vector.shape_cast %322 : vector<1x16x4xf32> to vector<16x4xf32>
    %324 = vector.shape_cast %321 : vector<16x4xf32> to vector<1x16x4xf32>
    tpu.vector_store %arg48[%c0_166, %c0_167, %c0_168], %324 {strides = array<i32>} : memref<1x16x4xf32, #tpu.memory_space<vmem>>, vector<1x16x4xf32>,
    %c0_169 = arith.constant 0 : index
    %c0_170 = arith.constant 0 : index
    %c0_171 = arith.constant 0 : index
    %325 = vector.load %arg49[%c0_169, %c0_170, %c0_171] : memref<1x4x3xf32, #tpu.memory_space<vmem>>, vector<1x4x3xf32>
    %326 = vector.shape_cast %325 : vector<1x4x3xf32> to vector<4x3xf32>
    %327 = vector.shape_cast %186 : vector<4x3xf32> to vector<1x4x3xf32>
    tpu.vector_store %arg49[%c0_169, %c0_170, %c0_171], %327 {strides = array<i32>} : memref<1x4x3xf32, #tpu.memory_space<vmem>>, vector<1x4x3xf32>,
    return
  }
  func.func @transform_0(%arg0: i32) -> (i32, i32, i32) {
    %c0_i32 = arith.constant 0 : i32
    %c0_i32_0 = arith.constant 0 : i32
    %c0_i32_1 = arith.constant 0 : i32
    return %arg0, %c0_i32, %c0_i32_0 : i32, i32, i32
  }
  func.func @transform_1(%arg0: i32) -> (i32, i32, i32) {
    %c0_i32 = arith.constant 0 : i32
    %c0_i32_0 = arith.constant 0 : i32
    %c0_i32_1 = arith.constant 0 : i32
    return %arg0, %c0_i32, %c0_i32_0 : i32, i32, i32
  }
  func.func @transform_2(%arg0: i32) -> (i32, i32) {
    %c0_i32 = arith.constant 0 : i32
    %c0_i32_0 = arith.constant 0 : i32
    %c0_i32_1 = arith.constant 0 : i32
    return %c0_i32, %c0_i32_0 : i32, i32
  }
  func.func @transform_3(%arg0: i32) -> (i32, i32) {
    %c0_i32 = arith.constant 0 : i32
    %c0_i32_0 = arith.constant 0 : i32
    %c0_i32_1 = arith.constant 0 : i32
    return %c0_i32, %c0_i32_0 : i32, i32
  }
  func.func @transform_4(%arg0: i32) -> (i32, i32) {
    %c0_i32 = arith.constant 0 : i32
    %c0_i32_0 = arith.constant 0 : i32
    %c0_i32_1 = arith.constant 0 : i32
    return %c0_i32, %c0_i32_0 : i32, i32
  }
  func.func @transform_5(%arg0: i32) -> (i32, i32) {
    %c0_i32 = arith.constant 0 : i32
    %c0_i32_0 = arith.constant 0 : i32
    %c0_i32_1 = arith.constant 0 : i32
    return %c0_i32, %c0_i32_0 : i32, i32
  }
  func.func @transform_6(%arg0: i32) -> (i32, i32) {
    %c0_i32 = arith.constant 0 : i32
    %c0_i32_0 = arith.constant 0 : i32
    %c0_i32_1 = arith.constant 0 : i32
    return %c0_i32, %c0_i32_0 : i32, i32
  }
  func.func @transform_7(%arg0: i32) -> (i32, i32) {
    %c0_i32 = arith.constant 0 : i32
    %c0_i32_0 = arith.constant 0 : i32
    %c0_i32_1 = arith.constant 0 : i32
    return %c0_i32, %c0_i32_0 : i32, i32
  }
  func.func @transform_8(%arg0: i32) -> (i32, i32) {
    %c0_i32 = arith.constant 0 : i32
    %c0_i32_0 = arith.constant 0 : i32
    %c0_i32_1 = arith.constant 0 : i32
    return %c0_i32, %c0_i32_0 : i32, i32
  }
  func.func @transform_9(%arg0: i32) -> (i32, i32) {
    %c0_i32 = arith.constant 0 : i32
    %c0_i32_0 = arith.constant 0 : i32
    %c0_i32_1 = arith.constant 0 : i32
    return %c0_i32, %c0_i32_0 : i32, i32
  }
  func.func @transform_10(%arg0: i32) -> (i32, i32) {
    %c0_i32 = arith.constant 0 : i32
    %c0_i32_0 = arith.constant 0 : i32
    %c0_i32_1 = arith.constant 0 : i32
    return %c0_i32, %c0_i32_0 : i32, i32
  }
  func.func @transform_11(%arg0: i32) -> (i32, i32) {
    %c0_i32 = arith.constant 0 : i32
    %c0_i32_0 = arith.constant 0 : i32
    %c0_i32_1 = arith.constant 0 : i32
    return %c0_i32, %c0_i32_0 : i32, i32
  }
  func.func @transform_12(%arg0: i32) -> (i32, i32) {
    %c0_i32 = arith.constant 0 : i32
    %c0_i32_0 = arith.constant 0 : i32
    %c0_i32_1 = arith.constant 0 : i32
    return %c0_i32, %c0_i32_0 : i32, i32
  }
  func.func @transform_13(%arg0: i32) -> (i32, i32) {
    %c0_i32 = arith.constant 0 : i32
    %c0_i32_0 = arith.constant 0 : i32
    %c0_i32_1 = arith.constant 0 : i32
    return %c0_i32, %c0_i32_0 : i32, i32
  }
  func.func @transform_14(%arg0: i32) -> (i32, i32) {
    %c0_i32 = arith.constant 0 : i32
    %c0_i32_0 = arith.constant 0 : i32
    %c0_i32_1 = arith.constant 0 : i32
    return %c0_i32, %c0_i32_0 : i32, i32
  }
  func.func @transform_15(%arg0: i32) -> (i32, i32) {
    %c0_i32 = arith.constant 0 : i32
    %c0_i32_0 = arith.constant 0 : i32
    %c0_i32_1 = arith.constant 0 : i32
    return %c0_i32, %c0_i32_0 : i32, i32
  }
  func.func @transform_16(%arg0: i32) -> (i32, i32) {
    %c0_i32 = arith.constant 0 : i32
    %c0_i32_0 = arith.constant 0 : i32
    %c0_i32_1 = arith.constant 0 : i32
    return %c0_i32, %c0_i32_0 : i32, i32
  }
  func.func @transform_17(%arg0: i32) -> (i32, i32) {
    %c0_i32 = arith.constant 0 : i32
    %c0_i32_0 = arith.constant 0 : i32
    %c0_i32_1 = arith.constant 0 : i32
    return %c0_i32, %c0_i32_0 : i32, i32
  }
  func.func @transform_18(%arg0: i32) -> (i32, i32) {
    %c0_i32 = arith.constant 0 : i32
    %c0_i32_0 = arith.constant 0 : i32
    %c0_i32_1 = arith.constant 0 : i32
    return %c0_i32, %c0_i32_0 : i32, i32
  }
  func.func @transform_19(%arg0: i32) -> (i32, i32) {
    %c0_i32 = arith.constant 0 : i32
    %c0_i32_0 = arith.constant 0 : i32
    %c0_i32_1 = arith.constant 0 : i32
    return %c0_i32, %c0_i32_0 : i32, i32
  }
  func.func @transform_20(%arg0: i32) -> (i32, i32) {
    %c0_i32 = arith.constant 0 : i32
    %c0_i32_0 = arith.constant 0 : i32
    %c0_i32_1 = arith.constant 0 : i32
    return %c0_i32, %c0_i32_0 : i32, i32
  }
  func.func @transform_21(%arg0: i32) -> (i32, i32) {
    %c0_i32 = arith.constant 0 : i32
    %c0_i32_0 = arith.constant 0 : i32
    %c0_i32_1 = arith.constant 0 : i32
    return %c0_i32, %c0_i32_0 : i32, i32
  }
  func.func @transform_22(%arg0: i32) -> (i32, i32) {
    %c0_i32 = arith.constant 0 : i32
    %c0_i32_0 = arith.constant 0 : i32
    %c0_i32_1 = arith.constant 0 : i32
    return %c0_i32, %c0_i32_0 : i32, i32
  }
  func.func @transform_23(%arg0: i32) -> (i32, i32) {
    %c0_i32 = arith.constant 0 : i32
    %c0_i32_0 = arith.constant 0 : i32
    %c0_i32_1 = arith.constant 0 : i32
    return %c0_i32, %c0_i32_0 : i32, i32
  }
  func.func @transform_24(%arg0: i32) -> (i32, i32) {
    %c0_i32 = arith.constant 0 : i32
    %c0_i32_0 = arith.constant 0 : i32
    %c0_i32_1 = arith.constant 0 : i32
    return %c0_i32, %c0_i32_0 : i32, i32
  }
  func.func @transform_25(%arg0: i32) -> (i32, i32) {
    %c0_i32 = arith.constant 0 : i32
    %c0_i32_0 = arith.constant 0 : i32
    %c0_i32_1 = arith.constant 0 : i32
    return %c0_i32, %c0_i32_0 : i32, i32
  }
  func.func @transform_26(%arg0: i32) -> (i32, i32) {
    %c0_i32 = arith.constant 0 : i32
    %c0_i32_0 = arith.constant 0 : i32
    %c0_i32_1 = arith.constant 0 : i32
    return %c0_i32, %c0_i32_0 : i32, i32
  }
  func.func @transform_27(%arg0: i32) -> (i32, i32) {
    %c0_i32 = arith.constant 0 : i32
    %c0_i32_0 = arith.constant 0 : i32
    %c0_i32_1 = arith.constant 0 : i32
    return %c0_i32, %c0_i32_0 : i32, i32
  }
  func.func @transform_28(%arg0: i32) -> (i32, i32) {
    %c0_i32 = arith.constant 0 : i32
    %c0_i32_0 = arith.constant 0 : i32
    %c0_i32_1 = arith.constant 0 : i32
    return %c0_i32, %c0_i32_0 : i32, i32
  }
  func.func @transform_29(%arg0: i32) -> (i32, i32) {
    %c0_i32 = arith.constant 0 : i32
    %c0_i32_0 = arith.constant 0 : i32
    %c0_i32_1 = arith.constant 0 : i32
    return %c0_i32, %c0_i32_0 : i32, i32
  }
  func.func @transform_30(%arg0: i32) -> (i32, i32) {
    %c0_i32 = arith.constant 0 : i32
    %c0_i32_0 = arith.constant 0 : i32
    %c0_i32_1 = arith.constant 0 : i32
    return %c0_i32, %c0_i32_0 : i32, i32
  }
  func.func @transform_31(%arg0: i32) -> (i32, i32) {
    %c0_i32 = arith.constant 0 : i32
    %c0_i32_0 = arith.constant 0 : i32
    %c0_i32_1 = arith.constant 0 : i32
    return %c0_i32, %c0_i32_0 : i32, i32
  }
  func.func @transform_32(%arg0: i32) -> (i32, i32) {
    %c0_i32 = arith.constant 0 : i32
    %c0_i32_0 = arith.constant 0 : i32
    %c0_i32_1 = arith.constant 0 : i32
    return %c0_i32, %c0_i32_0 : i32, i32
  }
  func.func @transform_33(%arg0: i32) -> (i32, i32) {
    %c0_i32 = arith.constant 0 : i32
    %c0_i32_0 = arith.constant 0 : i32
    %c0_i32_1 = arith.constant 0 : i32
    return %c0_i32, %c0_i32_0 : i32, i32
  }
  func.func @transform_34(%arg0: i32) -> (i32, i32) {
    %c0_i32 = arith.constant 0 : i32
    %c0_i32_0 = arith.constant 0 : i32
    %c0_i32_1 = arith.constant 0 : i32
    return %c0_i32, %c0_i32_0 : i32, i32
  }
  func.func @transform_35(%arg0: i32) -> (i32, i32) {
    %c0_i32 = arith.constant 0 : i32
    %c0_i32_0 = arith.constant 0 : i32
    %c0_i32_1 = arith.constant 0 : i32
    return %c0_i32, %c0_i32_0 : i32, i32
  }
  func.func @transform_36(%arg0: i32) -> (i32, i32) {
    %c0_i32 = arith.constant 0 : i32
    %c0_i32_0 = arith.constant 0 : i32
    %c0_i32_1 = arith.constant 0 : i32
    return %c0_i32, %c0_i32_0 : i32, i32
  }
  func.func @transform_37(%arg0: i32) -> (i32, i32) {
    %c0_i32 = arith.constant 0 : i32
    %c0_i32_0 = arith.constant 0 : i32
    %c0_i32_1 = arith.constant 0 : i32
    return %c0_i32, %c0_i32_0 : i32, i32
  }
  func.func @transform_38(%arg0: i32) -> (i32, i32) {
    %c0_i32 = arith.constant 0 : i32
    %c0_i32_0 = arith.constant 0 : i32
    %c0_i32_1 = arith.constant 0 : i32
    return %c0_i32, %c0_i32_0 : i32, i32
  }
  func.func @transform_39(%arg0: i32) -> (i32, i32) {
    %c0_i32 = arith.constant 0 : i32
    %c0_i32_0 = arith.constant 0 : i32
    %c0_i32_1 = arith.constant 0 : i32
    return %c0_i32, %c0_i32_0 : i32, i32
  }
  func.func @transform_40(%arg0: i32) -> (i32, i32) {
    %c0_i32 = arith.constant 0 : i32
    %c0_i32_0 = arith.constant 0 : i32
    %c0_i32_1 = arith.constant 0 : i32
    return %c0_i32, %c0_i32_0 : i32, i32
  }
  func.func @transform_41(%arg0: i32) -> (i32, i32) {
    %c0_i32 = arith.constant 0 : i32
    %c0_i32_0 = arith.constant 0 : i32
    %c0_i32_1 = arith.constant 0 : i32
    return %c0_i32, %c0_i32_0 : i32, i32
  }
  func.func @transform_42(%arg0: i32) -> (i32, i32) {
    %c0_i32 = arith.constant 0 : i32
    %c0_i32_0 = arith.constant 0 : i32
    %c0_i32_1 = arith.constant 0 : i32
    return %c0_i32, %c0_i32_0 : i32, i32
  }
  func.func @transform_43(%arg0: i32) -> (i32, i32) {
    %c0_i32 = arith.constant 0 : i32
    %c0_i32_0 = arith.constant 0 : i32
    %c0_i32_1 = arith.constant 0 : i32
    return %c0_i32, %c0_i32_0 : i32, i32
  }
  func.func @transform_44(%arg0: i32) -> (i32, i32) {
    %c0_i32 = arith.constant 0 : i32
    %c0_i32_0 = arith.constant 0 : i32
    %c0_i32_1 = arith.constant 0 : i32
    return %c0_i32, %c0_i32_0 : i32, i32
  }
  func.func @transform_45(%arg0: i32) -> (i32, i32) {
    %c0_i32 = arith.constant 0 : i32
    %c0_i32_0 = arith.constant 0 : i32
    %c0_i32_1 = arith.constant 0 : i32
    return %c0_i32, %c0_i32_0 : i32, i32
  }
  func.func @transform_46(%arg0: i32) -> (i32, i32) {
    %c0_i32 = arith.constant 0 : i32
    %c0_i32_0 = arith.constant 0 : i32
    %c0_i32_1 = arith.constant 0 : i32
    return %c0_i32, %c0_i32_0 : i32, i32
  }
  func.func @transform_47(%arg0: i32) -> (i32, i32, i32) {
    %c0_i32 = arith.constant 0 : i32
    %c0_i32_0 = arith.constant 0 : i32
    %c0_i32_1 = arith.constant 0 : i32
    return %arg0, %c0_i32, %c0_i32_0 : i32, i32, i32
  }
  func.func @transform_48(%arg0: i32) -> (i32, i32, i32) {
    %c0_i32 = arith.constant 0 : i32
    %c0_i32_0 = arith.constant 0 : i32
    %c0_i32_1 = arith.constant 0 : i32
    return %arg0, %c0_i32, %c0_i32_0 : i32, i32, i32
  }
}

</mosaic_0001>

<bundles_post_ra>
// kernel: _lambda_.2
= control target key start
LH: loop header
LB: loop body
LE: loop exit
PB: predicated region body
PF: predicated region fallthrough
CT: control target
= control target key end

     0   :  { %s5147_s6 = smov 1   ;;  %s5148_s10 = smov 2   ;;  %s5901_s0 = inlined_call_operand.smem [shape: u32[37], index: -1, kind: input, shape index: {}] }
   0x1   :  { %s5202_s5 = sld [smem:[%s5901_s0]]   ;;  %s5149_s14 = smov 3  }
   0x2   :  { %s5207_s9 = sld [smem:[%s5901_s0 + %s5147_s6]]   ;;  %s5150_s18 = smov 4  }
   0x3   :  { %s5212_s13 = sld [smem:[%s5901_s0 + %s5148_s10]]   ;;  %s5151_s22 = smov 5  }
   0x4   :  { %s5217_s17 = sld [smem:[%s5901_s0 + %s5149_s14]]   ;;  %s5152_s26 = smov 6  }
   0x5   :  { %s5222_s21 = sld [smem:[%s5901_s0 + %s5150_s18]]   ;;  %s5153_s30 = smov 7  }
   0x6   :  { %s5227_s25 = sld [smem:[%s5901_s0 + %s5151_s22]]   ;;  %s5154_s4 = smov 8  }
   0x7   :  { %s5232_s29 = sld [smem:[%s5901_s0 + %s5152_s26]]   ;;  %s5155_s10 = smov 9  }
   0x8   :  { %s5237_s3 = sld [smem:[%s5901_s0 + %s5153_s30]]   ;;  %s5156_s15 = smov 10  }
   0x9   :  { %s5242_s8 = sld [smem:[%s5901_s0 + %s5154_s4]]   ;;  %s5157_s20 = smov 11  }
   0xa   :  { %s5247_s14 = sld [smem:[%s5901_s0 + %s5155_s10]]   ;;  %s5158_s26 = smov 12  }
   0xb   :  { %s5252_s19 = sld [smem:[%s5901_s0 + %s5156_s15]]   ;;  %s5159_s1 = smov 13  }
   0xc   :  { %s5257_s24 = sld [smem:[%s5901_s0 + %s5157_s20]]   ;;  %s5160_s7 = smov 14  }
   0xd   :  { %s5262_s30 = sld [smem:[%s5901_s0 + %s5158_s26]]   ;;  %s5161_s15 = smov 15  }
   0xe   :  { %s5267_s6 = sld [smem:[%s5901_s0 + %s5159_s1]]   ;;  %s5162_s22 = smov 16  }
   0xf   :  { %s5272_s12 = sld [smem:[%s5901_s0 + %s5160_s7]]   ;;  %s5163_s28 = smov 17  }
  0x10   :  { %s5277_s20 = sld [smem:[%s5901_s0 + %s5161_s15]]   ;;  %s5164_s7 = smov 18  }
  0x11   :  { %s5282_s27 = sld [smem:[%s5901_s0 + %s5162_s22]]   ;;  %s5165_s15 = smov 19  }
  0x12   :  { %s5287_s4 = sld [smem:[%s5901_s0 + %s5163_s28]]   ;;  %s5166_s22 = smov 20  }
  0x13   :  { %s5167_s28 = smov 21  }
  0x15   :  { %5915 = sst [smem:[#allocation2_spill]] %s5272_s12 }
  0x16   :  { %5916 = sst [smem:[#allocation3_spill]] %s5277_s20 }
  0x17   :  { %5917 = sst [smem:[#allocation4_spill]] %s5282_s27 }
  0x18   :  { %5918 = sst [smem:[#allocation5_spill]] %s5287_s4 }
  0x19   :  { %s5292_s12 = sld [smem:[%s5901_s0 + %s5164_s7]]   ;;  %s5168_s7 = smov 22  }
  0x1a   :  { %s5297_s20 = sld [smem:[%s5901_s0 + %s5165_s15]]   ;;  %s5169_s15 = smov 23  }
  0x1b   :  { %s5302_s27 = sld [smem:[%s5901_s0 + %s5166_s22]]   ;;  %s5170_s22 = smov 24  }
  0x1c   :  { %s5307_s4 = sld [smem:[%s5901_s0 + %s5167_s28]]   ;;  %s5171_s28 = smov 25  }
  0x1f   :  { %5919 = sst [smem:[#allocation6_spill]] %s5292_s12 }
  0x20   :  { %5920 = sst [smem:[#allocation7_spill]] %s5297_s20 }
  0x21   :  { %5921 = sst [smem:[#allocation8_spill]] %s5302_s27 }
  0x22   :  { %5922 = sst [smem:[#allocation9_spill]] %s5307_s4 }
  0x23   :  { %s5312_s12 = sld [smem:[%s5901_s0 + %s5168_s7]]   ;;  %s5172_s7 = smov 26  }
  0x24   :  { %s5317_s20 = sld [smem:[%s5901_s0 + %s5169_s15]]   ;;  %s5173_s15 = smov 27  }
  0x25   :  { %s5322_s27 = sld [smem:[%s5901_s0 + %s5170_s22]]   ;;  %s5174_s22 = smov 28  }
  0x26   :  { %s5327_s4 = sld [smem:[%s5901_s0 + %s5171_s28]]   ;;  %s5175_s28 = smov 29  }
  0x29   :  { %5923 = sst [smem:[#allocation10_spill]] %s5312_s12 }
  0x2a   :  { %5924 = sst [smem:[#allocation11_spill]] %s5317_s20 }
  0x2b   :  { %5925 = sst [smem:[#allocation12_spill]] %s5322_s27 }
  0x2c   :  { %5926 = sst [smem:[#allocation13_spill]] %s5327_s4 }
  0x2d   :  { %s5332_s12 = sld [smem:[%s5901_s0 + %s5172_s7]]   ;;  %s5176_s7 = smov 30  }
  0x2e   :  { %s5337_s20 = sld [smem:[%s5901_s0 + %s5173_s15]]   ;;  %s5177_s15 = smov 31  }
  0x2f   :  { %s5342_s27 = sld [smem:[%s5901_s0 + %s5174_s22]]   ;;  %s5178_s22 = smov 32  }
  0x30   :  { %s5347_s4 = sld [smem:[%s5901_s0 + %s5175_s28]]   ;;  %s5179_s28 = smov 33  }
  0x33   :  { %5927 = sst [smem:[#allocation14_spill]] %s5332_s12 }
  0x34   :  { %5928 = sst [smem:[#allocation15_spill]] %s5337_s20 }
  0x35   :  { %5929 = sst [smem:[#allocation16_spill]] %s5342_s27 }
  0x36   :  { %5930 = sst [smem:[#allocation17_spill]] %s5347_s4 }
  0x37   :  { %s5352_s12 = sld [smem:[%s5901_s0 + %s5176_s7]]   ;;  %s5180_s7 = smov 34  }
  0x38   :  { %s5357_s20 = sld [smem:[%s5901_s0 + %s5177_s15]]   ;;  %s5181_s15 = smov 35  }
  0x39   :  { %s5362_s27 = sld [smem:[%s5901_s0 + %s5178_s22]]   ;;  %s5182_s22 = smov 36  }
  0x3a   :  { %s5367_s4 = sld [smem:[%s5901_s0 + %s5179_s28]]   ;;  %s5384_s28 = smov 0  }
  0x3d   :  { %5931 = sst [smem:[#allocation18_spill]] %s5352_s12 }
  0x3e   :  { %5932 = sst [smem:[#allocation19_spill]] %s5357_s20 }
  0x3f   :  { %5933 = sst [smem:[#allocation20_spill]] %s5362_s27 }
  0x40   :  { %s5372_s12 = sld [smem:[%s5901_s0 + %s5180_s7]]  }
  0x41   :  { %s5377_s20 = sld [smem:[%s5901_s0 + %s5181_s15]]  }
  0x42   :  { %s5382_s27 = sld [smem:[%s5901_s0 + %s5182_s22]]  }
  0x43 LB: > { %s4129_s1 = sadd.s32 4294967295, %s5145_s28   ;;  %p4133_p0 = scmp.ge.s32.totalorder %s5145_s28, 1  ;;  %s5145_s28 = sphi %s5384_s28, %s83_s28  }
  0x44   : > { %p999_p1 = scmp.lt.s32.totalorder %s5145_s28, 3 }
  0x46   : > { %p1000_p2 = pnand %p4133_p0, %p999_p1 }
  0x47   : > { %v1099_v0 = vld [vmem:[%s5212_s13] sm:$0xf] (!%p1000_p2)  ;;  %vm1289_vm0 = vcmask (!%p1000_p2), 1043456   ;;  %p1089_p3 = scmp.lt.s32.totalorder (!%p1000_p2), %s4129_s1, 1  ;;  %v1102_v2 = vld [vmem:[%s5222_s21 + $0x8] sm:$0xff] (!%p1000_p2)  ;;  %v1103_v4 = vld [vmem:[%s5222_s21 + $0x10] sm:$0xff] (!%p1000_p2) }
  0x48   : > { %1003 = sbr.rel (%p1000_p2) target bundleno = 5593 (0x15d9), region = 164  ;;  %v1101_v1 = vld [vmem:[%s5222_s21] sm:$0xff] (!%p1000_p2)  ;;  %4424 = vmatprep.subr.msk.mxu0 (!%p1000_p2), %vm1289_vm0, %v1099_v0  ;;  %v1104_v5 = vld [vmem:[%s5222_s21 + $0x18] sm:$0xff] (!%p1000_p2)  ;;  %vm1282_vm1 = vcmask (!%p1000_p2), 31744   ;;  %v1106_v10 = vld [vmem:[%s5222_s21 + $0x28] sm:$0xff] (!%p1000_p2)  ;;  %vm1376_vm2 = vcmask (!%p1000_p2), 523264  }
  0x49   : > { %4425 = vmatpush3.msk.msra.mxu0 (!%p1000_p2), %vm1289_vm0, %v1099_v0  ;;  %v4674_v3 = vpack.c.bf16 (!%p1000_p2), %v1102_v2, %v1101_v1  ;;  %v4678_v8 = vpack.c.bf16 (!%p1000_p2), %v1104_v5, %v1103_v4  ;;  %v1105_v9 = vld [vmem:[%s5222_s21 + $0x20] sm:$0xff] (!%p1000_p2)  ;;  %v1107_v12 = vld [vmem:[%s5222_s21 + $0x30] sm:$0xff] (!%p1000_p2)  ;;  %v1108_v13 = vld [vmem:[%s5222_s21 + $0x38] sm:$0xff] (!%p1000_p2)  ;;  %v5183_v52 = vmov (!%p1000_p2), 0.0|0.0   ;;  %vm5184_vm3 = vmmov (!%p1000_p2), 0   ;;  %s5186_s7 = smov (!%p1000_p2), 96  }
  0x4a   : > { %v4682_v11 = vpack.c.bf16 (!%p1000_p2), %v1106_v10, %v1105_v9  ;;  %v4686_v14 = vpack.c.bf16 (!%p1000_p2), %v1108_v13, %v1107_v12  ;;  %v4138_v15 = vld [vmem:[%s5217_s17] ss:$0 sm:$0xff] (!%p1000_p2)  ;;  %v1124_v47 = vld [vmem:[%s5262_s30 + $0x8] sm:$0xff] (!%p1000_p2)  ;;  %v1125_v53 = vld [vmem:[%s5262_s30 + $0x10] sm:$0xff] (!%p1000_p2)  ;;  %vm1695_vm4 = vcmask (!%p1000_p2), 130048   ;;  %s5187_s10 = smov (!%p1000_p2), 112  }
  0x4b   : > { %4675 = vmatprep.subr.bf16.mxu0 (!%p1000_p2), %v4674_v3  ;;  %v5411_v22 = vld [vmem:[%s5207_s9] sm:$0xff] (!%p1000_p2)  ;;  %v1115_v50 = vld [vmem:[%s5252_s19 + $0x8] sm:$0xff] (!%p1000_p2)  ;;  %v1126_v54 = vld [vmem:[%s5262_s30 + $0x18] sm:$0xff] (!%p1000_p2)  ;;  %s5188_s11 = smov (!%p1000_p2), 80   ;;  %s5189_s15 = smov (!%p1000_p2), 48   ;;  %vm2394_vm6 = vcmask (!%p1000_p2), 261120  }
  0x4c   : > { %v1459_v23 = vsel (!%p1000_p2), %vm1376_vm2, %v5411_v22, 0.0  ;;  %v4142_v24 = vld [vmem:[%s5227_s25] ss:$0 sm:$0xff] (!%p1000_p2)  ;;  %v4706_v55 = vpack.c.bf16 (!%p1000_p2), %v1126_v54, %v1125_v53  ;;  %v1116_v56 = vld [vmem:[%s5252_s19 + $0x10] sm:$0xff] (!%p1000_p2)  ;;  %v1117_v57 = vld [vmem:[%s5252_s19 + $0x18] sm:$0xff] (!%p1000_p2)  ;;  %s5913_s16 = smov (!%p1000_p2), 32  }
  0x4d   : > { %1460 = vadd.xlane.f32.xlu1 (!%p1000_p2), %v1459_v23  ;;  %v1123_v46 = vld [vmem:[%s5262_s30] sm:$0xff] (!%p1000_p2)  ;;  %v4694_v58 = vpack.c.bf16 (!%p1000_p2), %v1117_v57, %v1116_v56  ;;  %v1128_v60 = vld [vmem:[%s5262_s30 + $0x28] sm:$0xff] (!%p1000_p2)  ;;  %v1129_v1 = vld [vmem:[%s5262_s30 + $0x30] sm:$0xff] (!%p1000_p2)  ;;  %s5910_s18 = smov (!%p1000_p2), 64   ;;  %s5911_s22 = smov (!%p1000_p2), 16   ;;  %vm2396_vm7 = vcmask (!%p1000_p2), 392192  }
  0x4e   : > { %v4702_v48 = vpack.c.bf16 (!%p1000_p2), %v1124_v47, %v1123_v46  ;;  %v1114_v49 = vld [vmem:[%s5252_s19] sm:$0xff] (!%p1000_p2)  ;;  %v1119_v63 = vld [vmem:[%s5252_s19 + $0x28] sm:$0xff] (!%p1000_p2)  ;;  %v1130_v2 = vld [vmem:[%s5262_s30 + $0x38] sm:$0xff] (!%p1000_p2)  ;;  %s5936_s23 = sld [smem:[#allocation2_spill]] (!%p1000_p2)  ;;  %s5937_s26 = sld [smem:[#allocation3_spill]] (!%p1000_p2)  ;;  %vm2681_vm8 = vcmask (!%p1000_p2), 516096  }
  0x4f   : > { %s5962_s1 = smov (!%p1089_p3, %s4129_s1), 1  ;;  %v4691_v51 = vpack.c.bf16 %v1115_v50, %v1114_v49  ;;  %v1127_v59 = vld [vmem:[%s5262_s30 + $0x20] sm:$0xff]  ;;  %v1120_v4 = vld [vmem:[%s5252_s19 + $0x30] sm:$0xff]  ;;  %v1121_v5 = vld [vmem:[%s5252_s19 + $0x38] sm:$0xff]  ;;  %vm3253_vm9 = vcmask 65536   ;;  %vm3249_vm10 = vcmask 72704  }
  0x50   : > { %s5909_s0 = sshll.u32 %s5962_s1, 4  ;;  %4703 = vmatprep.subr.bf16.mxu1 %v4702_v48  ;;  %v4710_v61 = vpack.c.bf16 %v1128_v60, %v1127_v59  ;;  %v1118_v62 = vld [vmem:[%s5252_s19 + $0x20] sm:$0xff]  ;;  %vm5477_vm5 = vmpackc.low %vm1695_vm4, %vm1695_vm4  ;;  %vm3350_vm11 = vcmask 1040384   ;;  %vm5193_vm12 = vmmov 1  }
  0x51   : > { %s1093_s2 = scalar_lea.vmem %s5202_s5, %s5909_s0  ;;  %4705 = vmatpush3.bf16.msra.mxu1 %v4702_v48  ;;  %v4697_v0 = vpack.c.bf16 %v1119_v63, %v1118_v62  ;;  %s5940_s0 = sld [smem:[#allocation4_spill]]  ;;  %vm5752_vm13 = vmpackc.low %vm3350_vm11, %vm5193_vm12 }
  0x52   : > { %v1274_v6 = vld [vmem:[%s1093_s2] sm:$0xff]  ;;  %v1275_v7 = vld [vmem:[%s1093_s2 + $0x8] sm:$0xff]  ;;  %4707 = vmatprep.subr.bf16.mxu1 %v4706_v55  ;;  %s5938_s2 = sld [smem:[#allocation6_spill]] }
  0x53   : > { %4426 = vmatprep.mubr.msk.f32.mxu0 %vm1282_vm1, %v1274_v6  ;;  %v4700_v6 = vpack.c.bf16 %v1121_v5, %v1120_v4 }
  0x54   : > { %4427 = vmatmul.mubr.msk.f32.vlgmr.msra.gmra.mrb[0].mxu0 %vm1282_vm1, %v1275_v7  ;;  %v5185_v7 = vmov 0.0  }
  0x55   : > { %4677 = vmatpush3.bf16.msra.mxu0 %v4674_v3  ;;  %4709 = vmatpush3.bf16.msra.mxu1 %v4706_v55  ;;  %v4714_v3 = vpack.c.bf16 %v1130_v2, %v1129_v1 }
  0x56   : > { %4679 = vmatprep.subr.bf16.mxu0 %v4678_v8  ;;  %4711 = vmatprep.subr.bf16.mxu1 %v4710_v61 }
  0x59   : > { %4681 = vmatpush3.bf16.msra.mxu0 %v4678_v8  ;;  %4713 = vmatpush3.bf16.msra.mxu1 %v4710_v61 }
  0x5a   : > { %4683 = vmatprep.subr.bf16.mxu0 %v4682_v11  ;;  %4715 = vmatprep.subr.bf16.mxu1 %v4714_v3 }
  0x5d   : > { %4685 = vmatpush3.bf16.msra.mxu0 %v4682_v11  ;;  %4717 = vmatpush3.bf16.msra.mxu1 %v4714_v3 }
  0x5e   : > { %4687 = vmatprep.subr.bf16.mxu0 %v4686_v14  ;;  %4726 = vmatprep.subr.bf16.mxu1 %v5183_v52 }
  0x61   : > { %4689 = vmatpush3.bf16.msra.mxu0 %v4686_v14 }
  0x62   : > { %4690 = vmatprep.subr.bf16.mxu0 %v5183_v52 }
  0xda   : > { %v1461_v31 = vpop.xlane.xlu1 %1460 }
  0xdb   : > { %v1463_v32 = vmul.f32 0.015625, %v1461_v31 }
  0xdd   : > { %v5419_v35 = vsub.f32 %v5411_v22, %v1463_v32 }
  0xdf   : > { %v1465_v40 = vmul.f32 %v5419_v35, %v5419_v35 }
  0xe1   : > { %v1466_v43 = vsel %vm1376_vm2, %v1465_v40, 0.0 }
 0x127   : > { %v4428_v16 = vpop.f32.mrb[0].mxu0 }
 0x128   : > { %v1365_v17 = vadd.f32 %v4428_v16, %v4138_v15  ;;  %v1359_v18 = vpop.f32.mrb[1].mxu0 }
 0x129   : > { %v1360_v19 = vadd.f32 %v4138_v15, %v1359_v18  ;;  %v4147_v18 = vld [vmem:[%s5242_s8] ss:$0 sm:$0xff] }
 0x12a   : > { %v1369_v21 = vmax.f32 %v1365_v17, 0.0 }
 0x12b   : > { %v1368_v20 = vmax.f32 %v1360_v19, 0.0 }
 0x12d   : > { %4445 = vmatprep.mubr.msk.f32.mxu0 %vm1376_vm2, %v1368_v20  ;;  %v4148_v20 = vld [vmem:[%s5247_s14] ss:$0 sm:$0xff] }
 0x12e   : > { %4446 = vmatmul.mubr.msk.f32.vlgmr.msra.gmra.mrb[2].mxu0 %vm1376_vm2, %v1369_v21 }
 0x12f   : > { %4692 = vmatpush3.bf16.msra.mxu0 %v4691_v51  ;;  %4464 = vmatprep.mubr.msk.f32.mxu0 %vm5184_vm3, %v5185_v7 }
 0x130   : > { %4693 = vmatprep.subr.bf16.mxu0 %v5183_v52 }
 0x133   : > { %4695 = vmatpush3.bf16.msra.mxu0 %v4694_v58 }
 0x134   : > { %4696 = vmatprep.subr.bf16.mxu0 %v5183_v52 }
 0x137   : > { %4698 = vmatpush3.bf16.msra.mxu0 %v4697_v0 }
 0x138   : > { %4699 = vmatprep.subr.bf16.mxu0 %v5183_v52 }
 0x13b   : > { %4701 = vmatpush3.bf16.msra.mxu0 %v4700_v6 }
 0x13c   : > { %4718 = vmatprep.subr.bf16.mxu0 %v5183_v52 }
 0x201   : > { %v4447_v25 = vpop.f32.mrb[2].mxu0 }
 0x202   : > { %v1449_v26 = vpop.f32.mrb[3].mxu0  ;;  %v1455_v28 = vadd.f32 %v4447_v25, %v4142_v24 }
 0x203   : > { %v1450_v27 = vadd.f32 %v4142_v24, %v1449_v26  ;;  %v4145_v24 = vld [vmem:[%s5232_s29] ss:$0 sm:$0xff] }
 0x204   : > { %v1490_v30 = vsel %vm1376_vm2, %v1455_v28, 0.0 }
 0x205   : > { %v1487_v29 = vsel %vm1376_vm2, %v1450_v27, 0.0 }
 0x206   : > { %1488 = vadd.xlane.f32.xlu0 %v1487_v29  ;;  %v4146_v29 = vld [vmem:[%s5237_s3] ss:$0 sm:$0xff] }
 0x20a   : > { %1491 = vadd.xlane.f32.xlu0 %v1490_v30 }
 0x293   : > { %v1489_v33 = vpop.xlane.xlu0 %1488 }
 0x294   : > { %v1493_v34 = vmul.f32 0.015625, %v1489_v33 }
 0x296   : > { %v5421_v36 = vsub.f32 %v1450_v27, %v1493_v34  ;;  %v4151_v34 = vld [vmem:[%s5267_s6] ss:$0 sm:$0xff] }
 0x297   : > { %v1492_v37 = vpop.xlane.xlu0 %1491 }
 0x298   : > { %v1494_v38 = vmul.f32 0.015625, %v1492_v37  ;;  %v1497_v39 = vmul.f32 %v5421_v36, %v5421_v36 }
 0x29a   : > { %v5427_v41 = vsub.f32 %v1455_v28, %v1494_v38  ;;  %v1499_v42 = vsel %vm1376_vm2, %v1497_v39, 0.0 }
 0x29b   : > { %1500 = vadd.xlane.f32.xlu1 %v1499_v42 }
 0x29c   : > { %v1498_v44 = vmul.f32 %v5427_v41, %v5427_v41 }
 0x29e   : > { %v1502_v45 = vsel %vm1376_vm2, %v1498_v44, 0.0  ;;  %v4149_v44 = vld [vmem:[%s5257_s24] ss:$0 sm:$0xff] }
 0x29f   : > { %1467 = vadd.xlane.f32.xlu1 %v1466_v43  ;;  %1503 = vadd.xlane.f32.xlu0 %v1502_v45 }
 0x328   : > { %v1501_v8 = vpop.xlane.xlu1 %1500 }
 0x329   : > { %v1505_v9 = vmul.f32 0.015625, %v1501_v8 }
 0x32b   : > { %v1507_v10 = vadd.f32 1e-05, %v1505_v9 }
 0x32c   : > { %v1468_v11 = vpop.xlane.xlu1 %1467  ;;  %v1504_v12 = vpop.xlane.xlu0 %1503 }
 0x32d   : > { %5075 = vrsqrt.f32 %v1507_v10  ;;  %v1469_v13 = vmul.f32 0.015625, %v1468_v11  ;;  %v1506_v14 = vmul.f32 0.015625, %v1504_v12 }
 0x32f   : > { %v1470_v15 = vadd.f32 1e-05, %v1469_v13  ;;  %v1508_v16 = vadd.f32 1e-05, %v1506_v14 }
 0x331   : > { %5077 = vrsqrt.f32 %v1470_v15 }
 0x332   : > { %5079 = vrsqrt.f32 %v1508_v16 }
 0x337   : > { %v5076_v17 = vpop.eup %5075 }
 0x338   : > { %v1511_v19 = vmul.f32 %v5076_v17, %v5421_v36 }
 0x33a   : > { %v1519_v21 = vmul.f32 %v4147_v18, %v1511_v19 }
 0x33b   : > { %v5078_v23 = vpop.eup %5077 }
 0x33c   : > { %v5080_v25 = vpop.eup %5079  ;;  %v1472_v26 = vmul.f32 %v5078_v23, %v5419_v35  ;;  %v1527_v27 = vadd.f32 %v4148_v20, %v1519_v21 }
 0x33d   : > { %v1512_v28 = vmul.f32 %v5080_v25, %v5427_v41 }
 0x33e   : > { %4483 = vmatprep.mubr.msk.f32.mxu1 %vm1376_vm2, %v1527_v27  ;;  %v1479_v30 = vmul.f32 %v4145_v24, %v1472_v26 }
 0x33f   : > { %v1520_v31 = vmul.f32 %v4147_v18, %v1512_v28 }
 0x340   : > { %v1486_v32 = vadd.f32 %v4146_v29, %v1479_v30 }
 0x341   : > { %v1528_v33 = vadd.f32 %v4148_v20, %v1520_v31 }
 0x342   : > { %4465 = vmatmul.mubr.msk.f32.vlgmr.msra.gmra.mrb[4].mxu0 %vm1376_vm2, %v1486_v32 }
 0x343   : > { %4484 = vmatmul.mubr.msk.f32.vlgmr.msra.gmra.mrb[0].mxu1 %vm1376_vm2, %v1528_v33  ;;  %4490 = vmatprep.mubr.msk.f32.mxu0 %vm5184_vm3, %v5185_v7 }
 0x344   : > { %4504 = vmatprep.mubr.msk.f32.mxu1 %vm5184_vm3, %v5185_v7 }
 0x415   : > { %v1604_v35 = vpop.f32.mrb[4].mxu0 }
 0x416   : > { %v4485_v36 = vpop.f32.mrb[0].mxu1  ;;  %v4466_v37 = vpop.f32.mrb[5].mxu0  ;;  %v1605_v45 = vadd.f32 %v4149_v44, %v1604_v35 }
 0x417   : > { %v1692_v38 = vadd.f32 %v4485_v36, %v4151_v34  ;;  %v1686_v39 = vpop.f32.mrb[1].mxu1 }
 0x418   : > { %v1687_v40 = vadd.f32 %v4151_v34, %v1686_v39 }
 0x41a   : > { %v5473_v41 = vpack.i.bf16 %v1692_v38, %v1687_v40  ;;  %v4719_v42 = vpack.c.bf16 %v1692_v38, %v1687_v40 }
 0x41c   : > { %5011 = vrot.lane.b32.xlu1 %v5473_v41, %s5186_s7  ;;  %5006 = vrot.lane.b32.xlu0 %v5473_v41, %s5187_s10 }
 0x41d   : > { %4721 = vmatpush3.bf16.xpose.msk.msra.mxu0 %vm5477_vm5, %v4719_v42 }
 0x41e   : > { %4722 = vmatprep.subr.bf16.mxu0 %v5183_v52 }
 0x420   : > { %5016 = vrot.lane.b32.xlu1 %v5473_v41, %s5188_s11  ;;  %1857 = vrot.lane.b32.xlu0 %v1605_v45, %s5186_s7 }
 0x424   : > { %4491 = vmatmul.mubr.msk.f32.vlgmr.msra.gmra.mrb[6].mxu0 %vm1695_vm4, %v1605_v45  ;;  %1775 = vrot.lane.b32.xlu1 %v1605_v45, %s5187_s10 }
 0x425   : > { %4497 = vmatprep.mubr.msk.f32.mxu0 %vm5184_vm3, %v5185_v7 }
 0x428   : > { %1939 = vrot.lane.b32.xlu1 %v1605_v45, %s5188_s11 }
 0x48e   : > { %v5012_v46 = vpop.permute.xlu1 %5011  ;;  %v5007_v47 = vpop.permute.xlu0 %5006 }
 0x48f   : > { %v5014_v48 = vunpack.i.h.bf16 %v5012_v46  ;;  %v5013_v49 = vunpack.i.l.bf16 %v5012_v46  ;;  %v5009_v50 = vunpack.i.h.bf16 %v5007_v47  ;;  %v5008_v51 = vunpack.i.l.bf16 %v5007_v47 }
 0x491   : > { %v4727_v53 = vpack.c.bf16 %v5014_v48, %v5013_v49  ;;  %v4723_v54 = vpack.c.bf16 %v5009_v50, %v5008_v51 }
 0x492   : > { %v5017_v55 = vpop.permute.xlu1 %5016  ;;  %v1858_v59 = vpop.permute.xlu0 %1857 }
 0x493   : > { %4725 = vmatpush3.bf16.xpose.msk.msra.mxu0 %vm5477_vm5, %v4723_v54  ;;  %4729 = vmatpush3.bf16.xpose.msk.msra.mxu1 %vm5477_vm5, %v4727_v53  ;;  %v5019_v56 = vunpack.i.h.bf16 %v5017_v55  ;;  %v5018_v57 = vunpack.i.l.bf16 %v5017_v55 }
 0x494   : > { %4730 = vmatprep.subr.bf16.mxu0 %v5183_v52  ;;  %4734 = vmatprep.subr.bf16.mxu1 %v5183_v52 }
 0x495   : > { %v4731_v58 = vpack.c.bf16 %v5019_v56, %v5018_v57 }
 0x496   : > { %v1776_v60 = vpop.permute.xlu1 %1775 }
 0x49a   : > { %4498 = vmatmul.mubr.msk.f32.vlgmr.msra.gmra.mrb[8].mxu0 %vm1695_vm4, %v1776_v60  ;;  %4505 = vmatmul.mubr.msk.f32.vlgmr.msra.gmra.mrb[2].mxu1 %vm1695_vm4, %v1858_v59  ;;  %v1940_v61 = vpop.permute.xlu1 %1939 }
 0x49b   : > { %4733 = vmatpush3.bf16.xpose.msk.msra.mxu0 %vm5477_vm5, %v4731_v58  ;;  %4511 = vmatprep.mubr.msk.f32.mxu0 %vm5184_vm3, %v5185_v7 }
 0x49c   : > { %4737 = vmatprep.subr.bf16.mxu0 %v5183_v52  ;;  %4518 = vmatprep.mubr.msk.f32.mxu1 %vm5184_vm3, %v5185_v7 }
 0x4a2   : > { %4512 = vmatmul.mubr.msk.f32.vlgmr.msra.gmra.mrb[10].mxu0 %vm1695_vm4, %v1940_v61 }
 0x4a3   : > { %4525 = vmatprep.mubr.msk.f32.mxu0 %vm5184_vm3, %v5185_v7 }
 0x4f7   : > { %v1771_v62 = vpop.f32.mrb[6].mxu0 }
 0x4f8   : > { %v4492_v63 = vpop.f32.mrb[7].mxu0  ;;  %v2021_v0 = vsel %vm1695_vm4, %v1771_v62, -inf }
 0x4f9   : > { %2022 = vmax.xlane.f32.xlu0 %v2021_v0  ;;  %v1133_v63 = vld [vmem:[%s5936_s23 + $0x8] sm:$0xff]  ;;  %v1134_v0 = vld [vmem:[%s5936_s23 + $0x10] sm:$0xff] }
 0x56d   : > { %v1853_v1 = vpop.f32.mrb[8].mxu0  ;;  %v1935_v2 = vpop.f32.mrb[2].mxu1 }
 0x56e   : > { %v4499_v3 = vpop.f32.mrb[9].mxu0  ;;  %v4506_v4 = vpop.f32.mrb[3].mxu1  ;;  %v2027_v5 = vsel %vm1695_vm4, %v1935_v2, -inf  ;;  %v2024_v6 = vsel %vm1695_vm4, %v1853_v1, -inf }
 0x56f   : > { %2028 = vmax.xlane.f32.xlu0 %v2027_v5  ;;  %2025 = vmax.xlane.f32.xlu1 %v2024_v6  ;;  %v1136_v4 = vld [vmem:[%s5936_s23 + $0x20] sm:$0xff]  ;;  %v1137_v5 = vld [vmem:[%s5936_s23 + $0x28] sm:$0xff] }
 0x575   : > { %v2017_v8 = vpop.f32.mrb[10].mxu0 }
 0x576   : > { %v4513_v9 = vpop.f32.mrb[11].mxu0  ;;  %v2030_v10 = vsel %vm1695_vm4, %v2017_v8, -inf }
 0x577   : > { %2031 = vmax.xlane.f32.xlu0 %v2030_v10  ;;  %v1138_v10 = vld [vmem:[%s5936_s23 + $0x30] sm:$0xff] }
 0x586   : > { %v2023_v11 = vpop.xlane.xlu0 %2022 }
 0x587   : > { %v2033_v12 = vsub.f32 %v1771_v62, %v2023_v11  ;;  %v1132_v62 = vld [vmem:[%s5936_s23] sm:$0xff]  ;;  %v1139_v11 = vld [vmem:[%s5936_s23 + $0x38] sm:$0xff] }
 0x589   : > { %v2037_v13 = vmul.f32 1.442695, %v2033_v12 }
 0x58b   : > { %5081 = vpow2.f32 %v2037_v13 }
 0x595   : > { %v5082_v14 = vpop.eup %5081 }
 0x596   : > { %v2045_v15 = vsel %vm1695_vm4, %v5082_v14, 0.0 }
 0x597   : > { %2046 = vadd.xlane.f32.xlu0 %v2045_v15 }
 0x5fc   : > { %v2029_v16 = vpop.xlane.xlu0 %2028  ;;  %v2026_v17 = vpop.xlane.xlu1 %2025 }
 0x5fd   : > { %v2035_v18 = vsub.f32 %v1935_v2, %v2029_v16  ;;  %v2034_v19 = vsub.f32 %v1853_v1, %v2026_v17  ;;  %v4747_v1 = vpack.c.bf16 %v1133_v63, %v1132_v62  ;;  %v1135_v2 = vld [vmem:[%s5936_s23 + $0x18] sm:$0xff] }
 0x5fe   : > { %v4750_v3 = vpack.c.bf16 %v1135_v2, %v1134_v0 }
 0x5ff   : > { %v2041_v20 = vmul.f32 1.442695, %v2035_v18  ;;  %v2039_v21 = vmul.f32 1.442695, %v2034_v19 }
 0x601   : > { %5083 = vpow2.f32 %v2041_v20 }
 0x602   : > { %5085 = vpow2.f32 %v2039_v21 }
 0x604   : > { %v2032_v27 = vpop.xlane.xlu0 %2031 }
 0x605   : > { %v2036_v28 = vsub.f32 %v2017_v8, %v2032_v27  ;;  %v4753_v8 = vpack.c.bf16 %v1137_v5, %v1136_v4 }
 0x607   : > { %v2043_v29 = vmul.f32 1.442695, %v2036_v28 }
 0x609   : > { %5087 = vpow2.f32 %v2043_v29 }
 0x60b   : > { %v5084_v23 = vpop.eup %5083 }
 0x60c   : > { %v5086_v24 = vpop.eup %5085  ;;  %v2051_v25 = vsel %vm1695_vm4, %v5084_v23, 0.0 }
 0x60d   : > { %v2048_v26 = vsel %vm1695_vm4, %v5086_v24, 0.0  ;;  %2052 = vadd.xlane.f32.xlu0 %v2051_v25  ;;  %v4170_v25 = vld [vmem:[%s5937_s26] ss:$0 sm:$0xff]  ;;  %s5939_s26 = sld [smem:[#allocation8_spill]] }
 0x60e   : > { %2049 = vadd.xlane.f32.xlu1 %v2048_v26 }
 0x613   : > { %v5088_v30 = vpop.eup %5087  ;;  %v1177_v62 = vld [vmem:[%s5939_s26 + $0x88] sm:$0xff]  ;;  %v1160_v63 = vld [vmem:[%s5939_s26] sm:$0xff]  ;;  %v1178_v2 = vld [vmem:[%s5939_s26 + $0x90] sm:$0xff] }
 0x614   : > { %v2054_v31 = vsel %vm1695_vm4, %v5088_v30, 0.0 }
 0x61f   : > { %5026 = vrot.lane.b32.xlu1 %v5473_v41, %s5189_s15 }
 0x623   : > { %5031 = vrot.lane.b32.xlu1 %v5473_v41, %s5913_s16  ;;  %5021 = vrot.lane.b32.xlu0 %v5473_v41, %s5910_s18  ;;  %s5941_s18 = sld [smem:[#allocation5_spill]] }
 0x624   : > { %v2047_v32 = vpop.xlane.xlu0 %2046 }
 0x625   : > { %5089 = vrcp.f32 %v2047_v32 }
 0x62f   : > { %v5090_v42 = vpop.eup %5089 }
 0x630   : > { %v2058_v47 = vmul.f32 %v5090_v42, %v5082_v14  ;;  %v4756_v14 = vpack.c.bf16 %v1139_v11, %v1138_v10  ;;  %v1148_v42 = vld [vmem:[%s5938_s2 + $0x28] sm:$0xff] }
 0x631   : > { %v1181_v10 = vld [vmem:[%s5939_s26 + $0xa8] sm:$0xff] }
 0x647   : > { %2055 = vadd.xlane.f32.xlu1 %v2054_v31 }
 0x658   : > { %5036 = vrot.lane.b32.xlu1 %v5473_v41, %s5911_s22 }
 0x69a   : > { %v2053_v33 = vpop.xlane.xlu0 %2052 }
 0x69b   : > { %v2050_v34 = vpop.xlane.xlu1 %2049  ;;  %5091 = vrcp.f32 %v2053_v33 }
 0x69c   : > { %5093 = vrcp.f32 %v2050_v34 }
 0x69e   : > { %v5022_v35 = vpop.permute.xlu0 %5021 }
 0x69f   : > { %v5027_v36 = vpop.permute.xlu1 %5026  ;;  %v5024_v37 = vunpack.i.h.bf16 %v5022_v35  ;;  %v5023_v38 = vunpack.i.l.bf16 %v5022_v35 }
 0x6a0   : > { %v5029_v39 = vunpack.i.h.bf16 %v5027_v36  ;;  %v5028_v40 = vunpack.i.l.bf16 %v5027_v36  ;;  %v1146_v36 = vld [vmem:[%s5938_s2 + $0x18] sm:$0xff] }
 0x6a1   : > { %v4735_v44 = vpack.c.bf16 %v5024_v37, %v5023_v38  ;;  %v1143_v38 = vld [vmem:[%s5938_s2] sm:$0xff] }
 0x6a2   : > { %v4738_v45 = vpack.c.bf16 %v5029_v39, %v5028_v40  ;;  %v1145_v39 = vld [vmem:[%s5938_s2 + $0x10] sm:$0xff] }
 0x6a3   : > { %v5032_v46 = vpop.permute.xlu1 %5031  ;;  %4736 = vmatpush3.bf16.msra.mxu1 %v4735_v44  ;;  %v4760_v40 = vpack.c.bf16 %v1145_v39, %v1143_v38  ;;  %v1150_v44 = vld [vmem:[%s5938_s2 + $0x38] sm:$0xff] }
 0x6a4   : > { %v5034_v48 = vunpack.i.h.bf16 %v5032_v46  ;;  %v5033_v41 = vunpack.i.l.bf16 %v5032_v46  ;;  %4739 = vmatpush3.bf16.msra.mxu0 %v4738_v45  ;;  %4740 = vmatprep.subr.bf16.mxu1 %v5183_v52  ;;  %v4762_v45 = vpack.c.bf16 %v1150_v44, %v1148_v42  ;;  %v1147_v46 = vld [vmem:[%s5938_s2 + $0x20] sm:$0xff] }
 0x6a5   : > { %v5092_v49 = vpop.eup %5091  ;;  %4743 = vmatprep.subr.bf16.mxu0 %v5183_v52  ;;  %v4172_v44 = vld [vmem:[%s5940_s0] ss:$0 sm:$0xff]  ;;  %s5943_s0 = sld [smem:[#allocation9_spill]] }
 0x6a6   : > { %v5094_v50 = vpop.eup %5093  ;;  %v4741_v51 = vpack.c.bf16 %v5034_v48, %v5033_v41  ;;  %4519 = vmatmul.mubr.msk.f32.vlgmr.msra.gmra.mrb[4].mxu1 %vm1695_vm4, %v2058_v47  ;;  %v2062_v54 = vmul.f32 %v5092_v49, %v5084_v23  ;;  %v1149_v47 = vld [vmem:[%s5938_s2 + $0x30] sm:$0xff]  ;;  %v1152_v41 = vld [vmem:[%s5938_s2 + $0x48] sm:$0xff]  ;;  %v1154_v49 = vld [vmem:[%s5938_s2 + $0x58] sm:$0xff] }
 0x6a7   : > { %v2060_v53 = vmul.f32 %v5094_v50, %v5086_v24  ;;  %4532 = vmatprep.mubr.msk.f32.mxu1 %vm5184_vm3, %v5185_v7  ;;  %v4764_v48 = vpack.c.bf16 %v1149_v47, %v1147_v46  ;;  %v4766_v50 = vpack.c.bf16 %v1154_v49, %v1152_v41  ;;  %v4173_v46 = vld [vmem:[%s5941_s18] ss:$0 sm:$0xff]  ;;  %v1173_v49 = vld [vmem:[%s5939_s26 + $0x68] sm:$0xff]  ;;  %s5944_s18 = sld [smem:[#allocation12_spill]] }
 0x6a8   : > { %4742 = vmatpush3.bf16.msra.mxu1 %v4741_v51  ;;  %v1151_v51 = vld [vmem:[%s5938_s2 + $0x40] sm:$0xff] }
 0x6a9   : > { %4526 = vmatmul.mubr.msk.f32.vlgmr.msra.gmra.mrb[12].mxu0 %vm1695_vm4, %v2060_v53  ;;  %4746 = vmatprep.subr.bf16.mxu1 %v5183_v52  ;;  %v1153_v53 = vld [vmem:[%s5938_s2 + $0x50] sm:$0xff]  ;;  %v1172_v41 = vld [vmem:[%s5939_s26 + $0x60] sm:$0xff] }
 0x6aa   : > { %4539 = vmatprep.mubr.msk.f32.mxu0 %vm5184_vm3, %v5185_v7 }
 0x6ab   : > { %4533 = vmatmul.mubr.msk.f32.vlgmr.msra.gmra.mrb[6].mxu1 %vm1695_vm4, %v2062_v54  ;;  %v4768_v54 = vpack.c.bf16 %v1153_v53, %v1151_v51  ;;  %v1190_v51 = vld [vmem:[%s5939_s26 + $0xf0] sm:$0xff]  ;;  %v1191_v53 = vld [vmem:[%s5939_s26 + $0xf8] sm:$0xff] }
 0x6ac   : > { %4558 = vmatprep.mubr.msk.f32.mxu1 %vm5184_vm3, %v5185_v7  ;;  %4748 = vmatpush3.bf16.msra.mxu1 %v4747_v1  ;;  %v1161_v1 = vld [vmem:[%s5939_s26 + $0x8] sm:$0xff] }
 0x6ad   : > { %4749 = vmatprep.subr.bf16.mxu1 %v5183_v52  ;;  %v4776_v4 = vpack.c.bf16 %v1161_v1, %v1160_v63 }
 0x6b0   : > { %4751 = vmatpush3.bf16.msra.mxu1 %v4750_v3  ;;  %v1179_v3 = vld [vmem:[%s5939_s26 + $0x98] sm:$0xff] }
 0x6b1   : > { %4752 = vmatprep.subr.bf16.mxu1 %v5183_v52  ;;  %v4778_v5 = vpack.c.bf16 %v1179_v3, %v1178_v2 }
 0x6b4   : > { %4754 = vmatpush3.bf16.msra.mxu1 %v4753_v8  ;;  %v1163_v8 = vld [vmem:[%s5939_s26 + $0x18] sm:$0xff] }
 0x6b5   : > { %4755 = vmatprep.subr.bf16.mxu1 %v5183_v52 }
 0x6b8   : > { %4757 = vmatpush3.bf16.msra.mxu1 %v4756_v14  ;;  %v1165_v14 = vld [vmem:[%s5939_s26 + $0x28] sm:$0xff] }
 0x6d4   : > { %v2056_v55 = vpop.xlane.xlu1 %2055 }
 0x6d5   : > { %5095 = vrcp.f32 %v2056_v55  ;;  %v1156_v55 = vld [vmem:[%s5938_s2 + $0x68] sm:$0xff] }
 0x6d8   : > { %v5037_v56 = vpop.permute.xlu1 %5036 }
 0x6d9   : > { %v5039_v57 = vunpack.i.h.bf16 %v5037_v56  ;;  %v5038_v58 = vunpack.i.l.bf16 %v5037_v56  ;;  %v1158_v56 = vld [vmem:[%s5938_s2 + $0x78] sm:$0xff] }
 0x6db   : > { %v4744_v59 = vpack.c.bf16 %v5039_v57, %v5038_v58  ;;  %v4770_v57 = vpack.c.bf16 %v1158_v56, %v1156_v55  ;;  %v1155_v58 = vld [vmem:[%s5938_s2 + $0x60] sm:$0xff]  ;;  %v1174_v55 = vld [vmem:[%s5939_s26 + $0x70] sm:$0xff]  ;;  %v1175_v56 = vld [vmem:[%s5939_s26 + $0x78] sm:$0xff] }
 0x6dd   : > { %4745 = vmatpush3.bf16.msra.mxu0 %v4744_v59  ;;  %v1157_v59 = vld [vmem:[%s5938_s2 + $0x70] sm:$0xff] }
 0x6df   : > { %v5096_v60 = vpop.eup %5095 }
 0x6e0   : > { %v2064_v61 = vmul.f32 %v5096_v60, %v5088_v30  ;;  %v4772_v60 = vpack.c.bf16 %v1157_v59, %v1155_v58  ;;  %v2506_v58 = vlaneseq }
 0x6e2   : > { %4540 = vmatmul.mubr.msk.f32.vlgmr.msra.gmra.mrb[14].mxu0 %vm1695_vm4, %v2064_v61  ;;  %v1176_v61 = vld [vmem:[%s5939_s26 + $0x80] sm:$0xff] }
 0x6e3   : > { %2583 = vmatprep.mubr.f32.mxu0 %v5185_v7  ;;  %v4774_v0 = vpack.c.bf16 %v1177_v62, %v1176_v61 }
 0x6e5   : > { %4775 = vmatprep.subr.bf16.mxu1 %v4774_v0 }
 0x779   : > { %v2140_v6 = vpop.f32.mrb[4].mxu1 }
 0x77a   : > { %v4520_v9 = vpop.f32.mrb[5].mxu1 }
 0x77b   : > { %v1180_v9 = vld [vmem:[%s5939_s26 + $0xa0] sm:$0xff] }
 0x77c   : > { %v2219_v12 = vpop.f32.mrb[12].mxu0 }
 0x77d   : > { %2382 = vrot.lane.b32.xlu0 %v2219_v12, %s5911_s22  ;;  %v4527_v13 = vpop.f32.mrb[13].mxu0  ;;  %v4782_v12 = vpack.c.bf16 %v1181_v10, %v1180_v9  ;;  %s5942_s22 = sld [smem:[#allocation7_spill]]  ;;  %v4175_v10 = vld [vmem:[%s5943_s0] ss:$0 sm:$0xff]  ;;  %s5946_s0 = sld [smem:[#allocation10_spill]] }
 0x77e   : > { %v2298_v15 = vpop.f32.mrb[6].mxu1  ;;  %v1164_v13 = vld [vmem:[%s5939_s26 + $0x20] sm:$0xff] }
 0x77f   : > { %2386 = vrot.lane.b32.xlu1 %v2298_v15, %s5913_s16  ;;  %v4534_v16 = vpop.f32.mrb[7].mxu1  ;;  %v1182_v15 = vld [vmem:[%s5939_s26 + $0xb0] sm:$0xff]  ;;  %s5947_s16 = sld [smem:[#allocation11_spill]] }
 0x780   : > { %v1183_v16 = vld [vmem:[%s5939_s26 + $0xb8] sm:$0xff] }
 0x7b5   : > { %v2377_v17 = vpop.f32.mrb[14].mxu0 }
 0x7b6   : > { %2390 = vrot.lane.b32.xlu0 %v2377_v17, %s5189_s15  ;;  %v4541_v18 = vpop.f32.mrb[15].mxu0  ;;  %v4784_v17 = vpack.c.bf16 %v1165_v14, %v1164_v13 }
 0x7b7   : > { %v4786_v18 = vpack.c.bf16 %v1183_v16, %v1182_v15 }
 0x7ef   : > { %v2383_v19 = vpop.permute.xlu0 %2382 }
 0x7f0   : > { %v2393_v20 = vsel %vm1695_vm4, %v2140_v6, %v2383_v19  ;;  %v1162_v6 = vld [vmem:[%s5939_s26 + $0x10] sm:$0xff] }
 0x7f1   : > { %v2387_v21 = vpop.permute.xlu1 %2386  ;;  %v4780_v11 = vpack.c.bf16 %v1163_v8, %v1162_v6  ;;  %v1166_v19 = vld [vmem:[%s5939_s26 + $0x30] sm:$0xff] }
 0x7f2   : > { %v2395_v23 = vsel %vm2394_vm6, %v2393_v20, %v2387_v21  ;;  %v1167_v20 = vld [vmem:[%s5939_s26 + $0x38] sm:$0xff]  ;;  %v1184_v21 = vld [vmem:[%s5939_s26 + $0xc0] sm:$0xff] }
 0x828   : > { %v2391_v24 = vpop.permute.xlu0 %2390 }
 0x829   : > { %v2397_v52 = vsel %vm2396_vm7, %v2395_v23, %v2391_v24  ;;  %v1185_v23 = vld [vmem:[%s5939_s26 + $0xc8] sm:$0xff]  ;;  %v4788_v24 = vpack.c.bf16 %v1167_v20, %v1166_v19 }
 0x82a   : > { %4559 = vmatmul.mubr.msk.f32.vlgmr.msra.gmra.mrb[8].mxu1 %vm1376_vm2, %v2397_v52  ;;  %v4790_v52 = vpack.c.bf16 %v1185_v23, %v1184_v21 }
 0x82b   : > { %4777 = vmatpush3.bf16.msra.mxu1 %v4776_v4 }
 0x82c   : > { %4779 = vmatprep.subr.bf16.mxu1 %v4778_v5 }
 0x82f   : > { %4781 = vmatpush3.bf16.msra.mxu1 %v4780_v11 }
 0x830   : > { %4783 = vmatprep.subr.bf16.mxu1 %v4782_v12 }
 0x833   : > { %4785 = vmatpush3.bf16.msra.mxu1 %v4784_v17 }
 0x834   : > { %4787 = vmatprep.subr.bf16.mxu1 %v4786_v18 }
 0x837   : > { %4789 = vmatpush3.bf16.msra.mxu1 %v4788_v24 }
 0x838   : > { %4791 = vmatprep.subr.bf16.mxu1 %v4790_v52 }
 0x8fd   : > { %v2473_v26 = vpop.f32.mrb[8].mxu1 }
 0x8fe   : > { %v2474_v27 = vadd.f32 %v4170_v25, %v2473_v26  ;;  %v4560_v28 = vpop.f32.mrb[9].mxu1  ;;  %v1168_v25 = vld [vmem:[%s5939_s26 + $0x40] sm:$0xff]  ;;  %v1169_v26 = vld [vmem:[%s5939_s26 + $0x48] sm:$0xff] }
 0x8ff   : > { %v1187_v28 = vld [vmem:[%s5939_s26 + $0xd8] sm:$0xff] }
 0x900   : > { %v5565_v29 = vadd.f32 %v2474_v27, %v5411_v22  ;;  %v1144_v22 = vld [vmem:[%s5938_s2 + $0x8] sm:$0xff]  ;;  %v1186_v27 = vld [vmem:[%s5939_s26 + $0xd0] sm:$0xff] }
 0x901   : > { %v4758_v37 = vpack.c.bf16 %v1146_v36, %v1144_v22  ;;  %v1189_v22 = vld [vmem:[%s5939_s26 + $0xe8] sm:$0xff] }
 0x902   : > { %v2478_v30 = vsel %vm1376_vm2, %v5565_v29, 0.0 }
 0x903   : > { %2479 = vadd.xlane.f32.xlu1 %v2478_v30  ;;  %4759 = vmatprep.subr.bf16.mxu0 %v4758_v37  ;;  %v4792_v30 = vpack.c.bf16 %v1169_v26, %v1168_v25 }
 0x904   : > { %4761 = vmatpush1.bf16.msra.mxu0 %v4760_v40 }
 0x905   : > { %4763 = vmatprep.subr.bf16.mxu0 %v4762_v45  ;;  %4793 = vmatpush3.bf16.msra.mxu1 %v4792_v30 }
 0x908   : > { %4765 = vmatpush1.bf16.msra.mxu0 %v4764_v48 }
 0x909   : > { %4767 = vmatprep.subr.bf16.mxu0 %v4766_v50  ;;  %v4800_v50 = vpack.c.bf16 %v1173_v49, %v1172_v41 }
 0x90c   : > { %4769 = vmatpush1.bf16.msra.mxu0 %v4768_v54  ;;  %v4802_v54 = vpack.c.bf16 %v1191_v53, %v1190_v51 }
 0x90d   : > { %4771 = vmatprep.subr.bf16.mxu0 %v4770_v57  ;;  %v4804_v57 = vpack.c.bf16 %v1175_v56, %v1174_v55 }
 0x910   : > { %4773 = vmatpush1.bf16.msra.mxu0 %v4772_v60  ;;  %v1159_v60 = vld [vmem:[%s5942_s22] sm:$0x3]  ;;  %s5945_s22 = sld [smem:[#allocation14_spill]] }
 0x990   : > { %v2480_v31 = vpop.xlane.xlu1 %2479 }
 0x991   : > { %v2481_v32 = vmul.f32 0.015625, %v2480_v31  ;;  %v4794_v31 = vpack.c.bf16 %v1187_v28, %v1186_v27 }
 0x993   : > { %v5570_v33 = vsub.f32 %v5565_v29, %v2481_v32  ;;  %v1170_v32 = vld [vmem:[%s5939_s26 + $0x50] sm:$0xff]  ;;  %4795 = vmatprep.subr.bf16.mxu1 %v4794_v31 }
 0x995   : > { %v2483_v34 = vmul.f32 %v5570_v33, %v5570_v33 }
 0x997   : > { %v2484_v35 = vsel %vm1376_vm2, %v2483_v34, 0.0  ;;  %v1171_v34 = vld [vmem:[%s5939_s26 + $0x58] sm:$0xff] }
 0x998   : > { %2485 = vadd.xlane.f32.xlu0 %v2484_v35  ;;  %v1188_v35 = vld [vmem:[%s5939_s26 + $0xe0] sm:$0xff]  ;;  %v4796_v36 = vpack.c.bf16 %v1171_v34, %v1170_v32  ;;  %v1196_v34 = vld [vmem:[%s5944_s18 + $0x8] sm:$0xff] }
 0x999   : > { %v4798_v37 = vpack.c.bf16 %v1189_v22, %v1188_v35  ;;  %v1195_v32 = vld [vmem:[%s5944_s18] sm:$0xff]  ;;  %v1197_v22 = vld [vmem:[%s5944_s18 + $0x10] sm:$0xff] }
 0x99a   : > { %4797 = vmatpush3.bf16.msra.mxu1 %v4796_v36  ;;  %v4806_v35 = vpack.c.bf16 %v1196_v34, %v1195_v32  ;;  %v1198_v36 = vld [vmem:[%s5944_s18 + $0x18] sm:$0xff] }
 0x99b   : > { %4799 = vmatprep.subr.bf16.mxu1 %v4798_v37  ;;  %v4810_v37 = vpack.c.bf16 %v1198_v36, %v1197_v22 }
 0x99c   : > { %4807 = vmatprep.subr.bf16.mxu0 %v4806_v35 }
 0x99e   : > { %4801 = vmatpush3.bf16.msra.mxu1 %v4800_v50 }
 0x99f   : > { %4803 = vmatprep.subr.bf16.mxu1 %v4802_v54  ;;  %v4176_v54 = vld [vmem:[%s5946_s0] ss:$0 sm:$0xff]  ;;  %s5948_s0 = sld [smem:[#allocation13_spill]] }
 0x9a2   : > { %4805 = vmatpush3.bf16.msra.mxu1 %v4804_v57  ;;  %v4177_v57 = vld [vmem:[%s5947_s16] ss:$0 sm:$0xff]  ;;  %s5949_s16 = sld [smem:[#allocation15_spill]] }
 0xa25   : > { %v2486_v38 = vpop.xlane.xlu0 %2485 }
 0xa26   : > { %v2487_v39 = vmul.f32 0.015625, %v2486_v38  ;;  %v1199_v38 = vld [vmem:[%s5944_s18 + $0x20] sm:$0xff] }
 0xa28   : > { %v2488_v40 = vadd.f32 1e-05, %v2487_v39  ;;  %v1200_v39 = vld [vmem:[%s5944_s18 + $0x28] sm:$0xff] }
 0xa2a   : > { %5097 = vrsqrt.f32 %v2488_v40  ;;  %v4814_v40 = vpack.c.bf16 %v1200_v39, %v1199_v38 }
 0xa34   : > { %v5098_v42 = vpop.eup %5097 }
 0xa35   : > { %v2490_v45 = vmul.f32 %v5098_v42, %v5570_v33  ;;  %v5627_v33 = vshrl.u32 %v2506_v58, 7  ;;  %v1201_v42 = vld [vmem:[%s5944_s18 + $0x30] sm:$0xff] }
 0xa37   : > { %v2497_v47 = vmul.f32 %v4172_v44, %v2490_v45  ;;  %v2508_v59 = vsub.s32 0, %v5627_v33  ;;  %v2512_v61 = vsub.s32 1, %v5627_v33  ;;  %v1202_v44 = vld [vmem:[%s5944_s18 + $0x38] sm:$0xff] }
 0xa38   : > { %v4818_v45 = vpack.c.bf16 %v1202_v44, %v1201_v42 }
 0xa39   : > { %v2504_v48 = vadd.f32 %v4173_v46, %v2497_v47  ;;  %v2509_v62 = vrot.slane %v1159_v60, %v2508_v59  ;;  %v2513_v63 = vrot.slane %v1159_v60, %v2512_v61  ;;  %v1204_v46 = vld [vmem:[%s5945_s22] sm:$0xff]  ;;  %v1205_v47 = vld [vmem:[%s5945_s22 + $0x8] sm:$0xff] }
 0xa3b   : > { %4174 = vmatmul.mubr.msk.f32.vlgmr.msra.gmra.mrb[16].mxu0 %vm1376_vm2, %v2504_v48  ;;  %v4822_v48 = vpack.c.bf16 %v1205_v47, %v1204_v46 }
 0xa3c   : > { %4809 = vmatpush3.bf16.msra.mxu0 %v4806_v35 }
 0xa3d   : > { %4811 = vmatprep.subr.bf16.mxu0 %v4810_v37 }
 0xa40   : > { %4813 = vmatpush3.bf16.msra.mxu0 %v4810_v37 }
 0xa41   : > { %4815 = vmatprep.subr.bf16.mxu0 %v4814_v40 }
 0xa44   : > { %4817 = vmatpush3.bf16.msra.mxu0 %v4814_v40 }
 0xa45   : > { %4819 = vmatprep.subr.bf16.mxu0 %v4818_v45 }
 0xa48   : > { %4821 = vmatpush3.bf16.msra.mxu0 %v4818_v45 }
 0xa49   : > { %4823 = vmatprep.subr.bf16.mxu0 %v4822_v48 }
 0xb0e   : > { %v2585_v0 = vpop.f32.mrb[16].mxu0 }
 0xb0f   : > { %v2586_v1 = vadd.f32 %v2585_v0, %v2509_v62  ;;  %v2587_v2 = vpop.f32.mrb[17].mxu0 }
 0xb10   : > { %v2588_v3 = vadd.f32 %v2587_v2, %v2513_v63  ;;  %v1207_v2 = vld [vmem:[%s5945_s22 + $0x18] sm:$0xff] }
 0xb11   : > { %v2590_v5 = vmax.f32 %v2586_v1, 0.0  ;;  %v1206_v1 = vld [vmem:[%s5945_s22 + $0x10] sm:$0xff] }
 0xb12   : > { %v2591_v4 = vmax.f32 %v2588_v3, 0.0 }
 0xb14   : > { %2656 = vmatprep.mubr.f32.mxu1 %v2591_v4 }
 0xb15   : > { %2657 = vmatmul.mubr.f32.vlgmr.msra.gmra.mrb[10].mxu1 %v2590_v5  ;;  %v4826_v5 = vpack.c.bf16 %v1207_v2, %v1206_v1 }
 0xbe8   : > { %v4321_v6 = vpop.f32.mrb[10].mxu1 }
 0xbe9   : > { %v4322_v8 = vpop.f32.mrb[11].mxu1 }
 0xbea   : > { %v4323_v9 = vadd.f32 %v4322_v8, %v4321_v6  ;;  %v1208_v6 = vld [vmem:[%s5945_s22 + $0x20] sm:$0xff]  ;;  %v1209_v8 = vld [vmem:[%s5945_s22 + $0x28] sm:$0xff] }
 0xbec   : > { %v2662_v11 = vadd.f32 %v4323_v9, %v5565_v29  ;;  %v4830_v9 = vpack.c.bf16 %v1209_v8, %v1208_v6 }
 0xbee   : > { %v5638_v12 = vadd.f32 %v4175_v10, %v2662_v11  ;;  %v1210_v10 = vld [vmem:[%s5945_s22 + $0x30] sm:$0xff]  ;;  %v1211_v11 = vld [vmem:[%s5945_s22 + $0x38] sm:$0xff] }
 0xbf0   : > { %v2670_v13 = vsel %vm1376_vm2, %v5638_v12, 0.0 }
 0xbf1   : > { %2679 = vadd.xlane.f32.xlu0 %v2670_v13  ;;  %v2671_v14 = vrot.slane %v2670_v13, 4 }
 0xbf3   : > { %v2672_v15 = vadd.f32 %v2671_v14, %v2670_v13  ;;  %v4834_v13 = vpack.c.bf16 %v1211_v11, %v1210_v10  ;;  %v4178_v14 = vld [vmem:[%s5948_s0] ss:$0 sm:$0xff]  ;;  %s5955_s0 = sld [smem:[#allocation16_spill]] }
 0xbf5   : > { %v2673_v16 = vrot.slane %v2672_v15, 2 }
 0xbf7   : > { %v2674_v17 = vadd.f32 %v2673_v16, %v2672_v15 }
 0xbf9   : > { %v2675_v18 = vrot.slane %v2674_v17, 1 }
 0xbfb   : > { %v2676_v19 = vadd.f32 %v2675_v18, %v2674_v17  ;;  %v4181_v18 = vld [vmem:[%s5949_s16] ss:$0 sm:$0xff]  ;;  %s5956_s16 = sld [smem:[#allocation17_spill]] }
 0xbfd   : > { %v5642_v20 = vmul.f32 0.125, %v2676_v19 }
 0xbff   : > { %v2682_v29 = vsel %vm2681_vm8, %v5642_v20, 0.0 }
 0xc00   : > { %2683 = vadd.xlane.f32.xlu0 %v2682_v29 }
 0xc7e   : > { %v2680_v21 = vpop.xlane.xlu0 %2679 }
 0xc7f   : > { %v2685_v23 = vmul.f32 0.015625, %v2680_v21 }
 0xc81   : > { %v2687_v24 = vsub.f32 %v5638_v12, %v2685_v23 }
 0xc83   : > { %v2689_v52 = vmul.f32 %v2687_v24, %v2687_v24 }
 0xc85   : > { %v2691_v25 = vsel %vm1376_vm2, %v2689_v52, 0.0 }
 0xc86   : > { %2692 = vadd.xlane.f32.xlu1 %v2691_v25 }
 0xc8d   : > { %v2684_v26 = vpop.xlane.xlu0 %2683 }
 0xc8e   : > { %v2686_v27 = vmul.f32 0.015625, %v2684_v26 }
 0xc90   : > { %v2688_v28 = vsub.f32 %v5642_v20, %v2686_v27 }
 0xc92   : > { %v2690_v30 = vmul.f32 %v2688_v28, %v2688_v28 }
 0xc94   : > { %v2694_v31 = vsel %vm2681_vm8, %v2690_v30, 0.0 }
 0xc95   : > { %2695 = vadd.xlane.f32.xlu0 %v2694_v31 }
 0xd13   : > { %v2693_v41 = vpop.xlane.xlu1 %2692 }
 0xd14   : > { %v2697_v49 = vmul.f32 0.015625, %v2693_v41 }
 0xd16   : > { %v2699_v50 = vadd.f32 1e-05, %v2697_v49 }
 0xd18   : > { %5099 = vrsqrt.f32 %v2699_v50 }
 0xd22   : > { %v5100_v51 = vpop.eup %5099  ;;  %v2696_v53 = vpop.xlane.xlu0 %2695 }
 0xd23   : > { %v2698_v55 = vmul.f32 0.015625, %v2696_v53  ;;  %v2703_v56 = vmul.f32 %v5100_v51, %v2687_v24 }
 0xd25   : > { %v2700_v58 = vadd.f32 1e-05, %v2698_v55  ;;  %v2711_v60 = vmul.f32 %v4176_v54, %v2703_v56 }
 0xd27   : > { %5101 = vrsqrt.f32 %v2700_v58  ;;  %v2719_v62 = vadd.f32 %v4177_v57, %v2711_v60 }
 0xd29   : > { %4577 = vmatprep.mubr.msk.f32.mxu0 %vm1376_vm2, %v2719_v62 }
 0xd31   : > { %v5102_v63 = vpop.eup %5101 }
 0xd32   : > { %v2704_v0 = vmul.f32 %v5102_v63, %v2688_v28 }
 0xd34   : > { %v2712_v3 = vmul.f32 %v4176_v54, %v2704_v0 }
 0xd36   : > { %v2720_v4 = vadd.f32 %v4177_v57, %v2712_v3 }
 0xd38   : > { %4578 = vmatmul.mubr.msk.f32.vlgmr.msra.gmra.mrb[18].mxu0 %vm1376_vm2, %v2720_v4 }
 0xd39   : > { %4825 = vmatpush3.bf16.msra.mxu0 %v4822_v48  ;;  %4596 = vmatprep.mubr.msk.f32.mxu0 %vm1376_vm2, %v2719_v62 }
 0xd3a   : > { %4827 = vmatprep.subr.bf16.mxu0 %v4826_v5 }
 0xd3d   : > { %4829 = vmatpush3.bf16.msra.mxu0 %v4826_v5 }
 0xd3e   : > { %4831 = vmatprep.subr.bf16.mxu0 %v4830_v9 }
 0xd41   : > { %4833 = vmatpush3.bf16.msra.mxu0 %v4830_v9 }
 0xd42   : > { %4835 = vmatprep.subr.bf16.mxu0 %v4834_v13 }
 0xd45   : > { %4837 = vmatpush3.bf16.msra.mxu0 %v4834_v13 }
 0xd48   : > { %4597 = vmatmul.mubr.msk.f32.vlgmr.msra.gmra.mrb[20].mxu0 %vm1376_vm2, %v2720_v4 }
 0xe0b   : > { %v4579_v15 = vpop.f32.mrb[18].mxu0 }
 0xe0c   : > { %v2799_v16 = vpop.f32.mrb[19].mxu0  ;;  %v2805_v25 = vadd.f32 %v4579_v15, %v4178_v14 }
 0xe0d   : > { %v2800_v17 = vadd.f32 %v4178_v14, %v2799_v16 }
 0xe0f   : > { %4603 = vmatprep.mubr.msk.f32.mxu1 %vm1695_vm4, %v2800_v17 }
 0xe1b   : > { %v4598_v19 = vpop.f32.mrb[20].mxu0 }
 0xe1c   : > { %v2886_v29 = vadd.f32 %v4598_v19, %v4181_v18  ;;  %v2880_v21 = vpop.f32.mrb[21].mxu0 }
 0xe1d   : > { %v2881_v23 = vadd.f32 %v4181_v18, %v2880_v21 }
 0xe1f   : > { %v5675_v24 = vpack.i.bf16 %v2886_v29, %v2881_v23  ;;  %v4838_v52 = vpack.c.bf16 %v2886_v29, %v2881_v23 }
 0xe21   : > { %5046 = vrot.lane.b32.xlu0 %v5675_v24, %s5186_s7  ;;  %5041 = vrot.lane.b32.xlu1 %v5675_v24, %s5187_s10 }
 0xe22   : > { %4840 = vmatprep.subr.msk.bf16.mxu1 %vm5477_vm5, %v4838_v52 }
 0xe23   : > { %4843 = vmatpush3.bf16.xpose.msk.msra.mxu1 %vm5477_vm5, %v4838_v52 }
 0xe25   : > { %3067 = vrot.lane.b32.xlu0 %v2800_v17, %s5186_s7  ;;  %2976 = vrot.lane.b32.xlu1 %v2800_v17, %s5187_s10 }
 0xe29   : > { %3158 = vrot.lane.b32.xlu0 %v2800_v17, %s5188_s11  ;;  %5051 = vrot.lane.b32.xlu1 %v5675_v24, %s5188_s11 }
 0xe2a   : > { %4604 = vmatmul.mubr.msk.f32.vlgmr.msra.gmra.mrb[12].mxu1 %vm1695_vm4, %v2805_v25 }
 0xe2d   : > { %2978 = vrot.lane.b32.xlu1 %v2805_v25, %s5187_s10  ;;  %s5951_s10 = smov 16  }
 0xe31   : > { %3069 = vrot.lane.b32.xlu1 %v2805_v25, %s5186_s7  ;;  %s5950_s7 = smov 32  }
 0xe35   : > { %3160 = vrot.lane.b32.xlu1 %v2805_v25, %s5188_s11  ;;  %s5952_s11 = smov 64  }
 0xe93   : > { %v5047_v26 = vpop.permute.xlu0 %5046  ;;  %v5042_v27 = vpop.permute.xlu1 %5041 }
 0xe94   : > { %v5049_v28 = vunpack.i.h.bf16 %v5047_v26  ;;  %v5048_v30 = vunpack.i.l.bf16 %v5047_v26  ;;  %v5044_v31 = vunpack.i.h.bf16 %v5042_v27  ;;  %v5043_v32 = vunpack.i.l.bf16 %v5042_v27 }
 0xe96   : > { %v4850_v34 = vpack.c.bf16 %v5049_v28, %v5048_v30  ;;  %v4844_v35 = vpack.c.bf16 %v5044_v31, %v5043_v32 }
 0xe97   : > { %v3068_v22 = vpop.permute.xlu0 %3067  ;;  %v2977_v36 = vpop.permute.xlu1 %2976 }
 0xe98   : > { %4846 = vmatprep.subr.msk.bf16.mxu0 %vm5477_vm5, %v4844_v35  ;;  %4610 = vmatprep.mubr.msk.f32.mxu0 %vm1695_vm4, %v2977_v36 }
 0xe99   : > { %4852 = vmatprep.subr.msk.bf16.mxu1 %vm5477_vm5, %v4850_v34  ;;  %4617 = vmatprep.mubr.msk.f32.mxu1 %vm1695_vm4, %v3068_v22 }
 0xe9a   : > { %4849 = vmatpush3.bf16.xpose.msk.msra.mxu0 %vm5477_vm5, %v4844_v35  ;;  %4855 = vmatpush3.bf16.xpose.msk.msra.mxu1 %vm5477_vm5, %v4850_v34 }
 0xe9b   : > { %v5052_v37 = vpop.permute.xlu1 %5051  ;;  %v3159_v44 = vpop.permute.xlu0 %3158 }
 0xe9c   : > { %v5054_v38 = vunpack.i.h.bf16 %v5052_v37  ;;  %v5053_v39 = vunpack.i.l.bf16 %v5052_v37 }
 0xe9e   : > { %v4856_v40 = vpack.c.bf16 %v5054_v38, %v5053_v39 }
 0xe9f   : > { %v2979_v42 = vpop.permute.xlu1 %2978 }
 0xea0   : > { %4858 = vmatprep.subr.msk.bf16.mxu0 %vm5477_vm5, %v4856_v40 }
 0xea1   : > { %4611 = vmatmul.mubr.msk.f32.vlgmr.msra.gmra.mrb[22].mxu0 %vm1695_vm4, %v2979_v42 }
 0xea2   : > { %4861 = vmatpush3.bf16.xpose.msk.msra.mxu0 %vm5477_vm5, %v4856_v40  ;;  %4624 = vmatprep.mubr.msk.f32.mxu0 %vm1695_vm4, %v3159_v44 }
 0xea3   : > { %v3070_v45 = vpop.permute.xlu1 %3069 }
 0xea4   : > { %4618 = vmatmul.mubr.msk.f32.vlgmr.msra.gmra.mrb[14].mxu1 %vm1695_vm4, %v3070_v45 }
 0xea7   : > { %v3161_v46 = vpop.permute.xlu1 %3160 }
 0xea9   : > { %4625 = vmatmul.mubr.msk.f32.vlgmr.msra.gmra.mrb[24].mxu0 %vm1695_vm4, %v3161_v46 }
 0xefd   : > { %v4605_v47 = vpop.f32.mrb[12].mxu1 }
 0xefe   : > { %v2967_v48 = vpop.f32.mrb[13].mxu1  ;;  %v3254_v41 = vsel %vm3253_vm9, %v4605_v47, -inf }
 0xeff   : > { %3255 = vmax.xlane.f32.xlu1 %v3254_v41  ;;  %v3250_v49 = vsel %vm3249_vm10, %v2967_v48, -inf }
 0xf00   : > { %3251 = vmax.xlane.f32.xlu0 %v3250_v49 }
 0xf74   : > { %v4612_v43 = vpop.f32.mrb[22].mxu0 }
 0xf75   : > { %v3058_v50 = vpop.f32.mrb[23].mxu0  ;;  %v3260_v51 = vsel %vm3253_vm9, %v4612_v43, -inf }
 0xf76   : > { %3261 = vmax.xlane.f32.xlu0 %v3260_v51  ;;  %v3257_v56 = vsel %vm3249_vm10, %v3058_v50, -inf }
 0xf77   : > { %v4619_v53 = vpop.f32.mrb[14].mxu1 }
 0xf78   : > { %v3149_v54 = vpop.f32.mrb[15].mxu1  ;;  %v3266_v55 = vsel %vm3253_vm9, %v4619_v53, -inf }
 0xf79   : > { %3267 = vmax.xlane.f32.xlu1 %v3266_v55  ;;  %v3263_v62 = vsel %vm3249_vm10, %v3149_v54, -inf }
 0xf7a   : > { %3258 = vmax.xlane.f32.xlu0 %v3257_v56 }
 0xf7c   : > { %v4626_v57 = vpop.f32.mrb[24].mxu0 }
 0xf7d   : > { %v3240_v58 = vpop.f32.mrb[25].mxu0  ;;  %v3272_v60 = vsel %vm3253_vm9, %v4626_v57, -inf }
 0xf7e   : > { %3273 = vmax.xlane.f32.xlu1 %v3272_v60  ;;  %3264 = vmax.xlane.f32.xlu0 %v3263_v62  ;;  %v3269_v63 = vsel %vm3249_vm10, %v3240_v58, -inf }
 0xf82   : > { %3270 = vmax.xlane.f32.xlu0 %v3269_v63 }
 0xf8c   : > { %v3256_v0 = vpop.xlane.xlu1 %3255 }
 0xf8d   : > { %v3276_v1 = vsub.f32 %v4605_v47, %v3256_v0  ;;  %v3252_v2 = vpop.xlane.xlu0 %3251 }
 0xf8e   : > { %v3275_v3 = vsub.f32 %v2967_v48, %v3252_v2 }
 0xf8f   : > { %v3285_v4 = vmul.f32 1.442695, %v3276_v1 }
 0xf90   : > { %v3283_v5 = vmul.f32 1.442695, %v3275_v3 }
 0xf91   : > { %5103 = vpow2.f32 %v3285_v4 }
 0xf92   : > { %5105 = vpow2.f32 %v3283_v5 }
 0xf9b   : > { %v5720_v6 = vpop.eup %5103 }
 0xf9c   : > { %v5106_v8 = vpop.eup %5105  ;;  %v3302_v9 = vsel %vm3253_vm9, %v5720_v6, 0.0 }
 0xf9d   : > { %3303 = vadd.xlane.f32.xlu1 %v3302_v9  ;;  %v3299_v10 = vsel %vm3249_vm10, %v5106_v8, 0.0 }
 0xf9e   : > { %3300 = vadd.xlane.f32.xlu0 %v3299_v10 }
0x1003   : > { %v3262_v11 = vpop.xlane.xlu0 %3261 }
0x1004   : > { %v3278_v13 = vsub.f32 %v4612_v43, %v3262_v11 }
0x1006   : > { %v3289_v14 = vmul.f32 1.442695, %v3278_v13  ;;  %v3268_v15 = vpop.xlane.xlu1 %3267 }
0x1007   : > { %v3259_v16 = vpop.xlane.xlu0 %3258  ;;  %v3280_v17 = vsub.f32 %v4619_v53, %v3268_v15 }
0x1008   : > { %5107 = vpow2.f32 %v3289_v14  ;;  %v3277_v18 = vsub.f32 %v3058_v50, %v3259_v16 }
0x1009   : > { %v3293_v19 = vmul.f32 1.442695, %v3280_v17 }
0x100a   : > { %v3287_v29 = vmul.f32 1.442695, %v3277_v18 }
0x100b   : > { %5109 = vpow2.f32 %v3293_v19  ;;  %v3274_v21 = vpop.xlane.xlu1 %3273  ;;  %v3265_v23 = vpop.xlane.xlu0 %3264 }
0x100c   : > { %5111 = vpow2.f32 %v3287_v29  ;;  %v3282_v52 = vsub.f32 %v4626_v57, %v3274_v21  ;;  %v3279_v25 = vsub.f32 %v3149_v54, %v3265_v23 }
0x100e   : > { %v3297_v26 = vmul.f32 1.442695, %v3282_v52  ;;  %v3291_v27 = vmul.f32 1.442695, %v3279_v25 }
0x100f   : > { %v3271_v28 = vpop.xlane.xlu0 %3270 }
0x1010   : > { %5113 = vpow2.f32 %v3297_v26  ;;  %v3281_v30 = vsub.f32 %v3240_v58, %v3271_v28  ;;  %v1213_v26 = vld [vmem:[%s5955_s0] sm:$0xff] }
0x1011   : > { %5115 = vpow2.f32 %v3291_v27  ;;  %v1214_v27 = vld [vmem:[%s5955_s0 + $0x8] sm:$0xff] }
0x1012   : > { %v5108_v31 = vpop.eup %5107  ;;  %v3295_v32 = vmul.f32 1.442695, %v3281_v30  ;;  %v4886_v28 = vpack.c.bf16 %v1214_v27, %v1213_v26  ;;  %v1215_v30 = vld [vmem:[%s5955_s0 + $0x10] sm:$0xff] }
0x1013   : > { %v3308_v34 = vsel %vm3253_vm9, %v5108_v31, 0.0 }
0x1014   : > { %5117 = vpow2.f32 %v3295_v32  ;;  %3309 = vadd.xlane.f32.xlu1 %v3308_v34  ;;  %v1217_v32 = vld [vmem:[%s5955_s0 + $0x20] sm:$0xff] }
0x1015   : > { %v5726_v35 = vpop.eup %5109 }
0x1016   : > { %v5112_v22 = vpop.eup %5111  ;;  %v3314_v36 = vsel %vm3253_vm9, %v5726_v35, 0.0 }
0x1017   : > { %v3305_v37 = vsel %vm3249_vm10, %v5112_v22, 0.0 }
0x1018   : > { %3315 = vadd.xlane.f32.xlu1 %v3314_v36  ;;  %3306 = vadd.xlane.f32.xlu0 %v3305_v37  ;;  %v1219_v36 = vld [vmem:[%s5955_s0 + $0x30] sm:$0xff]  ;;  %v1220_v37 = vld [vmem:[%s5955_s0 + $0x38] sm:$0xff] }
0x101a   : > { %v5731_v38 = vpop.eup %5113 }
0x101b   : > { %v5733_v39 = vpop.eup %5115  ;;  %v3320_v40 = vsel %vm3253_vm9, %v5731_v38, 0.0 }
0x101c   : > { %3321 = vadd.xlane.f32.xlu1 %v3320_v40  ;;  %v3311_v42 = vsel %vm3249_vm10, %v5733_v39, 0.0 }
0x101d   : > { %3312 = vadd.xlane.f32.xlu0 %v3311_v42 }
0x101e   : > { %v5739_v44 = vpop.eup %5117 }
0x101f   : > { %v3317_v45 = vsel %vm3249_vm10, %v5739_v44, 0.0 }
0x1021   : > { %3318 = vadd.xlane.f32.xlu0 %v3317_v45 }
0x102a   : > { %v3304_v41 = vpop.xlane.xlu1 %3303 }
0x102b   : > { %v3301_v46 = vpop.xlane.xlu0 %3300 }
0x102c   : > { %5119 = vrcp.f32 %v3301_v46 }
0x102d   : > { %5061 = vrot.lane.b32.xlu1 %v5675_v24, %s5189_s15 }
0x1031   : > { %5066 = vrot.lane.b32.xlu1 %v5675_v24, %s5950_s7 }
0x1035   : > { %5071 = vrot.lane.b32.xlu1 %v5675_v24, %s5951_s10 }
0x1036   : > { %v5120_v47 = vpop.eup %5119 }
0x1037   : > { %5056 = vrot.lane.b32.xlu0 %v5675_v24, %s5952_s11  ;;  %v3324_v48 = vmul.f32 %v5120_v47, %v5106_v8  ;;  %s5960_s11 = sshll.u32 %s5962_s1, 4 }
0x1039   : > { %4631 = vmatprep.mubr.msk.f32.mxu1 %vm3249_vm10, %v3324_v48 }
0x10a1   : > { %v3310_v49 = vpop.xlane.xlu1 %3309 }
0x10a2   : > { %5121 = vrcp.f32 %v3310_v49 }
0x10a5   : > { %v3316_v43 = vpop.xlane.xlu1 %3315  ;;  %v3307_v50 = vpop.xlane.xlu0 %3306 }
0x10a6   : > { %5123 = vrcp.f32 %v3307_v50 }
0x10a7   : > { %5125 = vrcp.f32 %v3304_v41 }
0x10a9   : > { %v3322_v51 = vpop.xlane.xlu1 %3321 }
0x10aa   : > { %v3313_v53 = vpop.xlane.xlu0 %3312 }
0x10ab   : > { %5127 = vrcp.f32 %v3313_v53 }
0x10ac   : > { %5129 = vrcp.f32 %v3322_v51  ;;  %v5122_v58 = vpop.eup %5121 }
0x10ad   : > { %v5062_v54 = vpop.permute.xlu1 %5061  ;;  %v3330_v8 = vmul.f32 %v5122_v58, %v5108_v31  ;;  %v1216_v31 = vld [vmem:[%s5955_s0 + $0x18] sm:$0xff] }
0x10ae   : > { %v5064_v55 = vunpack.i.h.bf16 %v5062_v54  ;;  %v5063_v56 = vunpack.i.l.bf16 %v5062_v54  ;;  %v3319_v57 = vpop.xlane.xlu0 %3318  ;;  %v4890_v34 = vpack.c.bf16 %v1216_v31, %v1215_v30 }
0x10af   : > { %5131 = vrcp.f32 %v3319_v57 }
0x10b0   : > { %5133 = vrcp.f32 %v3316_v43  ;;  %v4868_v60 = vpack.c.bf16 %v5064_v55, %v5063_v56  ;;  %v5124_v62 = vpop.eup %5123 }
0x10b1   : > { %v5067_v63 = vpop.permute.xlu1 %5066  ;;  %v3328_v1 = vmul.f32 %v5124_v62, %v5112_v22  ;;  %v5126_v11 = vpop.eup %5125 }
0x10b2   : > { %v5057_v0 = vpop.permute.xlu0 %5056  ;;  %4870 = vmatprep.subr.msk.bf16.mxu0 %vm5752_vm13, %v4868_v60  ;;  %v5069_v2 = vunpack.i.h.bf16 %v5067_v63  ;;  %v5068_v3 = vunpack.i.l.bf16 %v5067_v63  ;;  %v3326_v29 = vmul.f32 %v5126_v11, %v5720_v6 }
0x10b3   : > { %v5059_v4 = vunpack.i.h.bf16 %v5057_v0  ;;  %v5058_v5 = vunpack.i.l.bf16 %v5057_v0  ;;  %4873 = vmatpush3.bf16.msk.msra.mxu0 %vm5752_vm13, %v4868_v60  ;;  %4638 = vmatprep.mubr.msk.f32.mxu0 %vm3249_vm10, %v3328_v1  ;;  %v4212_v60 = vld [vmem:[%s5956_s16] ss:$0 sm:$0xff]  ;;  %s1098_s16 = scalar_lea.vmem %s5382_s27, %s5960_s11 }
0x10b4   : > { %v4874_v16 = vpack.c.bf16 %v5069_v2, %v5068_v3 }
0x10b5   : > { %v4862_v9 = vpack.c.bf16 %v5059_v4, %v5058_v5  ;;  %v5072_v10 = vpop.permute.xlu1 %5071  ;;  %v5128_v15 = vpop.eup %5127 }
0x10b6   : > { %v5074_v13 = vunpack.i.h.bf16 %v5072_v10  ;;  %v5073_v14 = vunpack.i.l.bf16 %v5072_v10  ;;  %4639 = vmatmul.mubr.msk.f32.vlgmr.msra.gmra.mrb[26].mxu0 %vm3249_vm10, %v3330_v8  ;;  %v5130_v17 = vpop.eup %5129  ;;  %v3332_v23 = vmul.f32 %v5128_v15, %v5733_v39 }
0x10b7   : > { %4864 = vmatprep.subr.msk.bf16.mxu1 %vm5752_vm13, %v4862_v9  ;;  %v3338_v6 = vmul.f32 %v5130_v17, %v5731_v38  ;;  %v4898_v38 = vpack.c.bf16 %v1220_v37, %v1219_v36 }
0x10b8   : > { %v4880_v18 = vpack.c.bf16 %v5074_v13, %v5073_v14  ;;  %4867 = vmatpush3.bf16.msk.msra.mxu1 %vm5752_vm13, %v4862_v9 }
0x10b9   : > { %v5132_v19 = vpop.eup %5131  ;;  %4876 = vmatprep.subr.msk.bf16.mxu1 %vm5752_vm13, %v4874_v16 }
0x10ba   : > { %v5134_v21 = vpop.eup %5133  ;;  %4882 = vmatprep.subr.msk.bf16.mxu0 %vm5752_vm13, %v4880_v18  ;;  %v3336_v52 = vmul.f32 %v5132_v19, %v5739_v44 }
0x10bb   : > { %4632 = vmatmul.mubr.msk.f32.vlgmr.msra.gmra.mrb[16].mxu1 %vm3249_vm10, %v3326_v29  ;;  %4885 = vmatpush3.bf16.msk.msra.mxu0 %vm5752_vm13, %v4880_v18  ;;  %v3334_v25 = vmul.f32 %v5134_v21, %v5726_v35  ;;  %v1218_v35 = vld [vmem:[%s5955_s0 + $0x28] sm:$0xff] }
0x10bc   : > { %4879 = vmatpush3.bf16.msk.msra.mxu1 %vm5752_vm13, %v4874_v16  ;;  %4645 = vmatprep.mubr.msk.f32.mxu1 %vm3249_vm10, %v3332_v23  ;;  %v4894_v22 = vpack.c.bf16 %v1218_v35, %v1217_v32 }
0x10bd   : > { %4652 = vmatprep.mubr.msk.f32.mxu0 %vm3249_vm10, %v3336_v52  ;;  %4887 = vmatprep.subr.bf16.mxu1 %v4886_v28 }
0x10be   : > { %4653 = vmatmul.mubr.msk.f32.vlgmr.msra.gmra.mrb[28].mxu0 %vm3249_vm10, %v3338_v6 }
0x10bf   : > { %4646 = vmatmul.mubr.msk.f32.vlgmr.msra.gmra.mrb[18].mxu1 %vm3249_vm10, %v3334_v25  ;;  %3934 = vmatprep.mubr.f32.mxu0 %v5185_v7 }
0x10c0   : > { %4889 = vmatpush3.bf16.msra.mxu1 %v4886_v28 }
0x10c1   : > { %4891 = vmatprep.subr.bf16.mxu1 %v4890_v34 }
0x10c4   : > { %4893 = vmatpush3.bf16.msra.mxu1 %v4890_v34 }
0x10c5   : > { %4895 = vmatprep.subr.bf16.mxu1 %v4894_v22 }
0x10c8   : > { %4897 = vmatpush3.bf16.msra.mxu1 %v4894_v22 }
0x10c9   : > { %4899 = vmatprep.subr.bf16.mxu1 %v4898_v38 }
0x10cc   : > { %4901 = vmatpush3.bf16.msra.mxu1 %v4898_v38 }
0x1189   : > { %v4640_v39 = vpop.f32.mrb[26].mxu0 }
0x118a   : > { %3696 = vrot.lane.b32.xlu1 %v4640_v39, %s5951_s10  ;;  %v3507_v40 = vpop.f32.mrb[27].mxu0 }
0x118b   : > { %3694 = vrot.lane.b32.xlu0 %v3507_v40, %s5951_s10  ;;  %s5959_s10 = sld [smem:[#allocation19_spill]] }
0x118e   : > { %v4633_v42 = vpop.f32.mrb[16].mxu1 }
0x118f   : > { %v3419_v44 = vpop.f32.mrb[17].mxu1 }
0x1191   : > { %v4654_v45 = vpop.f32.mrb[28].mxu0 }
0x1192   : > { %v4647_v46 = vpop.f32.mrb[18].mxu1  ;;  %v3683_v47 = vpop.f32.mrb[29].mxu0 }
0x1193   : > { %3704 = vrot.lane.b32.xlu1 %v4647_v46, %s5950_s7  ;;  %v3595_v48 = vpop.f32.mrb[19].mxu1  ;;  %v1241_v46 = vld [vmem:[%s5372_s12] sm:$0xff] }
0x1194   : > { %3702 = vrot.lane.b32.xlu0 %v3595_v48, %s5950_s7  ;;  %v1242_v48 = vld [vmem:[%s5372_s12 + $0x8] sm:$0xff]  ;;  %s5958_s7 = sld [smem:[#allocation18_spill]] }
0x1197   : > { %3712 = vrot.lane.b32.xlu1 %v4654_v45, %s5189_s15  ;;  %v1258_v45 = vld [vmem:[%s5372_s12 + $0x88] sm:$0xff] }
0x1198   : > { %3710 = vrot.lane.b32.xlu0 %v3683_v47, %s5189_s15  ;;  %s5957_s15 = sld [smem:[#allocation20_spill]] }
0x119e   : > { %v1225_v17 = vld [vmem:[%s5957_s15 + $0x8] sm:$0xff]  ;;  %v1227_v18 = vld [vmem:[%s5957_s15 + $0x18] sm:$0xff]  ;;  %v1224_v29 = vld [vmem:[%s5957_s15] sm:$0xff] }
0x119f   : > { %v4902_v19 = vpack.c.bf16 %v1227_v18, %v1225_v17  ;;  %v1226_v21 = vld [vmem:[%s5957_s15 + $0x10] sm:$0xff]  ;;  %v1229_v52 = vld [vmem:[%s5957_s15 + $0x28] sm:$0xff]  ;;  %v1231_v6 = vld [vmem:[%s5957_s15 + $0x38] sm:$0xff] }
0x11a0   : > { %v4904_v23 = vpack.c.bf16 %v1226_v21, %v1224_v29  ;;  %v4906_v25 = vpack.c.bf16 %v1231_v6, %v1229_v52  ;;  %v1228_v26 = vld [vmem:[%s5957_s15 + $0x20] sm:$0xff]  ;;  %v1230_v27 = vld [vmem:[%s5957_s15 + $0x30] sm:$0xff]  ;;  %v1233_v30 = vld [vmem:[%s5957_s15 + $0x48] sm:$0xff] }
0x11a1   : > { %4903 = vmatprep.subr.bf16.mxu0 %v4902_v19  ;;  %v4908_v28 = vpack.c.bf16 %v1230_v27, %v1228_v26  ;;  %v1235_v31 = vld [vmem:[%s5957_s15 + $0x58] sm:$0xff]  ;;  %v1232_v34 = vld [vmem:[%s5957_s15 + $0x40] sm:$0xff]  ;;  %v1234_v35 = vld [vmem:[%s5957_s15 + $0x50] sm:$0xff] }
0x11a2   : > { %4905 = vmatpush1.bf16.msra.mxu0 %v4904_v23  ;;  %v4910_v32 = vpack.c.bf16 %v1235_v31, %v1233_v30  ;;  %v4912_v22 = vpack.c.bf16 %v1234_v35, %v1232_v34  ;;  %v1237_v36 = vld [vmem:[%s5957_s15 + $0x68] sm:$0xff]  ;;  %v1239_v37 = vld [vmem:[%s5957_s15 + $0x78] sm:$0xff]  ;;  %v1236_v38 = vld [vmem:[%s5957_s15 + $0x60] sm:$0xff] }
0x11a3   : > { %4907 = vmatprep.subr.bf16.mxu0 %v4906_v25  ;;  %v4914_v39 = vpack.c.bf16 %v1239_v37, %v1237_v36  ;;  %v1238_v40 = vld [vmem:[%s5957_s15 + $0x70] sm:$0xff]  ;;  %v1252_v19 = vld [vmem:[%s5372_s12 + $0x58] sm:$0xff]  ;;  %v1269_v29 = vld [vmem:[%s5372_s12 + $0xe0] sm:$0xff] }
0x11a4   : > { %v1251_v18 = vld [vmem:[%s5372_s12 + $0x50] sm:$0xff]  ;;  %v1270_v21 = vld [vmem:[%s5372_s12 + $0xe8] sm:$0xff]  ;;  %v4216_v35 = vld [vmem:[%s5959_s10] ss:$0 sm:$0xff] }
0x11a5   : > { %v4940_v23 = vpack.c.bf16 %v1252_v19, %v1251_v18  ;;  %v4942_v52 = vpack.c.bf16 %v1270_v21, %v1269_v29 }
0x11a6   : > { %4909 = vmatpush1.bf16.msra.mxu0 %v4908_v28 }
0x11a7   : > { %4911 = vmatprep.subr.bf16.mxu0 %v4910_v32  ;;  %v4215_v32 = vld [vmem:[%s5958_s7] ss:$0 sm:$0xff] }
0x11aa   : > { %4913 = vmatpush1.bf16.msra.mxu0 %v4912_v22 }
0x11ab   : > { %4915 = vmatprep.subr.bf16.mxu0 %v4914_v39 }
0x11fc   : > { %v3697_v41 = vpop.permute.xlu1 %3696 }
0x11fd   : > { %v3695_v49 = vpop.permute.xlu0 %3694  ;;  %v3717_v54 = vsel %vm1695_vm4, %v4633_v42, %v3697_v41  ;;  %v4916_v42 = vpack.c.bf16 %v1238_v40, %v1236_v38  ;;  %v1259_v41 = vld [vmem:[%s5372_s12 + $0x90] sm:$0xff] }
0x11fe   : > { %v3716_v51 = vsel %vm1695_vm4, %v3419_v44, %v3695_v49  ;;  %v1257_v44 = vld [vmem:[%s5372_s12 + $0x80] sm:$0xff]  ;;  %v1260_v49 = vld [vmem:[%s5372_s12 + $0x98] sm:$0xff] }
0x11ff   : > { %4917 = vmatpush1.bf16.msra.mxu0 %v4916_v42  ;;  %v4918_v47 = vpack.c.bf16 %v1258_v45, %v1257_v44  ;;  %v1253_v42 = vld [vmem:[%s5372_s12 + $0x60] sm:$0xff]  ;;  %v1271_v45 = vld [vmem:[%s5372_s12 + $0xf0] sm:$0xff] }
0x1201   : > { %4919 = vmatprep.subr.bf16.mxu1 %v4918_v47 }
0x1205   : > { %v3705_v43 = vpop.permute.xlu1 %3704 }
0x1206   : > { %v3703_v50 = vpop.permute.xlu0 %3702  ;;  %v3719_v57 = vsel %vm2394_vm6, %v3717_v54, %v3705_v43  ;;  %v4920_v43 = vpack.c.bf16 %v1242_v48, %v1241_v46  ;;  %v1261_v54 = vld [vmem:[%s5372_s12 + $0xa0] sm:$0xff]  ;;  %v1272_v46 = vld [vmem:[%s5372_s12 + $0xf8] sm:$0xff]  ;;  %v1255_v48 = vld [vmem:[%s5372_s12 + $0x70] sm:$0xff] }
0x1207   : > { %v3718_v55 = vsel %vm2394_vm6, %v3716_v51, %v3703_v50  ;;  %v4922_v50 = vpack.c.bf16 %v1260_v49, %v1259_v41  ;;  %v1243_v51 = vld [vmem:[%s5372_s12 + $0x10] sm:$0xff]  ;;  %v4946_v47 = vpack.c.bf16 %v1272_v46, %v1271_v45  ;;  %v1256_v41 = vld [vmem:[%s5372_s12 + $0x78] sm:$0xff] }
0x1208   : > { %v4948_v49 = vpack.c.bf16 %v1256_v41, %v1255_v48 }
0x1209   : > { %v3713_v53 = vpop.permute.xlu1 %3712 }
0x120a   : > { %v3711_v56 = vpop.permute.xlu0 %3710  ;;  %v3721_v58 = vsel %vm2396_vm7, %v3719_v57, %v3713_v53  ;;  %v1244_v53 = vld [vmem:[%s5372_s12 + $0x18] sm:$0xff] }
0x120b   : > { %v3720_v24 = vsel %vm2396_vm7, %v3718_v55, %v3711_v56  ;;  %v1262_v55 = vld [vmem:[%s5372_s12 + $0xa8] sm:$0xff]  ;;  %v4924_v56 = vpack.c.bf16 %v1244_v53, %v1243_v51 }
0x120c   : > { %4671 = vmatprep.mubr.msk.f32.mxu1 %vm1376_vm2, %v3720_v24  ;;  %v4926_v57 = vpack.c.bf16 %v1262_v55, %v1261_v54  ;;  %v1245_v24 = vld [vmem:[%s5372_s12 + $0x20] sm:$0xff] }
0x120d   : > { %4672 = vmatmul.mubr.msk.f32.vlgmr.msra.gmra.mrb[20].mxu1 %vm1376_vm2, %v3721_v58  ;;  %v1246_v58 = vld [vmem:[%s5372_s12 + $0x28] sm:$0xff] }
0x120e   : > { %4921 = vmatpush3.bf16.msra.mxu1 %v4920_v43 }
0x120f   : > { %4923 = vmatprep.subr.bf16.mxu1 %v4922_v50 }
0x1212   : > { %4925 = vmatpush3.bf16.msra.mxu1 %v4924_v56 }
0x1213   : > { %4927 = vmatprep.subr.bf16.mxu1 %v4926_v57 }
0x12e0   : > { %v4673_v62 = vpop.f32.mrb[20].mxu1 }
0x12e1   : > { %v3806_v63 = vadd.f32 %v4673_v62, %v4212_v60  ;;  %v3800_v0 = vpop.f32.mrb[21].mxu1  ;;  %v1264_v62 = vld [vmem:[%s5372_s12 + $0xb8] sm:$0xff] }
0x12e2   : > { %v3801_v1 = vadd.f32 %v4212_v60, %v3800_v0  ;;  %v1263_v60 = vld [vmem:[%s5372_s12 + $0xb0] sm:$0xff] }
0x12e3   : > { %v5809_v2 = vadd.f32 %v3806_v63, %v5642_v20  ;;  %v4928_v63 = vpack.c.bf16 %v1246_v58, %v1245_v24  ;;  %v4930_v0 = vpack.c.bf16 %v1264_v62, %v1263_v60 }
0x12e4   : > { %v5812_v3 = vadd.f32 %v3801_v1, %v5638_v12  ;;  %v1247_v1 = vld [vmem:[%s5372_s12 + $0x30] sm:$0xff] }
0x12e5   : > { %v3814_v4 = vsel %vm2681_vm8, %v5809_v2, 0.0  ;;  %4929 = vmatpush3.bf16.msra.mxu1 %v4928_v63 }
0x12e6   : > { %3815 = vadd.xlane.f32.xlu1 %v3814_v4  ;;  %v3811_v5 = vsel %vm1376_vm2, %v5812_v3, 0.0  ;;  %v1248_v4 = vld [vmem:[%s5372_s12 + $0x38] sm:$0xff]  ;;  %4931 = vmatprep.subr.bf16.mxu1 %v4930_v0  ;;  %v4219_v0 = vld [vmem:[%s5377_s20] ss:$0 sm:$0xff] }
0x12e7   : > { %3812 = vadd.xlane.f32.xlu0 %v3811_v5  ;;  %v1265_v5 = vld [vmem:[%s5372_s12 + $0xc0] sm:$0xff] }
0x1373   : > { %v3816_v8 = vpop.xlane.xlu1 %3815 }
0x1374   : > { %v3818_v9 = vmul.f32 0.015625, %v3816_v8  ;;  %v3813_v10 = vpop.xlane.xlu0 %3812  ;;  %v1266_v8 = vld [vmem:[%s5372_s12 + $0xc8] sm:$0xff] }
0x1375   : > { %v3817_v20 = vmul.f32 0.015625, %v3813_v10  ;;  %v4934_v10 = vpack.c.bf16 %v1266_v8, %v1265_v5 }
0x1376   : > { %v5819_v11 = vsub.f32 %v5809_v2, %v3818_v9  ;;  %v4932_v9 = vpack.c.bf16 %v1248_v4, %v1247_v1 }
0x1377   : > { %v5822_v12 = vsub.f32 %v5812_v3, %v3817_v20  ;;  %v1249_v20 = vld [vmem:[%s5372_s12 + $0x40] sm:$0xff] }
0x1378   : > { %v3822_v15 = vmul.f32 %v5819_v11, %v5819_v11  ;;  %4933 = vmatpush3.bf16.msra.mxu1 %v4932_v9 }
0x1379   : > { %v3821_v13 = vmul.f32 %v5822_v12, %v5822_v12  ;;  %4935 = vmatprep.subr.bf16.mxu1 %v4934_v10 }
0x137a   : > { %v3826_v16 = vsel %vm2681_vm8, %v3822_v15, 0.0  ;;  %v1268_v15 = vld [vmem:[%s5372_s12 + $0xd8] sm:$0xff] }
0x137b   : > { %v3823_v14 = vsel %vm1376_vm2, %v3821_v13, 0.0  ;;  %v1250_v13 = vld [vmem:[%s5372_s12 + $0x48] sm:$0xff] }
0x137c   : > { %3824 = vadd.xlane.f32.xlu0 %v3823_v14  ;;  %v1267_v14 = vld [vmem:[%s5372_s12 + $0xd0] sm:$0xff] }
0x137d   : > { %v4938_v17 = vpack.c.bf16 %v1268_v15, %v1267_v14 }
0x1380   : > { %3827 = vadd.xlane.f32.xlu0 %v3826_v16  ;;  %v4936_v16 = vpack.c.bf16 %v1250_v13, %v1249_v20 }
0x1382   : > { %4937 = vmatpush3.bf16.msra.mxu1 %v4936_v16 }
0x1383   : > { %4939 = vmatprep.subr.bf16.mxu1 %v4938_v17 }
0x1386   : > { %4941 = vmatpush3.bf16.msra.mxu1 %v4940_v23 }
0x1387   : > { %4943 = vmatprep.subr.bf16.mxu1 %v4942_v52 }
0x1409   : > { %v3825_v6 = vpop.xlane.xlu0 %3824 }
0x140a   : > { %v3829_v25 = vmul.f32 0.015625, %v3825_v6 }
0x140c   : > { %v3831_v26 = vadd.f32 1e-05, %v3829_v25 }
0x140d   : > { %v3828_v27 = vpop.xlane.xlu0 %3827 }
0x140e   : > { %5135 = vrsqrt.f32 %v3831_v26  ;;  %v3830_v28 = vmul.f32 0.015625, %v3828_v27 }
0x1410   : > { %v3832_v30 = vadd.f32 1e-05, %v3830_v28 }
0x1412   : > { %5137 = vrsqrt.f32 %v3832_v30 }
0x1418   : > { %v5136_v31 = vpop.eup %5135 }
0x1419   : > { %v3835_v34 = vmul.f32 %v5136_v31, %v5822_v12  ;;  %v1254_v12 = vld [vmem:[%s5372_s12 + $0x68] sm:$0xff] }
0x141a   : > { %v4944_v44 = vpack.c.bf16 %v1254_v12, %v1253_v42 }
0x141b   : > { %v3843_v22 = vmul.f32 %v4215_v32, %v3835_v34 }
0x141c   : > { %v5138_v36 = vpop.eup %5137  ;;  %4945 = vmatpush3.bf16.msra.mxu1 %v4944_v44 }
0x141d   : > { %v3851_v37 = vadd.f32 %v4216_v35, %v3843_v22  ;;  %v3836_v38 = vmul.f32 %v5138_v36, %v5819_v11  ;;  %4947 = vmatprep.subr.bf16.mxu1 %v4946_v47  ;;  %v1240_v11 = vld [vmem:[%s5367_s4] sm:$0x3] }
0x141e   : > { %v3857_v43 = vrot.slane %v1240_v11, %v2508_v59 }
0x141f   : > { %4217 = vmatmul.mubr.msk.f32.vlgmr.msra.gmra.mrb[30].mxu0 %vm1376_vm2, %v3851_v37  ;;  %v3844_v39 = vmul.f32 %v4215_v32, %v3836_v38 }
0x1420   : > { %3940 = vmatprep.mubr.f32.mxu0 %v5185_v7  ;;  %4949 = vmatpush3.bf16.msra.mxu1 %v4948_v49  ;;  %v3861_v7 = vrot.slane %v1240_v11, %v2512_v61 }
0x1421   : > { %v3852_v40 = vadd.f32 %v4216_v35, %v3844_v39 }
0x1423   : > { %4218 = vmatmul.mubr.msk.f32.gmra.mrb[32].mxu0 %vm1376_vm2, %v3852_v40 }
0x14f2   : > { %v3936_v50 = vpop.f32.mrb[30].mxu0 }
0x14f3   : > { %v3937_v51 = vadd.f32 %v3936_v50, %v3857_v43  ;;  %v3938_v53 = vpop.f32.mrb[31].mxu0 }
0x14f4   : > { %v3939_v54 = vadd.f32 %v3938_v53, %v3861_v7 }
0x14f5   : > { %v3947_v57 = vmax.f32 %v3937_v51, 0.0 }
0x14f6   : > { %v3948_v55 = vmax.f32 %v3939_v54, 0.0  ;;  %v3942_v56 = vpop.f32.mrb[32].mxu0 }
0x14f7   : > { %v3943_v24 = vadd.f32 %v3942_v56, %v3857_v43  ;;  %v3944_v58 = vpop.f32.mrb[33].mxu0 }
0x14f8   : > { %v3945_v60 = vadd.f32 %v3944_v58, %v3861_v7  ;;  %4015 = vmatprep.mubr.f32.mxu1 %v3948_v55 }
0x14f9   : > { %4016 = vmatmul.mubr.f32.vlgmr.msra.gmra.mrb[22].mxu1 %v3947_v57  ;;  %v3949_v59 = vmax.f32 %v3943_v24, 0.0 }
0x14fa   : > { %v3950_v62 = vmax.f32 %v3945_v60, 0.0 }
0x14fc   : > { %4020 = vmatprep.mubr.f32.mxu1 %v3950_v62 }
0x14fd   : > { %4021 = vmatmul.mubr.f32.gmra.mrb[24].mxu1 %v3949_v59 }
0x15cc   : > { %v4418_v33 = vpop.f32.mrb[22].mxu1 }
0x15cd   : > { %v4419_v61 = vpop.f32.mrb[23].mxu1 }
0x15ce   : > { %v4420_v63 = vadd.f32 %v4419_v61, %v4418_v33 }
0x15d0   : > { %v4026_v1 = vadd.f32 %v4420_v63, %v5812_v3  ;;  %v4421_v4 = vpop.f32.mrb[24].mxu1 }
0x15d1   : > { %v4422_v5 = vpop.f32.mrb[25].mxu1 }
0x15d2   : > { %v4034_v8 = vadd.f32 %v4219_v0, %v4026_v1  ;;  %v4423_v9 = vadd.f32 %v4422_v5, %v4421_v4 }
0x15d4   : > { %4036 = vst.msk [vmem:[%s1098_s16] sm:$0xff] %vm1376_vm2, %v4034_v8  ;;  %v4027_v10 = vadd.f32 %v4423_v9, %v5809_v2 }
0x15d6   : > { %v4035_v20 = vadd.f32 %v4219_v0, %v4027_v10 }
0x15d8   : > { %4037 = vst.msk [vmem:[%s1098_s16 + $0x8] sm:$0x1] %vm2681_vm8, %v4035_v20 }
0x15d9 PF: > { %s83_s28 = sadd.s32 1, %s5145_s28  }
0x15da   : > { %p80_p4 = scmp.ge.s32.totalorder %s83_s28, 4  }
0x15dc   :  { %82 = sbr.rel (!%p80_p4) target bundleno = 67 (0x43), region = 230 }

// kernel: _lambda_.3
= control target key start
LH: loop header
LB: loop body
LE: loop exit
PB: predicated region body
PF: predicated region fallthrough
CT: control target
= control target key end

     0   :  { %s7710_s6 = smov 1   ;;  %s7711_s10 = smov 2   ;;  %s8956_s0 = inlined_call_operand.smem [shape: u32[49], index: -1, kind: input, shape index: {}] }
   0x1   :  { %s7801_s5 = sld [smem:[%s8956_s0]]   ;;  %s7712_s14 = smov 3  }
   0x2   :  { %s7806_s9 = sld [smem:[%s8956_s0 + %s7710_s6]]   ;;  %s7713_s18 = smov 4  }
   0x3   :  { %s7811_s13 = sld [smem:[%s8956_s0 + %s7711_s10]]   ;;  %s7714_s22 = smov 5  }
   0x4   :  { %s7816_s17 = sld [smem:[%s8956_s0 + %s7712_s14]]   ;;  %s7715_s26 = smov 6  }
   0x5   :  { %s7821_s21 = sld [smem:[%s8956_s0 + %s7713_s18]]   ;;  %s7716_s30 = smov 7  }
   0x6   :  { %s7826_s25 = sld [smem:[%s8956_s0 + %s7714_s22]]   ;;  %s7717_s4 = smov 8  }
   0x7   :  { %9009 = sst [smem:[#allocation52_spill]] %s7801_s5  ;;  %s7718_s10 = smov 9  }
   0x8   :  { %9010 = sst [smem:[#allocation53_spill]] %s7806_s9  ;;  %s7719_s15 = smov 10  }
   0x9   :  { %9011 = sst [smem:[#allocation54_spill]] %s7811_s13  ;;  %s7720_s20 = smov 11  }
   0xa   :  { %9012 = sst [smem:[#allocation55_spill]] %s7816_s17  ;;  %s7722_s1 = smov 13  }
   0xb   :  { %9013 = sst [smem:[#allocation56_spill]] %s7821_s21  ;;  %s7723_s7 = smov 14  }
   0xc   :  { %9014 = sst [smem:[#allocation57_spill]] %s7826_s25  ;;  %s7725_s22 = smov 16  }
   0xd   :  { %s7831_s29 = sld [smem:[%s8956_s0 + %s7715_s26]]   ;;  %s7721_s26 = smov 12  }
   0xe   :  { %s7836_s3 = sld [smem:[%s8956_s0 + %s7716_s30]]   ;;  %s7726_s28 = smov 17  }
   0xf   :  { %s7841_s8 = sld [smem:[%s8956_s0 + %s7717_s4]]  }
  0x10   :  { %s7846_s14 = sld [smem:[%s8956_s0 + %s7718_s10]]  }
  0x11   :  { %s7851_s19 = sld [smem:[%s8956_s0 + %s7719_s15]]   ;;  %s7724_s15 = smov 15  }
  0x12   :  { %s7856_s24 = sld [smem:[%s8956_s0 + %s7720_s20]]  }
  0x13   :  { %9015 = sst [smem:[#allocation58_spill]] %s7831_s29 }
  0x14   :  { %9016 = sst [smem:[#allocation59_spill]] %s7836_s3 }
  0x15   :  { %9017 = sst [smem:[#allocation60_spill]] %s7841_s8 }
  0x16   :  { %s7861_s30 = sld [smem:[%s8956_s0 + %s7721_s26]]  }
  0x17   :  { %s7866_s6 = sld [smem:[%s8956_s0 + %s7722_s1]]  }
  0x18   :  { %9018 = sst [smem:[#allocation61_spill]] %s7856_s24 }
  0x19   :  { %s7871_s12 = sld [smem:[%s8956_s0 + %s7723_s7]]   ;;  %s7727_s7 = smov 18  }
  0x1a   :  { %s7876_s20 = sld [smem:[%s8956_s0 + %s7724_s15]]   ;;  %s7728_s15 = smov 19  }
  0x1b   :  { %s7881_s27 = sld [smem:[%s8956_s0 + %s7725_s22]]   ;;  %s7729_s22 = smov 20  }
  0x1c   :  { %s7886_s4 = sld [smem:[%s8956_s0 + %s7726_s28]]   ;;  %s7730_s28 = smov 21  }
  0x1d   :  { %9019 = sst [smem:[#allocation62_spill]] %s7866_s6 }
  0x1e   :  { %s7891_s29 = sld [smem:[%s8956_s0 + %s7727_s7]]   ;;  %s7731_s7 = smov 22  }
  0x1f   :  { %s7896_s21 = sld [smem:[%s8956_s0 + %s7728_s15]]   ;;  %s7732_s15 = smov 23  }
  0x20   :  { %9020 = sst [smem:[#allocation63_spill]] %s7876_s20 }
  0x21   :  { %9021 = sst [smem:[#allocation64_spill]] %s7881_s27 }
  0x22   :  { %9022 = sst [smem:[#allocation65_spill]] %s7886_s4 }
  0x23   :  { %s7901_s25 = sld [smem:[%s8956_s0 + %s7729_s22]]   ;;  %s7733_s22 = smov 24  }
  0x24   :  { %9023 = sst [smem:[#allocation66_spill]] %s7891_s29 }
  0x25   :  { %9024 = sst [smem:[#allocation67_spill]] %s7896_s21 }
  0x26   :  { %s7906_s5 = sld [smem:[%s8956_s0 + %s7730_s28]]   ;;  %s7734_s28 = smov 25  }
  0x27   :  { %s7911_s17 = sld [smem:[%s8956_s0 + %s7731_s7]]   ;;  %s7735_s7 = smov 26  }
  0x28   :  { %s7916_s21 = sld [smem:[%s8956_s0 + %s7732_s15]]   ;;  %s7736_s15 = smov 27  }
  0x29   :  { %9025 = sst [smem:[#allocation68_spill]] %s7901_s25 }
  0x2a   :  { %s7921_s25 = sld [smem:[%s8956_s0 + %s7733_s22]]   ;;  %s7737_s22 = smov 28  }
  0x2b   :  { %s7931_s20 = sld [smem:[%s8956_s0 + %s7735_s7]]   ;;  %s7739_s7 = smov 30  }
  0x2c   :  { %9026 = sst [smem:[#allocation69_spill]] %s7906_s5 }
  0x2d   :  { %s7926_s5 = sld [smem:[%s8956_s0 + %s7734_s28]]   ;;  %s7738_s28 = smov 29  }
  0x2e   :  { %9027 = sst [smem:[#allocation70_spill]] %s7916_s21 }
  0x2f   :  { %s7936_s6 = sld [smem:[%s8956_s0 + %s7736_s15]]   ;;  %s7740_s15 = smov 31  }
  0x30   :  { %s7941_s24 = sld [smem:[%s8956_s0 + %s7737_s22]]   ;;  %s7741_s22 = smov 32  }
  0x31   :  { %s7946_s13 = sld [smem:[%s8956_s0 + %s7738_s28]]   ;;  %s7742_s28 = smov 33  }
  0x32   :  { %s7951_s9 = sld [smem:[%s8956_s0 + %s7739_s7]]   ;;  %s7743_s7 = smov 34  }
  0x33   :  { %9028 = sst [smem:[#allocation71_spill]] %s7926_s5 }
  0x34   :  { %s7971_s5 = sld [smem:[%s8956_s0 + %s7743_s7]]   ;;  %s7747_s7 = smov 38  }
  0x35   :  { %9029 = sst [smem:[#allocation72_spill]] %s7936_s6 }
  0x36   :  { %9030 = sst [smem:[#allocation73_spill]] %s7941_s24 }
  0x37   :  { %9031 = sst [smem:[#allocation74_spill]] %s7946_s13 }
  0x38   :  { %9032 = sst [smem:[#allocation75_spill]] %s7951_s9 }
  0x39   :  { %s7956_s6 = sld [smem:[%s8956_s0 + %s7740_s15]]   ;;  %s7744_s15 = smov 35  }
  0x3a   :  { %s7961_s24 = sld [smem:[%s8956_s0 + %s7741_s22]]   ;;  %s7745_s22 = smov 36  }
  0x3b   :  { %s7966_s13 = sld [smem:[%s8956_s0 + %s7742_s28]]   ;;  %s7746_s28 = smov 37  }
  0x3c   :  { %9035 = sst [smem:[#allocation78_spill]] %s7971_s5 }
  0x3d   :  { %s7986_s21 = sld [smem:[%s8956_s0 + %s7746_s28]]   ;;  %s7750_s28 = smov 41  }
  0x3e   :  { %s7991_s5 = sld [smem:[%s8956_s0 + %s7747_s7]]   ;;  %s7751_s7 = smov 42  }
  0x3f   :  { %9033 = sst [smem:[#allocation76_spill]] %s7956_s6 }
  0x40   :  { %9034 = sst [smem:[#allocation77_spill]] %s7961_s24 }
  0x41   :  { %s7976_s6 = sld [smem:[%s8956_s0 + %s7744_s15]]   ;;  %s7748_s15 = smov 39  }
  0x42   :  { %s7981_s24 = sld [smem:[%s8956_s0 + %s7745_s22]]   ;;  %s7749_s22 = smov 40  }
  0x43   :  { %9038 = sst [smem:[#allocation81_spill]] %s7986_s21 }
  0x44   :  { %9039 = sst [smem:[#allocation82_spill]] %s7991_s5 }
  0x45   :  { %s8006_s21 = sld [smem:[%s8956_s0 + %s7750_s28]]   ;;  %s7754_s28 = smov 45  }
  0x46   :  { %s8011_s29 = sld [smem:[%s8956_s0 + %s7751_s7]]   ;;  %s7755_s7 = smov 46  }
  0x47   :  { %9036 = sst [smem:[#allocation79_spill]] %s7976_s6 }
  0x48   :  { %9037 = sst [smem:[#allocation80_spill]] %s7981_s24 }
  0x49   :  { %s7996_s6 = sld [smem:[%s8956_s0 + %s7748_s15]]   ;;  %s7752_s15 = smov 43  }
  0x4a   :  { %s8001_s24 = sld [smem:[%s8956_s0 + %s7749_s22]]   ;;  %s7753_s22 = smov 44  }
  0x4b   :  { %9042 = sst [smem:[#allocation85_spill]] %s8006_s21 }
  0x4c   :  { %s8026_s21 = sld [smem:[%s8956_s0 + %s7754_s28]]  }
  0x4d   :  { %s8031_s27 = sld [smem:[%s8956_s0 + %s7755_s7]]  }
  0x4f   :  { %9040 = sst [smem:[#allocation83_spill]] %s7996_s6 }
  0x50   :  { %9041 = sst [smem:[#allocation84_spill]] %s8001_s24 }
  0x51   :  { %s8016_s6 = sld [smem:[%s8956_s0 + %s7752_s15]]   ;;  %s7756_s15 = smov 47  }
  0x52   :  { %s8021_s24 = sld [smem:[%s8956_s0 + %s7753_s22]]   ;;  %s7757_s22 = smov 48  }
  0x57   :  { %9043 = sst [smem:[#allocation86_spill]] %s8016_s6 }
  0x58   :  { %9044 = sst [smem:[#allocation87_spill]] %s8021_s24 }
  0x59   :  { %s8036_s6 = sld [smem:[%s8956_s0 + %s7756_s15]]  }
  0x5a   :  { %s8041_s24 = sld [smem:[%s8956_s0 + %s7757_s22]]  }
  0x5b   :  { %103 = vsyncpa [#allocation3], 0 }
  0x5c   :  { %104 = vsyncpa [#allocation5], 0 }
  0x5d   :  { %105 = vsyncpa [#allocation8], 0 }
  0x5e   :  { %106 = vsyncpa [#allocation11], 0 }
  0x5f   :  { %107 = vsyncpa [#allocation14], 0 }
  0x60   :  { %108 = vsyncpa [#allocation17], 0 }
  0x61   :  { %109 = vsyncpa [#allocation20], 0 }
  0x62   :  { %110 = vsyncpa [#allocation23], 0 }
  0x63   :  { %111 = vsyncpa [#allocation26], 0 }
  0x64   :  { %112 = vsyncpa [#allocation29], 0 }
  0x65   :  { %113 = vsyncpa [#allocation32], 0 }
  0x66   :  { %114 = vsyncpa [#allocation35], 0 }
  0x67   :  { %115 = vsyncpa [#allocation38], 0  ;;  %s8043_s28 = smov 0  }
  0x68 LB: > { %s9045_s9 = sld [smem:[#allocation75_spill]]  ;;  %s9046_s8 = sld [smem:[#allocation60_spill]]  ;;  %s7708_s28 = sphi %s8043_s28, %s121_s28  }
  0x69   : > { %s9047_s5 = sld [smem:[#allocation82_spill]]  ;;  %s9048_s4 = sld [smem:[#allocation65_spill]] }
  0x6a   : > { %s9049_s3 = sld [smem:[#allocation59_spill]]  ;;  %s7758_s0 = smov [#allocation4]  }
  0x6b   : > { %s1214_s1 = sshll.u32 %s7758_s0, 4  ;;  %s8049_s2 = sadd.s32 4294967295, %s7708_s28   ;;  %s8054_s1 = int_to_ptr.vmem [resolvable:$true] %s1214_s1 }
  0x6c   : > { %p5535_p0 = scmp.ge.s32.totalorder %s7708_s28, 1  ;;  %p1175_p1 = scmp.lt.s32.totalorder %s7708_s28, 3 }
  0x6d   : > { %p8980_p2 = scmp.eq.s32.totalorder %s8049_s2, 0  ;;  %s7759_s10 = smov [#allocation7]  }
  0x6e   : > { %p8056_p3 = pnand %p5535_p0, %p1175_p1  ;;  %s1236_s11 = sshll.u32 %s7759_s10, 4  ;;  %s8062_s11 = int_to_ptr.vmem [resolvable:$true] %s1236_s11 }
  0x6f   : > { %s7760_s15 = smov [#allocation10]   ;;  %s7761_s22 = smov [#allocation13]  }
  0x70   : > { %s9050_s7 = scalar_select %p8056_p3, 1, 0 }
  0x71   : > { %p6632_p4 = pneg %p8056_p3  ;;  %s1264_s16 = sshll.u32 %s7760_s15, 4  ;;  %s8070_s16 = int_to_ptr.vmem [resolvable:$true] %s1264_s16 }
  0x72   : > { %s1289_s23 = sshll.u32 %s7761_s22, 4  ;;  %s6978_s26 = scalar_lea.hbm %s9046_s8, 16  ;;  %s8072_s23 = int_to_ptr.vmem [resolvable:$true] %s1289_s23 }
  0x73   : > { %p8066_p5 = pnand %p8980_p2, %p6632_p4  ;;  %p6979_p6 = scmp.ne.s32.totalorder %s9046_s8, %s6978_s26 }
  0x74   : > { %p6985_p10 = scmp.lt.u32.totalorder %s6978_s26, %s9046_s8 }
  0x75   : > { %p8078_p7 = pneg %p8066_p5 }
  0x77   : > { %p6981_p8 = pnand %p8078_p7, %p6979_p6 }
  0x79   : > { %p6982_p9 = pneg %p6981_p8 }
  0x7b   : > { %p6987_p11 = pnand %p6985_p10, %p6982_p9 }
  0x7d   : > { %6990 = shalt.err (!%p6987_p11)
}
  0x7e   : > { %s6991_s10 = scalar_lea.vmem %s8054_s1, 16  ;;  %s6998_s15 = scalar_lea.vmem %s8054_s1, 32 }
  0x7f   : > { %p6992_p12 = scmp.ne.s32.totalorder %s8054_s1, %s6991_s10  ;;  %p6999_p1 = scmp.lt.s32.totalorder %s8054_s1, %s8054_s1 }
  0x80   : > { %p7000_p4 = scmp.lt.s32.totalorder %s6998_s15, %s6991_s10 }
  0x81   : > { %p6994_p13 = pnand %p6992_p12, %p8078_p7 }
  0x82   : > { %p7001_p2 = por %p7000_p4, %p6999_p1 }
  0x83   : > { %p6995_p0 = pneg %p6994_p13 }
  0x85   : > { %p7002_p6 = pnand %p7001_p2, %p6995_p0 }
  0x87   : > { %7005 = shalt.err (!%p7002_p6)
}
  0x88   : > { %6638 = dma.hbm_to_vmem [thread:$0]  (!%p8066_p5), %s9046_s8, 16, %s8054_s1, [#allocation5]  }
  0x89   : > { %s7006_s22 = scalar_lea.hbm %s7851_s19, 16 }
  0x8a   : > { %p7007_p8 = scmp.ne.s32.totalorder %s7851_s19, %s7006_s22  ;;  %p7013_p11 = scmp.lt.u32.totalorder %s7006_s22, %s7851_s19 }
  0x8c   : > { %p7009_p9 = pnand %p7007_p8, %p8078_p7 }
  0x8e   : > { %p7010_p10 = pneg %p7009_p9 }
  0x90   : > { %p7015_p12 = pnand %p7013_p11, %p7010_p10 }
  0x92   : > { %7018 = shalt.err (!%p7015_p12)
}
  0x93   : > { %s7019_s26 = scalar_lea.vmem %s8062_s11, 16  ;;  %s7026_s10 = scalar_lea.vmem %s8062_s11, 32 }
  0x94   : > { %p7020_p2 = scmp.ne.s32.totalorder %s8062_s11, %s7019_s26  ;;  %p7027_p1 = scmp.lt.s32.totalorder %s8062_s11, %s8062_s11 }
  0x95   : > { %p7028_p4 = scmp.lt.s32.totalorder %s7026_s10, %s7019_s26 }
  0x96   : > { %p7022_p13 = pnand %p7020_p2, %p8078_p7 }
  0x97   : > { %p7029_p6 = por %p7028_p4, %p7027_p1 }
  0x98   : > { %p7023_p0 = pneg %p7022_p13 }
  0x9a   : > { %p7030_p8 = pnand %p7029_p6, %p7023_p0 }
  0x9c   : > { %7033 = shalt.err (!%p7030_p8)
}
  0x9d   : > { %6644 = dma.hbm_to_vmem [thread:$0]  (!%p8066_p5), %s7851_s19, 16, %s8062_s11, [#allocation8]  }
  0x9e   : > { %s7034_s1 = scalar_lea.hbm %s7871_s12, 16 }
  0x9f   : > { %p7035_p9 = scmp.ne.s32.totalorder %s7871_s12, %s7034_s1  ;;  %p7041_p12 = scmp.lt.u32.totalorder %s7034_s1, %s7871_s12 }
  0xa1   : > { %p7037_p10 = pnand %p7035_p9, %p8078_p7 }
  0xa3   : > { %p7038_p11 = pneg %p7037_p10 }
  0xa5   : > { %p7043_p2 = pnand %p7041_p12, %p7038_p11 }
  0xa7   : > { %7046 = shalt.err (!%p7043_p2)
}
  0xa8   : > { %s7047_s15 = scalar_lea.vmem %s8070_s16, 16  ;;  %s7054_s22 = scalar_lea.vmem %s8070_s16, 32 }
  0xa9   : > { %p7048_p13 = scmp.ne.s32.totalorder %s8070_s16, %s7047_s15  ;;  %p7055_p4 = scmp.lt.s32.totalorder %s8070_s16, %s8070_s16 }
  0xaa   : > { %p7056_p6 = scmp.lt.s32.totalorder %s7054_s22, %s7047_s15 }
  0xab   : > { %p7050_p0 = pnand %p7048_p13, %p8078_p7 }
  0xac   : > { %p7057_p8 = por %p7056_p6, %p7055_p4 }
  0xad   : > { %p7051_p1 = pneg %p7050_p0 }
  0xaf   : > { %p7058_p9 = pnand %p7057_p8, %p7051_p1 }
  0xb1   : > { %7061 = shalt.err (!%p7058_p9)
}
  0xb2   : > { %6650 = dma.hbm_to_vmem [thread:$0]  (!%p8066_p5), %s7871_s12, 16, %s8070_s16, [#allocation11]  }
  0xb3   : > { %s7062_s11 = scalar_lea.hbm %s9048_s4, 16 }
  0xb4   : > { %p7063_p10 = scmp.ne.s32.totalorder %s9048_s4, %s7062_s11  ;;  %p7069_p2 = scmp.lt.u32.totalorder %s7062_s11, %s9048_s4 }
  0xb6   : > { %p7065_p11 = pnand %p7063_p10, %p8078_p7 }
  0xb8   : > { %p7066_p12 = pneg %p7065_p11 }
  0xba   : > { %p7071_p13 = pnand %p7069_p2, %p7066_p12 }
  0xbc   : > { %7074 = shalt.err (!%p7071_p13)
}
  0xbd   : > { %s7075_s26 = scalar_lea.vmem %s8072_s23, 16  ;;  %s7082_s10 = scalar_lea.vmem %s8072_s23, 32 }
  0xbe   : > { %p7076_p0 = scmp.ne.s32.totalorder %s8072_s23, %s7075_s26  ;;  %p7083_p6 = scmp.lt.s32.totalorder %s8072_s23, %s8072_s23 }
  0xbf   : > { %p7084_p8 = scmp.lt.s32.totalorder %s7082_s10, %s7075_s26 }
  0xc0   : > { %p7078_p1 = pnand %p7076_p0, %p8078_p7 }
  0xc1   : > { %p7085_p9 = por %p7084_p8, %p7083_p6 }
  0xc2   : > { %p7079_p4 = pneg %p7078_p1 }
  0xc4   : > { %p7086_p10 = pnand %p7085_p9, %p7079_p4 }
  0xc6   : > { %7089 = shalt.err (!%p7086_p10)
}
  0xc7   : > { %6656 = dma.hbm_to_vmem [thread:$0]  (!%p8066_p5), %s9048_s4, 16, %s8072_s23, [#allocation14]  }
  0xc8   : > { %s7762_s16 = smov [#allocation16]   ;;  %s7763_s15 = smov [#allocation19]  }
  0xc9   : > { %s1320_s1 = sshll.u32 %s7762_s16, 4  ;;  %s1342_s22 = sshll.u32 %s7763_s15, 4  ;;  %s1321_s1 = int_to_ptr.vmem [resolvable:$true] %s1320_s1  ;;  %s1343_s22 = int_to_ptr.vmem [resolvable:$true] %s1342_s22 }
  0xca   : > { %s7090_s11 = scalar_lea.hbm %s7911_s17, 16 }
  0xcb   : > { %p7091_p11 = scmp.ne.s32.totalorder %s7911_s17, %s7090_s11  ;;  %p7097_p13 = scmp.lt.u32.totalorder %s7090_s11, %s7911_s17 }
  0xcd   : > { %p7093_p12 = pnand %p7091_p11, %p8078_p7 }
  0xcf   : > { %p7094_p2 = pneg %p7093_p12 }
  0xd1   : > { %p7099_p0 = pnand %p7097_p13, %p7094_p2 }
  0xd3   : > { %7102 = shalt.err (!%p7099_p0)
}
  0xd4   : > { %s7103_s26 = scalar_lea.vmem %s1321_s1, 16  ;;  %s7110_s23 = scalar_lea.vmem %s1321_s1, 32 }
  0xd5   : > { %p7104_p1 = scmp.ne.s32.totalorder %s1321_s1, %s7103_s26  ;;  %p7111_p8 = scmp.lt.s32.totalorder %s1321_s1, %s1321_s1 }
  0xd6   : > { %p7112_p9 = scmp.lt.s32.totalorder %s7110_s23, %s7103_s26 }
  0xd7   : > { %p7106_p4 = pnand %p7104_p1, %p8078_p7 }
  0xd8   : > { %p7113_p10 = por %p7112_p9, %p7111_p8 }
  0xd9   : > { %p7107_p6 = pneg %p7106_p4 }
  0xdb   : > { %p7114_p3 = pnand %p7113_p10, %p7107_p6 }
  0xdd   : > { %7117 = shalt.err (!%p7114_p3)
}
  0xde   : > { %6662 = dma.hbm_to_vmem [thread:$0]  (!%p8066_p5), %s7911_s17, 16, %s1321_s1, [#allocation17]  }
  0xdf   : > { %s7118_s10 = scalar_lea.hbm %s7921_s25, 16 }
  0xe0   : > { %p7119_p11 = scmp.ne.s32.totalorder %s7921_s25, %s7118_s10  ;;  %p7125_p13 = scmp.lt.u32.totalorder %s7118_s10, %s7921_s25 }
  0xe2   : > { %p7121_p12 = pnand %p7119_p11, %p8078_p7 }
  0xe4   : > { %p7122_p2 = pneg %p7121_p12 }
  0xe6   : > { %p7127_p0 = pnand %p7125_p13, %p7122_p2 }
  0xe8   : > { %7130 = shalt.err (!%p7127_p0)
}
  0xe9   : > { %s7131_s16 = scalar_lea.vmem %s1343_s22, 16  ;;  %s7138_s15 = scalar_lea.vmem %s1343_s22, 32 }
  0xea   : > { %p7132_p3 = scmp.ne.s32.totalorder %s1343_s22, %s7131_s16  ;;  %p7139_p6 = scmp.lt.s32.totalorder %s1343_s22, %s1343_s22 }
  0xeb   : > { %p7140_p8 = scmp.lt.s32.totalorder %s7138_s15, %s7131_s16 }
  0xec   : > { %p7134_p1 = pnand %p7132_p3, %p8078_p7 }
  0xed   : > { %p7141_p9 = por %p7140_p8, %p7139_p6 }
  0xee   : > { %p7135_p4 = pneg %p7134_p1 }
  0xf0   : > { %p7142_p10 = pnand %p7141_p9, %p7135_p4 }
  0xf2   : > { %7145 = shalt.err (!%p7142_p10)
}
  0xf3   : > { %6668 = dma.hbm_to_vmem [thread:$0]  (!%p8066_p5), %s7921_s25, 16, %s1343_s22, [#allocation20]  }
  0xf4   : > { %s7764_s1 = smov [#allocation22]   ;;  %s7765_s26 = smov [#allocation25]  }
  0xf5   : > { %s1364_s11 = sshll.u32 %s7764_s1, 4  ;;  %s1392_s23 = sshll.u32 %s7765_s26, 4  ;;  %s1365_s11 = int_to_ptr.vmem [resolvable:$true] %s1364_s11  ;;  %s1393_s23 = int_to_ptr.vmem [resolvable:$true] %s1392_s23 }
  0xf6   : > { %s7146_s10 = scalar_lea.hbm %s7931_s20, 16 }
  0xf7   : > { %p7147_p11 = scmp.ne.s32.totalorder %s7931_s20, %s7146_s10  ;;  %p7153_p13 = scmp.lt.u32.totalorder %s7146_s10, %s7931_s20 }
  0xf9   : > { %p7149_p12 = pnand %p7147_p11, %p8078_p7 }
  0xfb   : > { %p7150_p2 = pneg %p7149_p12 }
  0xfd   : > { %p7155_p0 = pnand %p7153_p13, %p7150_p2 }
  0xff   : > { %7158 = shalt.err (!%p7155_p0)
}
 0x100   : > { %s7159_s16 = scalar_lea.vmem %s1365_s11, 16  ;;  %s7166_s22 = scalar_lea.vmem %s1365_s11, 32 }
 0x101   : > { %p7160_p3 = scmp.ne.s32.totalorder %s1365_s11, %s7159_s16  ;;  %p7167_p6 = scmp.lt.s32.totalorder %s1365_s11, %s1365_s11 }
 0x102   : > { %p7168_p8 = scmp.lt.s32.totalorder %s7166_s22, %s7159_s16 }
 0x103   : > { %p7162_p1 = pnand %p7160_p3, %p8078_p7 }
 0x104   : > { %p7169_p9 = por %p7168_p8, %p7167_p6 }
 0x105   : > { %p7163_p4 = pneg %p7162_p1 }
 0x107   : > { %p7170_p10 = pnand %p7169_p9, %p7163_p4 }
 0x109   : > { %7173 = shalt.err (!%p7170_p10)
}
 0x10a   : > { %6674 = dma.hbm_to_vmem [thread:$0]  (!%p8066_p5), %s7931_s20, 16, %s1365_s11, [#allocation23]  }
 0x10b   : > { %s7174_s15 = scalar_lea.hbm %s9045_s9, 16 }
 0x10c   : > { %p7175_p11 = scmp.ne.s32.totalorder %s9045_s9, %s7174_s15  ;;  %p7181_p13 = scmp.lt.u32.totalorder %s7174_s15, %s9045_s9 }
 0x10e   : > { %p7177_p12 = pnand %p7175_p11, %p8078_p7 }
 0x110   : > { %p7178_p2 = pneg %p7177_p12 }
 0x112   : > { %p7183_p0 = pnand %p7181_p13, %p7178_p2 }
 0x114   : > { %7186 = shalt.err (!%p7183_p0)
}
 0x115   : > { %s7187_s1 = scalar_lea.vmem %s1393_s23, 16  ;;  %s7194_s26 = scalar_lea.vmem %s1393_s23, 32 }
 0x116   : > { %p7188_p3 = scmp.ne.s32.totalorder %s1393_s23, %s7187_s1  ;;  %p7195_p6 = scmp.lt.s32.totalorder %s1393_s23, %s1393_s23 }
 0x117   : > { %p7196_p8 = scmp.lt.s32.totalorder %s7194_s26, %s7187_s1 }
 0x118   : > { %p7190_p1 = pnand %p7188_p3, %p8078_p7 }
 0x119   : > { %p7197_p9 = por %p7196_p8, %p7195_p6 }
 0x11a   : > { %p7191_p4 = pneg %p7190_p1 }
 0x11c   : > { %p7198_p10 = pnand %p7197_p9, %p7191_p4 }
 0x11e   : > { %7201 = shalt.err (!%p7198_p10)
}
 0x11f   : > { %6680 = dma.hbm_to_vmem [thread:$0]  (!%p8066_p5), %s9045_s9, 16, %s1393_s23, [#allocation26]  }
 0x120   : > { %s7766_s11 = smov [#allocation28]   ;;  %s7767_s16 = smov [#allocation31]  }
 0x121   : > { %s1417_s10 = sshll.u32 %s7766_s11, 4  ;;  %s1448_s22 = sshll.u32 %s7767_s16, 4  ;;  %s1418_s10 = int_to_ptr.vmem [resolvable:$true] %s1417_s10  ;;  %s1449_s22 = int_to_ptr.vmem [resolvable:$true] %s1448_s22 }
 0x122   : > { %s7202_s15 = scalar_lea.hbm %s7966_s13, 16 }
 0x123   : > { %p7203_p11 = scmp.ne.s32.totalorder %s7966_s13, %s7202_s15  ;;  %p7209_p13 = scmp.lt.u32.totalorder %s7202_s15, %s7966_s13 }
 0x125   : > { %p7205_p12 = pnand %p7203_p11, %p8078_p7 }
 0x127   : > { %p7206_p2 = pneg %p7205_p12 }
 0x129   : > { %p7211_p0 = pnand %p7209_p13, %p7206_p2 }
 0x12b   : > { %7214 = shalt.err (!%p7211_p0)
}
 0x12c   : > { %s7215_s1 = scalar_lea.vmem %s1418_s10, 16  ;;  %s7222_s23 = scalar_lea.vmem %s1418_s10, 32 }
 0x12d   : > { %p7216_p3 = scmp.ne.s32.totalorder %s1418_s10, %s7215_s1  ;;  %p7223_p6 = scmp.lt.s32.totalorder %s1418_s10, %s1418_s10 }
 0x12e   : > { %p7224_p8 = scmp.lt.s32.totalorder %s7222_s23, %s7215_s1 }
 0x12f   : > { %p7218_p1 = pnand %p7216_p3, %p8078_p7 }
 0x130   : > { %p7225_p9 = por %p7224_p8, %p7223_p6 }
 0x131   : > { %p7219_p4 = pneg %p7218_p1 }
 0x133   : > { %p7226_p10 = pnand %p7225_p9, %p7219_p4 }
 0x135   : > { %7229 = shalt.err (!%p7226_p10)
}
 0x136   : > { %6686 = dma.hbm_to_vmem [thread:$0]  (!%p8066_p5), %s7966_s13, 16, %s1418_s10, [#allocation29]  }
 0x137   : > { %s7230_s26 = scalar_lea.hbm %s9047_s5, 16 }
 0x138   : > { %p7231_p11 = scmp.ne.s32.totalorder %s9047_s5, %s7230_s26  ;;  %p7237_p13 = scmp.lt.u32.totalorder %s7230_s26, %s9047_s5 }
 0x13a   : > { %p7233_p12 = pnand %p7231_p11, %p8078_p7 }
 0x13c   : > { %p7234_p2 = pneg %p7233_p12 }
 0x13e   : > { %p7239_p0 = pnand %p7237_p13, %p7234_p2 }
 0x140   : > { %7242 = shalt.err (!%p7239_p0)
}
 0x141   : > { %s7243_s11 = scalar_lea.vmem %s1449_s22, 16  ;;  %s7250_s16 = scalar_lea.vmem %s1449_s22, 32 }
 0x142   : > { %p7244_p3 = scmp.ne.s32.totalorder %s1449_s22, %s7243_s11  ;;  %p7251_p6 = scmp.lt.s32.totalorder %s1449_s22, %s1449_s22 }
 0x143   : > { %p7252_p8 = scmp.lt.s32.totalorder %s7250_s16, %s7243_s11 }
 0x144   : > { %p7246_p1 = pnand %p7244_p3, %p8078_p7 }
 0x145   : > { %p7253_p9 = por %p7252_p8, %p7251_p6 }
 0x146   : > { %p7247_p4 = pneg %p7246_p1 }
 0x148   : > { %p7254_p10 = pnand %p7253_p9, %p7247_p4 }
 0x14a   : > { %7257 = shalt.err (!%p7254_p10)
}
 0x14b   : > { %6692 = dma.hbm_to_vmem [thread:$0]  (!%p8066_p5), %s9047_s5, 16, %s1449_s22, [#allocation32]  }
 0x14c   : > { %s7768_s10 = smov [#allocation34]   ;;  %s7769_s1 = smov [#allocation2]  }
 0x14d   : > { %s1476_s15 = sshll.u32 %s7768_s10, 4  ;;  %s1203_s23 = sshll.u32 %s7769_s1, 4  ;;  %s1477_s15 = int_to_ptr.vmem [resolvable:$true] %s1476_s15  ;;  %s1204_s23 = int_to_ptr.vmem [resolvable:$true] %s1203_s23 }
 0x14e   : > { %s7258_s26 = scalar_lea.hbm %s8011_s29, 16 }
 0x14f   : > { %p7259_p11 = scmp.ne.s32.totalorder %s8011_s29, %s7258_s26  ;;  %p7265_p13 = scmp.lt.u32.totalorder %s7258_s26, %s8011_s29 }
 0x151   : > { %p7261_p12 = pnand %p7259_p11, %p8078_p7 }
 0x153   : > { %p7262_p2 = pneg %p7261_p12 }
 0x155   : > { %p7267_p0 = pnand %p7265_p13, %p7262_p2 }
 0x157   : > { %7270 = shalt.err (!%p7267_p0)
}
 0x158   : > { %s7271_s11 = scalar_lea.vmem %s1477_s15, 16  ;;  %s7278_s22 = scalar_lea.vmem %s1477_s15, 32 }
 0x159   : > { %p7272_p3 = scmp.ne.s32.totalorder %s1477_s15, %s7271_s11  ;;  %p7279_p6 = scmp.lt.s32.totalorder %s1477_s15, %s1477_s15 }
 0x15a   : > { %p7280_p8 = scmp.lt.s32.totalorder %s7278_s22, %s7271_s11 }
 0x15b   : > { %p7274_p1 = pnand %p7272_p3, %p8078_p7 }
 0x15c   : > { %p7281_p9 = por %p7280_p8, %p7279_p6 }
 0x15d   : > { %p7275_p4 = pneg %p7274_p1 }
 0x15f   : > { %p7282_p10 = pnand %p7281_p9, %p7275_p4 }
 0x161   : > { %7285 = shalt.err (!%p7282_p10)
}
 0x162   : > { %6698 = dma.hbm_to_vmem [thread:$0]  (!%p8066_p5), %s8011_s29, 16, %s1477_s15, [#allocation35]  }
 0x163   : > { %s7286_s16 = scalar_lea.hbm %s9049_s3, 16 }
 0x164   : > { %p7287_p11 = scmp.ne.s32.totalorder %s9049_s3, %s7286_s16  ;;  %p7293_p13 = scmp.lt.u32.totalorder %s7286_s16, %s9049_s3 }
 0x166   : > { %p7289_p12 = pnand %p7287_p11, %p8078_p7 }
 0x168   : > { %p7290_p2 = pneg %p7289_p12 }
 0x16a   : > { %p7295_p0 = pnand %p7293_p13, %p7290_p2 }
 0x16c   : > { %7298 = shalt.err (!%p7295_p0)
}
 0x16d   : > { %s7299_s10 = scalar_lea.vmem %s1204_s23, 16  ;;  %s7306_s1 = scalar_lea.vmem %s1204_s23, 32 }
 0x16e   : > { %p7300_p3 = scmp.ne.s32.totalorder %s1204_s23, %s7299_s10  ;;  %p7307_p6 = scmp.lt.s32.totalorder %s1204_s23, %s1204_s23 }
 0x16f   : > { %p7308_p8 = scmp.lt.s32.totalorder %s7306_s1, %s7299_s10 }
 0x170   : > { %p7302_p1 = pnand %p7300_p3, %p8078_p7 }
 0x171   : > { %p7309_p9 = por %p7308_p8, %p7307_p6 }
 0x172   : > { %p7303_p4 = pneg %p7302_p1 }
 0x174   : > { %p7310_p10 = pnand %p7309_p9, %p7303_p4 }
 0x176   : > { %7313 = shalt.err (!%p7310_p10)
}
 0x177   : > { %6635 = dma.hbm_to_vmem [thread:$0]  (!%p8066_p5), %s9049_s3, 16, %s1204_s23, [#allocation3]  }
 0x178   : > { %s7770_s15 = smov [#allocation6]   ;;  %s7771_s11 = smov [#allocation9]  }
 0x179   : > { %s1225_s26 = sshll.u32 %s7770_s15, 4  ;;  %s1250_s22 = sshll.u32 %s7771_s11, 4  ;;  %s1226_s26 = int_to_ptr.vmem [resolvable:$true] %s1225_s26  ;;  %s1251_s22 = int_to_ptr.vmem [resolvable:$true] %s1250_s22 }
 0x17a   : > { %s7314_s16 = scalar_lea.hbm %s7846_s14, 16 }
 0x17b   : > { %p7315_p11 = scmp.ne.s32.totalorder %s7846_s14, %s7314_s16  ;;  %p7321_p13 = scmp.lt.u32.totalorder %s7314_s16, %s7846_s14 }
 0x17d   : > { %p7317_p12 = pnand %p7315_p11, %p8078_p7 }
 0x17f   : > { %p7318_p2 = pneg %p7317_p12 }
 0x181   : > { %p7323_p0 = pnand %p7321_p13, %p7318_p2 }
 0x183   : > { %7326 = shalt.err (!%p7323_p0)
}
 0x184   : > { %s7327_s10 = scalar_lea.vmem %s1226_s26, 16  ;;  %s7334_s23 = scalar_lea.vmem %s1226_s26, 32 }
 0x185   : > { %p7328_p3 = scmp.ne.s32.totalorder %s1226_s26, %s7327_s10  ;;  %p7335_p6 = scmp.lt.s32.totalorder %s1226_s26, %s1226_s26 }
 0x186   : > { %p7336_p8 = scmp.lt.s32.totalorder %s7334_s23, %s7327_s10 }
 0x187   : > { %p7330_p1 = pnand %p7328_p3, %p8078_p7 }
 0x188   : > { %p7337_p9 = por %p7336_p8, %p7335_p6 }
 0x189   : > { %p7331_p4 = pneg %p7330_p1 }
 0x18b   : > { %p7338_p10 = pnand %p7337_p9, %p7331_p4 }
 0x18d   : > { %7341 = shalt.err (!%p7338_p10)
}
 0x18e   : > { %6641 = dma.hbm_to_vmem [thread:$0]  (!%p8066_p5), %s7846_s14, 16, %s1226_s26, [#allocation5]  }
 0x18f   : > { %s7342_s1 = scalar_lea.hbm %s7861_s30, 16 }
 0x190   : > { %p7343_p11 = scmp.ne.s32.totalorder %s7861_s30, %s7342_s1  ;;  %p7349_p13 = scmp.lt.u32.totalorder %s7342_s1, %s7861_s30 }
 0x192   : > { %p7345_p12 = pnand %p7343_p11, %p8078_p7 }
 0x194   : > { %p7346_p2 = pneg %p7345_p12 }
 0x196   : > { %p7351_p0 = pnand %p7349_p13, %p7346_p2 }
 0x198   : > { %7354 = shalt.err (!%p7351_p0)
}
 0x199   : > { %s7355_s15 = scalar_lea.vmem %s1251_s22, 16  ;;  %s7362_s11 = scalar_lea.vmem %s1251_s22, 32 }
 0x19a   : > { %p7356_p3 = scmp.ne.s32.totalorder %s1251_s22, %s7355_s15  ;;  %p7363_p6 = scmp.lt.s32.totalorder %s1251_s22, %s1251_s22 }
 0x19b   : > { %p7364_p8 = scmp.lt.s32.totalorder %s7362_s11, %s7355_s15 }
 0x19c   : > { %p7358_p1 = pnand %p7356_p3, %p8078_p7 }
 0x19d   : > { %p7365_p9 = por %p7364_p8, %p7363_p6 }
 0x19e   : > { %p7359_p4 = pneg %p7358_p1 }
 0x1a0   : > { %p7366_p10 = pnand %p7365_p9, %p7359_p4 }
 0x1a2   : > { %7369 = shalt.err (!%p7366_p10)
}
 0x1a3   : > { %s9053_s26 = sld [smem:[#allocation64_spill]]  ;;  %s7772_s16 = smov [#allocation12]  }
 0x1a4   : > { %6647 = dma.hbm_to_vmem [thread:$0]  (!%p8066_p5), %s7861_s30, 16, %s1251_s22, [#allocation8]  }
 0x1a5   : > { %s1278_s10 = sshll.u32 %s7772_s16, 4  ;;  %s7773_s23 = smov [#allocation15]   ;;  %s1279_s10 = int_to_ptr.vmem [resolvable:$true] %s1278_s10 }
 0x1a6   : > { %s1300_s1 = sshll.u32 %s7773_s23, 4  ;;  %s1301_s1 = int_to_ptr.vmem [resolvable:$true] %s1300_s1 }
 0x1a9   : > { %s7370_s3 = scalar_lea.hbm %s9053_s26, 16 }
 0x1aa   : > { %p7371_p11 = scmp.ne.s32.totalorder %s9053_s26, %s7370_s3  ;;  %p7377_p13 = scmp.lt.u32.totalorder %s7370_s3, %s9053_s26 }
 0x1ac   : > { %p7373_p12 = pnand %p7371_p11, %p8078_p7 }
 0x1ae   : > { %p7374_p2 = pneg %p7373_p12 }
 0x1b0   : > { %p7379_p0 = pnand %p7377_p13, %p7374_p2 }
 0x1b2   : > { %7382 = shalt.err (!%p7379_p0)
}
 0x1b3   : > { %s7383_s15 = scalar_lea.vmem %s1279_s10, 16  ;;  %s7390_s22 = scalar_lea.vmem %s1279_s10, 32 }
 0x1b4   : > { %p7384_p3 = scmp.ne.s32.totalorder %s1279_s10, %s7383_s15  ;;  %p7391_p6 = scmp.lt.s32.totalorder %s1279_s10, %s1279_s10 }
 0x1b5   : > { %p7392_p8 = scmp.lt.s32.totalorder %s7390_s22, %s7383_s15 }
 0x1b6   : > { %p7386_p1 = pnand %p7384_p3, %p8078_p7 }
 0x1b7   : > { %p7393_p9 = por %p7392_p8, %p7391_p6 }
 0x1b8   : > { %p7387_p4 = pneg %p7386_p1 }
 0x1ba   : > { %p7394_p10 = pnand %p7393_p9, %p7387_p4 }
 0x1bc   : > { %7397 = shalt.err (!%p7394_p10)
}
 0x1bd   : > { %s9054_s11 = sld [smem:[#allocation66_spill]] }
 0x1be   : > { %6653 = dma.hbm_to_vmem [thread:$0]  (!%p8066_p5), %s9053_s26, 16, %s1279_s10, [#allocation11]  }
 0x1c3   : > { %s7398_s3 = scalar_lea.hbm %s9054_s11, 16 }
 0x1c4   : > { %p7399_p11 = scmp.ne.s32.totalorder %s9054_s11, %s7398_s3  ;;  %p7405_p13 = scmp.lt.u32.totalorder %s7398_s3, %s9054_s11 }
 0x1c6   : > { %p7401_p12 = pnand %p7399_p11, %p8078_p7 }
 0x1c8   : > { %p7402_p2 = pneg %p7401_p12 }
 0x1ca   : > { %p7407_p0 = pnand %p7405_p13, %p7402_p2 }
 0x1cc   : > { %7410 = shalt.err (!%p7407_p0)
}
 0x1cd   : > { %s7411_s16 = scalar_lea.vmem %s1301_s1, 16  ;;  %s7418_s23 = scalar_lea.vmem %s1301_s1, 32 }
 0x1ce   : > { %p7412_p3 = scmp.ne.s32.totalorder %s1301_s1, %s7411_s16  ;;  %p7419_p6 = scmp.lt.s32.totalorder %s1301_s1, %s1301_s1 }
 0x1cf   : > { %p7420_p8 = scmp.lt.s32.totalorder %s7418_s23, %s7411_s16 }
 0x1d0   : > { %p7414_p1 = pnand %p7412_p3, %p8078_p7 }
 0x1d1   : > { %p7421_p9 = por %p7420_p8, %p7419_p6 }
 0x1d2   : > { %p7415_p4 = pneg %p7414_p1 }
 0x1d4   : > { %p7422_p10 = pnand %p7421_p9, %p7415_p4 }
 0x1d6   : > { %7425 = shalt.err (!%p7422_p10)
}
 0x1d7   : > { %s9055_s10 = sld [smem:[#allocation70_spill]]  ;;  %s7774_s15 = smov [#allocation18]  }
 0x1d8   : > { %6659 = dma.hbm_to_vmem [thread:$0]  (!%p8066_p5), %s9054_s11, 16, %s1301_s1, [#allocation14]  }
 0x1d9   : > { %s1331_s22 = sshll.u32 %s7774_s15, 4  ;;  %s7775_s3 = smov [#allocation21]   ;;  %s1332_s22 = int_to_ptr.vmem [resolvable:$true] %s1331_s22 }
 0x1da   : > { %s1353_s4 = sshll.u32 %s7775_s3, 4  ;;  %s1354_s4 = int_to_ptr.vmem [resolvable:$true] %s1353_s4 }
 0x1dd   : > { %s7426_s5 = scalar_lea.hbm %s9055_s10, 16 }
 0x1de   : > { %p7427_p11 = scmp.ne.s32.totalorder %s9055_s10, %s7426_s5  ;;  %p7433_p13 = scmp.lt.u32.totalorder %s7426_s5, %s9055_s10 }
 0x1e0   : > { %p7429_p12 = pnand %p7427_p11, %p8078_p7 }
 0x1e2   : > { %p7430_p2 = pneg %p7429_p12 }
 0x1e4   : > { %p7435_p0 = pnand %p7433_p13, %p7430_p2 }
 0x1e6   : > { %7438 = shalt.err (!%p7435_p0)
}
 0x1e7   : > { %s7439_s16 = scalar_lea.vmem %s1332_s22, 16  ;;  %s7446_s1 = scalar_lea.vmem %s1332_s22, 32 }
 0x1e8   : > { %p7440_p3 = scmp.ne.s32.totalorder %s1332_s22, %s7439_s16  ;;  %p7447_p6 = scmp.lt.s32.totalorder %s1332_s22, %s1332_s22 }
 0x1e9   : > { %p7448_p8 = scmp.lt.s32.totalorder %s7446_s1, %s7439_s16 }
 0x1ea   : > { %p7442_p1 = pnand %p7440_p3, %p8078_p7 }
 0x1eb   : > { %p7449_p9 = por %p7448_p8, %p7447_p6 }
 0x1ec   : > { %p7443_p4 = pneg %p7442_p1 }
 0x1ee   : > { %p7450_p10 = pnand %p7449_p9, %p7443_p4 }
 0x1f0   : > { %7453 = shalt.err (!%p7450_p10)
}
 0x1f1   : > { %s9056_s23 = sld [smem:[#allocation71_spill]] }
 0x1f2   : > { %6665 = dma.hbm_to_vmem [thread:$0]  (!%p8066_p5), %s9055_s10, 16, %s1332_s22, [#allocation17]  }
 0x1f7   : > { %s7454_s5 = scalar_lea.hbm %s9056_s23, 16 }
 0x1f8   : > { %p7455_p11 = scmp.ne.s32.totalorder %s9056_s23, %s7454_s5  ;;  %p7461_p13 = scmp.lt.u32.totalorder %s7454_s5, %s9056_s23 }
 0x1fa   : > { %p7457_p12 = pnand %p7455_p11, %p8078_p7 }
 0x1fc   : > { %p7458_p2 = pneg %p7457_p12 }
 0x1fe   : > { %p7463_p0 = pnand %p7461_p13, %p7458_p2 }
 0x200   : > { %7466 = shalt.err (!%p7463_p0)
}
 0x201   : > { %s7467_s15 = scalar_lea.vmem %s1354_s4, 16  ;;  %s7474_s3 = scalar_lea.vmem %s1354_s4, 32 }
 0x202   : > { %p7468_p3 = scmp.ne.s32.totalorder %s1354_s4, %s7467_s15  ;;  %p7475_p6 = scmp.lt.s32.totalorder %s1354_s4, %s1354_s4 }
 0x203   : > { %p7476_p8 = scmp.lt.s32.totalorder %s7474_s3, %s7467_s15 }
 0x204   : > { %p7470_p1 = pnand %p7468_p3, %p8078_p7 }
 0x205   : > { %p7477_p9 = por %p7476_p8, %p7475_p6 }
 0x206   : > { %p7471_p4 = pneg %p7470_p1 }
 0x208   : > { %p7478_p10 = pnand %p7477_p9, %p7471_p4 }
 0x20a   : > { %7481 = shalt.err (!%p7478_p10)
}
 0x20b   : > { %s9057_s22 = sld [smem:[#allocation73_spill]]  ;;  %s7776_s16 = smov [#allocation24]  }
 0x20c   : > { %6671 = dma.hbm_to_vmem [thread:$0]  (!%p8066_p5), %s9056_s23, 16, %s1354_s4, [#allocation20]  }
 0x20d   : > { %s1378_s1 = sshll.u32 %s7776_s16, 4  ;;  %s7777_s5 = smov [#allocation27]   ;;  %s1379_s1 = int_to_ptr.vmem [resolvable:$true] %s1378_s1 }
 0x20e   : > { %s1406_s8 = sshll.u32 %s7777_s5, 4  ;;  %s1407_s8 = int_to_ptr.vmem [resolvable:$true] %s1406_s8 }
 0x211   : > { %s7482_s9 = scalar_lea.hbm %s9057_s22, 16 }
 0x212   : > { %p7483_p11 = scmp.ne.s32.totalorder %s9057_s22, %s7482_s9  ;;  %p7489_p13 = scmp.lt.u32.totalorder %s7482_s9, %s9057_s22 }
 0x214   : > { %p7485_p12 = pnand %p7483_p11, %p8078_p7 }
 0x216   : > { %p7486_p2 = pneg %p7485_p12 }
 0x218   : > { %p7491_p0 = pnand %p7489_p13, %p7486_p2 }
 0x21a   : > { %7494 = shalt.err (!%p7491_p0)
}
 0x21b   : > { %s7495_s15 = scalar_lea.vmem %s1379_s1, 16  ;;  %s7502_s4 = scalar_lea.vmem %s1379_s1, 32 }
 0x21c   : > { %p7496_p3 = scmp.ne.s32.totalorder %s1379_s1, %s7495_s15  ;;  %p7503_p6 = scmp.lt.s32.totalorder %s1379_s1, %s1379_s1 }
 0x21d   : > { %p7504_p8 = scmp.lt.s32.totalorder %s7502_s4, %s7495_s15 }
 0x21e   : > { %p7498_p1 = pnand %p7496_p3, %p8078_p7 }
 0x21f   : > { %p7505_p9 = por %p7504_p8, %p7503_p6 }
 0x220   : > { %p7499_p4 = pneg %p7498_p1 }
 0x222   : > { %p7506_p10 = pnand %p7505_p9, %p7499_p4 }
 0x224   : > { %7509 = shalt.err (!%p7506_p10)
}
 0x225   : > { %s9058_s3 = sld [smem:[#allocation77_spill]] }
 0x226   : > { %6677 = dma.hbm_to_vmem [thread:$0]  (!%p8066_p5), %s9057_s22, 16, %s1379_s1, [#allocation23]  }
 0x22b   : > { %s7510_s9 = scalar_lea.hbm %s9058_s3, 16 }
 0x22c   : > { %p7511_p11 = scmp.ne.s32.totalorder %s9058_s3, %s7510_s9  ;;  %p7517_p13 = scmp.lt.u32.totalorder %s7510_s9, %s9058_s3 }
 0x22e   : > { %p7513_p12 = pnand %p7511_p11, %p8078_p7 }
 0x230   : > { %p7514_p2 = pneg %p7513_p12 }
 0x232   : > { %p7519_p0 = pnand %p7517_p13, %p7514_p2 }
 0x234   : > { %7522 = shalt.err (!%p7519_p0)
}
 0x235   : > { %s7523_s16 = scalar_lea.vmem %s1407_s8, 16  ;;  %s7530_s5 = scalar_lea.vmem %s1407_s8, 32 }
 0x236   : > { %p7524_p3 = scmp.ne.s32.totalorder %s1407_s8, %s7523_s16  ;;  %p7531_p6 = scmp.lt.s32.totalorder %s1407_s8, %s1407_s8 }
 0x237   : > { %p7532_p8 = scmp.lt.s32.totalorder %s7530_s5, %s7523_s16 }
 0x238   : > { %p7526_p1 = pnand %p7524_p3, %p8078_p7 }
 0x239   : > { %p7533_p9 = por %p7532_p8, %p7531_p6 }
 0x23a   : > { %p7527_p4 = pneg %p7526_p1 }
 0x23c   : > { %p7534_p10 = pnand %p7533_p9, %p7527_p4 }
 0x23e   : > { %7537 = shalt.err (!%p7534_p10)
}
 0x23f   : > { %s9059_s1 = sld [smem:[#allocation78_spill]]  ;;  %s7778_s15 = smov [#allocation30]  }
 0x240   : > { %6683 = dma.hbm_to_vmem [thread:$0]  (!%p8066_p5), %s9058_s3, 16, %s1407_s8, [#allocation26]  }
 0x241   : > { %s1428_s4 = sshll.u32 %s7778_s15, 4  ;;  %s7779_s9 = smov [#allocation33]   ;;  %s1429_s4 = int_to_ptr.vmem [resolvable:$true] %s1428_s4 }
 0x242   : > { %s1462_s10 = sshll.u32 %s7779_s9, 4  ;;  %s1463_s10 = int_to_ptr.vmem [resolvable:$true] %s1462_s10 }
 0x245   : > { %s7538_s11 = scalar_lea.hbm %s9059_s1, 16 }
 0x246   : > { %p7539_p11 = scmp.ne.s32.totalorder %s9059_s1, %s7538_s11  ;;  %p7545_p13 = scmp.lt.u32.totalorder %s7538_s11, %s9059_s1 }
 0x248   : > { %p7541_p12 = pnand %p7539_p11, %p8078_p7 }
 0x24a   : > { %p7542_p2 = pneg %p7541_p12 }
 0x24c   : > { %p7547_p0 = pnand %p7545_p13, %p7542_p2 }
 0x24e   : > { %7550 = shalt.err (!%p7547_p0)
}
 0x24f   : > { %s7551_s16 = scalar_lea.vmem %s1429_s4, 16  ;;  %s7558_s8 = scalar_lea.vmem %s1429_s4, 32 }
 0x250   : > { %p7552_p3 = scmp.ne.s32.totalorder %s1429_s4, %s7551_s16  ;;  %p7559_p6 = scmp.lt.s32.totalorder %s1429_s4, %s1429_s4 }
 0x251   : > { %p7560_p8 = scmp.lt.s32.totalorder %s7558_s8, %s7551_s16 }
 0x252   : > { %p7554_p1 = pnand %p7552_p3, %p8078_p7 }
 0x253   : > { %p7561_p9 = por %p7560_p8, %p7559_p6 }
 0x254   : > { %p7555_p4 = pneg %p7554_p1 }
 0x256   : > { %p7562_p10 = pnand %p7561_p9, %p7555_p4 }
 0x258   : > { %7565 = shalt.err (!%p7562_p10)
}
 0x259   : > { %s9060_s5 = sld [smem:[#allocation84_spill]] }
 0x25a   : > { %6689 = dma.hbm_to_vmem [thread:$0]  (!%p8066_p5), %s9059_s1, 16, %s1429_s4, [#allocation29]  }
 0x25f   : > { %s7566_s11 = scalar_lea.hbm %s9060_s5, 16 }
 0x260   : > { %p7567_p11 = scmp.ne.s32.totalorder %s9060_s5, %s7566_s11  ;;  %p7573_p13 = scmp.lt.u32.totalorder %s7566_s11, %s9060_s5 }
 0x262   : > { %p7569_p12 = pnand %p7567_p11, %p8078_p7 }
 0x264   : > { %p7570_p2 = pneg %p7569_p12 }
 0x266   : > { %p7575_p0 = pnand %p7573_p13, %p7570_p2 }
 0x268   : > { %7578 = shalt.err (!%p7575_p0)
}
 0x269   : > { %s7579_s15 = scalar_lea.vmem %s1463_s10, 16  ;;  %s7586_s9 = scalar_lea.vmem %s1463_s10, 32 }
 0x26a   : > { %p7580_p3 = scmp.ne.s32.totalorder %s1463_s10, %s7579_s15  ;;  %p7587_p6 = scmp.lt.s32.totalorder %s1463_s10, %s1463_s10 }
 0x26b   : > { %p7588_p8 = scmp.lt.s32.totalorder %s7586_s9, %s7579_s15 }
 0x26c   : > { %p7582_p1 = pnand %p7580_p3, %p8078_p7 }
 0x26d   : > { %p7589_p9 = por %p7588_p8, %p7587_p6 }
 0x26e   : > { %p7583_p4 = pneg %p7582_p1 }
 0x270   : > { %p7590_p10 = pnand %p7589_p9, %p7583_p4 }
 0x272   : > { %7593 = shalt.err (!%p7590_p10)
}
 0x273   : > { %s9061_s4 = sld [smem:[#allocation87_spill]]  ;;  %s7780_s16 = smov [#allocation36]  }
 0x274   : > { %6695 = dma.hbm_to_vmem [thread:$0]  (!%p8066_p5), %s9060_s5, 16, %s1463_s10, [#allocation32]  }
 0x275   : > { %s1490_s8 = sshll.u32 %s7780_s16, 4  ;;  %s7781_s11 = smov [#allocation37]   ;;  %s1491_s8 = int_to_ptr.vmem [resolvable:$true] %s1490_s8 }
 0x276   : > { %s1504_s1 = sshll.u32 %s7781_s11, 4  ;;  %s1505_s1 = int_to_ptr.vmem [resolvable:$true] %s1504_s1 }
 0x279   : > { %s7594_s3 = scalar_lea.hbm %s9061_s4, 16 }
 0x27a   : > { %p7595_p11 = scmp.ne.s32.totalorder %s9061_s4, %s7594_s3  ;;  %p7601_p13 = scmp.lt.u32.totalorder %s7594_s3, %s9061_s4 }
 0x27c   : > { %p7597_p12 = pnand %p7595_p11, %p8078_p7 }
 0x27e   : > { %p7598_p2 = pneg %p7597_p12 }
 0x280   : > { %p7603_p0 = pnand %p7601_p13, %p7598_p2 }
 0x282   : > { %7606 = shalt.err (!%p7603_p0)
}
 0x283   : > { %s7607_s15 = scalar_lea.vmem %s1491_s8, 16  ;;  %s7614_s10 = scalar_lea.vmem %s1491_s8, 32 }
 0x284   : > { %p7608_p3 = scmp.ne.s32.totalorder %s1491_s8, %s7607_s15  ;;  %p7615_p6 = scmp.lt.s32.totalorder %s1491_s8, %s1491_s8 }
 0x285   : > { %p7616_p8 = scmp.lt.s32.totalorder %s7614_s10, %s7607_s15 }
 0x286   : > { %p7610_p1 = pnand %p7608_p3, %p8078_p7 }
 0x287   : > { %p7617_p9 = por %p7616_p8, %p7615_p6 }
 0x288   : > { %p7611_p4 = pneg %p7610_p1 }
 0x28a   : > { %p7618_p10 = pnand %p7617_p9, %p7611_p4 }
 0x28c   : > { %7621 = shalt.err (!%p7618_p10)
}
 0x28d   : > { %6701 = dma.hbm_to_vmem [thread:$0]  (!%p8066_p5), %s9061_s4, 16, %s1491_s8, [#allocation35]  }
 0x28e   : > { %s7622_s3 = scalar_lea.hbm %s8031_s27, 16 }
 0x28f   : > { %p7623_p11 = scmp.ne.s32.totalorder %s8031_s27, %s7622_s3  ;;  %p7629_p13 = scmp.lt.u32.totalorder %s7622_s3, %s8031_s27 }
 0x291   : > { %p7625_p12 = pnand %p7623_p11, %p8078_p7 }
 0x293   : > { %p7626_p2 = pneg %p7625_p12 }
 0x295   : > { %p7631_p0 = pnand %p7629_p13, %p7626_p2 }
 0x297   : > { %7634 = shalt.err (!%p7631_p0)
}
 0x298   : > { %s7635_s9 = scalar_lea.vmem %s1505_s1, 16  ;;  %s7642_s16 = scalar_lea.vmem %s1505_s1, 32 }
 0x299   : > { %p7636_p3 = scmp.ne.s32.totalorder %s1505_s1, %s7635_s9  ;;  %p7643_p6 = scmp.lt.s32.totalorder %s1505_s1, %s1505_s1 }
 0x29a   : > { %p7644_p8 = scmp.lt.s32.totalorder %s7642_s16, %s7635_s9 }
 0x29b   : > { %p7638_p1 = pnand %p7636_p3, %p8078_p7 }
 0x29c   : > { %p7645_p9 = por %p7644_p8, %p7643_p6 }
 0x29d   : > { %p7639_p4 = pneg %p7638_p1 }
 0x29f   : > { %p7646_p10 = pnand %p7645_p9, %p7639_p4 }
 0x2a1   : > { %7649 = shalt.err (!%p7646_p10)
}
 0x2a2   : > { %6704 = dma.hbm_to_vmem [thread:$0]  (!%p8066_p5), %s8031_s27, 16, %s1505_s1, [#allocation38]  }
 0x2a3   : > { %p9062_p11 = scmp.ne.s32.totalorder %s9050_s7, 0 }
 0x2a4   : > { %p9063_p12 = scmp.eq.s32.totalorder (!%p9062_p11), %s8049_s2, 0 }
 0x2a5   : > { %1533 = sbr.rel (%p9062_p11) target bundleno = 6867 (0x1ad3), region = 208 }
 0x2ac   : > { %7655 = dma.done.wait (%p9063_p12), [#allocation3], 16   ;;  %p9064_p2 = pmov %p9063_p12 }
 0x2ae   : > { %7657 = vsyncadd (%p9064_p2), [#allocation3], 4294967280  ;;  %p9065_p7 = pmov %p9064_p2 }
 0x2af   : > { %p9066_p13 = pmov %p9064_p2 }
 0x2b0   : > { %7659 = dma.done.wait (%p9065_p7), [#allocation5], 32  }
 0x2b1   : > { %7661 = vsyncadd (%p9066_p13), [#allocation5], 4294967264  ;;  %p9067_p0 = pmov %p9064_p2 }
 0x2b3   : > { %7663 = dma.done.wait (%p9067_p0), [#allocation8], 32   ;;  %p9068_p5 = pmov %p9067_p0 }
 0x2b4   : > { %p9069_p3 = pmov %p9067_p0 }
 0x2b5   : > { %7665 = vsyncadd (%p9068_p5), [#allocation8], 4294967264 }
 0x2b6   : > { %7667 = dma.done.wait (%p9069_p3), [#allocation11], 32   ;;  %p9070_p1 = pmov %p9067_p0 }
 0x2b7   : > { %p9071_p4 = pmov %p9067_p0 }
 0x2b8   : > { %7669 = vsyncadd (%p9070_p1), [#allocation11], 4294967264 }
 0x2b9   : > { %7671 = dma.done.wait (%p9071_p4), [#allocation14], 32   ;;  %p9072_p6 = pmov %p9067_p0 }
 0x2ba   : > { %p9073_p8 = pmov %p9067_p0 }
 0x2bb   : > { %7673 = vsyncadd (%p9072_p6), [#allocation14], 4294967264 }
 0x2bc   : > { %7675 = dma.done.wait (%p9073_p8), [#allocation17], 32   ;;  %p9074_p9 = pmov %p9067_p0 }
 0x2bd   : > { %p9075_p10 = pmov %p9067_p0 }
 0x2be   : > { %7677 = vsyncadd (%p9074_p9), [#allocation17], 4294967264 }
 0x2bf   : > { %7679 = dma.done.wait (%p9075_p10), [#allocation20], 32   ;;  %p9076_p11 = pmov %p9067_p0 }
 0x2c0   : > { %p9077_p12 = pmov %p9067_p0 }
 0x2c1   : > { %7681 = vsyncadd (%p9076_p11), [#allocation20], 4294967264 }
 0x2c2   : > { %7683 = dma.done.wait (%p9077_p12), [#allocation23], 32   ;;  %p9078_p2 = pmov %p9067_p0 }
 0x2c3   : > { %p9079_p7 = pmov %p9067_p0 }
 0x2c4   : > { %7685 = vsyncadd (%p9078_p2), [#allocation23], 4294967264 }
 0x2c5   : > { %7687 = dma.done.wait (%p9079_p7), [#allocation26], 32   ;;  %p9080_p13 = pmov %p9067_p0 }
 0x2c7   : > { %7689 = vsyncadd (%p9080_p13), [#allocation26], 4294967264 }
 0x2c8   : > { %7691 = dma.done.wait (%p9067_p0), [#allocation29], 32   ;;  %p9081_p5 = pmov %p9067_p0 }
 0x2c9   : > { %p9082_p3 = pmov %p9067_p0 }
 0x2ca   : > { %7693 = vsyncadd (%p9081_p5), [#allocation29], 4294967264 }
 0x2cb   : > { %7695 = dma.done.wait (%p9082_p3), [#allocation32], 32   ;;  %p9083_p1 = pmov %p9067_p0 }
 0x2cc   : > { %p9084_p4 = pmov %p9067_p0 }
 0x2cd   : > { %7697 = vsyncadd (%p9083_p1), [#allocation32], 4294967264 }
 0x2ce   : > { %7699 = dma.done.wait (%p9084_p4), [#allocation35], 32   ;;  %p9085_p6 = pmov %p9067_p0 }
 0x2cf   : > { %p9086_p8 = pmov %p9067_p0 }
 0x2d0   : > { %7701 = vsyncadd (%p9085_p6), [#allocation35], 4294967264 }
 0x2d1   : > { %7703 = dma.done.wait (%p9086_p8), [#allocation38], 16   ;;  %p9087_p9 = pmov %p9067_p0 }
 0x2d2   : > { %s9088_s7 = sld [smem:[#allocation53_spill]]  ;;  %s9089_s18 = sld [smem:[#allocation54_spill]]  ;;  %vm1970_vm0 = vcmask 519168   ;;  %vm2003_vm1 = vcmask 516096   ;;  %vm1999_vm2 = vcmask 523264   ;;  %v7782_v24 = vmov 0.0|0.0  }
 0x2d3   : > { %7705 = vsyncadd (%p9087_p9), [#allocation38], 4294967280  ;;  %p1748_p10 = scmp.lt.s32.totalorder %s8049_s2, 1  ;;  %s9090_s8 = sld [smem:[#allocation61_spill]]  ;;  %6229 = vmatprep.subr.bf16.mxu0 %v7782_v24  ;;  %6261 = vmatprep.subr.bf16.mxu1 %v7782_v24  ;;  %vm7783_vm3 = vmmov 0   ;;  %v7784_v37 = vmov 0.0  }
 0x2d4   : > { %s9091_s11 = sld [smem:[#allocation62_spill]]  ;;  %5940 = vmatprep.mubr.msk.f32.mxu0 %vm7783_vm3, %v7784_v37  ;;  %5973 = vmatprep.mubr.msk.f32.mxu1 %vm7783_vm3, %v7784_v37  ;;  %v5593_v48 = vld [vmem:[#allocation2] ss:$0 sm:$0xff]  ;;  %v5594_v50 = vld [vmem:[#allocation4] ss:$0 sm:$0xff]  ;;  %vm2209_vm4 = vcmask 130048  }
 0x2d5   : > { %s9122_s2 = smov (!%p1748_p10, %s8049_s2), 1  ;;  %v5595_v57 = vld [vmem:[#allocation6] ss:$0 sm:$0xff]  ;;  %v5596_v61 = vld [vmem:[#allocation7] ss:$0 sm:$0xff]  ;;  %vm8464_vm5 = vmpackc.low %vm2209_vm4, %vm2209_vm4  ;;  %s8998_s15 = smov 96  }
 0x2d6   : > { %s8403_s0 = sshll.u32 %s9122_s2, 4  ;;  %s9002_s10 = smov 112   ;;  %vm2535_vm6 = vcmask 68608   ;;  %vm2589_vm7 = vcmask 1040384   ;;  %vm7792_vm8 = vmmov 1   ;;  %vm2585_vm10 = vcmask 72704  }
 0x2d7   : > { %s9000_s3 = smov 80   ;;  %s8996_s9 = smov 48   ;;  %vm8517_vm9 = vmpackc.low %vm2589_vm7, %vm7792_vm8  ;;  %vm2915_vm11 = vcmask 261120   ;;  %vm2917_vm12 = vcmask 392192   ;;  %vm3440_vm13 = vcmask 1043456   ;;  %vm3436_vm14 = vcmask 31744  }
 0x2d8   : > { %s1757_s1 = scalar_lea.vmem %s9088_s7, %s8403_s0  ;;  %v8408_v0 = vld [vmem:[%s9089_s18] sm:$0xf]  ;;  %s8994_s16 = smov 32   ;;  %vm5154_vm15 = vcmask 19456  }
 0x2d9   : > { %v1968_v1 = vld [vmem:[%s1757_s1 + $0x8] sm:$0x1]  ;;  %v1967_v2 = vld [vmem:[%s1757_s1] sm:$0xff]  ;;  %v1971_v3 = vsel %vm1970_vm0, %v8408_v0, 0.0  ;;  %v1784_v25 = vld [vmem:[%s9090_s8 + $0x10] sm:$0xff]  ;;  %s8991_s7 = smov 64  }
 0x2da   : > { %v2004_v4 = vsel %vm2003_vm1, %v1968_v1, 0.0  ;;  %1972 = vadd.xlane.f32.xlu0 %v1971_v3  ;;  %v2000_v5 = vsel %vm1999_vm2, %v1967_v2, 0.0  ;;  %v1782_v21 = vld [vmem:[%s9090_s8] sm:$0xff]  ;;  %v1783_v22 = vld [vmem:[%s9090_s8 + $0x8] sm:$0xff]  ;;  %v1785_v26 = vld [vmem:[%s9090_s8 + $0x18] sm:$0xff]  ;;  %s8992_s18 = smov 16  }
 0x2db   : > { %2005 = vadd.xlane.f32.xlu1 %v2004_v4  ;;  %v6230_v23 = vpack.c.bf16 %v1783_v22, %v1782_v21  ;;  %v6233_v27 = vpack.c.bf16 %v1785_v26, %v1784_v25  ;;  %v1786_v28 = vld [vmem:[%s9090_s8 + $0x20] sm:$0xff]  ;;  %v1787_v29 = vld [vmem:[%s9090_s8 + $0x28] sm:$0xff]  ;;  %v1788_v31 = vld [vmem:[%s9090_s8 + $0x30] sm:$0xff]  ;;  %s9096_s1 = sld [smem:[#allocation63_spill]]  ;;  %s9118_s5 = sld [smem:[#allocation76_spill]] }
 0x2dc   : > { %v6236_v30 = vpack.c.bf16 %v1787_v29, %v1786_v28  ;;  %v1789_v32 = vld [vmem:[%s9090_s8 + $0x38] sm:$0xff]  ;;  %v1791_v34 = vld [vmem:[%s9091_s11] sm:$0xff]  ;;  %v1792_v35 = vld [vmem:[%s9091_s11 + $0x8] sm:$0xff] }
 0x2dd   : > { %6231 = vmatpush3.bf16.msra.mxu0 %v6230_v23  ;;  %v6239_v33 = vpack.c.bf16 %v1789_v32, %v1788_v31  ;;  %v6241_v36 = vpack.c.bf16 %v1792_v35, %v1791_v34  ;;  %v1793_v51 = vld [vmem:[%s9091_s11 + $0x10] sm:$0xff]  ;;  %v1794_v52 = vld [vmem:[%s9091_s11 + $0x18] sm:$0xff]  ;;  %v1795_v59 = vld [vmem:[%s9091_s11 + $0x20] sm:$0xff] }
 0x2de   : > { %2001 = vadd.xlane.f32.xlu0 %v2000_v5  ;;  %6232 = vmatprep.subr.bf16.mxu0 %v7782_v24  ;;  %v6245_v56 = vpack.c.bf16 %v1794_v52, %v1793_v51  ;;  %v1796_v60 = vld [vmem:[%s9091_s11 + $0x28] sm:$0xff]  ;;  %v1797_v3 = vld [vmem:[%s9091_s11 + $0x30] sm:$0xff]  ;;  %v1798_v4 = vld [vmem:[%s9091_s11 + $0x38] sm:$0xff] }
 0x2df   : > { %v6249_v63 = vpack.c.bf16 %v1796_v60, %v1795_v59 }
 0x2e1   : > { %6234 = vmatpush3.bf16.msra.mxu0 %v6233_v27 }
 0x2e2   : > { %6235 = vmatprep.subr.bf16.mxu0 %v7782_v24 }
 0x2e5   : > { %6237 = vmatpush3.bf16.msra.mxu0 %v6236_v30 }
 0x2e6   : > { %6238 = vmatprep.subr.bf16.mxu0 %v7782_v24 }
 0x2e9   : > { %6240 = vmatpush3.bf16.msra.mxu0 %v6239_v33 }
 0x2ea   : > { %6242 = vmatprep.subr.bf16.mxu0 %v6241_v36 }
 0x367   : > { %v1973_v6 = vpop.xlane.xlu0 %1972 }
 0x368   : > { %v2006_v7 = vpop.xlane.xlu1 %2005  ;;  %v1975_v8 = vmul.f32 0.015625, %v1973_v6  ;;  %v6253_v6 = vpack.c.bf16 %v1798_v4, %v1797_v3 }
 0x369   : > { %v2008_v9 = vmul.f32 0.015625, %v2006_v7 }
 0x36a   : > { %v1976_v10 = vsub.f32 %v8408_v0, %v1975_v8 }
 0x36b   : > { %v8415_v11 = vsub.f32 %v1968_v1, %v2008_v9  ;;  %v2002_v12 = vpop.xlane.xlu0 %2001 }
 0x36c   : > { %v2007_v13 = vmul.f32 0.015625, %v2002_v12  ;;  %v1977_v14 = vmul.f32 %v1976_v10, %v1976_v10  ;;  %v5599_v12 = vld [vmem:[#allocation10] ss:$0 sm:$0xff] }
 0x36d   : > { %v2012_v15 = vmul.f32 %v8415_v11, %v8415_v11 }
 0x36e   : > { %v2009_v16 = vsub.f32 %v1967_v2, %v2007_v13  ;;  %v1978_v17 = vsel %vm1970_vm0, %v1977_v14, 0.0 }
 0x36f   : > { %1979 = vadd.xlane.f32.xlu1 %v1978_v17  ;;  %v2016_v18 = vsel %vm2003_vm1, %v2012_v15, 0.0 }
 0x370   : > { %v2011_v19 = vmul.f32 %v2009_v16, %v2009_v16 }
 0x372   : > { %v2013_v20 = vsel %vm1999_vm2, %v2011_v19, 0.0  ;;  %v5597_v19 = vld [vmem:[#allocation9] ss:$0 sm:$0xff] }
 0x373   : > { %2017 = vadd.xlane.f32.xlu1 %v2016_v18  ;;  %2014 = vadd.xlane.f32.xlu0 %v2013_v20 }
 0x3fc   : > { %v1980_v38 = vpop.xlane.xlu1 %1979 }
 0x3fd   : > { %v1981_v39 = vmul.f32 0.015625, %v1980_v38 }
 0x3ff   : > { %v1982_v40 = vadd.f32 1e-05, %v1981_v39 }
 0x400   : > { %v2018_v41 = vpop.xlane.xlu1 %2017  ;;  %v2015_v42 = vpop.xlane.xlu0 %2014 }
 0x401   : > { %6914 = vrsqrt.f32 %v1982_v40  ;;  %v2019_v43 = vmul.f32 0.015625, %v2015_v42  ;;  %v2020_v44 = vmul.f32 0.015625, %v2018_v41 }
 0x403   : > { %v2021_v45 = vadd.f32 1e-05, %v2019_v43  ;;  %v2022_v46 = vadd.f32 1e-05, %v2020_v44 }
 0x405   : > { %6916 = vrsqrt.f32 %v2021_v45 }
 0x406   : > { %6918 = vrsqrt.f32 %v2022_v46 }
 0x40b   : > { %v6915_v47 = vpop.eup %6914 }
 0x40c   : > { %v1984_v49 = vmul.f32 %v6915_v47, %v1976_v10 }
 0x40e   : > { %v1991_v53 = vmul.f32 %v5593_v48, %v1984_v49 }
 0x40f   : > { %v6917_v54 = vpop.eup %6916 }
 0x410   : > { %v1998_v55 = vadd.f32 %v5594_v50, %v1991_v53  ;;  %v8443_v58 = vmul.f32 %v6917_v54, %v2009_v16  ;;  %v6919_v1 = vpop.eup %6918 }
 0x411   : > { %v8453_v5 = vmul.f32 %v6919_v1, %v8415_v11 }
 0x412   : > { %5941 = vmatmul.mubr.msk.f32.vlgmr.msra.gmra.mrb[0].mxu0 %vm1999_vm2, %v1998_v55  ;;  %v2033_v62 = vmul.f32 %v5595_v57, %v8443_v58 }
 0x413   : > { %6244 = vmatpush3.bf16.msra.mxu0 %v6241_v36  ;;  %v2034_v7 = vmul.f32 %v5595_v57, %v8453_v5 }
 0x414   : > { %6246 = vmatprep.subr.bf16.mxu0 %v6245_v56  ;;  %v2041_v2 = vadd.f32 %v5596_v61, %v2033_v62 }
 0x415   : > { %v2042_v8 = vadd.f32 %v5596_v61, %v2034_v7 }
 0x416   : > { %5959 = vmatprep.mubr.msk.f32.mxu0 %vm1999_vm2, %v2041_v2 }
 0x417   : > { %6248 = vmatpush3.bf16.msra.mxu0 %v6245_v56 }
 0x418   : > { %6250 = vmatprep.subr.bf16.mxu0 %v6249_v63 }
 0x41b   : > { %6252 = vmatpush3.bf16.msra.mxu0 %v6249_v63 }
 0x41c   : > { %6254 = vmatprep.subr.bf16.mxu0 %v6253_v6 }
 0x41f   : > { %6256 = vmatpush3.bf16.msra.mxu0 %v6253_v6 }
 0x420   : > { %6257 = vmatprep.subr.bf16.mxu0 %v7782_v24 }
 0x422   : > { %5960 = vmatmul.mubr.msk.f32.vlgmr.msra.gmra.mrb[2].mxu0 %vm1999_vm2, %v2042_v8 }
 0x423   : > { %5966 = vmatprep.mubr.msk.f32.mxu0 %vm7783_vm3, %v7784_v37 }
 0x4e5   : > { %v2118_v9 = vpop.f32.mrb[0].mxu0 }
 0x4e6   : > { %v5942_v10 = vpop.f32.mrb[1].mxu0  ;;  %v2119_v20 = vadd.f32 %v5597_v19, %v2118_v9 }
 0x4f5   : > { %v5961_v11 = vpop.f32.mrb[2].mxu0 }
 0x4f6   : > { %v2206_v13 = vadd.f32 %v5961_v11, %v5599_v12  ;;  %v2200_v14 = vpop.f32.mrb[3].mxu0 }
 0x4f7   : > { %v2201_v15 = vadd.f32 %v5599_v12, %v2200_v14 }
 0x4f9   : > { %v8460_v16 = vpack.i.bf16 %v2206_v13, %v2201_v15  ;;  %v6258_v17 = vpack.c.bf16 %v2206_v13, %v2201_v15 }
 0x4fb   : > { %6850 = vrot.lane.b32.xlu1 %v8460_v16, %s8998_s15  ;;  %6845 = vrot.lane.b32.xlu0 %v8460_v16, %s9002_s10 }
 0x4fc   : > { %6260 = vmatpush3.bf16.xpose.msk.msra.mxu0 %vm8464_vm5, %v6258_v17 }
 0x4fd   : > { %6265 = vmatprep.subr.bf16.mxu0 %v7782_v24 }
 0x4ff   : > { %6855 = vrot.lane.b32.xlu1 %v8460_v16, %s9000_s3  ;;  %2371 = vrot.lane.b32.xlu0 %v2119_v20, %s8998_s15  ;;  %s9101_s15 = sld [smem:[#allocation85_spill]] }
 0x503   : > { %5967 = vmatmul.mubr.msk.f32.vlgmr.msra.gmra.mrb[4].mxu0 %vm2209_vm4, %v2119_v20  ;;  %2289 = vrot.lane.b32.xlu1 %v2119_v20, %s9002_s10  ;;  %s9104_s10 = sld [smem:[#allocation52_spill]] }
 0x504   : > { %5980 = vmatprep.mubr.msk.f32.mxu0 %vm7783_vm3, %v7784_v37 }
 0x507   : > { %2453 = vrot.lane.b32.xlu1 %v2119_v20, %s9000_s3  ;;  %s9103_s3 = sld [smem:[#allocation55_spill]] }
 0x509   : > { %s1752_s4 = scalar_lea.vmem %s9104_s10, %s8403_s0  ;;  %s9108_s10 = sld [smem:[#allocation72_spill]] }
 0x56d   : > { %v6851_v21 = vpop.permute.xlu1 %6850  ;;  %v6846_v22 = vpop.permute.xlu0 %6845 }
 0x56e   : > { %v6853_v23 = vunpack.i.h.bf16 %v6851_v21  ;;  %v6852_v25 = vunpack.i.l.bf16 %v6851_v21  ;;  %v6848_v26 = vunpack.i.h.bf16 %v6846_v22  ;;  %v6847_v27 = vunpack.i.l.bf16 %v6846_v22 }
 0x570   : > { %v6266_v28 = vpack.c.bf16 %v6853_v23, %v6852_v25  ;;  %v6262_v29 = vpack.c.bf16 %v6848_v26, %v6847_v27 }
 0x571   : > { %v6856_v30 = vpop.permute.xlu1 %6855  ;;  %v2372_v34 = vpop.permute.xlu0 %2371 }
 0x572   : > { %6264 = vmatpush3.bf16.xpose.msk.msra.mxu1 %vm8464_vm5, %v6262_v29  ;;  %6268 = vmatpush3.bf16.xpose.msk.msra.mxu0 %vm8464_vm5, %v6266_v28  ;;  %v6858_v31 = vunpack.i.h.bf16 %v6856_v30  ;;  %v6857_v32 = vunpack.i.l.bf16 %v6856_v30 }
 0x573   : > { %6269 = vmatprep.subr.bf16.mxu1 %v7782_v24  ;;  %6281 = vmatprep.subr.bf16.mxu0 %v7782_v24 }
 0x574   : > { %v6270_v33 = vpack.c.bf16 %v6858_v31, %v6857_v32 }
 0x575   : > { %v2290_v35 = vpop.permute.xlu1 %2289 }
 0x579   : > { %5974 = vmatmul.mubr.msk.f32.vlgmr.msra.gmra.mrb[0].mxu1 %vm2209_vm4, %v2290_v35  ;;  %5981 = vmatmul.mubr.msk.f32.vlgmr.msra.gmra.mrb[6].mxu0 %vm2209_vm4, %v2372_v34  ;;  %v2454_v36 = vpop.permute.xlu1 %2453 }
 0x57a   : > { %6272 = vmatpush3.bf16.xpose.msk.msra.mxu1 %vm8464_vm5, %v6270_v33  ;;  %5987 = vmatprep.mubr.msk.f32.mxu1 %vm7783_vm3, %v7784_v37 }
 0x57b   : > { %6273 = vmatprep.subr.bf16.mxu1 %v7782_v24  ;;  %6008 = vmatprep.mubr.msk.f32.mxu0 %vm7783_vm3, %v7784_v37 }
 0x581   : > { %5988 = vmatmul.mubr.msk.f32.vlgmr.msra.gmra.mrb[2].mxu1 %vm2209_vm4, %v2454_v36 }
 0x582   : > { %5994 = vmatprep.mubr.msk.f32.mxu1 %vm7783_vm3, %v7784_v37 }
 0x5d6   : > { %v2285_v38 = vpop.f32.mrb[4].mxu0 }
 0x5d7   : > { %v5968_v39 = vpop.f32.mrb[5].mxu0  ;;  %v2536_v40 = vsel %vm2535_vm6, %v2285_v38, -inf }
 0x5d8   : > { %2537 = vmax.xlane.f32.xlu0 %v2536_v40 }
 0x64c   : > { %v2367_v41 = vpop.f32.mrb[0].mxu1  ;;  %v2449_v42 = vpop.f32.mrb[6].mxu0 }
 0x64d   : > { %v5975_v43 = vpop.f32.mrb[1].mxu1  ;;  %v5982_v44 = vpop.f32.mrb[7].mxu0  ;;  %v2539_v45 = vsel %vm2535_vm6, %v2367_v41, -inf  ;;  %v2542_v46 = vsel %vm2535_vm6, %v2449_v42, -inf }
 0x64e   : > { %2540 = vmax.xlane.f32.xlu1 %v2539_v45  ;;  %2543 = vmax.xlane.f32.xlu0 %v2542_v46  ;;  %v1802_v43 = vld [vmem:[%s9096_s1 + $0x10] sm:$0xff]  ;;  %v1803_v45 = vld [vmem:[%s9096_s1 + $0x18] sm:$0xff] }
 0x64f   : > { %v6293_v46 = vpack.c.bf16 %v1803_v45, %v1802_v43 }
 0x654   : > { %v2531_v47 = vpop.f32.mrb[2].mxu1 }
 0x655   : > { %v5989_v48 = vpop.f32.mrb[3].mxu1  ;;  %v2545_v49 = vsel %vm2535_vm6, %v2531_v47, -inf }
 0x656   : > { %2546 = vmax.xlane.f32.xlu0 %v2545_v49  ;;  %v1805_v48 = vld [vmem:[%s9096_s1 + $0x28] sm:$0xff] }
 0x665   : > { %v2538_v50 = vpop.xlane.xlu0 %2537 }
 0x666   : > { %v2548_v51 = vsub.f32 %v2285_v38, %v2538_v50 }
 0x668   : > { %v2552_v52 = vmul.f32 1.442695, %v2548_v51 }
 0x66a   : > { %6920 = vpow2.f32 %v2552_v52  ;;  %v1806_v52 = vld [vmem:[%s9096_s1 + $0x30] sm:$0xff] }
 0x674   : > { %v6921_v53 = vpop.eup %6920 }
 0x675   : > { %v2560_v54 = vsel %vm2535_vm6, %v6921_v53, 0.0 }
 0x676   : > { %2561 = vadd.xlane.f32.xlu0 %v2560_v54 }
 0x6db   : > { %v2541_v55 = vpop.xlane.xlu1 %2540  ;;  %v2544_v56 = vpop.xlane.xlu0 %2543 }
 0x6dc   : > { %v2549_v57 = vsub.f32 %v2367_v41, %v2541_v55  ;;  %v2550_v59 = vsub.f32 %v2449_v42, %v2544_v56  ;;  %v1800_v41 = vld [vmem:[%s9096_s1] sm:$0xff]  ;;  %v1801_v42 = vld [vmem:[%s9096_s1 + $0x8] sm:$0xff] }
 0x6dd   : > { %v6290_v44 = vpack.c.bf16 %v1801_v42, %v1800_v41 }
 0x6de   : > { %v2554_v60 = vmul.f32 1.442695, %v2549_v57  ;;  %v2556_v61 = vmul.f32 1.442695, %v2550_v59 }
 0x6e0   : > { %6922 = vpow2.f32 %v2554_v60 }
 0x6e1   : > { %6924 = vpow2.f32 %v2556_v61 }
 0x6e3   : > { %v2547_v3 = vpop.xlane.xlu0 %2546 }
 0x6e4   : > { %v2551_v4 = vsub.f32 %v2531_v47, %v2547_v3  ;;  %v1804_v47 = vld [vmem:[%s9096_s1 + $0x20] sm:$0xff] }
 0x6e5   : > { %v6296_v50 = vpack.c.bf16 %v1805_v48, %v1804_v47 }
 0x6e6   : > { %v2558_v6 = vmul.f32 1.442695, %v2551_v4 }
 0x6e8   : > { %6926 = vpow2.f32 %v2558_v6  ;;  %v5622_v6 = vld [vmem:[#allocation12] ss:$0 sm:$0xff] }
 0x6ea   : > { %v6923_v62 = vpop.eup %6922 }
 0x6eb   : > { %v6925_v63 = vpop.eup %6924  ;;  %v2563_v1 = vsel %vm2535_vm6, %v6923_v62, 0.0 }
 0x6ec   : > { %2564 = vadd.xlane.f32.xlu1 %v2563_v1  ;;  %v2566_v2 = vsel %vm2535_vm6, %v6925_v63, 0.0 }
 0x6ed   : > { %2567 = vadd.xlane.f32.xlu0 %v2566_v2 }
 0x6f2   : > { %v6927_v7 = vpop.eup %6926 }
 0x6f3   : > { %v2569_v8 = vsel %vm2535_vm6, %v6927_v7, 0.0 }
 0x6fd   : > { %6865 = vrot.lane.b32.xlu1 %v8460_v16, %s8996_s9 }
 0x701   : > { %6870 = vrot.lane.b32.xlu1 %v8460_v16, %s8994_s16 }
 0x703   : > { %6860 = vrot.lane.b32.xlu0 %v8460_v16, %s8991_s7  ;;  %v2562_v9 = vpop.xlane.xlu0 %2561  ;;  %s9097_s7 = sld [smem:[#allocation67_spill]] }
 0x704   : > { %6928 = vrcp.f32 %v2562_v9 }
 0x709   : > { %v1825_v42 = vld [vmem:[%s9097_s7 + $0x70] sm:$0xff] }
 0x70e   : > { %v6929_v19 = vpop.eup %6928 }
 0x70f   : > { %v2573_v27 = vmul.f32 %v6929_v19, %v6921_v53  ;;  %v1807_v53 = vld [vmem:[%s9096_s1 + $0x38] sm:$0xff]  ;;  %s9105_s1 = sld [smem:[#allocation57_spill]] }
 0x710   : > { %v6299_v57 = vpack.c.bf16 %v1807_v53, %v1806_v52 }
 0x725   : > { %2570 = vadd.xlane.f32.xlu1 %v2569_v8 }
 0x736   : > { %6875 = vrot.lane.b32.xlu1 %v8460_v16, %s8992_s18 }
 0x779   : > { %v2565_v10 = vpop.xlane.xlu1 %2564 }
 0x77a   : > { %6930 = vrcp.f32 %v2565_v10  ;;  %v2568_v12 = vpop.xlane.xlu0 %2567 }
 0x77b   : > { %6932 = vrcp.f32 %v2568_v12 }
 0x77d   : > { %v6866_v11 = vpop.permute.xlu1 %6865 }
 0x77e   : > { %v6861_v13 = vpop.permute.xlu0 %6860  ;;  %v6868_v20 = vunpack.i.h.bf16 %v6866_v11  ;;  %v6867_v21 = vunpack.i.l.bf16 %v6866_v11 }
 0x77f   : > { %v6863_v14 = vunpack.i.h.bf16 %v6861_v13  ;;  %v6862_v15 = vunpack.i.l.bf16 %v6861_v13 }
 0x780   : > { %v6278_v30 = vpack.c.bf16 %v6868_v20, %v6867_v21  ;;  %v1814_v20 = vld [vmem:[%s9097_s7 + $0x18] sm:$0xff] }
 0x781   : > { %v6274_v16 = vpack.c.bf16 %v6863_v14, %v6862_v15  ;;  %v6871_v22 = vpop.permute.xlu1 %6870 }
 0x782   : > { %v6873_v23 = vunpack.i.h.bf16 %v6871_v22  ;;  %v6872_v25 = vunpack.i.l.bf16 %v6871_v22  ;;  %v1813_v22 = vld [vmem:[%s9097_s7 + $0x10] sm:$0xff] }
 0x783   : > { %6276 = vmatpush3.bf16.msk.msra.mxu1 %vm8517_vm9, %v6274_v16  ;;  %v1811_v16 = vld [vmem:[%s9097_s7] sm:$0xff] }
 0x784   : > { %v6931_v26 = vpop.eup %6930  ;;  %v6282_v28 = vpack.c.bf16 %v6873_v23, %v6872_v25  ;;  %6277 = vmatprep.subr.bf16.mxu1 %v7782_v24  ;;  %v6303_v23 = vpack.c.bf16 %v1813_v22, %v1811_v16  ;;  %v1816_v25 = vld [vmem:[%s9097_s7 + $0x28] sm:$0xff] }
 0x785   : > { %v6933_v29 = vpop.eup %6932  ;;  %v2575_v32 = vmul.f32 %v6931_v26, %v6923_v62  ;;  %v1818_v26 = vld [vmem:[%s9097_s7 + $0x38] sm:$0xff] }
 0x786   : > { %5995 = vmatmul.mubr.msk.f32.vlgmr.msra.gmra.mrb[4].mxu1 %vm2585_vm10, %v2573_v27  ;;  %6284 = vmatpush3.bf16.msk.msra.mxu0 %vm8517_vm9, %v6282_v28  ;;  %v2577_v31 = vmul.f32 %v6933_v29, %v6925_v63  ;;  %v6305_v27 = vpack.c.bf16 %v1818_v26, %v1816_v25  ;;  %v1815_v28 = vld [vmem:[%s9097_s7 + $0x20] sm:$0xff]  ;;  %v1817_v29 = vld [vmem:[%s9097_s7 + $0x30] sm:$0xff] }
 0x787   : > { %6280 = vmatpush3.bf16.msk.msra.mxu1 %vm8517_vm9, %v6278_v30  ;;  %6001 = vmatprep.mubr.msk.f32.mxu1 %vm7783_vm3, %v7784_v37  ;;  %v6307_v30 = vpack.c.bf16 %v1817_v29, %v1815_v28 }
 0x788   : > { %6285 = vmatprep.subr.bf16.mxu1 %v7782_v24  ;;  %6289 = vmatprep.subr.bf16.mxu0 %v7782_v24 }
 0x789   : > { %6009 = vmatmul.mubr.msk.f32.vlgmr.msra.gmra.mrb[8].mxu0 %vm2585_vm10, %v2577_v31  ;;  %v1820_v31 = vld [vmem:[%s9097_s7 + $0x48] sm:$0xff] }
 0x78a   : > { %6002 = vmatmul.mubr.msk.f32.vlgmr.msra.gmra.mrb[6].mxu1 %vm2585_vm10, %v2575_v32  ;;  %6034 = vmatprep.mubr.msk.f32.mxu0 %vm7783_vm3, %v7784_v37  ;;  %v1822_v32 = vld [vmem:[%s9097_s7 + $0x58] sm:$0xff] }
 0x78b   : > { %6015 = vmatprep.mubr.msk.f32.mxu1 %vm7783_vm3, %v7784_v37  ;;  %6291 = vmatpush3.bf16.msra.mxu0 %v6290_v44 }
 0x78c   : > { %6292 = vmatprep.subr.bf16.mxu0 %v7782_v24 }
 0x78f   : > { %6294 = vmatpush3.bf16.msra.mxu0 %v6293_v46 }
 0x790   : > { %6295 = vmatprep.subr.bf16.mxu0 %v7782_v24 }
 0x793   : > { %6297 = vmatpush3.bf16.msra.mxu0 %v6296_v50 }
 0x794   : > { %6298 = vmatprep.subr.bf16.mxu0 %v7782_v24 }
 0x797   : > { %6300 = vmatpush3.bf16.msra.mxu0 %v6299_v57 }
 0x7b2   : > { %v2571_v33 = vpop.xlane.xlu1 %2570 }
 0x7b3   : > { %6934 = vrcp.f32 %v2571_v33  ;;  %v6309_v33 = vpack.c.bf16 %v1822_v32, %v1820_v31  ;;  %v5625_v32 = vld [vmem:[#allocation15] ss:$0 sm:$0xff] }
 0x7b6   : > { %v6876_v34 = vpop.permute.xlu1 %6875 }
 0x7b7   : > { %v6878_v35 = vunpack.i.h.bf16 %v6876_v34  ;;  %v6877_v36 = vunpack.i.l.bf16 %v6876_v34  ;;  %v1819_v34 = vld [vmem:[%s9097_s7 + $0x40] sm:$0xff] }
 0x7b9   : > { %v6286_v38 = vpack.c.bf16 %v6878_v35, %v6877_v36  ;;  %v1821_v35 = vld [vmem:[%s9097_s7 + $0x50] sm:$0xff] }
 0x7ba   : > { %v6311_v36 = vpack.c.bf16 %v1821_v35, %v1819_v34 }
 0x7bb   : > { %6288 = vmatpush3.bf16.msk.msra.mxu1 %vm8517_vm9, %v6286_v38  ;;  %v1824_v38 = vld [vmem:[%s9097_s7 + $0x68] sm:$0xff] }
 0x7bd   : > { %v6935_v39 = vpop.eup %6934 }
 0x7be   : > { %v2579_v40 = vmul.f32 %v6935_v39, %v6927_v7  ;;  %v1826_v39 = vld [vmem:[%s9097_s7 + $0x78] sm:$0xff] }
 0x7bf   : > { %v6313_v41 = vpack.c.bf16 %v1826_v39, %v1824_v38 }
 0x7c0   : > { %6016 = vmatmul.mubr.msk.f32.vlgmr.msra.gmra.mrb[8].mxu1 %vm2585_vm10, %v2579_v40  ;;  %v1823_v40 = vld [vmem:[%s9097_s7 + $0x60] sm:$0xff] }
 0x7c1   : > { %3104 = vmatprep.mubr.f32.mxu1 %v7784_v37  ;;  %v6315_v43 = vpack.c.bf16 %v1825_v42, %v1823_v40 }
 0x859   : > { %v2658_v49 = vpop.f32.mrb[4].mxu1 }
 0x85a   : > { %v5996_v51 = vpop.f32.mrb[5].mxu1 }
 0x85c   : > { %v2818_v54 = vpop.f32.mrb[8].mxu0 }
 0x85d   : > { %v2738_v55 = vpop.f32.mrb[6].mxu1  ;;  %2907 = vrot.lane.b32.xlu1 %v2818_v54, %s8994_s16  ;;  %v6010_v56 = vpop.f32.mrb[9].mxu0  ;;  %s9099_s16 = sld [smem:[#allocation83_spill]] }
 0x85e   : > { %2903 = vrot.lane.b32.xlu0 %v2738_v55, %s8992_s18  ;;  %v6003_v59 = vpop.f32.mrb[7].mxu1  ;;  %s9098_s18 = sld [smem:[#allocation69_spill]] }
 0x864   : > { %v1844_v44 = vld [vmem:[%s9098_s18 + $0x80] sm:$0xff]  ;;  %v1845_v45 = vld [vmem:[%s9098_s18 + $0x88] sm:$0xff]  ;;  %v1847_v50 = vld [vmem:[%s9098_s18 + $0x98] sm:$0xff] }
 0x865   : > { %v1828_v46 = vld [vmem:[%s9098_s18] sm:$0xff]  ;;  %v6317_v47 = vpack.c.bf16 %v1845_v45, %v1844_v44  ;;  %v1829_v48 = vld [vmem:[%s9098_s18 + $0x8] sm:$0xff]  ;;  %v1830_v53 = vld [vmem:[%s9098_s18 + $0x10] sm:$0xff] }
 0x866   : > { %v6319_v51 = vpack.c.bf16 %v1829_v48, %v1828_v46  ;;  %v1831_v54 = vld [vmem:[%s9098_s18 + $0x18] sm:$0xff]  ;;  %v1848_v55 = vld [vmem:[%s9098_s18 + $0xa0] sm:$0xff]  ;;  %v1849_v56 = vld [vmem:[%s9098_s18 + $0xa8] sm:$0xff] }
 0x867   : > { %6318 = vmatprep.subr.bf16.mxu0 %v6317_v47  ;;  %v6323_v57 = vpack.c.bf16 %v1831_v54, %v1830_v53  ;;  %v6325_v59 = vpack.c.bf16 %v1849_v56, %v1848_v55  ;;  %v1856_v16 = vld [vmem:[%s9098_s18 + $0xe0] sm:$0xff]  ;;  %v1857_v22 = vld [vmem:[%s9098_s18 + $0xe8] sm:$0xff]  ;;  %v1858_v39 = vld [vmem:[%s9098_s18 + $0xf0] sm:$0xff] }
 0x868   : > { %v6341_v25 = vpack.c.bf16 %v1857_v22, %v1856_v16  ;;  %v1840_v35 = vld [vmem:[%s9098_s18 + $0x60] sm:$0xff]  ;;  %v1859_v40 = vld [vmem:[%s9098_s18 + $0xf8] sm:$0xff]  ;;  %v1945_v45 = vld [vmem:[%s9099_s16 + $0x8] sm:$0xff] }
 0x869   : > { %v1843_v42 = vld [vmem:[%s9098_s18 + $0x78] sm:$0xff]  ;;  %v1944_v44 = vld [vmem:[%s9099_s16] sm:$0xff]  ;;  %v1946_v46 = vld [vmem:[%s9099_s16 + $0x10] sm:$0xff] }
 0x86a   : > { %v6350_v47 = vpack.c.bf16 %v1945_v45, %v1944_v44  ;;  %v1947_v48 = vld [vmem:[%s9099_s16 + $0x18] sm:$0xff]  ;;  %v1770_v44 = vld [vmem:[%s9105_s1 + $0x8] sm:$0xff]  ;;  %v1965_v45 = vld [vmem:[%s8026_s21] sm:$0xf] }
 0x86b   : > { %v1956_v16 = vld [vmem:[%s9101_s15 + $0x18] sm:$0xff] }
 0x893   : > { %v2898_v60 = vpop.f32.mrb[8].mxu1 }
 0x894   : > { %2911 = vrot.lane.b32.xlu0 %v2898_v60, %s8996_s9  ;;  %v6017_v61 = vpop.f32.mrb[9].mxu1  ;;  %v1832_v60 = vld [vmem:[%s9098_s18 + $0x20] sm:$0xff]  ;;  %s9100_s9 = sld [smem:[#allocation68_spill]] }
 0x895   : > { %v1833_v61 = vld [vmem:[%s9098_s18 + $0x28] sm:$0xff] }
 0x89a   : > { %v1827_v53 = vld [vmem:[%s9100_s9] sm:$0x3]  ;;  %s9102_s9 = sld [smem:[#allocation86_spill]] }
 0x8cf   : > { %v2908_v1 = vpop.permute.xlu1 %2907 }
 0x8d0   : > { %v2904_v62 = vpop.permute.xlu0 %2903 }
 0x8d1   : > { %v2914_v63 = vsel %vm2209_vm4, %v2658_v49, %v2904_v62  ;;  %v1846_v49 = vld [vmem:[%s9098_s18 + $0x90] sm:$0xff] }
 0x8d2   : > { %v2916_v2 = vsel %vm2915_vm11, %v2914_v63, %v2908_v1  ;;  %v6321_v52 = vpack.c.bf16 %v1847_v50, %v1846_v49  ;;  %v1850_v62 = vld [vmem:[%s9098_s18 + $0xb0] sm:$0xff]  ;;  %v1851_v63 = vld [vmem:[%s9098_s18 + $0xb8] sm:$0xff]  ;;  %v6327_v1 = vpack.c.bf16 %v1833_v61, %v1832_v60  ;;  %v6353_v49 = vpack.c.bf16 %v1947_v48, %v1946_v46 }
 0x8d3   : > { %v3027_v50 = vlaneseq }
 0x906   : > { %v2912_v3 = vpop.permute.xlu0 %2911 }
 0x907   : > { %v2918_v4 = vsel %vm2917_vm12, %v2916_v2, %v2912_v3  ;;  %v6329_v2 = vpack.c.bf16 %v1851_v63, %v1850_v62  ;;  %v1834_v3 = vld [vmem:[%s9098_s18 + $0x30] sm:$0xff] }
 0x908   : > { %6035 = vmatmul.mubr.msk.f32.vlgmr.msra.gmra.mrb[10].mxu0 %vm1999_vm2, %v2918_v4  ;;  %v1835_v4 = vld [vmem:[%s9098_s18 + $0x38] sm:$0xff] }
 0x909   : > { %6320 = vmatpush3.bf16.msra.mxu0 %v6319_v51  ;;  %v8632_v51 = vshrl.u32 %v3027_v50, 7  ;;  %v1772_v50 = vld [vmem:[%s9105_s1 + $0x18] sm:$0xff] }
 0x90a   : > { %6322 = vmatprep.subr.bf16.mxu0 %v6321_v52 }
 0x90b   : > { %v3029_v52 = vsub.s32 0, %v8632_v51  ;;  %v3033_v54 = vsub.s32 1, %v8632_v51 }
 0x90d   : > { %6324 = vmatpush3.bf16.msra.mxu0 %v6323_v57  ;;  %v3030_v55 = vrot.slane %v1827_v53, %v3029_v52  ;;  %v3034_v56 = vrot.slane %v1827_v53, %v3033_v54 }
 0x90e   : > { %6326 = vmatprep.subr.bf16.mxu0 %v6325_v59 }
 0x911   : > { %6328 = vmatpush3.bf16.msra.mxu0 %v6327_v1  ;;  %v1948_v1 = vld [vmem:[%s9099_s16 + $0x20] sm:$0xff] }
 0x912   : > { %6330 = vmatprep.subr.bf16.mxu0 %v6329_v2  ;;  %v1949_v2 = vld [vmem:[%s9099_s16 + $0x28] sm:$0xff] }
 0x9db   : > { %v2994_v7 = vpop.f32.mrb[10].mxu0 }
 0x9dc   : > { %v2995_v8 = vadd.f32 %v5622_v6, %v2994_v7  ;;  %v6036_v9 = vpop.f32.mrb[11].mxu0  ;;  %v1852_v6 = vld [vmem:[%s9098_s18 + $0xc0] sm:$0xff]  ;;  %v1853_v7 = vld [vmem:[%s9098_s18 + $0xc8] sm:$0xff] }
 0x9dd   : > { %v6333_v9 = vpack.c.bf16 %v1853_v7, %v1852_v6  ;;  %v1951_v6 = vld [vmem:[%s9099_s16 + $0x38] sm:$0xff] }
 0x9de   : > { %v8562_v10 = vadd.f32 %v2995_v8, %v8408_v0  ;;  %v1812_v0 = vld [vmem:[%s9097_s7 + $0x8] sm:$0xff]  ;;  %v6331_v8 = vpack.c.bf16 %v1835_v4, %v1834_v3  ;;  %v6356_v3 = vpack.c.bf16 %v1949_v2, %v1948_v1  ;;  %v1950_v4 = vld [vmem:[%s9099_s16 + $0x30] sm:$0xff] }
 0x9df   : > { %v6301_v21 = vpack.c.bf16 %v1814_v20, %v1812_v0  ;;  %v1838_v20 = vld [vmem:[%s9098_s18 + $0x50] sm:$0xff]  ;;  %v6359_v7 = vpack.c.bf16 %v1951_v6, %v1950_v4  ;;  %v1776_v6 = vld [vmem:[%s9105_s1 + $0x38] sm:$0xff] }
 0x9e0   : > { %v2999_v12 = vsel %vm1970_vm0, %v8562_v10, 0.0  ;;  %6332 = vmatpush3.bf16.msra.mxu0 %v6331_v8  ;;  %v1775_v4 = vld [vmem:[%s9105_s1 + $0x30] sm:$0xff] }
 0x9e1   : > { %3000 = vadd.xlane.f32.xlu1 %v2999_v12  ;;  %6302 = vmatprep.subr.bf16.mxu1 %v6301_v21  ;;  %v1836_v12 = vld [vmem:[%s9098_s18 + $0x40] sm:$0xff]  ;;  %v1839_v21 = vld [vmem:[%s9098_s18 + $0x58] sm:$0xff] }
 0x9e2   : > { %6304 = vmatpush1.bf16.msra.mxu1 %v6303_v23  ;;  %6334 = vmatprep.subr.bf16.mxu0 %v6333_v9  ;;  %v6339_v23 = vpack.c.bf16 %v1839_v21, %v1838_v20  ;;  %v1955_v21 = vld [vmem:[%s9101_s15 + $0x10] sm:$0xff] }
 0x9e3   : > { %6306 = vmatprep.subr.bf16.mxu1 %v6305_v27  ;;  %v6365_v22 = vpack.c.bf16 %v1956_v16, %v1955_v21 }
 0x9e6   : > { %6308 = vmatpush1.bf16.msra.mxu1 %v6307_v30  ;;  %v5624_v30 = vld [vmem:[#allocation13] ss:$0 sm:$0xff] }
 0x9e7   : > { %6310 = vmatprep.subr.bf16.mxu1 %v6309_v33 }
 0x9ea   : > { %6312 = vmatpush1.bf16.msra.mxu1 %v6311_v36  ;;  %v1841_v36 = vld [vmem:[%s9098_s18 + $0x68] sm:$0xff] }
 0x9eb   : > { %6314 = vmatprep.subr.bf16.mxu1 %v6313_v41  ;;  %v6343_v38 = vpack.c.bf16 %v1841_v36, %v1840_v35  ;;  %v6345_v41 = vpack.c.bf16 %v1859_v40, %v1858_v39  ;;  %v1767_v35 = vld [vmem:[%s9103_s3] sm:$0xf]  ;;  %v5630_v36 = vld [vmem:[#allocation34] ss:$0 sm:$0xff]  ;;  %s9106_s3 = sld [smem:[#allocation56_spill]] }
 0x9ee   : > { %6316 = vmatpush1.bf16.msra.mxu1 %v6315_v43 }
 0x9ef   : > { %6349 = vmatprep.subr.bf16.mxu1 %v7782_v24 }
 0xa6e   : > { %v3001_v11 = vpop.xlane.xlu1 %3000 }
 0xa6f   : > { %v3002_v13 = vmul.f32 0.015625, %v3001_v11  ;;  %v1837_v11 = vld [vmem:[%s9098_s18 + $0x48] sm:$0xff] }
 0xa71   : > { %v8567_v14 = vsub.f32 %v8562_v10, %v3002_v13  ;;  %v1854_v13 = vld [vmem:[%s9098_s18 + $0xd0] sm:$0xff] }
 0xa73   : > { %v3004_v15 = vmul.f32 %v8567_v14, %v8567_v14 }
 0xa75   : > { %v3005_v19 = vsel %vm1970_vm0, %v3004_v15, 0.0  ;;  %v1855_v15 = vld [vmem:[%s9098_s18 + $0xd8] sm:$0xff] }
 0xa76   : > { %3006 = vadd.xlane.f32.xlu0 %v3005_v19  ;;  %v6335_v19 = vpack.c.bf16 %v1837_v11, %v1836_v12  ;;  %v6337_v0 = vpack.c.bf16 %v1855_v15, %v1854_v13  ;;  %v1953_v11 = vld [vmem:[%s9101_s15] sm:$0xff]  ;;  %v1954_v13 = vld [vmem:[%s9101_s15 + $0x8] sm:$0xff]  ;;  %v5627_v15 = vld [vmem:[#allocation16] ss:$0 sm:$0xff] }
 0xa78   : > { %6336 = vmatpush3.bf16.msra.mxu0 %v6335_v19 }
 0xa79   : > { %6338 = vmatprep.subr.bf16.mxu0 %v6337_v0  ;;  %v6362_v0 = vpack.c.bf16 %v1954_v13, %v1953_v11 }
 0xa7c   : > { %6340 = vmatpush3.bf16.msra.mxu0 %v6339_v23  ;;  %v1957_v23 = vld [vmem:[%s9101_s15 + $0x20] sm:$0xff] }
 0xa7d   : > { %6342 = vmatprep.subr.bf16.mxu0 %v6341_v25  ;;  %v1958_v25 = vld [vmem:[%s9101_s15 + $0x28] sm:$0xff] }
 0xa80   : > { %6344 = vmatpush3.bf16.msra.mxu0 %v6343_v38 }
 0xa81   : > { %6346 = vmatprep.subr.bf16.mxu0 %v6345_v41 }
 0xb03   : > { %v3007_v26 = vpop.xlane.xlu0 %3006 }
 0xb04   : > { %v3008_v27 = vmul.f32 0.015625, %v3007_v26  ;;  %v1959_v26 = vld [vmem:[%s9101_s15 + $0x30] sm:$0xff] }
 0xb06   : > { %v3009_v28 = vadd.f32 1e-05, %v3008_v27  ;;  %v1960_v27 = vld [vmem:[%s9101_s15 + $0x38] sm:$0xff] }
 0xb08   : > { %6936 = vrsqrt.f32 %v3009_v28  ;;  %v6371_v28 = vpack.c.bf16 %v1960_v27, %v1959_v26 }
 0xb12   : > { %v6937_v29 = vpop.eup %6936 }
 0xb13   : > { %v3011_v31 = vmul.f32 %v6937_v29, %v8567_v14  ;;  %v1842_v14 = vld [vmem:[%s9098_s18 + $0x70] sm:$0xff]  ;;  %v5628_v29 = vld [vmem:[#allocation33] ss:$0 sm:$0xff] }
 0xb14   : > { %v6347_v43 = vpack.c.bf16 %v1843_v42, %v1842_v14  ;;  %v3514_v14 = vld [vmem:[%s1752_s4] sm:$0xff]  ;;  %v3515_v42 = vld [vmem:[%s1752_s4 + $0x8] sm:$0xff]  ;;  %s9107_s4 = sld [smem:[#allocation74_spill]] }
 0xb15   : > { %v3018_v33 = vmul.f32 %v5624_v30, %v3011_v31 }
 0xb16   : > { %6348 = vmatpush3.bf16.msra.mxu0 %v6347_v43  ;;  %v1769_v43 = vld [vmem:[%s9105_s1] sm:$0xff] }
 0xb17   : > { %v3025_v34 = vadd.f32 %v5625_v32, %v3018_v33  ;;  %6373 = vmatprep.subr.bf16.mxu0 %v7782_v24  ;;  %v1963_v33 = vld [vmem:[%s9102_s9 + $0x8] sm:$0xff]  ;;  %v6376_v46 = vpack.c.bf16 %v1770_v44, %v1769_v43 }
 0xb19   : > { %5626 = vmatmul.mubr.msk.f32.vlgmr.msra.gmra.mrb[10].mxu1 %vm1999_vm2, %v3025_v34 }
 0xb1a   : > { %6053 = vmatprep.mubr.msk.f32.mxu1 %vm7783_vm3, %v7784_v37  ;;  %6351 = vmatpush3.bf16.msra.mxu1 %v6350_v47  ;;  %v5632_v47 = vld [vmem:[#allocation36] ss:$0 sm:$0xff]  ;;  %v1881_v26 = vld [vmem:[%s9107_s4 + $0x38] sm:$0xff] }
 0xb1b   : > { %6352 = vmatprep.subr.bf16.mxu1 %v7782_v24 }
 0xb1e   : > { %6354 = vmatpush3.bf16.msra.mxu1 %v6353_v49  ;;  %v1771_v49 = vld [vmem:[%s9105_s1 + $0x10] sm:$0xff] }
 0xb1f   : > { %6355 = vmatprep.subr.bf16.mxu1 %v7782_v24 }
 0xb22   : > { %6357 = vmatpush3.bf16.msra.mxu1 %v6356_v3 }
 0xb23   : > { %6358 = vmatprep.subr.bf16.mxu1 %v7782_v24 }
 0xb26   : > { %6360 = vmatpush3.bf16.msra.mxu1 %v6359_v7  ;;  %v6388_v7 = vpack.c.bf16 %v1776_v6, %v1775_v4 }
 0xb27   : > { %6361 = vmatprep.subr.bf16.mxu1 %v7782_v24 }
 0xbec   : > { %v3106_v57 = vpop.f32.mrb[10].mxu1 }
 0xbed   : > { %v3107_v59 = vadd.f32 %v3106_v57, %v3030_v55  ;;  %v3108_v60 = vpop.f32.mrb[11].mxu1  ;;  %v6380_v57 = vpack.c.bf16 %v1772_v50, %v1771_v49 }
 0xbee   : > { %v3109_v61 = vadd.f32 %v3108_v60, %v3034_v56 }
 0xbef   : > { %v3111_v63 = vmax.f32 %v3107_v59, 0.0  ;;  %v5637_v59 = vld [vmem:[%s9106_s3] ss:$0 sm:$0xff]  ;;  %s9109_s3 = sld [smem:[#allocation58_spill]] }
 0xbf0   : > { %v3112_v62 = vmax.f32 %v3109_v61, 0.0  ;;  %v1773_v61 = vld [vmem:[%s9105_s1 + $0x20] sm:$0xff] }
 0xbf2   : > { %3177 = vmatprep.mubr.f32.mxu0 %v3112_v62  ;;  %v1774_v62 = vld [vmem:[%s9105_s1 + $0x28] sm:$0xff]  ;;  %s5592_s1 = sshll.u32 %s9122_s2, 2  ;;  %s9110_s2 = smov 112  }
 0xbf3   : > { %3178 = vmatmul.mubr.f32.vlgmr.msra.gmra.mrb[12].mxu0 %v3111_v63  ;;  %v6384_v2 = vpack.c.bf16 %v1774_v62, %v1773_v61 }
 0xbf4   : > { %6079 = vmatprep.mubr.msk.f32.mxu0 %vm7783_vm3, %v7784_v37 }
 0xcc6   : > { %v5782_v8 = vpop.f32.mrb[12].mxu0 }
 0xcc7   : > { %v5783_v9 = vpop.f32.mrb[13].mxu0 }
 0xcc8   : > { %v5784_v12 = vadd.f32 %v5783_v9, %v5782_v8  ;;  %v1874_v8 = vld [vmem:[%s9107_s4] sm:$0xff]  ;;  %v1875_v9 = vld [vmem:[%s9107_s4 + $0x8] sm:$0xff] }
 0xcc9   : > { %v6408_v13 = vpack.c.bf16 %v1875_v9, %v1874_v8 }
 0xcca   : > { %v3183_v19 = vadd.f32 %v5784_v12, %v8562_v10  ;;  %v6368_v10 = vpack.c.bf16 %v1958_v25, %v1957_v23  ;;  %v5646_v12 = vld [vmem:[#allocation21] ss:$0 sm:$0xff]  ;;  %v1878_v23 = vld [vmem:[%s9107_s4 + $0x20] sm:$0xff]  ;;  %v1879_v25 = vld [vmem:[%s9107_s4 + $0x28] sm:$0xff] }
 0xccc   : > { %v3190_v20 = vadd.f32 %v5627_v15, %v3183_v19  ;;  %v3743_v15 = vmul.f32 %v5646_v12, %v8443_v58  ;;  %v1876_v19 = vld [vmem:[%s9107_s4 + $0x10] sm:$0xff]  ;;  %v6416_v58 = vpack.c.bf16 %v1879_v25, %v1878_v23 }
 0xcce   : > { %6054 = vmatmul.mubr.msk.f32.vlgmr.msra.gmra.mrb[12].mxu1 %vm1999_vm2, %v3190_v20  ;;  %v5647_v20 = vld [vmem:[#allocation22] ss:$0 sm:$0xff] }
 0xccf   : > { %6363 = vmatpush3.bf16.msra.mxu1 %v6362_v0  ;;  %6072 = vmatprep.mubr.msk.f32.mxu1 %vm7783_vm3, %v7784_v37  ;;  %v1877_v0 = vld [vmem:[%s9107_s4 + $0x18] sm:$0xff] }
 0xcd0   : > { %6364 = vmatprep.subr.bf16.mxu1 %v7782_v24  ;;  %v6412_v16 = vpack.c.bf16 %v1877_v0, %v1876_v19 }
 0xcd3   : > { %6366 = vmatpush3.bf16.msra.mxu1 %v6365_v22  ;;  %v3751_v22 = vadd.f32 %v5647_v20, %v3743_v15 }
 0xcd4   : > { %6367 = vmatprep.subr.bf16.mxu1 %v7782_v24 }
 0xcd7   : > { %6369 = vmatpush3.bf16.msra.mxu1 %v6368_v10  ;;  %v1880_v10 = vld [vmem:[%s9107_s4 + $0x30] sm:$0xff]  ;;  %s1766_s4 = scalar_lea.vmem %s8041_s24, %s5592_s1  ;;  %s9111_s1 = smov 80  }
 0xcd8   : > { %6370 = vmatprep.subr.bf16.mxu1 %v7782_v24  ;;  %v1962_v24 = vld [vmem:[%s9102_s9] sm:$0xff]  ;;  %v6420_v27 = vpack.c.bf16 %v1881_v26, %v1880_v10  ;;  %v5645_v26 = vld [vmem:[#allocation19] ss:$0 sm:$0xff] }
 0xcd9   : > { %v6374_v34 = vpack.c.bf16 %v1963_v33, %v1962_v24  ;;  %v1867_v33 = vld [vmem:[%s9108_s10 + $0x10] sm:$0xff] }
 0xcdb   : > { %6372 = vmatpush3.bf16.msra.mxu1 %v6371_v28  ;;  %6375 = vmatpush3.bf16.msra.mxu0 %v6374_v34  ;;  %v3744_v28 = vmul.f32 %v5646_v12, %v8453_v5  ;;  %v1868_v34 = vld [vmem:[%s9108_s10 + $0x18] sm:$0xff] }
 0xcdc   : > { %6082 = vmatprep.subr.mxu1 %v7784_v37  ;;  %6087 = vmatprep.subr.msk.mxu0 %vm3440_vm13, %v1767_v35 }
 0xda1   : > { %v3266_v30 = vpop.f32.mrb[12].mxu1 }
 0xda2   : > { %v8665_v31 = vadd.f32 %v5628_v29, %v3266_v30  ;;  %v6055_v32 = vpop.f32.mrb[13].mxu1  ;;  %v3752_v29 = vadd.f32 %v5647_v20, %v3744_v28  ;;  %v1865_v30 = vld [vmem:[%s9108_s10] sm:$0xff] }
 0xda3   : > { %v1866_v32 = vld [vmem:[%s9108_s10 + $0x8] sm:$0xff] }
 0xda4   : > { %6073 = vmatmul.mubr.msk.f32.vlgmr.msra.gmra.mrb[14].mxu1 %vm1999_vm2, %v8665_v31  ;;  %v6392_v24 = vpack.c.bf16 %v1866_v32, %v1865_v30 }
 0xda5   : > { %6084 = vmatprep.mubr.msk.f32.mxu1 %vm7783_vm3, %v7784_v37  ;;  %6083 = vmatpush3.msk.msra.mxu1 %vm3440_vm13, %v1965_v45  ;;  %v5641_v45 = vld [vmem:[%s9109_s3] ss:$0 sm:$0xff]  ;;  %s9113_s3 = smov 48  }
 0xda6   : > { %6377 = vmatprep.subr.bf16.mxu1 %v6376_v46 }
 0xe77   : > { %v3345_v38 = vpop.f32.mrb[14].mxu1 }
 0xe78   : > { %v3346_v39 = vadd.f32 %v5630_v36, %v3345_v38  ;;  %v6074_v40 = vpop.f32.mrb[15].mxu1  ;;  %v6396_v36 = vpack.c.bf16 %v1868_v34, %v1867_v33  ;;  %v1870_v38 = vld [vmem:[%s9108_s10 + $0x28] sm:$0xff] }
 0xe79   : > { %v1872_v40 = vld [vmem:[%s9108_s10 + $0x38] sm:$0xff] }
 0xe7a   : > { %v3349_v41 = vmax.f32 %v3346_v39, 0.0  ;;  %v1871_v39 = vld [vmem:[%s9108_s10 + $0x30] sm:$0xff] }
 0xe7c   : > { %6080 = vmatmul.mubr.msk.f32.vlgmr.msra.gmra.mrb[14].mxu0 %vm2209_vm4, %v3349_v41  ;;  %v6404_v41 = vpack.c.bf16 %v1872_v40, %v1871_v39 }
 0xe7d   : > { %6088 = vmatpush3.msk.msra.mxu0 %vm3440_vm13, %v1767_v35  ;;  %6089 = vmatprep.mubr.msk.f32.mxu0 %vm3436_vm14, %v3514_v14  ;;  %v1869_v35 = vld [vmem:[%s9108_s10 + $0x20] sm:$0xff]  ;;  %v5634_v14 = vld [vmem:[#allocation37] ss:$0 sm:$0xff] }
 0xe7e   : > { %6393 = vmatprep.subr.bf16.mxu0 %v6392_v24  ;;  %v6400_v5 = vpack.c.bf16 %v1870_v38, %v1869_v35 }
 0xe80   : > { %6090 = vmatmul.mubr.msk.f32.vlgmr.msra.gmra.mrb[16].mxu0 %vm3436_vm14, %v3515_v42 }
 0xe81   : > { %6395 = vmatpush3.bf16.msra.mxu0 %v6392_v24 }
 0xe82   : > { %6397 = vmatprep.subr.bf16.mxu0 %v6396_v36 }
 0xe85   : > { %6399 = vmatpush3.bf16.msra.mxu0 %v6396_v36 }
 0xe86   : > { %6401 = vmatprep.subr.bf16.mxu0 %v6400_v5 }
 0xe89   : > { %6403 = vmatpush3.bf16.msra.mxu0 %v6400_v5  ;;  %v5648_v5 = vld [vmem:[#allocation24] ss:$0 sm:$0xff] }
 0xe8a   : > { %6405 = vmatprep.subr.bf16.mxu0 %v6404_v41 }
 0xe8d   : > { %6407 = vmatpush3.bf16.msra.mxu0 %v6404_v41 }
 0xf4f   : > { %v3425_v48 = vpop.f32.mrb[14].mxu0 }
 0xf50   : > { %v3426_v53 = vadd.f32 %v5632_v47, %v3425_v48  ;;  %v6081_v55 = vpop.f32.mrb[15].mxu0 }
 0xf51   : > { %v5651_v55 = vld [vmem:[#allocation25] ss:$0 sm:$0xff] }
 0xf52   : > { %v3429_v56 = vmax.f32 %v3426_v53, 0.0 }
 0xf53   : > { %v6091_v60 = vpop.f32.mrb[16].mxu0 }
 0xf54   : > { %6085 = vmatmul.mubr.msk.f32.vlgmr.msra.gmra.mrb[16].mxu1 %vm3436_vm14, %v3429_v56  ;;  %v3597_v63 = vpop.f32.mrb[17].mxu0  ;;  %v3603_v11 = vadd.f32 %v6091_v60, %v5637_v59 }
 0xf55   : > { %6379 = vmatpush3.bf16.msra.mxu1 %v6376_v46  ;;  %v3598_v1 = vadd.f32 %v5637_v59, %v3597_v63 }
 0xf56   : > { %6381 = vmatprep.subr.bf16.mxu1 %v6380_v57  ;;  %v3607_v21 = vmax.f32 %v3603_v11, 0.0 }
 0xf57   : > { %v3606_v3 = vmax.f32 %v3598_v1, 0.0 }
 0xf59   : > { %6383 = vmatpush3.bf16.msra.mxu1 %v6380_v57  ;;  %6108 = vmatprep.mubr.msk.f32.mxu1 %vm1999_vm2, %v3606_v3 }
 0xf5a   : > { %6385 = vmatprep.subr.bf16.mxu1 %v6384_v2 }
 0xf5d   : > { %6387 = vmatpush3.bf16.msra.mxu1 %v6384_v2 }
 0xf5e   : > { %6389 = vmatprep.subr.bf16.mxu1 %v6388_v7 }
 0xf61   : > { %6391 = vmatpush3.bf16.msra.mxu1 %v6388_v7 }
 0xf62   : > { %6409 = vmatprep.subr.bf16.mxu1 %v6408_v13 }
 0xf64   : > { %6109 = vmatmul.mubr.msk.f32.vlgmr.msra.gmra.mrb[18].mxu1 %vm1999_vm2, %v3607_v21 }
 0xf65   : > { %6411 = vmatpush3.bf16.msra.mxu1 %v6408_v13  ;;  %6146 = vmatprep.mubr.msk.f32.mxu1 %vm1999_vm2, %v3751_v22 }
 0xf66   : > { %6413 = vmatprep.subr.bf16.mxu1 %v6412_v16 }
 0xf69   : > { %6415 = vmatpush3.bf16.msra.mxu1 %v6412_v16 }
 0xf6a   : > { %6417 = vmatprep.subr.bf16.mxu1 %v6416_v58 }
 0xf6d   : > { %6419 = vmatpush3.bf16.msra.mxu1 %v6416_v58  ;;  %v5644_v58 = vld [vmem:[#allocation18] ss:$0 sm:$0xff] }
 0xf6e   : > { %6421 = vmatprep.subr.bf16.mxu1 %v6420_v27 }
 0xf71   : > { %6423 = vmatpush3.bf16.msra.mxu1 %v6420_v27 }
 0xf74   : > { %6147 = vmatmul.mubr.msk.f32.vlgmr.msra.gmra.mrb[20].mxu1 %vm1999_vm2, %v3752_v29 }
0x1027   : > { %v3510_v42 = vpop.f32.mrb[16].mxu1 }
0x1028   : > { %v3511_v43 = vadd.f32 %v5634_v14, %v3510_v42  ;;  %v6086_v44 = vpop.f32.mrb[17].mxu1 }
0x102a   : > { %5155 = vst.msk [vmem:[%s1766_s4] sm:$0xf] %vm5154_vm15, %v3511_v43  ;;  %s9112_s4 = smov 96  }
0x1037   : > { %v6110_v46 = vpop.f32.mrb[18].mxu1 }
0x1038   : > { %v3686_v47 = vpop.f32.mrb[19].mxu1  ;;  %v8720_v49 = vadd.f32 %v6110_v46, %v5641_v45 }
0x1039   : > { %v8718_v48 = vadd.f32 %v5641_v45, %v3686_v47 }
0x103a   : > { %v3698_v53 = vsel %vm1999_vm2, %v8720_v49, 0.0 }
0x103b   : > { %v3695_v50 = vsel %vm1999_vm2, %v8718_v48, 0.0 }
0x103c   : > { %3696 = vadd.xlane.f32.xlu0 %v3695_v50 }
0x1040   : > { %3699 = vadd.xlane.f32.xlu0 %v3698_v53 }
0x1047   : > { %v6148_v56 = vpop.f32.mrb[20].mxu1 }
0x1048   : > { %v3924_v57 = vadd.f32 %v6148_v56, %v5651_v55  ;;  %v3918_v59 = vpop.f32.mrb[21].mxu1 }
0x1049   : > { %v3919_v60 = vadd.f32 %v5651_v55, %v3918_v59 }
0x104b   : > { %v6424_v61 = vpack.c.bf16 %v3924_v57, %v3919_v60  ;;  %v8726_v62 = vpack.i.bf16 %v3924_v57, %v3919_v60 }
0x104d   : > { %6426 = vmatprep.subr.msk.bf16.mxu0 %vm8464_vm5, %v6424_v61 }
0x10c9   : > { %v3697_v63 = vpop.xlane.xlu0 %3696 }
0x10ca   : > { %v3701_v1 = vmul.f32 0.015625, %v3697_v63 }
0x10cc   : > { %v3703_v2 = vsub.f32 %v8718_v48, %v3701_v1 }
0x10cd   : > { %v3700_v3 = vpop.xlane.xlu0 %3699 }
0x10ce   : > { %v3702_v4 = vmul.f32 0.015625, %v3700_v3  ;;  %v3705_v6 = vmul.f32 %v3703_v2, %v3703_v2 }
0x10d0   : > { %v3704_v7 = vsub.f32 %v8720_v49, %v3702_v4  ;;  %v3707_v8 = vsel %vm1999_vm2, %v3705_v6, 0.0 }
0x10d1   : > { %3708 = vadd.xlane.f32.xlu1 %v3707_v8 }
0x10d2   : > { %v3706_v9 = vmul.f32 %v3704_v7, %v3704_v7 }
0x10d4   : > { %v3710_v12 = vsel %vm1999_vm2, %v3706_v9, 0.0 }
0x10d5   : > { %3711 = vadd.xlane.f32.xlu0 %v3710_v12 }
0x10e2   : > { %6880 = vrot.lane.b32.xlu1 %v8726_v62, %s9110_s2 }
0x10e6   : > { %6890 = vrot.lane.b32.xlu1 %v8726_v62, %s9111_s1 }
0x10eb   : > { %6885 = vrot.lane.b32.xlu0 %v8726_v62, %s9112_s4 }
0x115e   : > { %v3709_v11 = vpop.xlane.xlu1 %3708 }
0x115f   : > { %v3713_v13 = vmul.f32 0.015625, %v3709_v11 }
0x1161   : > { %v3715_v15 = vadd.f32 1e-05, %v3713_v13 }
0x1162   : > { %v3712_v19 = vpop.xlane.xlu0 %3711  ;;  %v6881_v29 = vpop.permute.xlu1 %6880 }
0x1163   : > { %6938 = vrsqrt.f32 %v3715_v15  ;;  %v3714_v0 = vmul.f32 0.015625, %v3712_v19  ;;  %v6883_v24 = vunpack.i.h.bf16 %v6881_v29  ;;  %v6882_v33 = vunpack.i.l.bf16 %v6881_v29 }
0x1165   : > { %v3716_v20 = vadd.f32 1e-05, %v3714_v0  ;;  %v6430_v36 = vpack.c.bf16 %v6883_v24, %v6882_v33 }
0x1166   : > { %v6886_v21 = vpop.permute.xlu0 %6885  ;;  %v6891_v38 = vpop.permute.xlu1 %6890 }
0x1167   : > { %6940 = vrsqrt.f32 %v3716_v20  ;;  %v6888_v16 = vunpack.i.h.bf16 %v6886_v21  ;;  %v6887_v22 = vunpack.i.l.bf16 %v6886_v21  ;;  %v6893_v40 = vunpack.i.h.bf16 %v6891_v38 }
0x1168   : > { %v6892_v41 = vunpack.i.l.bf16 %v6891_v38 }
0x1169   : > { %v6436_v23 = vpack.c.bf16 %v6888_v16, %v6887_v22 }
0x116a   : > { %v6442_v44 = vpack.c.bf16 %v6893_v40, %v6892_v41 }
0x116b   : > { %6438 = vmatprep.subr.msk.bf16.mxu1 %vm8464_vm5, %v6436_v23 }
0x116c   : > { %6441 = vmatpush3.bf16.xpose.msk.msra.mxu1 %vm8464_vm5, %v6436_v23 }
0x116d   : > { %v6939_v25 = vpop.eup %6938 }
0x116e   : > { %v3719_v10 = vmul.f32 %v6939_v25, %v3703_v2 }
0x1170   : > { %v3727_v27 = vmul.f32 %v5644_v58, %v3719_v10 }
0x1171   : > { %v6941_v28 = vpop.eup %6940 }
0x1172   : > { %v3720_v30 = vmul.f32 %v6941_v28, %v3704_v7  ;;  %v3735_v32 = vadd.f32 %v5645_v26, %v3727_v27 }
0x1174   : > { %v3728_v34 = vmul.f32 %v5644_v58, %v3720_v30  ;;  %6127 = vmatprep.mubr.msk.f32.mxu0 %vm1999_vm2, %v3735_v32 }
0x1176   : > { %v3736_v35 = vadd.f32 %v5645_v26, %v3728_v34 }
0x1178   : > { %6128 = vmatmul.mubr.msk.f32.vlgmr.msra.gmra.mrb[18].mxu0 %vm1999_vm2, %v3736_v35 }
0x1179   : > { %6429 = vmatpush3.bf16.xpose.msk.msra.mxu0 %vm8464_vm5, %v6424_v61 }
0x117a   : > { %6432 = vmatprep.subr.msk.bf16.mxu0 %vm8464_vm5, %v6430_v36 }
0x124b   : > { %v6129_v39 = vpop.f32.mrb[18].mxu0 }
0x124c   : > { %v3837_v14 = vadd.f32 %v6129_v39, %v5648_v5  ;;  %v3831_v42 = vpop.f32.mrb[19].mxu0 }
0x124d   : > { %v3832_v43 = vadd.f32 %v5648_v5, %v3831_v42 }
0x124e   : > { %4016 = vrot.lane.b32.xlu1 %v3837_v14, %s9110_s2 }
0x124f   : > { %4105 = vrot.lane.b32.xlu0 %v3832_v43, %s9112_s4  ;;  %6153 = vmatprep.mubr.msk.f32.mxu0 %vm2209_vm4, %v3832_v43 }
0x1250   : > { %6154 = vmatmul.mubr.msk.f32.vlgmr.msra.gmra.mrb[20].mxu0 %vm2209_vm4, %v3837_v14 }
0x1251   : > { %6435 = vmatpush3.bf16.xpose.msk.msra.mxu0 %vm8464_vm5, %v6430_v36 }
0x1252   : > { %6444 = vmatprep.subr.msk.bf16.mxu0 %vm8464_vm5, %v6442_v44  ;;  %4014 = vrot.lane.b32.xlu1 %v3832_v43, %s9110_s2  ;;  %s9114_s2 = smov 32  }
0x1253   : > { %4196 = vrot.lane.b32.xlu0 %v3832_v43, %s9111_s1 }
0x1256   : > { %4107 = vrot.lane.b32.xlu1 %v3837_v14, %s9112_s4  ;;  %s9116_s4 = smov 64  }
0x125a   : > { %4198 = vrot.lane.b32.xlu1 %v3837_v14, %s9111_s1  ;;  %s9115_s1 = smov 16  }
0x12c0   : > { %v4017_v45 = vpop.permute.xlu1 %4016 }
0x12c1   : > { %v4106_v46 = vpop.permute.xlu0 %4105 }
0x12c2   : > { %6167 = vmatprep.mubr.msk.f32.mxu1 %vm2209_vm4, %v4106_v46 }
0x12c4   : > { %v4015_v47 = vpop.permute.xlu1 %4014 }
0x12c5   : > { %6160 = vmatprep.mubr.msk.f32.mxu0 %vm2209_vm4, %v4015_v47  ;;  %v4197_v50 = vpop.permute.xlu0 %4196 }
0x12c6   : > { %6161 = vmatmul.mubr.msk.f32.vlgmr.msra.gmra.mrb[22].mxu0 %vm2209_vm4, %v4017_v45 }
0x12c7   : > { %6447 = vmatpush3.bf16.xpose.msk.msra.mxu0 %vm8464_vm5, %v6442_v44  ;;  %6174 = vmatprep.mubr.msk.f32.mxu0 %vm2209_vm4, %v4197_v50 }
0x12c8   : > { %v4108_v53 = vpop.permute.xlu1 %4107 }
0x12c9   : > { %6168 = vmatmul.mubr.msk.f32.vlgmr.msra.gmra.mrb[22].mxu1 %vm2209_vm4, %v4108_v53 }
0x12cc   : > { %v4199_v55 = vpop.permute.xlu1 %4198 }
0x12ce   : > { %6175 = vmatmul.mubr.msk.f32.vlgmr.msra.gmra.mrb[24].mxu0 %vm2209_vm4, %v4199_v55 }
0x1323   : > { %v6155_v56 = vpop.f32.mrb[20].mxu0 }
0x1324   : > { %v4005_v57 = vpop.f32.mrb[21].mxu0  ;;  %v4290_v59 = vsel %vm2585_vm10, %v6155_v56, -inf }
0x1325   : > { %4291 = vmax.xlane.f32.xlu1 %v4290_v59  ;;  %v4287_v60 = vsel %vm2585_vm10, %v4005_v57, -inf }
0x1326   : > { %4288 = vmax.xlane.f32.xlu0 %v4287_v60 }
0x1399   : > { %v6162_v61 = vpop.f32.mrb[22].mxu0 }
0x139a   : > { %v4096_v63 = vpop.f32.mrb[23].mxu0  ;;  %v4296_v18 = vsel %vm2585_vm10, %v6162_v61, -inf }
0x139b   : > { %4297 = vmax.xlane.f32.xlu0 %v4296_v18  ;;  %v4293_v4 = vsel %vm2585_vm10, %v4096_v63, -inf }
0x139c   : > { %v6169_v1 = vpop.f32.mrb[22].mxu1 }
0x139d   : > { %v4187_v2 = vpop.f32.mrb[23].mxu1  ;;  %v4302_v3 = vsel %vm2585_vm10, %v6169_v1, -inf }
0x139e   : > { %4303 = vmax.xlane.f32.xlu1 %v4302_v3  ;;  %v4299_v9 = vsel %vm2585_vm10, %v4187_v2, -inf }
0x139f   : > { %4294 = vmax.xlane.f32.xlu0 %v4293_v4 }
0x13a1   : > { %v6176_v6 = vpop.f32.mrb[24].mxu0 }
0x13a2   : > { %v4278_v7 = vpop.f32.mrb[25].mxu0  ;;  %v4308_v8 = vsel %vm2585_vm10, %v6176_v6, -inf }
0x13a3   : > { %4309 = vmax.xlane.f32.xlu1 %v4308_v8  ;;  %4300 = vmax.xlane.f32.xlu0 %v4299_v9  ;;  %v4305_v12 = vsel %vm2585_vm10, %v4278_v7, -inf }
0x13a7   : > { %4306 = vmax.xlane.f32.xlu0 %v4305_v12 }
0x13b2   : > { %v4292_v11 = vpop.xlane.xlu1 %4291 }
0x13b3   : > { %v4312_v13 = vsub.f32 %v6155_v56, %v4292_v11  ;;  %v4289_v15 = vpop.xlane.xlu0 %4288 }
0x13b4   : > { %v4311_v19 = vsub.f32 %v4005_v57, %v4289_v15 }
0x13b5   : > { %v4321_v0 = vmul.f32 1.442695, %v4312_v13 }
0x13b6   : > { %v4319_v20 = vmul.f32 1.442695, %v4311_v19 }
0x13b7   : > { %6942 = vpow2.f32 %v4321_v0 }
0x13b8   : > { %6944 = vpow2.f32 %v4319_v20 }
0x13c1   : > { %v8778_v21 = vpop.eup %6942 }
0x13c2   : > { %v6945_v16 = vpop.eup %6944  ;;  %v4338_v22 = vsel %vm2585_vm10, %v8778_v21, 0.0 }
0x13c3   : > { %4339 = vadd.xlane.f32.xlu1 %v4338_v22  ;;  %v4335_v23 = vsel %vm2585_vm10, %v6945_v16, 0.0 }
0x13c4   : > { %4336 = vadd.xlane.f32.xlu0 %v4335_v23 }
0x1428   : > { %v4298_v25 = vpop.xlane.xlu0 %4297 }
0x1429   : > { %v4314_v58 = vsub.f32 %v6162_v61, %v4298_v25 }
0x142b   : > { %v4325_v10 = vmul.f32 1.442695, %v4314_v58  ;;  %v4304_v26 = vpop.xlane.xlu1 %4303 }
0x142c   : > { %v4316_v27 = vsub.f32 %v6169_v1, %v4304_v26  ;;  %v4295_v28 = vpop.xlane.xlu0 %4294 }
0x142d   : > { %6946 = vpow2.f32 %v4325_v10  ;;  %v4313_v29 = vsub.f32 %v4096_v63, %v4295_v28 }
0x142e   : > { %v4329_v30 = vmul.f32 1.442695, %v4316_v27 }
0x142f   : > { %v4323_v32 = vmul.f32 1.442695, %v4313_v29 }
0x1430   : > { %6948 = vpow2.f32 %v4329_v30  ;;  %v4310_v24 = vpop.xlane.xlu1 %4309  ;;  %v4301_v33 = vpop.xlane.xlu0 %4300 }
0x1431   : > { %6950 = vpow2.f32 %v4323_v32  ;;  %v4318_v34 = vsub.f32 %v6176_v6, %v4310_v24  ;;  %v4315_v35 = vsub.f32 %v4187_v2, %v4301_v33 }
0x1433   : > { %v4333_v36 = vmul.f32 1.442695, %v4318_v34  ;;  %v4327_v38 = vmul.f32 1.442695, %v4315_v35 }
0x1434   : > { %v4307_v5 = vpop.xlane.xlu0 %4306 }
0x1435   : > { %6952 = vpow2.f32 %v4333_v36  ;;  %v4317_v39 = vsub.f32 %v4278_v7, %v4307_v5 }
0x1436   : > { %6954 = vpow2.f32 %v4327_v38 }
0x1437   : > { %v6947_v40 = vpop.eup %6946  ;;  %v4331_v41 = vmul.f32 1.442695, %v4317_v39 }
0x1438   : > { %v4344_v14 = vsel %vm2585_vm10, %v6947_v40, 0.0 }
0x1439   : > { %6956 = vpow2.f32 %v4331_v41  ;;  %4345 = vadd.xlane.f32.xlu1 %v4344_v14 }
0x143a   : > { %v8784_v42 = vpop.eup %6948 }
0x143b   : > { %v6951_v43 = vpop.eup %6950  ;;  %v4350_v44 = vsel %vm2585_vm10, %v8784_v42, 0.0 }
0x143c   : > { %v4341_v45 = vsel %vm2585_vm10, %v6951_v43, 0.0 }
0x143d   : > { %4351 = vadd.xlane.f32.xlu1 %v4350_v44  ;;  %4342 = vadd.xlane.f32.xlu0 %v4341_v45 }
0x143f   : > { %v8789_v46 = vpop.eup %6952 }
0x1440   : > { %v8791_v47 = vpop.eup %6954  ;;  %v4356_v50 = vsel %vm2585_vm10, %v8789_v46, 0.0 }
0x1441   : > { %4357 = vadd.xlane.f32.xlu1 %v4356_v50  ;;  %v4347_v53 = vsel %vm2585_vm10, %v8791_v47, 0.0 }
0x1442   : > { %4348 = vadd.xlane.f32.xlu0 %v4347_v53 }
0x1443   : > { %v8797_v55 = vpop.eup %6956 }
0x1444   : > { %v4353_v56 = vsel %vm2585_vm10, %v8797_v55, 0.0 }
0x1446   : > { %4354 = vadd.xlane.f32.xlu0 %v4353_v56 }
0x1450   : > { %v4340_v61 = vpop.xlane.xlu1 %4339 }
0x1451   : > { %v4337_v57 = vpop.xlane.xlu0 %4336 }
0x1452   : > { %6958 = vrcp.f32 %v4337_v57  ;;  %6900 = vrot.lane.b32.xlu1 %v8726_v62, %s9113_s3 }
0x1456   : > { %6905 = vrot.lane.b32.xlu1 %v8726_v62, %s9114_s2 }
0x145a   : > { %6910 = vrot.lane.b32.xlu1 %v8726_v62, %s9115_s1 }
0x145c   : > { %v6959_v59 = vpop.eup %6958  ;;  %6895 = vrot.lane.b32.xlu0 %v8726_v62, %s9116_s4  ;;  %s9117_s4 = sld [smem:[#allocation79_spill]] }
0x145d   : > { %v4360_v60 = vmul.f32 %v6959_v59, %v6945_v16 }
0x145f   : > { %6181 = vmatprep.mubr.msk.f32.mxu1 %vm2585_vm10, %v4360_v60 }
0x1462   : > { %v1895_v27 = vld [vmem:[%s9117_s4 + $0x8] sm:$0xff]  ;;  %v1897_v28 = vld [vmem:[%s9117_s4 + $0x18] sm:$0xff]  ;;  %v1894_v33 = vld [vmem:[%s9117_s4] sm:$0xff] }
0x1463   : > { %v1896_v34 = vld [vmem:[%s9117_s4 + $0x10] sm:$0xff]  ;;  %v6488_v38 = vpack.c.bf16 %v1897_v28, %v1895_v27  ;;  %v1899_v5 = vld [vmem:[%s9117_s4 + $0x28] sm:$0xff]  ;;  %v1901_v39 = vld [vmem:[%s9117_s4 + $0x38] sm:$0xff] }
0x1464   : > { %v6492_v44 = vpack.c.bf16 %v1901_v39, %v1899_v5  ;;  %v1898_v45 = vld [vmem:[%s9117_s4 + $0x20] sm:$0xff]  ;;  %v1903_v53 = vld [vmem:[%s9117_s4 + $0x48] sm:$0xff]  ;;  %v1904_v57 = vld [vmem:[%s9117_s4 + $0x50] sm:$0xff] }
0x1465   : > { %v1902_v56 = vld [vmem:[%s9117_s4 + $0x40] sm:$0xff]  ;;  %v1909_v59 = vld [vmem:[%s9117_s4 + $0x78] sm:$0xff] }
0x1466   : > { %v6498_v60 = vpack.c.bf16 %v1904_v57, %v1902_v56 }
0x14c6   : > { %v4346_v63 = vpop.xlane.xlu1 %4345 }
0x14c7   : > { %6960 = vrcp.f32 %v4346_v63  ;;  %v1906_v63 = vld [vmem:[%s9117_s4 + $0x60] sm:$0xff] }
0x14ca   : > { %v4352_v18 = vpop.xlane.xlu1 %4351  ;;  %v4343_v1 = vpop.xlane.xlu0 %4342 }
0x14cb   : > { %6962 = vrcp.f32 %v4343_v1 }
0x14cc   : > { %6964 = vrcp.f32 %v4340_v61 }
0x14ce   : > { %v4358_v2 = vpop.xlane.xlu1 %4357 }
0x14cf   : > { %v4349_v3 = vpop.xlane.xlu0 %4348 }
0x14d0   : > { %6966 = vrcp.f32 %v4349_v3  ;;  %v1884_v3 = vld [vmem:[%s9118_s5 + $0x8] sm:$0xff] }
0x14d1   : > { %6968 = vrcp.f32 %v4358_v2  ;;  %v6961_v62 = vpop.eup %6960  ;;  %v1883_v2 = vld [vmem:[%s9118_s5] sm:$0xff] }
0x14d2   : > { %v6901_v4 = vpop.permute.xlu1 %6900  ;;  %v4366_v22 = vmul.f32 %v6961_v62, %v6947_v40 }
0x14d3   : > { %v6903_v6 = vunpack.i.h.bf16 %v6901_v4  ;;  %v6902_v7 = vunpack.i.l.bf16 %v6901_v4  ;;  %v4355_v8 = vpop.xlane.xlu0 %4354  ;;  %v6472_v4 = vpack.c.bf16 %v1884_v3, %v1883_v2 }
0x14d4   : > { %6970 = vrcp.f32 %v4355_v8  ;;  %v1887_v8 = vld [vmem:[%s9118_s5 + $0x20] sm:$0xff] }
0x14d5   : > { %6972 = vrcp.f32 %v4352_v18  ;;  %v6454_v9 = vpack.c.bf16 %v6903_v6, %v6902_v7  ;;  %v6963_v12 = vpop.eup %6962  ;;  %v1908_v18 = vld [vmem:[%s9117_s4 + $0x70] sm:$0xff]  ;;  %v1886_v7 = vld [vmem:[%s9118_s5 + $0x18] sm:$0xff] }
0x14d6   : > { %v6906_v11 = vpop.permute.xlu1 %6905  ;;  %v4364_v15 = vmul.f32 %v6963_v12, %v6951_v43  ;;  %v6965_v58 = vpop.eup %6964  ;;  %v6502_v1 = vpack.c.bf16 %v1908_v18, %v1906_v63  ;;  %v1885_v6 = vld [vmem:[%s9118_s5 + $0x10] sm:$0xff] }
0x14d7   : > { %v6896_v13 = vpop.permute.xlu0 %6895  ;;  %6456 = vmatprep.subr.msk.bf16.mxu0 %vm8517_vm9, %v6454_v9  ;;  %v6908_v19 = vunpack.i.h.bf16 %v6906_v11  ;;  %v6907_v0 = vunpack.i.l.bf16 %v6906_v11  ;;  %v4362_v36 = vmul.f32 %v6965_v58, %v8778_v21  ;;  %v6490_v21 = vpack.c.bf16 %v1896_v34, %v1894_v33  ;;  %v1889_v11 = vld [vmem:[%s9118_s5 + $0x30] sm:$0xff] }
0x14d8   : > { %v6898_v20 = vunpack.i.h.bf16 %v6896_v13  ;;  %v6897_v16 = vunpack.i.l.bf16 %v6896_v13  ;;  %6459 = vmatpush3.bf16.msk.msra.mxu0 %vm8517_vm9, %v6454_v9  ;;  %6188 = vmatprep.mubr.msk.f32.mxu0 %vm2585_vm10, %v4364_v15  ;;  %v6476_v62 = vpack.c.bf16 %v1886_v7, %v1885_v6  ;;  %v1888_v9 = vld [vmem:[%s9118_s5 + $0x28] sm:$0xff]  ;;  %v1890_v13 = vld [vmem:[%s9118_s5 + $0x38] sm:$0xff] }
0x14d9   : > { %v6460_v30 = vpack.c.bf16 %v6908_v19, %v6907_v0  ;;  %v6480_v12 = vpack.c.bf16 %v1888_v9, %v1887_v8  ;;  %v6484_v15 = vpack.c.bf16 %v1890_v13, %v1889_v11 }
0x14da   : > { %v6448_v23 = vpack.c.bf16 %v6898_v20, %v6897_v16  ;;  %v6911_v25 = vpop.permute.xlu1 %6910  ;;  %v6967_v29 = vpop.eup %6966 }
0x14db   : > { %v6913_v10 = vunpack.i.h.bf16 %v6911_v25  ;;  %v6912_v26 = vunpack.i.l.bf16 %v6911_v25  ;;  %6189 = vmatmul.mubr.msk.f32.vlgmr.msra.gmra.mrb[26].mxu0 %vm2585_vm10, %v4366_v22  ;;  %v6969_v32 = vpop.eup %6968  ;;  %v4368_v41 = vmul.f32 %v6967_v29, %v8791_v47  ;;  %v1900_v47 = vld [vmem:[%s9117_s4 + $0x30] sm:$0xff] }
0x14dc   : > { %6450 = vmatprep.subr.msk.bf16.mxu1 %vm8517_vm9, %v6448_v23  ;;  %v4374_v43 = vmul.f32 %v6969_v32, %v8789_v46  ;;  %v6494_v17 = vpack.c.bf16 %v1900_v47, %v1898_v45 }
0x14dd   : > { %v6466_v24 = vpack.c.bf16 %v6913_v10, %v6912_v26  ;;  %6453 = vmatpush3.bf16.msk.msra.mxu1 %vm8517_vm9, %v6448_v23 }
0x14de   : > { %v6971_v35 = vpop.eup %6970  ;;  %6462 = vmatprep.subr.msk.bf16.mxu1 %vm8517_vm9, %v6460_v30 }
0x14df   : > { %v6973_v40 = vpop.eup %6972  ;;  %6468 = vmatprep.subr.msk.bf16.mxu0 %vm8517_vm9, %v6466_v24  ;;  %v4372_v14 = vmul.f32 %v6971_v35, %v8797_v55  ;;  %v1905_v55 = vld [vmem:[%s9117_s4 + $0x58] sm:$0xff] }
0x14e0   : > { %6182 = vmatmul.mubr.msk.f32.vlgmr.msra.gmra.mrb[24].mxu1 %vm2585_vm10, %v4362_v36  ;;  %6471 = vmatpush3.bf16.msk.msra.mxu0 %vm8517_vm9, %v6466_v24  ;;  %v4370_v50 = vmul.f32 %v6973_v40, %v8784_v42  ;;  %v6496_v46 = vpack.c.bf16 %v1905_v55, %v1903_v53  ;;  %v1907_v42 = vld [vmem:[%s9117_s4 + $0x68] sm:$0xff] }
0x14e1   : > { %6465 = vmatpush3.bf16.msk.msra.mxu1 %vm8517_vm9, %v6460_v30  ;;  %6195 = vmatprep.mubr.msk.f32.mxu1 %vm2585_vm10, %v4368_v41  ;;  %v6500_v61 = vpack.c.bf16 %v1909_v59, %v1907_v42 }
0x14e2   : > { %6202 = vmatprep.mubr.msk.f32.mxu0 %vm2585_vm10, %v4372_v14  ;;  %6489 = vmatprep.subr.bf16.mxu0 %v6488_v38  ;;  %v5682_v38 = vld [vmem:[#allocation27] ss:$0 sm:$0xff] }
0x14e3   : > { %6203 = vmatmul.mubr.msk.f32.vlgmr.msra.gmra.mrb[28].mxu0 %vm2585_vm10, %v4374_v43  ;;  %6473 = vmatprep.subr.bf16.mxu1 %v6472_v4 }
0x14e4   : > { %6196 = vmatmul.mubr.msk.f32.vlgmr.msra.gmra.mrb[26].mxu1 %vm2585_vm10, %v4370_v50  ;;  %6491 = vmatpush1.bf16.msra.mxu0 %v6490_v21 }
0x14e5   : > { %6493 = vmatprep.subr.bf16.mxu0 %v6492_v44  ;;  %4969 = vmatprep.mubr.f32.mxu0 %v7784_v37 }
0x14e6   : > { %6475 = vmatpush3.bf16.msra.mxu1 %v6472_v4 }
0x14e7   : > { %6477 = vmatprep.subr.bf16.mxu1 %v6476_v62 }
0x14e8   : > { %6495 = vmatpush1.bf16.msra.mxu0 %v6494_v17 }
0x14e9   : > { %6497 = vmatprep.subr.bf16.mxu0 %v6496_v46 }
0x14ea   : > { %6479 = vmatpush3.bf16.msra.mxu1 %v6476_v62 }
0x14eb   : > { %6481 = vmatprep.subr.bf16.mxu1 %v6480_v12 }
0x14ec   : > { %6499 = vmatpush1.bf16.msra.mxu0 %v6498_v60 }
0x14ed   : > { %6501 = vmatprep.subr.bf16.mxu0 %v6500_v61 }
0x14ee   : > { %6483 = vmatpush3.bf16.msra.mxu1 %v6480_v12 }
0x14ef   : > { %6485 = vmatprep.subr.bf16.mxu1 %v6484_v15 }
0x14f0   : > { %6503 = vmatpush1.bf16.msra.mxu0 %v6502_v1 }
0x14f1   : > { %6224 = vmatprep.subr.msk.mxu0 %vm1999_vm2, %v8665_v31 }
0x14f2   : > { %6487 = vmatpush3.bf16.msra.mxu1 %v6484_v15 }
0x15ae   : > { %v6190_v19 = vpop.f32.mrb[26].mxu0 }
0x15af   : > { %4731 = vrot.lane.b32.xlu1 %v6190_v19, %s9115_s1  ;;  %v4542_v0 = vpop.f32.mrb[27].mxu0 }
0x15b0   : > { %4729 = vrot.lane.b32.xlu0 %v4542_v0, %s9115_s1  ;;  %s1762_s1 = scalar_lea.vmem %s8036_s6, %s8403_s0 }
0x15b3   : > { %v6183_v20 = vpop.f32.mrb[24].mxu1 }
0x15b4   : > { %v4454_v16 = vpop.f32.mrb[25].mxu1 }
0x15b6   : > { %v6204_v22 = vpop.f32.mrb[28].mxu0 }
0x15b7   : > { %v6197_v23 = vpop.f32.mrb[26].mxu1  ;;  %v4718_v25 = vpop.f32.mrb[29].mxu0 }
0x15b8   : > { %4739 = vrot.lane.b32.xlu1 %v6197_v23, %s9114_s2  ;;  %v4630_v58 = vpop.f32.mrb[27].mxu1 }
0x15b9   : > { %4737 = vrot.lane.b32.xlu0 %v4630_v58, %s9114_s2  ;;  %s9120_s2 = sld [smem:[#allocation80_spill]] }
0x15bc   : > { %4747 = vrot.lane.b32.xlu1 %v6204_v22, %s9113_s3 }
0x15bd   : > { %4745 = vrot.lane.b32.xlu0 %v4718_v25, %s9113_s3  ;;  %s9119_s3 = sld [smem:[#allocation81_spill]] }
0x15c3   : > { %v1927_v57 = vld [vmem:[%s9119_s3 + $0x80] sm:$0xff]  ;;  %v1928_v42 = vld [vmem:[%s9119_s3 + $0x88] sm:$0xff]  ;;  %v1929_v63 = vld [vmem:[%s9119_s3 + $0x90] sm:$0xff] }
0x15c4   : > { %v1911_v59 = vld [vmem:[%s9119_s3] sm:$0xff]  ;;  %v6504_v60 = vpack.c.bf16 %v1928_v42, %v1927_v57  ;;  %v1912_v61 = vld [vmem:[%s9119_s3 + $0x8] sm:$0xff]  ;;  %v1930_v18 = vld [vmem:[%s9119_s3 + $0x98] sm:$0xff] }
0x15c5   : > { %v6506_v1 = vpack.c.bf16 %v1912_v61, %v1911_v59  ;;  %v6508_v2 = vpack.c.bf16 %v1930_v18, %v1929_v63  ;;  %v1913_v3 = vld [vmem:[%s9119_s3 + $0x10] sm:$0xff]  ;;  %v1914_v4 = vld [vmem:[%s9119_s3 + $0x18] sm:$0xff]  ;;  %v1931_v6 = vld [vmem:[%s9119_s3 + $0xa0] sm:$0xff] }
0x15c6   : > { %6505 = vmatprep.subr.bf16.mxu1 %v6504_v60  ;;  %v1932_v7 = vld [vmem:[%s9119_s3 + $0xa8] sm:$0xff]  ;;  %v6510_v8 = vpack.c.bf16 %v1914_v4, %v1913_v3  ;;  %v1915_v9 = vld [vmem:[%s9119_s3 + $0x20] sm:$0xff]  ;;  %v1933_v11 = vld [vmem:[%s9119_s3 + $0xb0] sm:$0xff] }
0x15c7   : > { %v6512_v62 = vpack.c.bf16 %v1932_v7, %v1931_v6  ;;  %v1916_v12 = vld [vmem:[%s9119_s3 + $0x28] sm:$0xff]  ;;  %v1934_v13 = vld [vmem:[%s9119_s3 + $0xb8] sm:$0xff]  ;;  %v1917_v0 = vld [vmem:[%s9119_s3 + $0x30] sm:$0xff] }
0x15c8   : > { %v6514_v15 = vpack.c.bf16 %v1916_v12, %v1915_v9  ;;  %v6516_v19 = vpack.c.bf16 %v1934_v13, %v1933_v11  ;;  %v1936_v22 = vld [vmem:[%s9119_s3 + $0xc8] sm:$0xff]  ;;  %v1919_v58 = vld [vmem:[%s9119_s3 + $0x40] sm:$0xff]  ;;  %v1941_v59 = vld [vmem:[%s9119_s3 + $0xf0] sm:$0xff] }
0x15c9   : > { %v1924_v57 = vld [vmem:[%s9119_s3 + $0x68] sm:$0xff]  ;;  %v1942_v60 = vld [vmem:[%s9119_s3 + $0xf8] sm:$0xff] }
0x15ca   : > { %v6532_v61 = vpack.c.bf16 %v1942_v60, %v1941_v59  ;;  %v1926_v63 = vld [vmem:[%s9119_s3 + $0x78] sm:$0xff] }
0x1621   : > { %v4732_v10 = vpop.permute.xlu1 %4731 }
0x1622   : > { %v4730_v26 = vpop.permute.xlu0 %4729  ;;  %v4752_v32 = vsel %vm2209_vm4, %v6183_v20, %v4732_v10  ;;  %v1918_v20 = vld [vmem:[%s9119_s3 + $0x38] sm:$0xff]  ;;  %v1920_v10 = vld [vmem:[%s9119_s3 + $0x48] sm:$0xff] }
0x1623   : > { %v4751_v29 = vsel %vm2209_vm4, %v4454_v16, %v4730_v26  ;;  %v1935_v16 = vld [vmem:[%s9119_s3 + $0xc0] sm:$0xff]  ;;  %v6518_v23 = vpack.c.bf16 %v1918_v20, %v1917_v0  ;;  %v1937_v26 = vld [vmem:[%s9119_s3 + $0xd0] sm:$0xff] }
0x1624   : > { %v6520_v25 = vpack.c.bf16 %v1936_v22, %v1935_v16 }
0x162a   : > { %v4740_v27 = vpop.permute.xlu1 %4739 }
0x162b   : > { %v4738_v28 = vpop.permute.xlu0 %4737  ;;  %v4754_v34 = vsel %vm2915_vm11, %v4752_v32, %v4740_v27  ;;  %v1938_v27 = vld [vmem:[%s9119_s3 + $0xd8] sm:$0xff] }
0x162c   : > { %v4753_v24 = vsel %vm2915_vm11, %v4751_v29, %v4738_v28  ;;  %v6522_v28 = vpack.c.bf16 %v1920_v10, %v1919_v58  ;;  %v6524_v29 = vpack.c.bf16 %v1938_v27, %v1937_v26  ;;  %v1922_v32 = vld [vmem:[%s9119_s3 + $0x58] sm:$0xff] }
0x162e   : > { %v4748_v30 = vpop.permute.xlu1 %4747 }
0x162f   : > { %v4746_v33 = vpop.permute.xlu0 %4745  ;;  %v4756_v36 = vsel %vm2917_vm12, %v4754_v34, %v4748_v30  ;;  %v1921_v30 = vld [vmem:[%s9119_s3 + $0x50] sm:$0xff] }
0x1630   : > { %v4755_v35 = vsel %vm2917_vm12, %v4753_v24, %v4746_v33  ;;  %v1939_v24 = vld [vmem:[%s9119_s3 + $0xe0] sm:$0xff]  ;;  %v1940_v33 = vld [vmem:[%s9119_s3 + $0xe8] sm:$0xff]  ;;  %v6526_v34 = vpack.c.bf16 %v1922_v32, %v1921_v30 }
0x1631   : > { %6221 = vmatprep.mubr.msk.f32.mxu1 %vm1999_vm2, %v4755_v35  ;;  %v6528_v35 = vpack.c.bf16 %v1940_v33, %v1939_v24 }
0x1632   : > { %6222 = vmatmul.mubr.msk.f32.vlgmr.msra.gmra.mrb[28].mxu1 %vm1999_vm2, %v4756_v36 }
0x1633   : > { %6507 = vmatpush3.bf16.msra.mxu1 %v6506_v1  ;;  %v1910_v1 = vld [vmem:[%s9120_s2] sm:$0x3] }
0x1634   : > { %6509 = vmatprep.subr.bf16.mxu1 %v6508_v2 }
0x1637   : > { %6511 = vmatpush3.bf16.msra.mxu1 %v6510_v8 }
0x1638   : > { %6513 = vmatprep.subr.bf16.mxu1 %v6512_v62 }
0x163b   : > { %6515 = vmatpush3.bf16.msra.mxu1 %v6514_v15 }
0x163c   : > { %6517 = vmatprep.subr.bf16.mxu1 %v6516_v19  ;;  %v5689_v19 = vld [vmem:[#allocation31] ss:$0 sm:$0xff] }
0x163f   : > { %6519 = vmatpush3.bf16.msra.mxu1 %v6518_v23 }
0x1640   : > { %6521 = vmatprep.subr.bf16.mxu1 %v6520_v25 }
0x1643   : > { %6523 = vmatpush3.bf16.msra.mxu1 %v6522_v28 }
0x1644   : > { %6525 = vmatprep.subr.bf16.mxu1 %v6524_v29 }
0x1647   : > { %6527 = vmatpush3.bf16.msra.mxu1 %v6526_v34 }
0x1648   : > { %6529 = vmatprep.subr.bf16.mxu1 %v6528_v35 }
0x1705   : > { %v6223_v5 = vpop.f32.mrb[28].mxu1 }
0x1706   : > { %v4841_v39 = vadd.f32 %v6223_v5, %v5682_v38  ;;  %v4835_v40 = vpop.f32.mrb[29].mxu1 }
0x1707   : > { %v4836_v41 = vadd.f32 %v5682_v38, %v4835_v40 }
0x1708   : > { %v8880_v14 = vadd.f32 %v4841_v39, %v8720_v49 }
0x1709   : > { %v8883_v21 = vadd.f32 %v4836_v41, %v8718_v48 }
0x170a   : > { %v4849_v43 = vsel %vm1999_vm2, %v8880_v14, 0.0 }
0x170b   : > { %4850 = vadd.xlane.f32.xlu1 %v4849_v43  ;;  %v4846_v44 = vsel %vm1999_vm2, %v8883_v21, 0.0 }
0x170c   : > { %4847 = vadd.xlane.f32.xlu0 %v4846_v44  ;;  %v5685_v44 = vld [vmem:[#allocation28] ss:$0 sm:$0xff] }
0x1798   : > { %v4851_v45 = vpop.xlane.xlu1 %4850 }
0x1799   : > { %v4853_v47 = vmul.f32 0.015625, %v4851_v45  ;;  %v4848_v49 = vpop.xlane.xlu0 %4847 }
0x179a   : > { %v4852_v50 = vmul.f32 0.015625, %v4848_v49 }
0x179b   : > { %v8890_v48 = vsub.f32 %v8880_v14, %v4853_v47  ;;  %v5686_v47 = vld [vmem:[#allocation30] ss:$0 sm:$0xff] }
0x179c   : > { %v8893_v53 = vsub.f32 %v8883_v21, %v4852_v50 }
0x179d   : > { %v4857_v46 = vmul.f32 %v8890_v48, %v8890_v48 }
0x179e   : > { %v4856_v55 = vmul.f32 %v8893_v53, %v8893_v53 }
0x179f   : > { %v4861_v56 = vsel %vm1999_vm2, %v4857_v46, 0.0 }
0x17a0   : > { %v4858_v17 = vsel %vm1999_vm2, %v4856_v55, 0.0 }
0x17a1   : > { %4859 = vadd.xlane.f32.xlu0 %v4858_v17 }
0x17a5   : > { %4862 = vadd.xlane.f32.xlu0 %v4861_v56  ;;  %v1923_v56 = vld [vmem:[%s9119_s3 + $0x60] sm:$0xff] }
0x17a6   : > { %v6530_v42 = vpack.c.bf16 %v1924_v57, %v1923_v56 }
0x17a8   : > { %6531 = vmatpush3.bf16.msra.mxu1 %v6530_v42 }
0x17a9   : > { %6533 = vmatprep.subr.bf16.mxu1 %v6532_v61 }
0x182e   : > { %v4860_v36 = vpop.xlane.xlu0 %4859 }
0x182f   : > { %v4864_v38 = vmul.f32 0.015625, %v4860_v36 }
0x1831   : > { %v4866_v5 = vadd.f32 1e-05, %v4864_v38 }
0x1832   : > { %v4863_v39 = vpop.xlane.xlu0 %4862 }
0x1833   : > { %6974 = vrsqrt.f32 %v4866_v5  ;;  %v4865_v40 = vmul.f32 0.015625, %v4863_v39 }
0x1835   : > { %v4867_v41 = vadd.f32 1e-05, %v4865_v40 }
0x1837   : > { %6976 = vrsqrt.f32 %v4867_v41 }
0x183d   : > { %v6975_v43 = vpop.eup %6974 }
0x183e   : > { %v4870_v45 = vmul.f32 %v6975_v43, %v8893_v53 }
0x1840   : > { %v4878_v49 = vmul.f32 %v5685_v44, %v4870_v45 }
0x1841   : > { %v6977_v50 = vpop.eup %6976 }
0x1842   : > { %v4886_v55 = vadd.f32 %v5686_v47, %v4878_v49  ;;  %v4871_v17 = vmul.f32 %v6977_v50, %v8890_v48  ;;  %v1925_v48 = vld [vmem:[%s9119_s3 + $0x70] sm:$0xff] }
0x1843   : > { %v6534_v18 = vpack.c.bf16 %v1926_v63, %v1925_v48 }
0x1844   : > { %5687 = vmatmul.mubr.msk.f32.vlgmr.msra.gmra.mrb[30].mxu0 %vm1999_vm2, %v4886_v55  ;;  %v4879_v46 = vmul.f32 %v5685_v44, %v4871_v17 }
0x1845   : > { %6225 = vmatpush3.xpose.msk.msra.mxu0 %vm1999_vm2, %v8665_v31  ;;  %4975 = vmatprep.mubr.f32.mxu0 %v7784_v37  ;;  %v4892_v31 = vrot.slane %v1910_v1, %v3029_v52  ;;  %v4896_v37 = vrot.slane %v1910_v1, %v3033_v54 }
0x1846   : > { %v4887_v53 = vadd.f32 %v5686_v47, %v4879_v46  ;;  %6535 = vmatpush3.bf16.msra.mxu1 %v6534_v18 }
0x1848   : > { %5688 = vmatmul.mubr.msk.f32.gmra.mrb[32].mxu0 %vm1999_vm2, %v4887_v53 }
0x1917   : > { %v4971_v2 = vpop.f32.mrb[30].mxu0 }
0x1918   : > { %v4972_v3 = vadd.f32 %v4971_v2, %v4892_v31  ;;  %v4973_v4 = vpop.f32.mrb[31].mxu0 }
0x1919   : > { %v4974_v6 = vadd.f32 %v4973_v4, %v4896_v37 }
0x191a   : > { %v4982_v62 = vmax.f32 %v4972_v3, 0.0 }
0x191b   : > { %v4983_v7 = vmax.f32 %v4974_v6, 0.0  ;;  %v4977_v8 = vpop.f32.mrb[32].mxu0 }
0x191c   : > { %v4978_v9 = vadd.f32 %v4977_v8, %v4892_v31  ;;  %v4979_v12 = vpop.f32.mrb[33].mxu0 }
0x191d   : > { %v4980_v11 = vadd.f32 %v4979_v12, %v4896_v37  ;;  %5050 = vmatprep.mubr.f32.mxu1 %v4983_v7 }
0x191e   : > { %5051 = vmatmul.mubr.f32.vlgmr.msra.gmra.mrb[30].mxu1 %v4982_v62  ;;  %v4984_v15 = vmax.f32 %v4978_v9, 0.0 }
0x191f   : > { %v4985_v13 = vmax.f32 %v4980_v11, 0.0 }
0x1921   : > { %5055 = vmatprep.mubr.f32.mxu1 %v4985_v13 }
0x1922   : > { %5056 = vmatmul.mubr.f32.gmra.mrb[32].mxu1 %v4984_v15 }
0x19f1   : > { %v5915_v51 = vpop.f32.mrb[30].mxu1 }
0x19f2   : > { %v5916_v52 = vpop.f32.mrb[31].mxu1 }
0x19f3   : > { %v5917_v54 = vadd.f32 %v5916_v52, %v5915_v51 }
0x19f5   : > { %v5061_v0 = vadd.f32 %v5917_v54, %v8883_v21  ;;  %v5918_v20 = vpop.f32.mrb[32].mxu1 }
0x19f6   : > { %v5919_v16 = vpop.f32.mrb[33].mxu1 }
0x19f7   : > { %v5069_v22 = vadd.f32 %v5689_v19, %v5061_v0  ;;  %v5920_v23 = vadd.f32 %v5919_v16, %v5918_v20 }
0x19f9   : > { %v5062_v25 = vadd.f32 %v5920_v23, %v8880_v14  ;;  %6226 = vmatprep.mubr.msk.f32.mxu0 %vm1999_vm2, %v5069_v22 }
0x19fb   : > { %v5070_v58 = vadd.f32 %v5689_v19, %v5062_v25 }
0x19fd   : > { %6227 = vmatmul.mubr.msk.f32.vlgmr.msra.gmra.mrb[34].mxu0 %vm1999_vm2, %v5070_v58 }
0x1ad0   : > { %v6228_v10 = vpop.f32.mrb[34].mxu0 }
0x1ad1   : > { %5153 = vst.msk [vmem:[%s1762_s1 + $0x8] sm:$0xff] %vm3436_vm14, %v6228_v10  ;;  %v5143_v26 = vpop.f32.mrb[35].mxu0 }
0x1ad2   : > { %5152 = vst.msk [vmem:[%s1762_s1] sm:$0xff] %vm3436_vm14, %v5143_v26 }
0x1ad3 PF: > { %s121_s28 = sadd.s32 1, %s7708_s28  }
0x1ad4   : > { %p118_p11 = scmp.ge.s32.totalorder %s121_s28, 4  }
0x1ad6   :  { %120 = sbr.rel (!%p118_p11) target bundleno = 104 (0x68), region = 398 }
0x1add   :  { %5191 = vsyncpa [#allocation3], 1 }
0x1ade   :  { %5193 = vsyncpa [#allocation3 + $0x1], 1 }
0x1adf   :  { %5194 = vsyncpa [#allocation5], 1 }
0x1ae0   :  { %5195 = vsyncpa [#allocation8], 1 }
0x1ae1   :  { %5196 = vsyncpa [#allocation11], 1 }
0x1ae2   :  { %5197 = vsyncpa [#allocation14], 1 }
0x1ae3   :  { %5198 = vsyncpa [#allocation17], 1 }
0x1ae4   :  { %5199 = vsyncpa [#allocation20], 1 }
0x1ae5   :  { %5200 = vsyncpa [#allocation23], 1 }
0x1ae6   :  { %5201 = vsyncpa [#allocation26], 1 }
0x1ae7   :  { %5202 = vsyncpa [#allocation29], 1 }
0x1ae8   :  { %5203 = vsyncpa [#allocation32], 1 }
0x1ae9   :  { %5204 = vsyncpa [#allocation35], 1 }
0x1aea   :  { %5205 = vsyncpa [#allocation38], 1 }

</bundles_post_ra>
